<compile_context>
chip_gen: v6e
topology: v6e:2x2x1
jax: 0.10.0
libtpu: 0.0.40
codegen_flags: <defaults>
</compile_context>

<pallas_src>
import functools

import jax
import jax.numpy as jnp
from jax.experimental import pallas as pl
from jax.experimental.pallas import tpu as pltpu

_SENTINEL = 1e30                 # reference-side "out of radius" distance
_INT_SENT = (1 << 31) - 1        # kernel-side packed-key sentinel (> any valid key)


def _fold_batchnorm(bn):
    """Eval-mode BatchNorm1d(1) folded to y = a*x + b (two f32 scalars)."""
    gamma = jnp.reshape(jnp.asarray(bn["weight"], jnp.float32), ())
    beta = jnp.reshape(jnp.asarray(bn["bias"], jnp.float32), ())
    mean = jnp.reshape(jnp.asarray(bn["running_mean"], jnp.float32), ())
    var = jnp.reshape(jnp.asarray(bn["running_var"], jnp.float32), ())
    eps = jnp.asarray(bn["eps"], jnp.float32)
    a = gamma * jax.lax.rsqrt(var + eps)
    b = beta - mean * a
    return a, b


def _dgc_kernel(scal_ref, src_ref, dstT_ref, dsq_ref, idx_out, w_out, *, k, norm,
                weighting):
    a = scal_ref[0]          # folded BatchNorm scale
    b = scal_ref[1]          # folded BatchNorm shift
    rmax_sq = scal_ref[2]    # knn_radius ** 2

    s = src_ref[...]                                              # [T, D]
    dT = dstT_ref[...]                                            # [D, Nd]
    # MXU: likelihoods for every (src-in-tile, dst) pair, lane-dense [T, Nd] output.
    lik_mat = jnp.dot(s, dT, preferred_element_type=jnp.float32)
    s_sq = jnp.sum(s * s, axis=-1, keepdims=True)                 # [T, 1]
    d_sq = dsq_ref[...]                                           # [1, Nd]
    # Squared distances via the Gram expansion; clamp the tiny negative values that
    # cancellation can produce so the f32 bit pattern stays order-preserving.
    d2 = jnp.maximum(s_sq + d_sq - 2.0 * lik_mat, 0.0)            # [T, Nd]

    tile, n_dst = lik_mat.shape
    nbits = max(1, (n_dst - 1).bit_length())
    low_mask = (1 << nbits) - 1

    # Packed monotone selection key: for non-negative f32, bit order == value order.
    # Clear the low `nbits` mantissa bits and OR in the lane (dst) index, so ONE
    # cross-lane min per iteration yields both the nearest distance and its index,
    # with ties breaking toward the lower dst index. Radius mask -> int sentinel.
    lane = jax.lax.broadcasted_iota(jnp.int32, (tile, n_dst), 1)
    key = (pltpu.bitcast(d2, jnp.int32) & jnp.int32(~low_mask)) | lane
    key = jnp.where(d2 <= rmax_sq, key, _INT_SENT)
    # `lane` is dead after this point; only `key` and `lik_mat` stay live in the loop.

    col = jax.lax.broadcasted_iota(jnp.int32, (tile, k), 1)
    keys0 = jnp.full((tile, k), _INT_SENT, jnp.int32)
    lik0 = jnp.zeros((tile, k), jnp.float32)

    def body(j, carry):
        key_c, keys_acc, lik_acc = carry
        mkey = jnp.min(key_c, axis=-1, keepdims=True)             # single XLU reduce
        eq = key_c == mkey                                        # unique column (lane bits)
        # Exact dot product of the selected pair, reusing the same eq mask.
        lik_j = jnp.sum(jnp.where(eq, lik_mat, 0.0), axis=-1, keepdims=True)
        key_c = jnp.where(eq, _INT_SENT, key_c)                   # drop selected column
        hit = col == j
        keys_acc = jnp.where(hit, mkey, keys_acc)
        lik_acc = jnp.where(hit, lik_j, lik_acc)
        return key_c, keys_acc, lik_acc

    _, keys_acc, lik_acc = jax.lax.fori_loop(
        0, k, body, (key, keys0, lik0), unroll=True)

    # ---- narrow [T, k] epilogue (hoisted out of the selection loop) ----
    found = keys_acc < _INT_SENT
    idx = jnp.where(found, keys_acc & jnp.int32(low_mask), -1)
    logits = a * lik_acc + b                                      # folded BatchNorm
    if weighting == "sigmoid":
        w = 1.0 / (1.0 + jnp.exp(-logits))
    else:  # "exp"  (can overflow for huge logits, same as the PyTorch formulation)
        w = jnp.exp(logits)
    w = jnp.where(found, w, 0.0)
    if norm:
        # scatter_add over graph[0] == per-src-row sum in this dense layout.
        w = w / (1e-12 + jnp.sum(w, axis=-1, keepdims=True))

    idx_out[...] = idx
    w_out[...] = w.astype(w_out.dtype)


def dynamic_graph_construction(src_embeddings, dst_embeddings, bn_params, knn_radius,
                               *, sym=False, norm=False, k=10,
                               weighting_function="sigmoid", tile_rows=128):
    # tile_rows: 128 fits v7x's 64 MiB/TC budget; v5e/v6e can raise to 256 to amortize
    # per-grid-step overhead when N_dst is moderate.
    if sym:
        raise NotImplementedError("sym=True (cudf symmetrize) is not translated")
    if weighting_function not in ("sigmoid", "exp"):
        raise NotImplementedError(weighting_function)

    src = jnp.asarray(src_embeddings, jnp.float32)
    dst = jnp.asarray(dst_embeddings, jnp.float32)
    n_src, dim = src.shape
    n_dst = dst.shape[0]

    tile = min(tile_rows, n_src)
    assert n_src % tile == 0, "pad N_src to a multiple of the row tile"

    a, b = _fold_batchnorm(bn_params)
    rmax_sq = jnp.square(jnp.reshape(jnp.asarray(knn_radius, jnp.float32), ()))
    scal = jnp.stack([a, b, rmax_sq, jnp.float32(0.0)])        # -> SMEM

    dst_t = dst.T                                              # [D, N_dst] lane-dense rhs
    dst_sq = jnp.sum(dst * dst, axis=1)[None, :]               # [1, N_dst]

    kernel = functools.partial(_dgc_kernel, k=k, norm=norm,
                               weighting=weighting_function)

    # Explicit VMEM budget: resident dst^T + |dst|^2, double-buffered src tile,
    # a handful of live [tile, N_dst] intermediates and the small output blocks.
    resident_bytes = 4 * (dim * n_dst + 8 * n_dst)
    per_step_bytes = 4 * (2 * tile * dim + 6 * tile * n_dst + 4 * tile * max(k, 8))
    vmem_limit = int(min(100 * (1 << 20),
                         max(32 * (1 << 20), 4 * (resident_bytes + per_step_bytes))))

    cost = pl.CostEstimate(
        flops=2 * n_src * n_dst * dim + n_src * n_dst * (4 * k + 8),
        transcendentals=n_src * k,
        bytes_accessed=4 * (n_src * dim + n_dst * dim + n_dst + 2 * n_src * k))

    idx_dense, w_dense = pl.pallas_call(
        kernel,
        grid=(n_src // tile,),
        in_specs=[
            pl.BlockSpec(memory_space=pltpu.MemorySpace.SMEM),   # folded scalars
            pl.BlockSpec((tile, dim), lambda i: (i, 0)),         # src row tile
            pl.BlockSpec((dim, n_dst), lambda i: (0, 0)),        # dst^T (resident)
            pl.BlockSpec((1, n_dst), lambda i: (0, 0)),          # |dst|^2 (resident)
        ],
        out_specs=(
            pl.BlockSpec((tile, k), lambda i: (i, 0)),
            pl.BlockSpec((tile, k), lambda i: (i, 0)),
        ),
        out_shape=(
            jax.ShapeDtypeStruct((n_src, k), jnp.int32),
            jax.ShapeDtypeStruct((n_src, k), jnp.float32),
        ),
        compiler_params=pltpu.CompilerParams(
            dimension_semantics=("parallel",),
            vmem_limit_bytes=vmem_limit),
        cost_estimate=cost,
    )(scal, src, dst_t, dst_sq)

    # Fixed-shape equivalent of the PyTorch (graph, edge_weights) pair: missing
    # neighbours are marked dst=-1 / weight=0 instead of being compacted away.
    graph_src = jnp.repeat(jnp.arange(n_src, dtype=jnp.int32), k)
    graph = jnp.stack([graph_src, idx_dense.reshape(-1)], axis=0)
    edge_weights = w_dense.reshape(-1, 1)
    return graph, edge_weights, idx_dense, w_dense


# ----------------------- pure-JAX reference (for verification) -----------------------
def _reference(src, dst, bn_params, knn_radius, *, k, norm, weighting):
    """Same radius-kNN semantics (ties -> lower dst index) via a tie-free sort key."""
    a, b = _fold_batchnorm(bn_params)
    rmax_sq = jnp.square(jnp.reshape(jnp.asarray(knn_radius, jnp.float32), ()))
    lik_mat = jnp.dot(src, dst.T, precision=jax.lax.Precision.HIGHEST)
    d2 = (jnp.sum(src * src, 1, keepdims=True) + jnp.sum(dst * dst, 1)[None, :]
          - 2.0 * lik_mat)
    n_dst = dst.shape[0]
    lane = jnp.arange(n_dst, dtype=jnp.float32)[None, :]
    # lexicographic (distance, index) key — exact for the integer-valued demo inputs
    key = jnp.where(d2 <= rmax_sq, d2 * n_dst + lane, _SENTINEL)
    neg_key, idxs = jax.lax.top_k(-key, k)
    found = -neg_key < 1e29
    lik = jnp.take_along_axis(lik_mat, idxs, axis=1)
    logits = a * lik + b
    if weighting == "sigmoid":
        w = 1.0 / (1.0 + jnp.exp(-logits))
    else:
        w = jnp.exp(logits)
    w = jnp.where(found, w, 0.0)
    if norm:
        w = w / (1e-12 + jnp.sum(w, axis=1, keepdims=True))
    idx = jnp.where(found, idxs.astype(jnp.int32), -1)
    return idx, w


if __name__ == "__main__":
    key = jax.random.PRNGKey(0)
    N_SRC, N_DST, D, K = 256, 256, 128, 10
    k1, k2 = jax.random.split(key)

    # Integer-valued embeddings -> every pairwise dot product / squared distance is an
    # exact small integer on both the MXU and the XLA reference path, so the kNN
    # selection (including tie-breaks) is deterministic across implementations.
    src = jnp.clip(jnp.round(2.0 * jax.random.normal(k1, (N_SRC, D))), -4.0, 4.0)
    dst = jnp.clip(jnp.round(2.0 * jax.random.normal(k2, (N_DST, D))), -4.0, 4.0)
    src = src.astype(jnp.float32)
    dst = dst.astype(jnp.float32)

    bn = {"weight": jnp.array([1.1], jnp.float32),
          "bias": jnp.array([0.1], jnp.float32),
          "running_mean": jnp.array([0.0], jnp.float32),
          "running_var": jnp.array([2500.0], jnp.float32),
          "eps": 1e-5}

    # Radius ~3rd percentile of squared distance, offset to x.5 so no integer distance
    # sits exactly on the boundary; leaves some rows with fewer than K in-range
    # neighbours (exercises the -1 / zero-weight padding path).
    d2_all = (jnp.sum(src * src, 1, keepdims=True) + jnp.sum(dst * dst, 1)[None, :]
              - 2.0 * jnp.dot(src, dst.T, precision=jax.lax.Precision.HIGHEST))
    knn_radius = jnp.sqrt(jnp.floor(jnp.quantile(d2_all, 0.03)) + 0.5)

    for weighting, norm in (("sigmoid", False), ("sigmoid", True), ("exp", True)):
        graph, edge_weights, idx_dense, w_dense = dynamic_graph_construction(
            src, dst, bn, knn_radius, norm=norm, k=K,
            weighting_function=weighting)
        graph, edge_weights, idx_dense, w_dense = jax.block_until_ready(
            (graph, edge_weights, idx_dense, w_dense))

        idx_ref, w_ref = _reference(src, dst, bn, knn_radius, k=K, norm=norm,
                                    weighting=weighting)
        assert graph.shape == (2, N_SRC * K)
        assert edge_weights.shape == (N_SRC * K, 1)
        assert jnp.array_equal(idx_dense, idx_ref), (weighting, norm)
        max_err = float(jnp.max(jnp.abs(w_dense - w_ref)))
        assert max_err < 1e-5, (weighting, norm, max_err)

    print("KERNEL_OK")
</pallas_src>

<mosaic_0001>
module attributes {stable_mosaic.version = 11 : i64} {
  func.func @_dgc_kernel(%arg0: i32, %arg1: memref<4xf32, #tpu.memory_space<smem>>, %arg2: memref<128x128xf32, #tpu.memory_space<vmem>>, %arg3: memref<128x256xf32, #tpu.memory_space<vmem>>, %arg4: memref<1x256xf32, #tpu.memory_space<vmem>>, %arg5: memref<128x10xi32, #tpu.memory_space<vmem>>, %arg6: memref<128x10xf32, #tpu.memory_space<vmem>>) attributes {dimension_semantics = [#tpu.dimension_semantics<parallel>], iteration_bounds = array<i64: 2>, scalar_prefetch = 0 : i64, scratch_operands = 0 : i64, tpu.core_type = #tpu.core_type<tc>, window_params = [{transform_indices = @transform_0, window_bounds = array<i64: 4>}, {transform_indices = @transform_1, window_bounds = array<i64: 128, 128>}, {pipeline_mode = #tpu.pipeline_mode<synchronous>, transform_indices = @transform_2, window_bounds = array<i64: 128, 256>}, {pipeline_mode = #tpu.pipeline_mode<synchronous>, transform_indices = @transform_3, window_bounds = array<i64: 1, 256>}, {transform_indices = @transform_4, window_bounds = array<i64: 128, 10>}, {transform_indices = @transform_5, window_bounds = array<i64: 128, 10>}]} {
    %c0 = arith.constant 0 : index
    %0 = memref.load %arg1[%c0] : memref<4xf32, #tpu.memory_space<smem>>
    %c1 = arith.constant 1 : index
    %1 = memref.load %arg1[%c1] : memref<4xf32, #tpu.memory_space<smem>>
    %c2 = arith.constant 2 : index
    %2 = memref.load %arg1[%c2] : memref<4xf32, #tpu.memory_space<smem>>
    %c0_0 = arith.constant 0 : index
    %c0_1 = arith.constant 0 : index
    %3 = vector.load %arg2[%c0_0, %c0_1] : memref<128x128xf32, #tpu.memory_space<vmem>>, vector<128x128xf32>
    %c0_2 = arith.constant 0 : index
    %c0_3 = arith.constant 0 : index
    %4 = vector.load %arg3[%c0_2, %c0_3] : memref<128x256xf32, #tpu.memory_space<vmem>>, vector<128x256xf32>
    %cst = arith.constant dense<0.000000e+00> : vector<128x256xf32>
    %5 = tpu.matmul %3, %4, %cst {dimension_numbers = #tpu.dot_dimension_numbers<[1], [0], [0], [1], [0, 0, 1, 1], [], []>} : vector<128x128xf32>, vector<128x256xf32>, vector<128x256xf32> -> vector<128x256xf32>
    %6 = arith.mulf %3, %3 : vector<128x128xf32>
    %cst_4 = arith.constant dense<0.000000e+00> : vector<128xf32>
    %7 = vector.multi_reduction <add>, %6, %cst_4 [1] : vector<128x128xf32> to vector<128xf32>
    %8 = vector.shape_cast %7 : vector<128xf32> to vector<128x1xf32>
    %c0_5 = arith.constant 0 : index
    %c0_6 = arith.constant 0 : index
    %9 = vector.load %arg4[%c0_5, %c0_6] : memref<1x256xf32, #tpu.memory_space<vmem>>, vector<1x256xf32>
    %10 = vector.broadcast %8 : vector<128x1xf32> to vector<128x256xf32>
    %11 = vector.broadcast %9 : vector<1x256xf32> to vector<128x256xf32>
    %12 = arith.addf %10, %11 : vector<128x256xf32>
    %cst_7 = arith.constant 2.000000e+00 : f32
    %13 = vector.broadcast %cst_7 : f32 to vector<128x256xf32>
    %14 = arith.mulf %13, %5 : vector<128x256xf32>
    %15 = arith.subf %12, %14 : vector<128x256xf32>
    %cst_8 = arith.constant 0.000000e+00 : f32
    %16 = vector.broadcast %cst_8 : f32 to vector<128x256xf32>
    %17 = arith.maximumf %15, %16 : vector<128x256xf32>
    %18 = tpu.iota {dimensions = array<i32: 1>} : vector<128x256xi32>
    %19 = tpu.bitcast %17 : vector<128x256xf32> -> vector<128x256xi32>
    %c-256_i32 = arith.constant -256 : i32
    %20 = vector.broadcast %c-256_i32 : i32 to vector<128x256xi32>
    %21 = arith.andi %19, %20 : vector<128x256xi32>
    %22 = arith.ori %21, %18 : vector<128x256xi32>
    %23 = vector.broadcast %2 : f32 to vector<128x256xf32>
    %24 = arith.cmpf ole, %17, %23 : vector<128x256xf32>
    %c2147483647_i32 = arith.constant 2147483647 : i32
    %25 = vector.broadcast %c2147483647_i32 : i32 to vector<128x256xi32>
    %26 = arith.select %24, %22, %25 : vector<128x256xi1>, vector<128x256xi32>
    %27 = tpu.iota {dimensions = array<i32: 1>} : vector<128x10xi32>
    %c2147483647_i32_9 = arith.constant 2147483647 : i32
    %28 = vector.broadcast %c2147483647_i32_9 : i32 to vector<128x10xi32>
    %cst_10 = arith.constant 0.000000e+00 : f32
    %29 = vector.broadcast %cst_10 : f32 to vector<128x10xf32>
    %c0_i32 = arith.constant 0 : i32
    %cst_11 = arith.constant dense<2147483647> : vector<128xi32>
    %30 = vector.multi_reduction <minsi>, %26, %cst_11 [1] : vector<128x256xi32> to vector<128xi32>
    %31 = vector.shape_cast %30 : vector<128xi32> to vector<128x1xi32>
    %32 = vector.broadcast %31 : vector<128x1xi32> to vector<128x256xi32>
    %33 = arith.cmpi eq, %26, %32 : vector<128x256xi32>
    %cst_12 = arith.constant 0.000000e+00 : f32
    %34 = vector.broadcast %cst_12 : f32 to vector<128x256xf32>
    %35 = arith.select %33, %5, %34 : vector<128x256xi1>, vector<128x256xf32>
    %cst_13 = arith.constant dense<0.000000e+00> : vector<128xf32>
    %36 = vector.multi_reduction <add>, %35, %cst_13 [1] : vector<128x256xf32> to vector<128xf32>
    %37 = vector.shape_cast %36 : vector<128xf32> to vector<128x1xf32>
    %c2147483647_i32_14 = arith.constant 2147483647 : i32
    %38 = vector.broadcast %c2147483647_i32_14 : i32 to vector<128x256xi32>
    %39 = arith.select %33, %38, %26 : vector<128x256xi1>, vector<128x256xi32>
    %40 = vector.broadcast %c0_i32 : i32 to vector<128x10xi32>
    %41 = arith.cmpi eq, %27, %40 : vector<128x10xi32>
    %42 = vector.shape_cast %31 : vector<128x1xi32> to vector<128x1xi32>
    %43 = vector.broadcast %42 : vector<128x1xi32> to vector<128x10xi32>
    %44 = arith.select %41, %43, %28 : vector<128x10xi1>, vector<128x10xi32>
    %45 = vector.shape_cast %37 : vector<128x1xf32> to vector<128x1xf32>
    %46 = vector.broadcast %45 : vector<128x1xf32> to vector<128x10xf32>
    %47 = arith.select %41, %46, %29 : vector<128x10xi1>, vector<128x10xf32>
    %c1_i32 = arith.constant 1 : i32
    %cst_15 = arith.constant dense<2147483647> : vector<128xi32>
    %48 = vector.multi_reduction <minsi>, %39, %cst_15 [1] : vector<128x256xi32> to vector<128xi32>
    %49 = vector.shape_cast %48 : vector<128xi32> to vector<128x1xi32>
    %50 = vector.broadcast %49 : vector<128x1xi32> to vector<128x256xi32>
    %51 = arith.cmpi eq, %39, %50 : vector<128x256xi32>
    %cst_16 = arith.constant 0.000000e+00 : f32
    %52 = vector.broadcast %cst_16 : f32 to vector<128x256xf32>
    %53 = arith.select %51, %5, %52 : vector<128x256xi1>, vector<128x256xf32>
    %cst_17 = arith.constant dense<0.000000e+00> : vector<128xf32>
    %54 = vector.multi_reduction <add>, %53, %cst_17 [1] : vector<128x256xf32> to vector<128xf32>
    %55 = vector.shape_cast %54 : vector<128xf32> to vector<128x1xf32>
    %c2147483647_i32_18 = arith.constant 2147483647 : i32
    %56 = vector.broadcast %c2147483647_i32_18 : i32 to vector<128x256xi32>
    %57 = arith.select %51, %56, %39 : vector<128x256xi1>, vector<128x256xi32>
    %58 = vector.broadcast %c1_i32 : i32 to vector<128x10xi32>
    %59 = arith.cmpi eq, %27, %58 : vector<128x10xi32>
    %60 = vector.shape_cast %49 : vector<128x1xi32> to vector<128x1xi32>
    %61 = vector.broadcast %60 : vector<128x1xi32> to vector<128x10xi32>
    %62 = arith.select %59, %61, %44 : vector<128x10xi1>, vector<128x10xi32>
    %63 = vector.shape_cast %55 : vector<128x1xf32> to vector<128x1xf32>
    %64 = vector.broadcast %63 : vector<128x1xf32> to vector<128x10xf32>
    %65 = arith.select %59, %64, %47 : vector<128x10xi1>, vector<128x10xf32>
    %c2_i32 = arith.constant 2 : i32
    %cst_19 = arith.constant dense<2147483647> : vector<128xi32>
    %66 = vector.multi_reduction <minsi>, %57, %cst_19 [1] : vector<128x256xi32> to vector<128xi32>
    %67 = vector.shape_cast %66 : vector<128xi32> to vector<128x1xi32>
    %68 = vector.broadcast %67 : vector<128x1xi32> to vector<128x256xi32>
    %69 = arith.cmpi eq, %57, %68 : vector<128x256xi32>
    %cst_20 = arith.constant 0.000000e+00 : f32
    %70 = vector.broadcast %cst_20 : f32 to vector<128x256xf32>
    %71 = arith.select %69, %5, %70 : vector<128x256xi1>, vector<128x256xf32>
    %cst_21 = arith.constant dense<0.000000e+00> : vector<128xf32>
    %72 = vector.multi_reduction <add>, %71, %cst_21 [1] : vector<128x256xf32> to vector<128xf32>
    %73 = vector.shape_cast %72 : vector<128xf32> to vector<128x1xf32>
    %c2147483647_i32_22 = arith.constant 2147483647 : i32
    %74 = vector.broadcast %c2147483647_i32_22 : i32 to vector<128x256xi32>
    %75 = arith.select %69, %74, %57 : vector<128x256xi1>, vector<128x256xi32>
    %76 = vector.broadcast %c2_i32 : i32 to vector<128x10xi32>
    %77 = arith.cmpi eq, %27, %76 : vector<128x10xi32>
    %78 = vector.shape_cast %67 : vector<128x1xi32> to vector<128x1xi32>
    %79 = vector.broadcast %78 : vector<128x1xi32> to vector<128x10xi32>
    %80 = arith.select %77, %79, %62 : vector<128x10xi1>, vector<128x10xi32>
    %81 = vector.shape_cast %73 : vector<128x1xf32> to vector<128x1xf32>
    %82 = vector.broadcast %81 : vector<128x1xf32> to vector<128x10xf32>
    %83 = arith.select %77, %82, %65 : vector<128x10xi1>, vector<128x10xf32>
    %c3_i32 = arith.constant 3 : i32
    %cst_23 = arith.constant dense<2147483647> : vector<128xi32>
    %84 = vector.multi_reduction <minsi>, %75, %cst_23 [1] : vector<128x256xi32> to vector<128xi32>
    %85 = vector.shape_cast %84 : vector<128xi32> to vector<128x1xi32>
    %86 = vector.broadcast %85 : vector<128x1xi32> to vector<128x256xi32>
    %87 = arith.cmpi eq, %75, %86 : vector<128x256xi32>
    %cst_24 = arith.constant 0.000000e+00 : f32
    %88 = vector.broadcast %cst_24 : f32 to vector<128x256xf32>
    %89 = arith.select %87, %5, %88 : vector<128x256xi1>, vector<128x256xf32>
    %cst_25 = arith.constant dense<0.000000e+00> : vector<128xf32>
    %90 = vector.multi_reduction <add>, %89, %cst_25 [1] : vector<128x256xf32> to vector<128xf32>
    %91 = vector.shape_cast %90 : vector<128xf32> to vector<128x1xf32>
    %c2147483647_i32_26 = arith.constant 2147483647 : i32
    %92 = vector.broadcast %c2147483647_i32_26 : i32 to vector<128x256xi32>
    %93 = arith.select %87, %92, %75 : vector<128x256xi1>, vector<128x256xi32>
    %94 = vector.broadcast %c3_i32 : i32 to vector<128x10xi32>
    %95 = arith.cmpi eq, %27, %94 : vector<128x10xi32>
    %96 = vector.shape_cast %85 : vector<128x1xi32> to vector<128x1xi32>
    %97 = vector.broadcast %96 : vector<128x1xi32> to vector<128x10xi32>
    %98 = arith.select %95, %97, %80 : vector<128x10xi1>, vector<128x10xi32>
    %99 = vector.shape_cast %91 : vector<128x1xf32> to vector<128x1xf32>
    %100 = vector.broadcast %99 : vector<128x1xf32> to vector<128x10xf32>
    %101 = arith.select %95, %100, %83 : vector<128x10xi1>, vector<128x10xf32>
    %c4_i32 = arith.constant 4 : i32
    %cst_27 = arith.constant dense<2147483647> : vector<128xi32>
    %102 = vector.multi_reduction <minsi>, %93, %cst_27 [1] : vector<128x256xi32> to vector<128xi32>
    %103 = vector.shape_cast %102 : vector<128xi32> to vector<128x1xi32>
    %104 = vector.broadcast %103 : vector<128x1xi32> to vector<128x256xi32>
    %105 = arith.cmpi eq, %93, %104 : vector<128x256xi32>
    %cst_28 = arith.constant 0.000000e+00 : f32
    %106 = vector.broadcast %cst_28 : f32 to vector<128x256xf32>
    %107 = arith.select %105, %5, %106 : vector<128x256xi1>, vector<128x256xf32>
    %cst_29 = arith.constant dense<0.000000e+00> : vector<128xf32>
    %108 = vector.multi_reduction <add>, %107, %cst_29 [1] : vector<128x256xf32> to vector<128xf32>
    %109 = vector.shape_cast %108 : vector<128xf32> to vector<128x1xf32>
    %c2147483647_i32_30 = arith.constant 2147483647 : i32
    %110 = vector.broadcast %c2147483647_i32_30 : i32 to vector<128x256xi32>
    %111 = arith.select %105, %110, %93 : vector<128x256xi1>, vector<128x256xi32>
    %112 = vector.broadcast %c4_i32 : i32 to vector<128x10xi32>
    %113 = arith.cmpi eq, %27, %112 : vector<128x10xi32>
    %114 = vector.shape_cast %103 : vector<128x1xi32> to vector<128x1xi32>
    %115 = vector.broadcast %114 : vector<128x1xi32> to vector<128x10xi32>
    %116 = arith.select %113, %115, %98 : vector<128x10xi1>, vector<128x10xi32>
    %117 = vector.shape_cast %109 : vector<128x1xf32> to vector<128x1xf32>
    %118 = vector.broadcast %117 : vector<128x1xf32> to vector<128x10xf32>
    %119 = arith.select %113, %118, %101 : vector<128x10xi1>, vector<128x10xf32>
    %c5_i32 = arith.constant 5 : i32
    %cst_31 = arith.constant dense<2147483647> : vector<128xi32>
    %120 = vector.multi_reduction <minsi>, %111, %cst_31 [1] : vector<128x256xi32> to vector<128xi32>
    %121 = vector.shape_cast %120 : vector<128xi32> to vector<128x1xi32>
    %122 = vector.broadcast %121 : vector<128x1xi32> to vector<128x256xi32>
    %123 = arith.cmpi eq, %111, %122 : vector<128x256xi32>
    %cst_32 = arith.constant 0.000000e+00 : f32
    %124 = vector.broadcast %cst_32 : f32 to vector<128x256xf32>
    %125 = arith.select %123, %5, %124 : vector<128x256xi1>, vector<128x256xf32>
    %cst_33 = arith.constant dense<0.000000e+00> : vector<128xf32>
    %126 = vector.multi_reduction <add>, %125, %cst_33 [1] : vector<128x256xf32> to vector<128xf32>
    %127 = vector.shape_cast %126 : vector<128xf32> to vector<128x1xf32>
    %c2147483647_i32_34 = arith.constant 2147483647 : i32
    %128 = vector.broadcast %c2147483647_i32_34 : i32 to vector<128x256xi32>
    %129 = arith.select %123, %128, %111 : vector<128x256xi1>, vector<128x256xi32>
    %130 = vector.broadcast %c5_i32 : i32 to vector<128x10xi32>
    %131 = arith.cmpi eq, %27, %130 : vector<128x10xi32>
    %132 = vector.shape_cast %121 : vector<128x1xi32> to vector<128x1xi32>
    %133 = vector.broadcast %132 : vector<128x1xi32> to vector<128x10xi32>
    %134 = arith.select %131, %133, %116 : vector<128x10xi1>, vector<128x10xi32>
    %135 = vector.shape_cast %127 : vector<128x1xf32> to vector<128x1xf32>
    %136 = vector.broadcast %135 : vector<128x1xf32> to vector<128x10xf32>
    %137 = arith.select %131, %136, %119 : vector<128x10xi1>, vector<128x10xf32>
    %c6_i32 = arith.constant 6 : i32
    %cst_35 = arith.constant dense<2147483647> : vector<128xi32>
    %138 = vector.multi_reduction <minsi>, %129, %cst_35 [1] : vector<128x256xi32> to vector<128xi32>
    %139 = vector.shape_cast %138 : vector<128xi32> to vector<128x1xi32>
    %140 = vector.broadcast %139 : vector<128x1xi32> to vector<128x256xi32>
    %141 = arith.cmpi eq, %129, %140 : vector<128x256xi32>
    %cst_36 = arith.constant 0.000000e+00 : f32
    %142 = vector.broadcast %cst_36 : f32 to vector<128x256xf32>
    %143 = arith.select %141, %5, %142 : vector<128x256xi1>, vector<128x256xf32>
    %cst_37 = arith.constant dense<0.000000e+00> : vector<128xf32>
    %144 = vector.multi_reduction <add>, %143, %cst_37 [1] : vector<128x256xf32> to vector<128xf32>
    %145 = vector.shape_cast %144 : vector<128xf32> to vector<128x1xf32>
    %c2147483647_i32_38 = arith.constant 2147483647 : i32
    %146 = vector.broadcast %c2147483647_i32_38 : i32 to vector<128x256xi32>
    %147 = arith.select %141, %146, %129 : vector<128x256xi1>, vector<128x256xi32>
    %148 = vector.broadcast %c6_i32 : i32 to vector<128x10xi32>
    %149 = arith.cmpi eq, %27, %148 : vector<128x10xi32>
    %150 = vector.shape_cast %139 : vector<128x1xi32> to vector<128x1xi32>
    %151 = vector.broadcast %150 : vector<128x1xi32> to vector<128x10xi32>
    %152 = arith.select %149, %151, %134 : vector<128x10xi1>, vector<128x10xi32>
    %153 = vector.shape_cast %145 : vector<128x1xf32> to vector<128x1xf32>
    %154 = vector.broadcast %153 : vector<128x1xf32> to vector<128x10xf32>
    %155 = arith.select %149, %154, %137 : vector<128x10xi1>, vector<128x10xf32>
    %c7_i32 = arith.constant 7 : i32
    %cst_39 = arith.constant dense<2147483647> : vector<128xi32>
    %156 = vector.multi_reduction <minsi>, %147, %cst_39 [1] : vector<128x256xi32> to vector<128xi32>
    %157 = vector.shape_cast %156 : vector<128xi32> to vector<128x1xi32>
    %158 = vector.broadcast %157 : vector<128x1xi32> to vector<128x256xi32>
    %159 = arith.cmpi eq, %147, %158 : vector<128x256xi32>
    %cst_40 = arith.constant 0.000000e+00 : f32
    %160 = vector.broadcast %cst_40 : f32 to vector<128x256xf32>
    %161 = arith.select %159, %5, %160 : vector<128x256xi1>, vector<128x256xf32>
    %cst_41 = arith.constant dense<0.000000e+00> : vector<128xf32>
    %162 = vector.multi_reduction <add>, %161, %cst_41 [1] : vector<128x256xf32> to vector<128xf32>
    %163 = vector.shape_cast %162 : vector<128xf32> to vector<128x1xf32>
    %c2147483647_i32_42 = arith.constant 2147483647 : i32
    %164 = vector.broadcast %c2147483647_i32_42 : i32 to vector<128x256xi32>
    %165 = arith.select %159, %164, %147 : vector<128x256xi1>, vector<128x256xi32>
    %166 = vector.broadcast %c7_i32 : i32 to vector<128x10xi32>
    %167 = arith.cmpi eq, %27, %166 : vector<128x10xi32>
    %168 = vector.shape_cast %157 : vector<128x1xi32> to vector<128x1xi32>
    %169 = vector.broadcast %168 : vector<128x1xi32> to vector<128x10xi32>
    %170 = arith.select %167, %169, %152 : vector<128x10xi1>, vector<128x10xi32>
    %171 = vector.shape_cast %163 : vector<128x1xf32> to vector<128x1xf32>
    %172 = vector.broadcast %171 : vector<128x1xf32> to vector<128x10xf32>
    %173 = arith.select %167, %172, %155 : vector<128x10xi1>, vector<128x10xf32>
    %c8_i32 = arith.constant 8 : i32
    %cst_43 = arith.constant dense<2147483647> : vector<128xi32>
    %174 = vector.multi_reduction <minsi>, %165, %cst_43 [1] : vector<128x256xi32> to vector<128xi32>
    %175 = vector.shape_cast %174 : vector<128xi32> to vector<128x1xi32>
    %176 = vector.broadcast %175 : vector<128x1xi32> to vector<128x256xi32>
    %177 = arith.cmpi eq, %165, %176 : vector<128x256xi32>
    %cst_44 = arith.constant 0.000000e+00 : f32
    %178 = vector.broadcast %cst_44 : f32 to vector<128x256xf32>
    %179 = arith.select %177, %5, %178 : vector<128x256xi1>, vector<128x256xf32>
    %cst_45 = arith.constant dense<0.000000e+00> : vector<128xf32>
    %180 = vector.multi_reduction <add>, %179, %cst_45 [1] : vector<128x256xf32> to vector<128xf32>
    %181 = vector.shape_cast %180 : vector<128xf32> to vector<128x1xf32>
    %c2147483647_i32_46 = arith.constant 2147483647 : i32
    %182 = vector.broadcast %c2147483647_i32_46 : i32 to vector<128x256xi32>
    %183 = arith.select %177, %182, %165 : vector<128x256xi1>, vector<128x256xi32>
    %184 = vector.broadcast %c8_i32 : i32 to vector<128x10xi32>
    %185 = arith.cmpi eq, %27, %184 : vector<128x10xi32>
    %186 = vector.shape_cast %175 : vector<128x1xi32> to vector<128x1xi32>
    %187 = vector.broadcast %186 : vector<128x1xi32> to vector<128x10xi32>
    %188 = arith.select %185, %187, %170 : vector<128x10xi1>, vector<128x10xi32>
    %189 = vector.shape_cast %181 : vector<128x1xf32> to vector<128x1xf32>
    %190 = vector.broadcast %189 : vector<128x1xf32> to vector<128x10xf32>
    %191 = arith.select %185, %190, %173 : vector<128x10xi1>, vector<128x10xf32>
    %c9_i32 = arith.constant 9 : i32
    %cst_47 = arith.constant dense<2147483647> : vector<128xi32>
    %192 = vector.multi_reduction <minsi>, %183, %cst_47 [1] : vector<128x256xi32> to vector<128xi32>
    %193 = vector.shape_cast %192 : vector<128xi32> to vector<128x1xi32>
    %194 = vector.broadcast %193 : vector<128x1xi32> to vector<128x256xi32>
    %195 = arith.cmpi eq, %183, %194 : vector<128x256xi32>
    %cst_48 = arith.constant 0.000000e+00 : f32
    %196 = vector.broadcast %cst_48 : f32 to vector<128x256xf32>
    %197 = arith.select %195, %5, %196 : vector<128x256xi1>, vector<128x256xf32>
    %cst_49 = arith.constant dense<0.000000e+00> : vector<128xf32>
    %198 = vector.multi_reduction <add>, %197, %cst_49 [1] : vector<128x256xf32> to vector<128xf32>
    %199 = vector.shape_cast %198 : vector<128xf32> to vector<128x1xf32>
    %c2147483647_i32_50 = arith.constant 2147483647 : i32
    %200 = vector.broadcast %c2147483647_i32_50 : i32 to vector<128x256xi32>
    %201 = arith.select %195, %200, %183 : vector<128x256xi1>, vector<128x256xi32>
    %202 = vector.broadcast %c9_i32 : i32 to vector<128x10xi32>
    %203 = arith.cmpi eq, %27, %202 : vector<128x10xi32>
    %204 = vector.shape_cast %193 : vector<128x1xi32> to vector<128x1xi32>
    %205 = vector.broadcast %204 : vector<128x1xi32> to vector<128x10xi32>
    %206 = arith.select %203, %205, %188 : vector<128x10xi1>, vector<128x10xi32>
    %207 = vector.shape_cast %199 : vector<128x1xf32> to vector<128x1xf32>
    %208 = vector.broadcast %207 : vector<128x1xf32> to vector<128x10xf32>
    %209 = arith.select %203, %208, %191 : vector<128x10xi1>, vector<128x10xf32>
    %c10_i32 = arith.constant 10 : i32
    %c2147483647_i32_51 = arith.constant 2147483647 : i32
    %210 = vector.broadcast %c2147483647_i32_51 : i32 to vector<128x10xi32>
    %211 = arith.cmpi slt, %206, %210 : vector<128x10xi32>
    %c255_i32 = arith.constant 255 : i32
    %212 = vector.broadcast %c255_i32 : i32 to vector<128x10xi32>
    %213 = arith.andi %206, %212 : vector<128x10xi32>
    %c-1_i32 = arith.constant -1 : i32
    %214 = vector.broadcast %c-1_i32 : i32 to vector<128x10xi32>
    %215 = arith.select %211, %213, %214 : vector<128x10xi1>, vector<128x10xi32>
    %216 = vector.broadcast %0 : f32 to vector<128x10xf32>
    %217 = arith.mulf %216, %209 : vector<128x10xf32>
    %218 = vector.broadcast %1 : f32 to vector<128x10xf32>
    %219 = arith.addf %217, %218 : vector<128x10xf32>
    %cst_52 = arith.constant 0.000000e+00 : f32
    %220 = vector.broadcast %cst_52 : f32 to vector<128x10xf32>
    %221 = arith.subf %220, %219 : vector<128x10xf32>
    %222 = math.exp %221 : vector<128x10xf32>
    %cst_53 = arith.constant 1.000000e+00 : f32
    %223 = vector.broadcast %cst_53 : f32 to vector<128x10xf32>
    %224 = arith.addf %223, %222 : vector<128x10xf32>
    %cst_54 = arith.constant 1.000000e+00 : f32
    %225 = vector.broadcast %cst_54 : f32 to vector<128x10xf32>
    %226 = arith.divf %225, %224 : vector<128x10xf32>
    %cst_55 = arith.constant 0.000000e+00 : f32
    %227 = vector.broadcast %cst_55 : f32 to vector<128x10xf32>
    %228 = arith.select %211, %226, %227 : vector<128x10xi1>, vector<128x10xf32>
    %c0_56 = arith.constant 0 : index
    %c0_57 = arith.constant 0 : index
    %229 = vector.load %arg5[%c0_56, %c0_57] : memref<128x10xi32, #tpu.memory_space<vmem>>, vector<128x10xi32>
    tpu.vector_store %arg5[%c0_56, %c0_57], %215 {strides = array<i32>} : memref<128x10xi32, #tpu.memory_space<vmem>>, vector<128x10xi32>,
    %c0_58 = arith.constant 0 : index
    %c0_59 = arith.constant 0 : index
    %230 = vector.load %arg6[%c0_58, %c0_59] : memref<128x10xf32, #tpu.memory_space<vmem>>, vector<128x10xf32>
    tpu.vector_store %arg6[%c0_58, %c0_59], %228 {strides = array<i32>} : memref<128x10xf32, #tpu.memory_space<vmem>>, vector<128x10xf32>,
    return
  }
  func.func @transform_0(%arg0: i32) -> i32 {
    %c0_i32 = arith.constant 0 : i32
    %c0_i32_0 = arith.constant 0 : i32
    return %c0_i32 : i32
  }
  func.func @transform_1(%arg0: i32) -> (i32, i32) {
    %c0_i32 = arith.constant 0 : i32
    %c0_i32_0 = arith.constant 0 : i32
    return %arg0, %c0_i32 : i32, i32
  }
  func.func @transform_2(%arg0: i32) -> (i32, i32) {
    %c0_i32 = arith.constant 0 : i32
    %c0_i32_0 = arith.constant 0 : i32
    %c0_i32_1 = arith.constant 0 : i32
    return %c0_i32, %c0_i32_0 : i32, i32
  }
  func.func @transform_3(%arg0: i32) -> (i32, i32) {
    %c0_i32 = arith.constant 0 : i32
    %c0_i32_0 = arith.constant 0 : i32
    %c0_i32_1 = arith.constant 0 : i32
    return %c0_i32, %c0_i32_0 : i32, i32
  }
  func.func @transform_4(%arg0: i32) -> (i32, i32) {
    %c0_i32 = arith.constant 0 : i32
    %c0_i32_0 = arith.constant 0 : i32
    return %arg0, %c0_i32 : i32, i32
  }
  func.func @transform_5(%arg0: i32) -> (i32, i32) {
    %c0_i32 = arith.constant 0 : i32
    %c0_i32_0 = arith.constant 0 : i32
    return %arg0, %c0_i32 : i32, i32
  }
}

</mosaic_0001>

<bundles_post_ra>
// kernel: tpu_custom_call.1
= control target key start
LH: loop header
LB: loop body
LE: loop exit
PB: predicated region body
PF: predicated region fallthrough
CT: control target
= control target key end

     0   :  { %11 = vsyncpa [#allocation4], 0  ;;  %s13689_s0 = inlined_call_operand.hbm [shape: f32[4], index: 0, kind: input, shape index: {}]   ;;  %s13690_s1 = inlined_call_operand.hbm [shape: f32[256,128], index: 1, kind: input, shape index: {}]   ;;  %s13691_s2 = inlined_call_operand.hbm [shape: f32[128,256], index: 2, kind: input, shape index: {}]   ;;  %s13692_s3 = inlined_call_operand.vmem [shape: f32[1,256], index: 3, kind: input, shape index: {}]   ;;  %s13693_s4 = inlined_call_operand.vmem [shape: s32[256,10], index: 4, kind: output, shape index: {0}]   ;;  %s13694_s5 = inlined_call_operand.vmem [shape: f32[256,10], index: 5, kind: output, shape index: {1}]  }
   0x1   :  { %12 = vsyncpa [#allocation3], 0 }
   0x2   :  { %14 = vsyncpa [#allocation3 + $0x1], 0 }
   0x3   :  { %15 = vsyncpa [#allocation7], 0  ;;  %s5830_s18 = smov 0   ;;  %s5832_s19 = smov 0  }
   0x4   :  { %s5834_s20 = smov 0   ;;  %s5836_s21 = smov 0  }
   0x5 LB: > { %s5500_s22 = sadd.s32 4294967295, %s5790_s21   ;;  %s5850_s23 = sadd.s32 1, %s5790_s21   ;;  %s5790_s21 = sphi %s5836_s21, %s16166_s21   ;;  %s5786_s20 = sphi %s5834_s20, %s16165_s20   ;;  %s5782_s19 = sphi %s5832_s19, %s16164_s19   ;;  %s5778_s18 = sphi %s5830_s18, %s16163_s18  }
   0x6   : > { %s46_s24 = ssub.s32 %s5790_s21, %s5850_s23  ;;  %s49_s25 = sadd.s32 1, %s5786_s20 }
   0x7   : > { %p47_p0 = scmp.eq.s32.totalorder %s46_s24, 0  ;;  %p56_p1 = scmp.ne.s32.totalorder %s5786_s20, %s5782_s19 }
   0x8   : > { %p57_p2 = scmp.eq.s32.totalorder %s5790_s21, 0  ;;  %p62_p3 = scmp.ne.s32.totalorder %s5782_s19, %s5778_s18 }
   0x9   : > { %s5860_s26 = scalar_select %p47_p0, %s5786_s20, %s49_s25  }
   0xa   : > { %p58_p4 = por %p57_p2, %p56_p1  ;;  %p5864_p5 = scmp.eq.s32.totalorder %s5500_s22, 0 }
   0xb   : > { %p5502_p6 = scmp.ge.s32.totalorder %s5790_s21, 1  ;;  %p167_p7 = scmp.lt.s32.totalorder %s5790_s21, 3 }
   0xc   : > { %s14380_s27 = scalar_select %p5864_p5, 1, 0 }
   0xd   : > { %p5872_p8 = por %p5864_p5, %p62_p3  ;;  %p5876_p9 = pnand %p5502_p6, %p167_p7 }
   0xe   : > { %p5577_p10 = scmp.lt.s32.totalorder %s5790_s21, 2  ;;  %s5792_s6 = smov [#allocation6]  }
   0xf   : > { %s14381_s28 = scalar_select %p5872_p8, 1, 0 }
  0x10   : > { %s14382_s29 = scalar_select %p5876_p9, 1, 0 }
  0x11   : > { %p5564_p11 = pneg %p5876_p9  ;;  %p5883_p12 = pnand %p5577_p10, %p58_p4 }
  0x12   : > { %s188_s7 = sshll.u32 %s5792_s6, 4  ;;  %s5793_s9 = smov [#allocation2]   ;;  %s189_s7 = int_to_ptr.vmem [resolvable:$true] %s188_s7 }
  0x13   : > { %p5889_p13 = pnand %p5564_p11, %p5864_p5  ;;  %s5705_s12 = scalar_lea.vmem %s189_s7, 4096 }
  0x14   : > { %p5706_p1 = scmp.ne.s32.totalorder %s189_s7, %s5705_s12  ;;  %p5713_p4 = scmp.lt.s32.totalorder %s189_s7, %s189_s7 }
  0x15   : > { %5567 = dma.hbm_to_smem (!%p5889_p13), %s13689_s0, 16, %s5793_s9, [#allocation4]  }
  0x16   : > { %p5696_p0 = pneg %p5889_p13  ;;  %p5714_p6 = scmp.lt.s32.totalorder %s5705_s12, %s5705_s12 }
  0x18   : > { %p5708_p2 = pnand %p5706_p1, %p5696_p0  ;;  %p5715_p7 = por %p5714_p6, %p5713_p4 }
  0x1a   : > { %p5709_p3 = pneg %p5708_p2 }
  0x1c   : > { %p5716_p10 = pnand %p5715_p7, %p5709_p3 }
  0x1e   : > { %5719 = shalt.err (!%p5716_p10)
}
  0x1f   : > { %s5794_s13 = smov 256   ;;  %s5795_s14 = smov 16  }
  0x20   : > { %5570 = dma.hbm_to_vmem [thread:$0]  (!%p5889_p13), %s13691_s2, 4096, %s189_s7, [#allocation7], %s5794_s13, %s5794_s13, %s5795_s14  }
  0x21   : > { %s205_s17 = sand.u32 1, %s5786_s20   ;;  %s5521_s18 = sshll.u32 %s5790_s21, 11 }
  0x22   : > { %s5506_s24 = sshll.u32 %s205_s17, 7  ;;  %s5910_s9 = scalar_lea.hbm %s13690_s1, %s5521_s18 }
  0x23   : > { %s209_s10 = scalar_lea.vmem [#allocation5], %s5506_s24  ;;  %s5914_s8 = scalar_lea.sflag [#allocation3], %s205_s17 }
  0x24   : > { %s216_s11 = sshll.u32 %s209_s10, 4  ;;  %s5720_s12 = scalar_lea.hbm %s5910_s9, 2048  ;;  %s5912_s11 = int_to_ptr.vmem [resolvable:$true] %s216_s11 }
  0x25   : > { %p5721_p11 = scmp.ne.s32.totalorder %s5910_s9, %s5720_s12  ;;  %p5722_p13 = pneg %p5883_p12 }
  0x26   : > { %s5725_s14 = scalar_lea.hbm %s13690_s1, 4096  ;;  %p5726_p2 = scmp.lt.s32.totalorder %s5910_s9, %s13690_s1 }
  0x27   : > { %p5723_p0 = pnand %p5722_p13, %p5721_p11  ;;  %p5727_p3 = scmp.lt.s32.totalorder %s5725_s14, %s5720_s12 }
  0x29   : > { %p5724_p1 = pneg %p5723_p0  ;;  %p5728_p4 = por %p5727_p3, %p5726_p2 }
  0x2b   : > { %p5729_p6 = pnand %p5728_p4, %p5724_p1 }
  0x2d   : > { %5732 = shalt.err (!%p5729_p6)
}
  0x2e   : > { %s5733_s17 = scalar_lea.vmem %s5912_s11, 2048  ;;  %s5796_s18 = smov [#allocation5]  }
  0x2f   : > { %p5734_p7 = scmp.ne.s32.totalorder %s5912_s11, %s5733_s17  ;;  %s5738_s24 = sshll.u32 %s5796_s18, 4  ;;  %s5739_s24 = int_to_ptr.vmem [resolvable:$false] %s5738_s24 }
  0x30   : > { %s5740_s25 = scalar_lea.vmem %s5739_s24, 4096  ;;  %p5741_p0 = scmp.lt.s32.totalorder %s5912_s11, %s5739_s24 }
  0x31   : > { %p5736_p10 = pnand %p5734_p7, %p5722_p13  ;;  %p5742_p8 = scmp.lt.s32.totalorder %s5740_s25, %s5733_s17 }
  0x33   : > { %p5737_p11 = pneg %p5736_p10  ;;  %p5743_p5 = por %p5742_p8, %p5741_p0 }
  0x35   : > { %p5744_p9 = pnand %p5743_p5, %p5737_p11 }
  0x37   : > { %5747 = shalt.err (!%p5744_p9)
}
  0x38   : > { %s5797_s6 = smov 128   ;;  %s5798_s10 = smov 8  }
  0x39   : > { %5574 = dma.hbm_to_vmem [thread:$0]  (!%p5883_p12), %s5910_s9, 2048, %s5912_s11, %s5914_s8, %s5797_s6, %s5797_s6, %s5798_s10  }
  0x3a   : > { %p14385_p13 = scmp.ne.s32.totalorder %s14382_s29, 0 }
  0x3c   : > { %228 = sbr.rel (%p14385_p13) target bundleno = 3474 (0xd92), region = 36 }
  0x41   : > { %p14386_p1 = scmp.ne.s32.totalorder %s14380_s27, 0 }
  0x43   : > { %5765 = dma.done.wait (%p14386_p1), [#allocation4], 16  }
  0x44   : > { %5767 = vsyncadd (%p14386_p1), [#allocation4], 4294967280  ;;  %s234_s12 = sand.u32 1, %s5782_s19   ;;  %p14387_p5 = scmp.ne.s32.totalorder %s14381_s28, 0 }
  0x45   : > { %s5511_s7 = sshll.u32 %s234_s12, 7  ;;  %s235_s13 = scalar_lea.sflag [#allocation3], %s234_s12 }
  0x46   : > { %s5942_s14 = scalar_lea.vmem [#allocation5], %s5511_s7 }
  0x47   : > { %5769 = dma.done.wait (%p14387_p5), %s235_s13, 2048  }
  0x48   : > { %5771 = vsyncadd (%p14387_p5), %s235_s13, 4294965248 }
  0x49   : > { %5773 = dma.done.wait (%p14386_p1), [#allocation7], 4096  }
  0x4a   : > { %5775 = vsyncadd (%p14386_p1), [#allocation7], 4294963200 }
  0x4b   : > { %247 = sfence }
  0x4c   : > { %v338_v0 = vld [vmem:[#allocation6 + $0xf8] sm:$0xff]  ;;  %v337_v1 = vld [vmem:[#allocation6 + $0xf0] sm:$0xff]  ;;  %v336_v2 = vld [vmem:[#allocation6 + $0xe8] sm:$0xff]  ;;  %v5799_v37 = vmov 0.0   ;;  %s5518_s27 = sld [smem:[#allocation2 + $0x2]]  ;;  %s5513_s30 = sshll.u32 %s5500_s22, 4 }
  0x4d   : > { %339 = vmatprep.subr.mxu0 %v338_v0  ;;  %5522 = vmatprep.subr.mxu1 %v338_v0  ;;  %v335_v3 = vld [vmem:[#allocation6 + $0xe0] sm:$0xff]  ;;  %v334_v4 = vld [vmem:[#allocation6 + $0xd8] sm:$0xff]  ;;  %v333_v5 = vld [vmem:[#allocation6 + $0xd0] sm:$0xff]  ;;  %p277_p8 = scmp.lt.s32.totalorder %s5513_s30, 31  ;;  %s288_s8 = sld [smem:[#allocation2]] }
  0x4e   : > { %340 = vmatpush1.msra.mxu0 %v337_v1  ;;  %5538 = vmatpush1.msra.mxu1 %v337_v1  ;;  %v332_v6 = vld [vmem:[#allocation6 + $0xc8] sm:$0xff]  ;;  %v331_v7 = vld [vmem:[#allocation6 + $0xc0] sm:$0xff]  ;;  %v330_v8 = vld [vmem:[#allocation6 + $0xb8] sm:$0xff]  ;;  %s5517_s15 = sld [smem:[#allocation2 + $0x1]] }
  0x4f   : > { %341 = vmatprep.subr.mxu0 %v336_v2  ;;  %5523 = vmatprep.subr.mxu1 %v336_v2  ;;  %v329_v9 = vld [vmem:[#allocation6 + $0xb0] sm:$0xff]  ;;  %v328_v10 = vld [vmem:[#allocation6 + $0xa8] sm:$0xff]  ;;  %v327_v11 = vld [vmem:[#allocation6 + $0xa0] sm:$0xff]  ;;  %s16168_s30 = smov (!%p277_p8, %s5513_s30), 31 }
  0x50   : > { %342 = vmatpush1.msra.mxu0 %v335_v3  ;;  %5539 = vmatpush1.msra.mxu1 %v335_v3  ;;  %v326_v12 = vld [vmem:[#allocation6 + $0x98] sm:$0xff]  ;;  %v325_v13 = vld [vmem:[#allocation6 + $0x90] sm:$0xff]  ;;  %v324_v14 = vld [vmem:[#allocation6 + $0x88] sm:$0xff]  ;;  %s5514_s9 = sshll.u32 %s16168_s30, 3 }
  0x51   : > { %343 = vmatprep.subr.mxu0 %v334_v4  ;;  %5524 = vmatprep.subr.mxu1 %v334_v4  ;;  %v323_v15 = vld [vmem:[#allocation6 + $0x80] sm:$0xff]  ;;  %v322_v16 = vld [vmem:[#allocation6 + $0x78] sm:$0xff]  ;;  %v321_v17 = vld [vmem:[#allocation6 + $0x70] sm:$0xff]  ;;  %s13049_s11 = scalar_lea.vmem %s13693_s4, %s5514_s9  ;;  %s13562_s18 = scalar_lea.vmem %s13694_s5, %s5514_s9 }
  0x52   : > { %344 = vmatpush1.msra.mxu0 %v333_v5  ;;  %5540 = vmatpush1.msra.mxu1 %v333_v5  ;;  %v320_v18 = vld [vmem:[#allocation6 + $0x68] sm:$0xff]  ;;  %v319_v19 = vld [vmem:[#allocation6 + $0x60] sm:$0xff]  ;;  %v318_v20 = vld [vmem:[#allocation6 + $0x58] sm:$0xff] }
  0x53   : > { %345 = vmatprep.subr.mxu0 %v332_v6  ;;  %5525 = vmatprep.subr.mxu1 %v332_v6  ;;  %v317_v21 = vld [vmem:[#allocation6 + $0x50] sm:$0xff]  ;;  %v316_v22 = vld [vmem:[#allocation6 + $0x48] sm:$0xff]  ;;  %v315_v23 = vld [vmem:[#allocation6 + $0x40] sm:$0xff]  ;;  %v550_v6 = vlaneseq }
  0x54   : > { %346 = vmatpush1.msra.mxu0 %v331_v7  ;;  %5541 = vmatpush1.msra.mxu1 %v331_v7  ;;  %v314_v24 = vld [vmem:[#allocation6 + $0x38] sm:$0xff]  ;;  %v313_v25 = vld [vmem:[#allocation6 + $0x30] sm:$0xff]  ;;  %v312_v26 = vld [vmem:[#allocation6 + $0x28] sm:$0xff] }
  0x55   : > { %347 = vmatprep.subr.mxu0 %v330_v8  ;;  %5526 = vmatprep.subr.mxu1 %v330_v8  ;;  %v311_v27 = vld [vmem:[#allocation6 + $0x20] sm:$0xff]  ;;  %v310_v28 = vld [vmem:[#allocation6 + $0x18] sm:$0xff]  ;;  %v309_v29 = vld [vmem:[#allocation6 + $0x10] sm:$0xff]  ;;  %v551_v8 = vshrl.u32 %v550_v6, 7 }
  0x56   : > { %348 = vmatpush1.msra.mxu0 %v329_v9  ;;  %5542 = vmatpush1.msra.mxu1 %v329_v9  ;;  %v308_v30 = vld [vmem:[#allocation6 + $0x8] sm:$0xff]  ;;  %v307_v31 = vld [vmem:[#allocation6] sm:$0xff]  ;;  %v293_v34 = vld [vmem:[%s5942_s14 + $0x10] sm:$0xff] }
  0x57   : > { %349 = vmatprep.subr.mxu0 %v328_v10  ;;  %5527 = vmatprep.subr.mxu1 %v328_v10  ;;  %v291_v32 = vld [vmem:[%s5942_s14] sm:$0xff]  ;;  %v502_v36 = vmul.f32 %v293_v34, %v293_v34  ;;  %v292_v38 = vld [vmem:[%s5942_s14 + $0x8] sm:$0xff]  ;;  %v294_v40 = vld [vmem:[%s5942_s14 + $0x18] sm:$0xff] }
  0x58   : > { %350 = vmatpush1.msra.mxu0 %v327_v11  ;;  %5543 = vmatpush1.msra.mxu1 %v327_v11  ;;  %v299_v33 = vld [vmem:[%s5942_s14 + $0x40] sm:$0xff]  ;;  %v500_v35 = vmul.f32 %v291_v32, %v291_v32  ;;  %v300_v39 = vld [vmem:[%s5942_s14 + $0x48] sm:$0xff]  ;;  %v501_v41 = vmul.f32 %v292_v38, %v292_v38  ;;  %v503_v42 = vmul.f32 %v294_v40, %v294_v40  ;;  %v301_v43 = vld [vmem:[%s5942_s14 + $0x50] sm:$0xff]  ;;  %v552_v11 = vsub.s32 0, %v551_v8 }
  0x59   : > { %351 = vmatprep.subr.mxu0 %v326_v12  ;;  %5528 = vmatprep.subr.mxu1 %v326_v12  ;;  %v295_v44 = vld [vmem:[%s5942_s14 + $0x20] sm:$0xff]  ;;  %v296_v45 = vld [vmem:[%s5942_s14 + $0x28] sm:$0xff]  ;;  %v302_v48 = vld [vmem:[%s5942_s14 + $0x58] sm:$0xff]  ;;  %v508_v54 = vmul.f32 %v299_v33, %v299_v33  ;;  %v509_v55 = vmul.f32 %v300_v39, %v300_v39  ;;  %v510_v57 = vmul.f32 %v301_v43, %v301_v43 }
  0x5a   : > { %352 = vmatpush1.msra.mxu0 %v325_v13  ;;  %5544 = vmatpush1.msra.mxu1 %v325_v13  ;;  %v504_v46 = vmul.f32 %v295_v44, %v295_v44  ;;  %v505_v47 = vmul.f32 %v296_v45, %v296_v45  ;;  %v297_v49 = vld [vmem:[%s5942_s14 + $0x30] sm:$0xff]  ;;  %v298_v50 = vld [vmem:[%s5942_s14 + $0x38] sm:$0xff]  ;;  %v303_v53 = vld [vmem:[%s5942_s14 + $0x60] sm:$0xff]  ;;  %v511_v58 = vmul.f32 %v302_v48, %v302_v48  ;;  %v556_v13 = vsub.s32 1, %v551_v8 }
  0x5b   : > { %353 = vmatprep.subr.mxu0 %v324_v14  ;;  %5529 = vmatprep.subr.mxu1 %v324_v14  ;;  %v506_v51 = vmul.f32 %v297_v49, %v297_v49  ;;  %v507_v52 = vmul.f32 %v298_v50, %v298_v50  ;;  %v304_v56 = vld [vmem:[%s5942_s14 + $0x68] sm:$0xff]  ;;  %v305_v59 = vld [vmem:[%s5942_s14 + $0x70] sm:$0xff]  ;;  %v512_v60 = vmul.f32 %v303_v53, %v303_v53  ;;  %v306_v62 = vld [vmem:[%s5942_s14 + $0x78] sm:$0xff] }
  0x5c   : > { %354 = vmatpush1.msra.mxu0 %v323_v15  ;;  %5545 = vmatpush1.msra.mxu1 %v323_v15  ;;  %v513_v61 = vmul.f32 %v304_v56, %v304_v56  ;;  %v514_v63 = vmul.f32 %v305_v59, %v305_v59  ;;  %v515_v0 = vmul.f32 %v306_v62, %v306_v62  ;;  %v548_v12 = vld [vmem:[%s13692_s3] sm:$0x3] }
  0x5d   : > { %355 = vmatprep.subr.mxu0 %v322_v16  ;;  %5530 = vmatprep.subr.mxu1 %v322_v16  ;;  %v5987_v15 = vrot.slane %v548_v12, %v552_v11  ;;  %v5989_v16 = vand.u32 127, %v550_v6 }
  0x5e   : > { %356 = vmatpush1.msra.mxu0 %v321_v17  ;;  %5546 = vmatpush1.msra.mxu1 %v321_v17  ;;  %v5991_v17 = vrot.slane %v548_v12, %v556_v13 }
  0x5f   : > { %357 = vmatprep.subr.mxu0 %v320_v18  ;;  %5531 = vmatprep.subr.mxu1 %v320_v18  ;;  %14388 = vst [vmem:[#allocation11_spill] sm:$0xff] %v5989_v16 }
  0x60   : > { %358 = vmatpush1.msra.mxu0 %v319_v19  ;;  %5547 = vmatpush1.msra.mxu1 %v319_v19 }
  0x61   : > { %359 = vmatprep.subr.mxu0 %v318_v20  ;;  %5532 = vmatprep.subr.mxu1 %v318_v20 }
  0x62   : > { %360 = vmatpush1.msra.mxu0 %v317_v21  ;;  %5548 = vmatpush1.msra.mxu1 %v317_v21  ;;  %v5995_v21 = vadd.s32 128, %v5989_v16 }
  0x63   : > { %361 = vmatprep.subr.mxu0 %v316_v22  ;;  %5533 = vmatprep.subr.mxu1 %v316_v22  ;;  %v5997_v22 = vstv %s5518_s27 }
  0x64   : > { %362 = vmatpush1.msra.mxu0 %v315_v23  ;;  %5549 = vmatpush1.msra.mxu1 %v315_v23 }
  0x65   : > { %363 = vmatprep.subr.mxu0 %v314_v24  ;;  %5534 = vmatprep.subr.mxu1 %v314_v24 }
  0x66   : > { %364 = vmatpush1.msra.mxu0 %v313_v25  ;;  %5550 = vmatpush1.msra.mxu1 %v313_v25 }
  0x67   : > { %365 = vmatprep.subr.mxu0 %v312_v26  ;;  %5535 = vmatprep.subr.mxu1 %v312_v26 }
  0x68   : > { %366 = vmatpush1.msra.mxu0 %v311_v27  ;;  %5551 = vmatpush1.msra.mxu1 %v311_v27 }
  0x69   : > { %367 = vmatprep.subr.mxu0 %v310_v28  ;;  %5536 = vmatprep.subr.mxu1 %v310_v28 }
  0x6a   : > { %368 = vmatpush1.msra.mxu0 %v309_v29  ;;  %5552 = vmatpush1.msra.mxu1 %v309_v29 }
  0x6b   : > { %369 = vmatprep.subr.mxu0 %v308_v30  ;;  %5537 = vmatprep.subr.mxu1 %v308_v30 }
  0x6c   : > { %370 = vmatpush1.msra.mxu0 %v307_v31  ;;  %5553 = vmatpush1.msra.mxu1 %v307_v31 }
  0x6d   : > { %403 = vmatprep.mubr.f32.mxu0 %v5799_v37  ;;  %451 = vmatprep.mubr.f32.mxu1 %v5799_v37 }
  0x6e   : > { %404 = vmatmul.mubr.f32.vlgmr.msra.gmra.mxu0 %v291_v32  ;;  %452 = vmatmul.mubr.f32.vlgmr.msra.gmra.mxu1 %v299_v33 }
  0x6f   : > { %409 = vmatprep.mubr.f32.mxu0 %v5799_v37  ;;  %457 = vmatprep.mubr.f32.mxu1 %v5799_v37 }
  0x70   : > { %516 = vadd.xlane.f32.xlu0 %v500_v35  ;;  %520 = vadd.xlane.f32.xlu1 %v502_v36 }
  0x72   : > { %410 = vmatmul.mubr.f32.gmra.mxu0 %v292_v38  ;;  %458 = vmatmul.mubr.f32.gmra.mxu1 %v300_v39 }
  0x73   : > { %415 = vmatprep.mubr.f32.mxu0 %v5799_v37  ;;  %463 = vmatprep.mubr.f32.mxu1 %v5799_v37 }
  0x74   : > { %518 = vadd.xlane.f32.xlu0 %v501_v41  ;;  %522 = vadd.xlane.f32.xlu1 %v503_v42 }
  0x76   : > { %416 = vmatmul.mubr.f32.gmra.mxu0 %v293_v34  ;;  %464 = vmatmul.mubr.f32.gmra.mxu1 %v301_v43 }
  0x77   : > { %421 = vmatprep.mubr.f32.mxu0 %v5799_v37  ;;  %469 = vmatprep.mubr.f32.mxu1 %v5799_v37 }
  0x78   : > { %524 = vadd.xlane.f32.xlu0 %v504_v46  ;;  %526 = vadd.xlane.f32.xlu1 %v505_v47 }
  0x7a   : > { %422 = vmatmul.mubr.f32.gmra.mxu0 %v294_v40  ;;  %470 = vmatmul.mubr.f32.gmra.mxu1 %v302_v48 }
  0x7b   : > { %427 = vmatprep.mubr.f32.mxu0 %v5799_v37  ;;  %475 = vmatprep.mubr.f32.mxu1 %v5799_v37 }
  0x7c   : > { %528 = vadd.xlane.f32.xlu0 %v506_v51  ;;  %530 = vadd.xlane.f32.xlu1 %v507_v52 }
  0x7e   : > { %428 = vmatmul.mubr.f32.gmra.mxu0 %v295_v44  ;;  %476 = vmatmul.mubr.f32.gmra.mxu1 %v303_v53 }
  0x7f   : > { %433 = vmatprep.mubr.f32.mxu0 %v5799_v37  ;;  %481 = vmatprep.mubr.f32.mxu1 %v5799_v37 }
  0x80   : > { %532 = vadd.xlane.f32.xlu0 %v508_v54  ;;  %534 = vadd.xlane.f32.xlu1 %v509_v55 }
  0x82   : > { %434 = vmatmul.mubr.f32.gmra.mxu0 %v296_v45  ;;  %482 = vmatmul.mubr.f32.gmra.mxu1 %v304_v56 }
  0x83   : > { %439 = vmatprep.mubr.f32.mxu0 %v5799_v37  ;;  %487 = vmatprep.mubr.f32.mxu1 %v5799_v37 }
  0x84   : > { %536 = vadd.xlane.f32.xlu0 %v510_v57  ;;  %538 = vadd.xlane.f32.xlu1 %v511_v58 }
  0x86   : > { %440 = vmatmul.mubr.f32.gmra.mxu0 %v297_v49  ;;  %488 = vmatmul.mubr.f32.gmra.mxu1 %v305_v59 }
  0x87   : > { %445 = vmatprep.mubr.f32.mxu0 %v5799_v37  ;;  %493 = vmatprep.mubr.f32.mxu1 %v5799_v37 }
  0x88   : > { %540 = vadd.xlane.f32.xlu0 %v512_v60  ;;  %542 = vadd.xlane.f32.xlu1 %v513_v61 }
  0x8a   : > { %446 = vmatmul.mubr.f32.gmra.mxu0 %v298_v50  ;;  %494 = vmatmul.mubr.f32.gmra.mxu1 %v306_v62 }
  0x8c   : > { %544 = vadd.xlane.f32.xlu0 %v514_v63  ;;  %546 = vadd.xlane.f32.xlu1 %v515_v0 }
  0xf9   : > { %v517_v1 = vpop.xlane.xlu0 %516  ;;  %v521_v2 = vpop.xlane.xlu1 %520 }
  0xfa   : > { %v560_v20 = vadd.f32 %v5987_v15, %v517_v1  ;;  %v561_v23 = vadd.f32 %v5991_v17, %v517_v1  ;;  %v6001_v24 = vadd.f32 %v5987_v15, %v521_v2  ;;  %v6004_v25 = vadd.f32 %v5991_v17, %v521_v2 }
  0xfd   : > { %v519_v3 = vpop.xlane.xlu0 %518  ;;  %v523_v4 = vpop.xlane.xlu1 %522 }
  0xfe   : > { %v6007_v26 = vadd.f32 %v5987_v15, %v519_v3  ;;  %v6010_v28 = vadd.f32 %v5991_v17, %v519_v3  ;;  %v6013_v29 = vadd.f32 %v5987_v15, %v523_v4  ;;  %v6016_v30 = vadd.f32 %v5991_v17, %v523_v4 }
 0x101   : > { %v525_v5 = vpop.xlane.xlu0 %524  ;;  %v527_v7 = vpop.xlane.xlu1 %526 }
 0x102   : > { %v6019_v31 = vadd.f32 %v5987_v15, %v525_v5  ;;  %v6022_v32 = vadd.f32 %v5991_v17, %v525_v5  ;;  %v6025_v33 = vadd.f32 %v5987_v15, %v527_v7  ;;  %v6028_v34 = vadd.f32 %v5991_v17, %v527_v7 }
 0x105   : > { %v529_v9 = vpop.xlane.xlu0 %528  ;;  %v531_v10 = vpop.xlane.xlu1 %530 }
 0x106   : > { %v6032_v37 = vadd.f32 %v5987_v15, %v529_v9  ;;  %v6035_v38 = vadd.f32 %v5991_v17, %v529_v9  ;;  %v6042_v41 = vadd.f32 %v5987_v15, %v531_v10  ;;  %v6045_v42 = vadd.f32 %v5991_v17, %v531_v10 }
 0x109   : > { %v533_v14 = vpop.xlane.xlu0 %532  ;;  %v535_v18 = vpop.xlane.xlu1 %534 }
 0x10a   : > { %v576_v35 = vadd.f32 %v5987_v15, %v533_v14  ;;  %v577_v44 = vadd.f32 %v5991_v17, %v533_v14  ;;  %v578_v45 = vadd.f32 %v5987_v15, %v535_v18  ;;  %v6056_v50 = vadd.f32 %v5991_v17, %v535_v18 }
 0x10d   : > { %v537_v19 = vpop.xlane.xlu0 %536  ;;  %v539_v27 = vpop.xlane.xlu1 %538 }
 0x10e   : > { %v6059_v51 = vadd.f32 %v5987_v15, %v537_v19  ;;  %v6062_v52 = vadd.f32 %v5991_v17, %v537_v19  ;;  %v6065_v53 = vadd.f32 %v5987_v15, %v539_v27  ;;  %v6074_v61 = vadd.f32 %v5991_v17, %v539_v27 }
 0x111   : > { %v541_v36 = vpop.xlane.xlu0 %540  ;;  %v543_v47 = vpop.xlane.xlu1 %542 }
 0x112   : > { %v6077_v62 = vadd.f32 %v5987_v15, %v541_v36  ;;  %v6080_v63 = vadd.f32 %v5991_v17, %v541_v36  ;;  %v6083_v0 = vadd.f32 %v5987_v15, %v543_v47  ;;  %v6091_v7 = vadd.f32 %v5991_v17, %v543_v47 }
 0x115   : > { %v545_v58 = vpop.xlane.xlu0 %544  ;;  %v547_v18 = vpop.xlane.xlu1 %546 }
 0x116   : > { %v6095_v10 = vadd.f32 %v5987_v15, %v545_v58  ;;  %v6098_v14 = vadd.f32 %v5991_v17, %v545_v58 }
 0x12e   : > { %v6037_v39 = vpop.f32.mrf.mxu0  ;;  %v6039_v40 = vpop.f32.mrf.mxu1 }
 0x12f   : > { %14389 = vst [vmem:[#allocation12_spill] sm:$0xff] %v6037_v39  ;;  %14390 = vst [vmem:[#allocation13_spill] sm:$0xff] %v6039_v40  ;;  %v608_v43 = vmul.f32 2.0, %v6039_v40  ;;  %v592_v46 = vmul.f32 2.0, %v6037_v39 }
 0x130   : > { %v6051_v48 = vpop.f32.mrf.mxu0  ;;  %v6053_v49 = vpop.f32.mrf.mxu1 }
 0x131   : > { %14391 = vst [vmem:[#allocation14_spill] sm:$0xff] %v6051_v48  ;;  %14392 = vst [vmem:[#allocation15_spill] sm:$0xff] %v6053_v49  ;;  %v640_v54 = vsub.f32 %v576_v35, %v608_v43  ;;  %v593_v55 = vmul.f32 2.0, %v6051_v48  ;;  %v624_v56 = vsub.f32 %v560_v20, %v592_v46  ;;  %v609_v57 = vmul.f32 2.0, %v6053_v49 }
 0x132   : > { %v6069_v59 = vpop.f32.mrf.mxu0  ;;  %v6071_v60 = vpop.f32.mrf.mxu1 }
 0x133   : > { %14393 = vst [vmem:[#allocation16_spill] sm:$0xff] %v6069_v59  ;;  %14394 = vst [vmem:[#allocation17_spill] sm:$0xff] %v6071_v60  ;;  %v672_v1 = vmax.f32 %v640_v54, 0.0  ;;  %v610_v2 = vmul.f32 2.0, %v6071_v60  ;;  %v625_v3 = vsub.f32 %v561_v23, %v593_v55  ;;  %v656_v4 = vmax.f32 %v624_v56, 0.0 }
 0x134   : > { %v6086_v5 = vpop.f32.mrf.mxu0  ;;  %v6088_v6 = vpop.f32.mrf.mxu1  ;;  %v594_v8 = vmul.f32 2.0, %v6069_v59  ;;  %v641_v9 = vsub.f32 %v577_v44, %v609_v57  ;;  %v6114_v57 = vadd.f32 %v5987_v15, %v547_v18 }
 0x135   : > { %14395 = vst [vmem:[#allocation18_spill] sm:$0xff] %v6086_v5  ;;  %14396 = vst [vmem:[#allocation19_spill] sm:$0xff] %v6088_v6  ;;  %v642_v11 = vsub.f32 %v578_v45, %v610_v2  ;;  %v657_v12 = vmax.f32 %v625_v3, 0.0  ;;  %v723_v13 = vand.u32 4294967040, %v656_v4  ;;  %v739_v19 = vand.u32 4294967040, %v672_v1 }
 0x136   : > { %v6100_v20 = vpop.f32.mrf.mxu1  ;;  %v595_v23 = vmul.f32 2.0, %v6086_v5  ;;  %v626_v27 = vsub.f32 %v6007_v26, %v594_v8  ;;  %v673_v35 = vmax.f32 %v641_v9, 0.0  ;;  %v6108_v46 = vpop.f32.mrf.mxu0  ;;  %vm788_vm0 = vcmp.le.f32.partialorder %v656_v4, %v5997_v22 }
 0x137   : > { %14397 = vst [vmem:[#allocation20_spill] sm:$0xff] %v6100_v20  ;;  %v6104_v36 = vmax.f32 %v642_v11, 0.0  ;;  %v612_v43 = vmul.f32 2.0, %v6100_v20  ;;  %v724_v44 = vand.u32 4294967040, %v657_v12  ;;  %v755_v45 = vor.u32 %v723_v13, %v5989_v16  ;;  %14398 = vst [vmem:[#allocation21_spill] sm:$0xff] %v6108_v46 }
 0x138   : > { %v6110_v47 = vpop.f32.mrf.mxu1  ;;  %v627_v54 = vsub.f32 %v6010_v28, %v595_v23  ;;  %v658_v55 = vmax.f32 %v626_v27, 0.0  ;;  %v740_v56 = vand.u32 4294967040, %v673_v35  ;;  %vm789_vm1 = vcmp.le.f32.partialorder %v657_v12, %v5997_v22  ;;  %v6130_v23 = vpop.f32.mrf.mxu0 }
 0x139   : > { %14399 = vst [vmem:[#allocation22_spill] sm:$0xff] %v6110_v47  ;;  %v644_v26 = vsub.f32 %v6059_v51, %v612_v43  ;;  %v756_v58 = vor.u32 %v724_v44, %v5995_v21  ;;  %v741_v2 = vand.u32 4294967040, %v6104_v36  ;;  %v6123_v8 = vsel %vm788_vm0, %v755_v45, 2147483647  ;;  %14401 = vst [vmem:[#allocation24_spill] sm:$0xff] %v6130_v23 }
 0x13a   : > { %v6121_v3 = vpop.f32.mrf.mxu1  ;;  %v659_v28 = vmax.f32 %v627_v54, 0.0  ;;  %v725_v9 = vand.u32 4294967040, %v658_v55  ;;  %v771_v51 = vor.u32 %v739_v19, %v5989_v16  ;;  %v772_v13 = vor.u32 %v740_v56, %v5995_v21 }
 0x13b   : > { %14400 = vst [vmem:[#allocation23_spill] sm:$0xff] %v6121_v3  ;;  %v614_v11 = vmul.f32 2.0, %v6121_v3  ;;  %v6126_v15 = vsel %vm789_vm1, %v756_v58, 2147483647  ;;  %vm790_vm3 = vcmp.le.f32.partialorder %v658_v55, %v5997_v22  ;;  %v6138_v43 = vmax.f32 %v644_v26, 0.0 }
 0x13c   : > { %v6132_v4 = vpop.f32.mrf.mxu1  ;;  %vm852_vm2 = vcmp.lt.s32.totalorder %v6123_v8, %v6126_v15  ;;  %v726_v12 = vand.u32 4294967040, %v659_v28  ;;  %v757_v27 = vor.u32 %v725_v9, %v5989_v16  ;;  %vm791_vm4 = vcmp.le.f32.partialorder %v659_v28, %v5997_v22  ;;  %v6159_v28 = vpop.f32.mrf.mxu0 }
 0x13d   : > { %14402 = vst [vmem:[#allocation25_spill] sm:$0xff] %v6132_v4  ;;  %v6142_v44 = vsel %vm852_vm2, %v6123_v8, %v6126_v15  ;;  %vm804_vm5 = vcmp.le.f32.partialorder %v672_v1, %v5997_v22  ;;  %vm805_vm6 = vcmp.le.f32.partialorder %v673_v35, %v5997_v22  ;;  %v646_v55 = vsub.f32 %v6065_v53, %v614_v11 }
 0x13e   : > { %v6146_v19 = vpop.f32.mrf.mxu1  ;;  %v855_v45 = vshra.s32 %v6142_v44, 16  ;;  %v758_v54 = vor.u32 %v726_v12, %v5995_v21  ;;  %v6150_v56 = vsel %vm790_vm3, %v757_v27, 2147483647  ;;  %v6155_v58 = vsel %vm804_vm5, %v771_v51, 2147483647  ;;  %14404 = vst [vmem:[#allocation27_spill] sm:$0xff] %v6159_v28 }
 0x13f   : > { %14403 = vst [vmem:[#allocation26_spill] sm:$0xff] %v6146_v19  ;;  %v616_v26 = vmul.f32 2.0, %v6146_v19  ;;  %v6157_v9 = vsel %vm805_vm6, %v772_v13, 2147483647  ;;  %v611_v35 = vmul.f32 2.0, %v6088_v6  ;;  %v6178_v51 = vadd.f32 %v5991_v17, %v547_v18  ;;  %v6197_v19 = vpop.f32.mrf.mxu0 }
 0x140   : > { %v6161_v1 = vpop.f32.mrf.mxu1  ;;  %v6163_v3 = vcvt.s32.f32 %v855_v45  ;;  %v6165_v20 = vsel %vm791_vm4, %v758_v54, 2147483647  ;;  %vm980_vm7 = vcmp.lt.s32.totalorder %v6155_v58, %v6157_v9  ;;  %v773_v45 = vor.u32 %v741_v2, %v5989_v16  ;;  %14408 = vst [vmem:[#allocation31_spill] sm:$0xff] %v6197_v19 }
 0x141   : > { %14405 = vst [vmem:[#allocation28_spill] sm:$0xff] %v6161_v1  ;;  %14406 = vst [vmem:[#allocation29_spill] sm:$0xff] %v6165_v20  ;;  %v648_v53 = vsub.f32 %v6077_v62, %v616_v26  ;;  %vm868_vm8 = vcmp.lt.s32.totalorder %v6150_v56, %v6165_v20  ;;  %v6175_v11 = vsel %vm980_vm7, %v6155_v58, %v6157_v9  ;;  %v6195_v18 = vmax.f32 %v646_v55, 0.0 }
 0x142   : > { %v6180_v13 = vpop.f32.mrf.mxu1  ;;  %858 = vmin.xlane.f32.xlu0 %v6163_v3  ;;  %v6185_v12 = vsel %vm868_vm8, %v6150_v56, %v6165_v20  ;;  %v983_v62 = vshra.s32 %v6175_v11, 16  ;;  %v643_v27 = vsub.f32 %v6056_v50, %v611_v35  ;;  %vm806_vm9 = vcmp.le.f32.partialorder %v6104_v36, %v5997_v22 }
 0x143   : > { %14407 = vst [vmem:[#allocation30_spill] sm:$0xff] %v6180_v13  ;;  %v618_v26 = vmul.f32 2.0, %v6180_v13  ;;  %v871_v17 = vshra.s32 %v6185_v12, 16  ;;  %v596_v2 = vmul.f32 2.0, %v6108_v46  ;;  %v6204_v35 = vmax.f32 %v648_v53, 0.0 }
 0x144   : > { %v6199_v6 = vpop.f32.mrf.mxu1  ;;  %v6201_v60 = vcvt.s32.f32 %v983_v62  ;;  %v675_v50 = vmax.f32 %v643_v27, 0.0  ;;  %v597_v49 = vmul.f32 2.0, %v6130_v23  ;;  %v6213_v40 = vsel %vm806_vm9, %v773_v45, 2147483647 }
 0x145   : > { %14409 = vst [vmem:[#allocation32_spill] sm:$0xff] %v6199_v6  ;;  %v650_v54 = vsub.f32 %v6083_v0, %v618_v26  ;;  %v6207_v13 = vcvt.s32.f32 %v871_v17  ;;  %v628_v62 = vsub.f32 %v6001_v24, %v596_v2  ;;  %v598_v27 = vmul.f32 2.0, %v6159_v28  ;;  %v6222_v17 = vpop.f32.mrf.mxu0 }
 0x146   : > { %v6210_v36 = vpop.f32.mrf.mxu1  ;;  %986 = vmin.xlane.f32.xlu0 %v6201_v60  ;;  %v742_v55 = vand.u32 4294967040, %v675_v50  ;;  %vm807_vm10 = vcmp.le.f32.partialorder %v675_v50, %v5997_v22  ;;  %v629_v0 = vsub.f32 %v6004_v25, %v597_v49  ;;  %v599_v26 = vmul.f32 2.0, %v6197_v19  ;;  %14411 = vst [vmem:[#allocation34_spill] sm:$0xff] %v6222_v17 }
 0x147   : > { %14410 = vst [vmem:[#allocation33_spill] sm:$0xff] %v6210_v36  ;;  %874 = vmin.xlane.f32.xlu1 %v6207_v13  ;;  %v620_v53 = vmul.f32 2.0, %v6210_v36  ;;  %v6224_v23 = vmax.f32 %v650_v54, 0.0  ;;  %v660_v2 = vmax.f32 %v628_v62, 0.0  ;;  %v630_v28 = vsub.f32 %v6013_v29, %v598_v27 }
 0x148   : > { %v6226_v45 = vpop.f32.mrf.mxu1  ;;  %v774_v24 = vor.u32 %v742_v55, %v5995_v21  ;;  %v745_v46 = vand.u32 4294967040, %v6195_v18  ;;  %v661_v50 = vmax.f32 %v629_v0, 0.0  ;;  %v631_v25 = vsub.f32 %v6016_v30, %v599_v26 }
 0x149   : > { %14412 = vst [vmem:[#allocation35_spill] sm:$0xff] %v6226_v45  ;;  %v652_v36 = vsub.f32 %v6095_v10, %v620_v53  ;;  %v727_v54 = vand.u32 4294967040, %v660_v2  ;;  %v662_v5 = vmax.f32 %v630_v28, 0.0  ;;  %v613_v55 = vmul.f32 2.0, %v6110_v47  ;;  %v6243_v10 = vpop.f32.mrf.mxu0 }
 0x14a   : > { %v6234_v19 = vsel %vm807_vm10, %v774_v24, 2147483647  ;;  %v6238_v20 = vpop.f32.mrf.mxu1  ;;  %v728_v29 = vand.u32 4294967040, %v661_v50  ;;  %14414 = vst [vmem:[#allocation37_spill] sm:$0xff] %v6243_v10  ;;  %vm792_vm12 = vcmp.le.f32.partialorder %v660_v2, %v5997_v22  ;;  %vm793_vm13 = vcmp.le.f32.partialorder %v661_v50, %v5997_v22 }
 0x14b   : > { %v6236_v59 = vmax.f32 %v652_v36, 0.0  ;;  %14413 = vst [vmem:[#allocation36_spill] sm:$0xff] %v6238_v20  ;;  %vm996_vm11 = vcmp.lt.s32.totalorder %v6213_v40, %v6234_v19  ;;  %v759_v28 = vor.u32 %v727_v54, %v5989_v16  ;;  %v663_v36 = vmax.f32 %v631_v25, 0.0 }
 0x14c   : > { %v6248_v62 = vsel %vm996_vm11, %v6213_v40, %v6234_v19  ;;  %v760_v53 = vor.u32 %v728_v29, %v5995_v21  ;;  %v729_v0 = vand.u32 4294967040, %v662_v5  ;;  %v6257_v24 = vmul.f32 2.0, %v6238_v20  ;;  %v6266_v29 = vpop.f32.mrf.mxu0 }
 0x14d   : > { %v999_v27 = vshra.s32 %v6248_v62, 16  ;;  %v730_v30 = vand.u32 4294967040, %v663_v36  ;;  %v6261_v47 = vsel %vm792_vm12, %v759_v28, 2147483647  ;;  %14416 = vst [vmem:[#allocation39_spill] sm:$0xff] %v6266_v29  ;;  %vm794_vm15 = vcmp.le.f32.partialorder %v662_v5, %v5997_v22 }
 0x14e   : > { %v6263_v25 = vsel %vm793_vm13, %v760_v53, 2147483647  ;;  %v761_v54 = vor.u32 %v729_v0, %v5989_v16  ;;  %v645_v50 = vsub.f32 %v6062_v52, %v613_v55  ;;  %vm795_vm0 = vcmp.le.f32.partialorder %v663_v36, %v5997_v22 }
 0x14f   : > { %v6259_v49 = vcvt.s32.f32 %v999_v27  ;;  %14415 = vst [vmem:[#allocation38_spill] sm:$0xff] %v6263_v25  ;;  %vm884_vm14 = vcmp.lt.s32.totalorder %v6261_v47, %v6263_v25  ;;  %v762_v2 = vor.u32 %v730_v30, %v5995_v21  ;;  %v14417_v27 = vand.u32 4294967040, %v6138_v43 }
 0x150   : > { %v6276_v28 = vsel %vm884_vm14, %v6261_v47, %v6263_v25  ;;  %vm808_vm1 = vcmp.le.f32.partialorder %v6138_v43, %v5997_v22  ;;  %v6285_v5 = vsel %vm794_vm15, %v761_v54, 2147483647  ;;  %v677_v55 = vmax.f32 %v645_v50, 0.0 }
 0x151   : > { %1002 = vmin.xlane.f32.xlu1 %v6259_v49  ;;  %v775_v53 = vor.u32 %v14417_v27, %v5989_v16  ;;  %v887_v30 = vshra.s32 %v6276_v28, 16  ;;  %14418 = vst [vmem:[#allocation40_spill] sm:$0xff] %v6285_v5  ;;  %v6287_v52 = vsel %vm795_vm0, %v762_v2, 2147483647  ;;  %v615_v36 = vmul.f32 2.0, %v6132_v4  ;;  %v6295_v27 = vpop.f32.mrf.mxu0 }
 0x152   : > { %14419 = vst [vmem:[#allocation41_spill] sm:$0xff] %v6287_v52  ;;  %vm900_vm2 = vcmp.lt.s32.totalorder %v6285_v5, %v6287_v52  ;;  %v777_v26 = vor.u32 %v745_v46, %v5989_v16  ;;  %14420 = vst [vmem:[#allocation42_spill] sm:$0xff] %v6295_v27  ;;  %v744_v54 = vand.u32 4294967040, %v677_v55  ;;  %vm809_vm3 = vcmp.le.f32.partialorder %v677_v55, %v5997_v22 }
 0x153   : > { %v6291_v0 = vsel %vm808_vm1, %v775_v53, 2147483647  ;;  %v6297_v20 = vcvt.s32.f32 %v887_v30  ;;  %v6301_v43 = vsel %vm900_vm2, %v6285_v5, %v6287_v52  ;;  %v647_v50 = vsub.f32 %v6074_v61, %v615_v36 }
 0x154   : > { %v903_v2 = vshra.s32 %v6301_v43, 16  ;;  %vm810_vm4 = vcmp.le.f32.partialorder %v6195_v18, %v5997_v22  ;;  %v600_v46 = vmul.f32 2.0, %v6222_v17  ;;  %v776_v53 = vor.u32 %v744_v54, %v5995_v21  ;;  %v6319_v18 = vpop.f32.mrf.mxu0 }
 0x155   : > { %890 = vmin.xlane.f32.xlu0 %v6297_v20  ;;  %v6311_v30 = vsel %vm810_vm4, %v777_v26, 2147483647  ;;  %v601_v4 = vmul.f32 2.0, %v6243_v10  ;;  %v602_v52 = vmul.f32 2.0, %v6266_v29  ;;  %v679_v5 = vmax.f32 %v647_v50, 0.0  ;;  %14422 = vst [vmem:[#allocation44_spill] sm:$0xff] %v6319_v18 }
 0x156   : > { %14421 = vst [vmem:[#allocation43_spill] sm:$0xff] %v6311_v30  ;;  %v6315_v55 = vcvt.s32.f32 %v903_v2  ;;  %v632_v61 = vsub.f32 %v6019_v31, %v600_v46  ;;  %v603_v36 = vmul.f32 2.0, %v6295_v27  ;;  %v6321_v17 = vsel %vm809_vm3, %v776_v53, 2147483647 }
 0x157   : > { %v633_v25 = vsub.f32 %v6022_v32, %v601_v4  ;;  %v634_v26 = vsub.f32 %v6025_v33, %v602_v52  ;;  %v617_v54 = vmul.f32 2.0, %v6161_v1  ;;  %vm1012_vm5 = vcmp.lt.s32.totalorder %v6291_v0, %v6321_v17  ;;  %v6338_v1 = vpop.f32.mrf.mxu0 }
 0x158   : > { %906 = vmin.xlane.f32.xlu1 %v6315_v55  ;;  %v746_v2 = vand.u32 4294967040, %v679_v5  ;;  %vm811_vm6 = vcmp.le.f32.partialorder %v679_v5, %v5997_v22  ;;  %v664_v31 = vmax.f32 %v632_v61, 0.0  ;;  %v6332_v50 = vsel %vm1012_vm5, %v6291_v0, %v6321_v17  ;;  %14423 = vst [vmem:[#allocation45_spill] sm:$0xff] %v6338_v1 }
 0x159   : > { %v665_v46 = vmax.f32 %v633_v25, 0.0  ;;  %v635_v32 = vsub.f32 %v6028_v34, %v603_v36  ;;  %v666_v4 = vmax.f32 %v634_v26, 0.0  ;;  %v1015_v33 = vshra.s32 %v6332_v50, 16 }
 0x15a   : > { %v778_v52 = vor.u32 %v746_v2, %v5995_v21  ;;  %v731_v53 = vand.u32 4294967040, %v664_v31  ;;  %vm796_vm7 = vcmp.le.f32.partialorder %v664_v31, %v5997_v22  ;;  %vm812_vm13 = vcmp.le.f32.partialorder %v6204_v35, %v5997_v22 }
 0x15b   : > { %v732_v27 = vand.u32 4294967040, %v665_v46  ;;  %vm797_vm8 = vcmp.le.f32.partialorder %v665_v46, %v5997_v22  ;;  %v667_v61 = vmax.f32 %v635_v32, 0.0  ;;  %v733_v29 = vand.u32 4294967040, %v666_v4 }
 0x15c   : > { %v6341_v10 = vcvt.s32.f32 %v1015_v33  ;;  %v6345_v34 = vsel %vm811_vm6, %v778_v52, 2147483647  ;;  %v763_v25 = vor.u32 %v731_v53, %v5989_v16  ;;  %vm798_vm9 = vcmp.le.f32.partialorder %v666_v4, %v5997_v22  ;;  %v6364_v33 = vpop.f32.mrf.mxu0 }
 0x15d   : > { %14424 = vst [vmem:[#allocation46_spill] sm:$0xff] %v6345_v34  ;;  %vm1028_vm10 = vcmp.lt.s32.totalorder %v6311_v30, %v6345_v34  ;;  %v764_v36 = vor.u32 %v732_v27, %v5995_v21  ;;  %v734_v26 = vand.u32 4294967040, %v667_v61  ;;  %v765_v2 = vor.u32 %v733_v29, %v5989_v16  ;;  %14426 = vst [vmem:[#allocation48_spill] sm:$0xff] %v6364_v33 }
 0x15e   : > { %1018 = vmin.xlane.f32.xlu0 %v6341_v10  ;;  %v6356_v32 = vsel %vm1028_vm10, %v6311_v30, %v6345_v34  ;;  %v6360_v5 = vsel %vm796_vm7, %v763_v25, 2147483647  ;;  %vm799_vm11 = vcmp.le.f32.partialorder %v667_v61, %v5997_v22  ;;  %v649_v4 = vsub.f32 %v6080_v63, %v617_v54 }
 0x15f   : > { %14425 = vst [vmem:[#allocation47_spill] sm:$0xff] %v6360_v5  ;;  %v1031_v27 = vshra.s32 %v6356_v32, 16  ;;  %v6369_v29 = vsel %vm797_vm8, %v764_v36, 2147483647  ;;  %v766_v52 = vor.u32 %v734_v26, %v5995_v21  ;;  %v6372_v53 = vsel %vm798_vm9, %v765_v2, 2147483647 }
 0x160   : > { %14427 = vst [vmem:[#allocation49_spill] sm:$0xff] %v6369_v29  ;;  %14428 = vst [vmem:[#allocation50_spill] sm:$0xff] %v6372_v53  ;;  %vm916_vm12 = vcmp.lt.s32.totalorder %v6360_v5, %v6369_v29  ;;  %v681_v31 = vmax.f32 %v649_v4, 0.0  ;;  %v14429_v61 = vand.u32 4294967040, %v6204_v35  ;;  %v619_v36 = vmul.f32 2.0, %v6199_v6  ;;  %v6395_v35 = vpop.f32.mrf.mxu0 }
 0x161   : > { %v6381_v54 = vcvt.s32.f32 %v1031_v27  ;;  %v6385_v46 = vsel %vm916_vm12, %v6360_v5, %v6369_v29  ;;  %v6387_v25 = vsel %vm799_vm11, %v766_v52, 2147483647  ;;  %v654_v26 = vsub.f32 %v6114_v57, %v6257_v24  ;;  %14431 = vst [vmem:[#allocation52_spill] sm:$0xff] %v6395_v35 }
 0x162   : > { %v779_v63 = vor.u32 %v14429_v61, %v5989_v16  ;;  %14430 = vst [vmem:[#allocation51_spill] sm:$0xff] %v6387_v25  ;;  %v919_v2 = vshra.s32 %v6385_v46, 16  ;;  %vm932_vm14 = vcmp.lt.s32.totalorder %v6372_v53, %v6387_v25  ;;  %v748_v4 = vand.u32 4294967040, %v681_v31 }
 0x163   : > { %1034 = vmin.xlane.f32.xlu1 %v6381_v54  ;;  %v6400_v27 = vsel %vm932_vm14, %v6372_v53, %v6387_v25  ;;  %vm813_vm15 = vcmp.le.f32.partialorder %v681_v31, %v5997_v22  ;;  %v651_v57 = vsub.f32 %v6091_v7, %v619_v36  ;;  %v14433_v29 = vand.u32 4294967040, %v6224_v23 }
 0x164   : > { %v6403_v52 = vsel %vm812_vm13, %v779_v63, 2147483647  ;;  %v6406_v24 = vcvt.s32.f32 %v919_v2  ;;  %v935_v61 = vshra.s32 %v6400_v27, 16  ;;  %v780_v6 = vor.u32 %v748_v4, %v5995_v21 }
 0x165   : > { %14432 = vst [vmem:[#allocation53_spill] sm:$0xff] %v6403_v52  ;;  %v781_v5 = vor.u32 %v14433_v29, %v5989_v16  ;;  %v683_v34 = vmax.f32 %v651_v57, 0.0  ;;  %vm814_vm0 = vcmp.le.f32.partialorder %v6224_v23, %v5997_v22  ;;  %v604_v31 = vmul.f32 2.0, %v6319_v18 }
 0x166   : > { %v605_v63 = vmul.f32 2.0, %v6338_v1  ;;  %922 = vmin.xlane.f32.xlu0 %v6406_v24  ;;  %v6418_v7 = vcvt.s32.f32 %v935_v61  ;;  %v6420_v36 = vsel %vm813_vm15, %v780_v6, 2147483647  ;;  %v606_v2 = vmul.f32 2.0, %v6364_v33 }
 0x167   : > { %14434 = vst [vmem:[#allocation54_spill] sm:$0xff] %v6420_v36  ;;  %v607_v4 = vmul.f32 2.0, %v6395_v35  ;;  %vm1044_vm1 = vcmp.lt.s32.totalorder %v6403_v52, %v6420_v36  ;;  %v750_v29 = vand.u32 4294967040, %v683_v34  ;;  %vm815_vm2 = vcmp.le.f32.partialorder %v683_v34, %v5997_v22 }
 0x168   : > { %v636_v57 = vsub.f32 %v6032_v37, %v604_v31  ;;  %938 = vmin.xlane.f32.xlu1 %v6418_v7  ;;  %v6431_v61 = vsel %vm1044_vm1, %v6403_v52, %v6420_v36  ;;  %v637_v6 = vsub.f32 %v6035_v38, %v605_v63  ;;  %v638_v33 = vsub.f32 %v6042_v41, %v606_v2 }
 0x169   : > { %v639_v35 = vsub.f32 %v6045_v42, %v607_v4  ;;  %v1047_v1 = vshra.s32 %v6431_v61, 16  ;;  %v782_v18 = vor.u32 %v750_v29, %v5995_v21  ;;  %v6441_v37 = vsel %vm814_vm0, %v781_v5, 2147483647 }
 0x16a   : > { %v668_v31 = vmax.f32 %v636_v57, 0.0  ;;  %v686_v25 = vmax.f32 %v654_v26, 0.0  ;;  %v669_v53 = vmax.f32 %v637_v6, 0.0  ;;  %v670_v36 = vmax.f32 %v638_v33, 0.0  ;;  %v6462_v33 = vpop.f32.mrf.mxu1 }
 0x16b   : > { %v671_v52 = vmax.f32 %v639_v35, 0.0  ;;  %v6443_v30 = vcvt.s32.f32 %v1047_v1  ;;  %v6447_v38 = vsel %vm815_vm2, %v782_v18, 2147483647  ;;  %v621_v42 = vmul.f32 2.0, %v6226_v45  ;;  %14436 = vst [vmem:[#allocation55_spill] sm:$0xff] %v6462_v33 }
 0x16c   : > { %v735_v41 = vand.u32 4294967040, %v668_v31  ;;  %vm1060_vm3 = vcmp.lt.s32.totalorder %v6441_v37, %v6447_v38  ;;  %v736_v23 = vand.u32 4294967040, %v669_v53  ;;  %v737_v5 = vand.u32 4294967040, %v670_v36 }
 0x16d   : > { %v14435_v26 = vand.u32 4294967040, %v6236_v59  ;;  %1050 = vmin.xlane.f32.xlu0 %v6443_v30  ;;  %v6458_v1 = vsel %vm1060_vm3, %v6441_v37, %v6447_v38  ;;  %vm800_vm4 = vcmp.le.f32.partialorder %v668_v31, %v5997_v22  ;;  %v738_v34 = vand.u32 4294967040, %v671_v52 }
 0x16e   : > { %v767_v18 = vor.u32 %v735_v41, %v5989_v16  ;;  %v1063_v35 = vshra.s32 %v6458_v1, 16  ;;  %v768_v2 = vor.u32 %v736_v23, %v5995_v21  ;;  %vm801_vm5 = vcmp.le.f32.partialorder %v669_v53, %v5997_v22 }
 0x16f   : > { %v783_v63 = vor.u32 %v14435_v26, %v5989_v16  ;;  %v769_v4 = vor.u32 %v737_v5, %v5989_v16  ;;  %v770_v29 = vor.u32 %v738_v34, %v5995_v21  ;;  %vm802_vm6 = vcmp.le.f32.partialorder %v670_v36, %v5997_v22 }
 0x170   : > { %vm803_vm7 = vcmp.le.f32.partialorder %v671_v52, %v5997_v22  ;;  %v653_v57 = vsub.f32 %v6098_v14, %v621_v42  ;;  %v6472_v6 = vcvt.s32.f32 %v1063_v35  ;;  %v6474_v31 = vsel %vm800_vm4, %v767_v18, 2147483647 }
 0x171   : > { %v6476_v41 = vsel %vm801_vm5, %v768_v2, 2147483647  ;;  %v6478_v26 = vsel %vm802_vm6, %v769_v4, 2147483647  ;;  %v6482_v53 = vsel %vm803_vm7, %v770_v29, 2147483647  ;;  %vm816_vm10 = vcmp.le.f32.partialorder %v6236_v59, %v5997_v22 }
 0x172   : > { %vm948_vm8 = vcmp.lt.s32.totalorder %v6474_v31, %v6476_v41  ;;  %v685_v23 = vmax.f32 %v653_v57, 0.0  ;;  %v623_v36 = vmul.f32 2.0, %v6462_v33  ;;  %v753_v5 = vand.u32 4294967040, %v686_v25  ;;  %1066 = vmin.xlane.f32.xlu1 %v6472_v6 }
 0x173   : > { %v6488_v14 = vsel %vm948_vm8, %v6474_v31, %v6476_v41  ;;  %vm964_vm9 = vcmp.lt.s32.totalorder %v6478_v26, %v6482_v53  ;;  %v6505_v29 = vsel %vm816_vm10, %v783_v63, 2147483647  ;;  %vm818_vm12 = vcmp.le.f32.partialorder %v686_v25, %v5997_v22 }
 0x174   : > { %v951_v52 = vshra.s32 %v6488_v14, 16  ;;  %v6497_v42 = vsel %vm964_vm9, %v6478_v26, %v6482_v53  ;;  %v752_v18 = vand.u32 4294967040, %v685_v23  ;;  %vm817_vm11 = vcmp.le.f32.partialorder %v685_v23, %v5997_v22 }
 0x175   : > { %v967_v34 = vshra.s32 %v6497_v42, 16  ;;  %v655_v35 = vsub.f32 %v6178_v51, %v623_v36  ;;  %v785_v33 = vor.u32 %v753_v5, %v5989_v16 }
 0x176   : > { %v6502_v2 = vcvt.s32.f32 %v951_v52  ;;  %v784_v4 = vor.u32 %v752_v18, %v5995_v21 }
 0x177   : > { %v6507_v59 = vcvt.s32.f32 %v967_v34  ;;  %v687_v57 = vmax.f32 %v655_v35, 0.0  ;;  %v6524_v5 = vsel %vm818_vm12, %v785_v33, 2147483647 }
 0x178   : > { %954 = vmin.xlane.f32.xlu0 %v6502_v2  ;;  %v6511_v45 = vsel %vm817_vm11, %v784_v4, 2147483647  ;;  %v982_v4 = vand.u32 65535, %v6175_v11 }
 0x179   : > { %970 = vmin.xlane.f32.xlu1 %v6507_v59  ;;  %vm1076_vm13 = vcmp.lt.s32.totalorder %v6505_v29, %v6511_v45  ;;  %v754_v51 = vand.u32 4294967040, %v687_v57  ;;  %vm819_vm14 = vcmp.le.f32.partialorder %v687_v57, %v5997_v22  ;;  %v870_v57 = vand.u32 65535, %v6185_v12 }
 0x17a   : > { %v6519_v63 = vsel %vm1076_vm13, %v6505_v29, %v6511_v45 }
 0x17b   : > { %v1079_v23 = vshra.s32 %v6519_v63, 16  ;;  %v786_v36 = vor.u32 %v754_v51, %v5995_v21  ;;  %v854_v21 = vand.u32 65535, %v6142_v44  ;;  %v872_v16 = vcvt.s32.f32 %v870_v57 }
 0x17d   : > { %v6526_v52 = vcvt.s32.f32 %v1079_v23  ;;  %v6528_v25 = vsel %vm819_vm14, %v786_v36, 2147483647  ;;  %v856_v35 = vcvt.s32.f32 %v854_v21  ;;  %v984_v36 = vcvt.s32.f32 %v982_v4 }
 0x17e   : > { %vm1092_vm15 = vcmp.lt.s32.totalorder %v6524_v5, %v6528_v25 }
 0x17f   : > { %1082 = vmin.xlane.f32.xlu0 %v6526_v52  ;;  %v6535_v18 = vsel %vm1092_vm15, %v6524_v5, %v6528_v25 }
 0x180   : > { %v1095_v22 = vshra.s32 %v6535_v18, 16 }
 0x182   : > { %v6538_v34 = vcvt.s32.f32 %v1095_v22 }
 0x184   : > { %1098 = vmin.xlane.f32.xlu1 %v6538_v34 }
 0x1cb   : > { %v6542_v33 = vpop.xlane.xlu0 %858 }
 0x1cc   : > { %vm860_vm0 = vcmp.eq.f32.partialorder %v6163_v3, %v6542_v33  ;;  %v998_v3 = vand.u32 65535, %v6248_v62 }
 0x1cd   : > { %v861_v51 = vsel %vm860_vm0, %v856_v35, inf  ;;  %v886_v35 = vand.u32 65535, %v6276_v28  ;;  %v1014_v28 = vand.u32 65535, %v6332_v50 }
 0x1ce   : > { %862 = vmin.xlane.f32.xlu0 %v861_v51  ;;  %v1000_v21 = vcvt.s32.f32 %v998_v3 }
 0x1cf   : > { %v6548_v23 = vpop.xlane.xlu0 %986 }
 0x1d0   : > { %v6550_v22 = vpop.xlane.xlu1 %874  ;;  %vm988_vm1 = vcmp.eq.f32.partialorder %v6201_v60, %v6548_v23  ;;  %v902_v60 = vand.u32 65535, %v6301_v43  ;;  %v1016_v43 = vcvt.s32.f32 %v1014_v28  ;;  %v966_v28 = vand.u32 65535, %v6497_v42 }
 0x1d1   : > { %vm876_vm2 = vcmp.eq.f32.partialorder %v6207_v13, %v6550_v22  ;;  %v989_v44 = vsel %vm988_vm1, %v984_v36, inf  ;;  %v888_v13 = vcvt.s32.f32 %v886_v35 }
 0x1d2   : > { %v877_v11 = vsel %vm876_vm2, %v872_v16, inf  ;;  %990 = vmin.xlane.f32.xlu0 %v989_v44  ;;  %v904_v51 = vcvt.s32.f32 %v902_v60 }
 0x1d3   : > { %878 = vmin.xlane.f32.xlu1 %v877_v11  ;;  %v918_v11 = vand.u32 65535, %v6385_v46 }
 0x1da   : > { %v6557_v12 = vpop.xlane.xlu1 %1002 }
 0x1db   : > { %vm1004_vm3 = vcmp.eq.f32.partialorder %v6259_v49, %v6557_v12 }
 0x1dc   : > { %v1005_v4 = vsel %vm1004_vm3, %v1000_v21, inf }
 0x1dd   : > { %1006 = vmin.xlane.f32.xlu1 %v1005_v4  ;;  %v920_v4 = vcvt.s32.f32 %v918_v11 }
 0x1de   : > { %v6563_v57 = vpop.xlane.xlu0 %890 }
 0x1df   : > { %vm892_vm4 = vcmp.eq.f32.partialorder %v6297_v20, %v6563_v57  ;;  %v1030_v20 = vand.u32 65535, %v6356_v32 }
 0x1e0   : > { %v893_v16 = vsel %vm892_vm4, %v888_v13, inf }
 0x1e1   : > { %894 = vmin.xlane.f32.xlu0 %v893_v16  ;;  %v6567_v62 = vpop.xlane.xlu1 %906  ;;  %v1032_v21 = vcvt.s32.f32 %v1030_v20 }
 0x1e2   : > { %vm908_vm5 = vcmp.eq.f32.partialorder %v6315_v55, %v6567_v62  ;;  %v934_v55 = vand.u32 65535, %v6400_v27 }
 0x1e3   : > { %v909_v49 = vsel %vm908_vm5, %v904_v51, inf }
 0x1e4   : > { %910 = vmin.xlane.f32.xlu1 %v909_v49  ;;  %v936_v46 = vcvt.s32.f32 %v934_v55 }
 0x1e7   : > { %v6572_v36 = vpop.xlane.xlu0 %1018 }
 0x1e8   : > { %vm1020_vm6 = vcmp.eq.f32.partialorder %v6341_v10, %v6572_v36 }
 0x1e9   : > { %v1021_v44 = vsel %vm1020_vm6, %v1016_v43, inf }
 0x1ea   : > { %1022 = vmin.xlane.f32.xlu0 %v1021_v44 }
 0x1ec   : > { %v6578_v3 = vpop.xlane.xlu1 %1034 }
 0x1ed   : > { %vm1036_vm7 = vcmp.eq.f32.partialorder %v6381_v54, %v6578_v3  ;;  %v1046_v54 = vand.u32 65535, %v6431_v61 }
 0x1ee   : > { %v1037_v50 = vsel %vm1036_vm7, %v1032_v21, inf }
 0x1ef   : > { %v6583_v35 = vpop.xlane.xlu0 %922  ;;  %1038 = vmin.xlane.f32.xlu1 %v1037_v50  ;;  %v1048_v13 = vcvt.s32.f32 %v1046_v54 }
 0x1f0   : > { %vm924_vm8 = vcmp.eq.f32.partialorder %v6406_v24, %v6583_v35  ;;  %v1062_v24 = vand.u32 65535, %v6458_v1  ;;  %v968_v1 = vcvt.s32.f32 %v966_v28 }
 0x1f1   : > { %v925_v10 = vsel %vm924_vm8, %v920_v4, inf  ;;  %v6587_v32 = vpop.xlane.xlu1 %938  ;;  %v993_v4 = vcvt.f32.s32 %v6548_v23 }
 0x1f2   : > { %926 = vmin.xlane.f32.xlu0 %v925_v10  ;;  %vm940_vm9 = vcmp.eq.f32.partialorder %v6418_v7, %v6587_v32  ;;  %v1064_v49 = vcvt.s32.f32 %v1062_v24  ;;  %v950_v7 = vand.u32 65535, %v6488_v14  ;;  %v1078_v14 = vand.u32 65535, %v6519_v63 }
 0x1f3   : > { %v941_v60 = vsel %vm940_vm9, %v936_v46, inf  ;;  %v865_v63 = vcvt.f32.s32 %v6542_v33 }
 0x1f4   : > { %942 = vmin.xlane.f32.xlu1 %v941_v60  ;;  %v952_v20 = vcvt.s32.f32 %v950_v7  ;;  %v1080_v11 = vcvt.s32.f32 %v1078_v14  ;;  %v994_v60 = vshll.u32 %v993_v4, 16 }
 0x1f5   : > { %v866_v46 = vshll.u32 %v865_v63, 16  ;;  %v14442_v63 = vld [vmem:[#allocation18_spill] sm:$0xff] }
 0x1f6   : > { %v6592_v27 = vpop.xlane.xlu0 %1050 }
 0x1f7   : > { %vm1052_vm10 = vcmp.eq.f32.partialorder %v6443_v30, %v6592_v27 }
 0x1f8   : > { %v1053_v16 = vsel %vm1052_vm10, %v1048_v13, inf }
 0x1f9   : > { %1054 = vmin.xlane.f32.xlu0 %v1053_v16 }
 0x1fb   : > { %v6597_v51 = vpop.xlane.xlu1 %1066 }
 0x1fc   : > { %vm1068_vm11 = vcmp.eq.f32.partialorder %v6472_v6, %v6597_v51 }
 0x1fd   : > { %v1069_v61 = vsel %vm1068_vm11, %v1064_v49, inf }
 0x1fe   : > { %1070 = vmin.xlane.f32.xlu1 %v1069_v61 }
 0x201   : > { %v6603_v43 = vpop.xlane.xlu0 %954 }
 0x202   : > { %vm956_vm12 = vcmp.eq.f32.partialorder %v6502_v2, %v6603_v43  ;;  %v6607_v30 = vpop.xlane.xlu1 %970  ;;  %v1094_v2 = vand.u32 65535, %v6535_v18 }
 0x203   : > { %v957_v44 = vsel %vm956_vm12, %v952_v20, inf  ;;  %vm972_vm13 = vcmp.eq.f32.partialorder %v6507_v59, %v6607_v30 }
 0x204   : > { %958 = vmin.xlane.f32.xlu0 %v957_v44  ;;  %v973_v6 = vsel %vm972_vm13, %v968_v1, inf  ;;  %v1096_v50 = vcvt.s32.f32 %v1094_v2  ;;  %v1009_v1 = vcvt.f32.s32 %v6557_v12  ;;  %v14438_v44 = vld [vmem:[#allocation29_spill] sm:$0xff] }
 0x205   : > { %974 = vmin.xlane.f32.xlu1 %v973_v6 }
 0x208   : > { %v6612_v42 = vpop.xlane.xlu0 %1082 }
 0x209   : > { %vm1084_vm14 = vcmp.eq.f32.partialorder %v6526_v52, %v6612_v42  ;;  %v881_v52 = vcvt.f32.s32 %v6550_v22 }
 0x20a   : > { %v1085_v21 = vsel %vm1084_vm14, %v1080_v11, inf }
 0x20b   : > { %1086 = vmin.xlane.f32.xlu0 %v1085_v21  ;;  %v882_v24 = vshll.u32 %v881_v52, 16  ;;  %v14441_v21 = vld [vmem:[#allocation16_spill] sm:$0xff]  ;;  %v14443_v52 = vld [vmem:[#allocation13_spill] sm:$0xff] }
 0x20d   : > { %v6617_v55 = vpop.xlane.xlu1 %1098 }
 0x20e   : > { %vm1100_vm15 = vcmp.eq.f32.partialorder %v6538_v34, %v6617_v55 }
 0x20f   : > { %v1101_v59 = vsel %vm1100_vm15, %v1096_v50, inf }
 0x210   : > { %1102 = vmin.xlane.f32.xlu1 %v1101_v59 }
 0x257   : > { %v863_v10 = vpop.xlane.xlu0 %862 }
 0x258   : > { %v864_v54 = vcvt.f32.s32 %v863_v10 }
 0x25a   : > { %v6624_v18 = vadd.s32 %v866_v46, %v864_v54 }
 0x25b   : > { %v991_v13 = vpop.xlane.xlu0 %990 }
 0x25c   : > { %v879_v16 = vpop.xlane.xlu1 %878  ;;  %v992_v49 = vcvt.f32.s32 %v991_v13  ;;  %vm1108_vm0 = vcmp.eq.s32.totalorder %v6123_v8, %v6624_v18  ;;  %vm1109_vm1 = vcmp.eq.s32.totalorder %v6126_v15, %v6624_v18 }
 0x25d   : > { %v880_v34 = vcvt.f32.s32 %v879_v16  ;;  %v6631_v33 = vsel %vm1108_vm0, 2147483647, %v6123_v8  ;;  %v6634_v23 = vsel %vm1109_vm1, 2147483647, %v6126_v15  ;;  %v1140_v22 = vsel %vm1108_vm0, %v6037_v39, 0.0  ;;  %v14445_v16 = vld [vmem:[#allocation15_spill] sm:$0xff] }
 0x25e   : > { %v6637_v7 = vadd.s32 %v994_v60, %v992_v49  ;;  %vm1285_vm2 = vcmp.lt.s32.totalorder %v6631_v33, %v6634_v23  ;;  %v1141_v61 = vsel %vm1109_vm1, %v6051_v48, 0.0  ;;  %v1010_v60 = vshll.u32 %v1009_v1, 16 }
 0x25f   : > { %v6642_v28 = vadd.s32 %v882_v24, %v880_v34  ;;  %v6646_v20 = vsel %vm1285_vm2, %v6631_v33, %v6634_v23  ;;  %v6648_v8 = vadd.f32 %v1141_v61, %v1140_v22  ;;  %v897_v34 = vcvt.f32.s32 %v6563_v57 }
 0x260   : > { %v1288_v15 = vshra.s32 %v6646_v20, 16  ;;  %vm1124_vm3 = vcmp.eq.s32.totalorder %v6155_v58, %v6637_v7  ;;  %vm1125_vm4 = vcmp.eq.s32.totalorder %v6157_v9, %v6637_v7 }
 0x261   : > { %14437 = vst [vmem:[#allocation56_spill] sm:$0xff] %v6648_v8  ;;  %vm1110_vm5 = vcmp.eq.s32.totalorder %v6150_v56, %v6642_v28  ;;  %vm1111_vm6 = vcmp.eq.s32.totalorder %v14438_v44, %v6642_v28  ;;  %v6664_v6 = vsel %vm1124_vm3, 2147483647, %v6155_v58  ;;  %v6678_v12 = vsel %vm1125_vm4, 2147483647, %v6157_v9 }
 0x262   : > { %14439 = vst [vmem:[#allocation29_spill] sm:$0xff] %v6664_v6  ;;  %v6666_v14 = vcvt.s32.f32 %v1288_v15  ;;  %v6669_v11 = vsel %vm1110_vm5, 2147483647, %v6150_v56  ;;  %v6672_v2 = vsel %vm1111_vm6, 2147483647, %v14438_v44  ;;  %14440 = vst [vmem:[#allocation57_spill] sm:$0xff] %v6678_v12  ;;  %vm1413_vm8 = vcmp.lt.s32.totalorder %v6664_v6, %v6678_v12 }
 0x263   : > { %vm1301_vm7 = vcmp.lt.s32.totalorder %v6669_v11, %v6672_v2  ;;  %v1142_v50 = vsel %vm1110_vm5, %v14441_v21, 0.0  ;;  %v6692_v59 = vsel %vm1413_vm8, %v6664_v6, %v6678_v12  ;;  %v1143_v4 = vsel %vm1111_vm6, %v14442_v63, 0.0 }
 0x264   : > { %1291 = vmin.xlane.f32.xlu0 %v6666_v14  ;;  %v6688_v56 = vsel %vm1301_vm7, %v6669_v11, %v6672_v2  ;;  %v1416_v46 = vshra.s32 %v6692_v59, 16  ;;  %v1156_v54 = vsel %vm1124_vm3, %v14443_v52, 0.0  ;;  %v6701_v24 = vadd.f32 %v1143_v4, %v1142_v50 }
 0x265   : > { %v1304_v10 = vshra.s32 %v6688_v56, 16  ;;  %v1157_v49 = vsel %vm1125_vm4, %v14445_v16, 0.0  ;;  %v898_v1 = vshll.u32 %v897_v34, 16  ;;  %v913_v50 = vcvt.f32.s32 %v6567_v62  ;;  %v14451_v62 = vld [vmem:[#allocation19_spill] sm:$0xff] }
 0x266   : > { %v1007_v13 = vpop.xlane.xlu1 %1006  ;;  %14444 = vst [vmem:[#allocation58_spill] sm:$0xff] %v6701_v24  ;;  %v6710_v15 = vcvt.s32.f32 %v1416_v46  ;;  %v6712_v44 = vadd.f32 %v1157_v49, %v1156_v54  ;;  %v14450_v46 = vld [vmem:[#allocation17_spill] sm:$0xff]  ;;  %v14454_v24 = vld [vmem:[#allocation38_spill] sm:$0xff]  ;;  %v961_v16 = vcvt.f32.s32 %v6603_v43 }
 0x267   : > { %v1008_v22 = vcvt.f32.s32 %v1007_v13  ;;  %v6708_v61 = vcvt.s32.f32 %v1304_v10 }
 0x268   : > { %14446 = vst [vmem:[#allocation59_spill] sm:$0xff] %v6712_v44  ;;  %1419 = vmin.xlane.f32.xlu0 %v6710_v15 }
 0x269   : > { %v6714_v58 = vadd.s32 %v1010_v60, %v1008_v22  ;;  %1307 = vmin.xlane.f32.xlu1 %v6708_v61 }
 0x26a   : > { %v895_v9 = vpop.xlane.xlu0 %894 }
 0x26b   : > { %14447 = vst [vmem:[#allocation60_spill] sm:$0xff] %v6714_v58  ;;  %vm1126_vm9 = vcmp.eq.s32.totalorder %v6213_v40, %v6714_v58  ;;  %vm1127_vm10 = vcmp.eq.s32.totalorder %v6234_v19, %v6714_v58  ;;  %v896_v57 = vcvt.f32.s32 %v895_v9 }
 0x26c   : > { %v6724_v4 = vsel %vm1126_vm9, 2147483647, %v6213_v40  ;;  %v6727_v10 = vsel %vm1127_vm10, 2147483647, %v6234_v19  ;;  %v1158_v54 = vsel %vm1126_vm9, %v14450_v46, 0.0  ;;  %v1159_v60 = vsel %vm1127_vm10, %v14451_v62, 0.0 }
 0x26d   : > { %14448 = vst [vmem:[#allocation61_spill] sm:$0xff] %v6724_v4  ;;  %14449 = vst [vmem:[#allocation62_spill] sm:$0xff] %v6727_v10  ;;  %vm1429_vm11 = vcmp.lt.s32.totalorder %v6724_v4, %v6727_v10  ;;  %v6733_v13 = vadd.s32 %v898_v1, %v896_v57  ;;  %v911_v49 = vpop.xlane.xlu1 %910  ;;  %v6739_v22 = vadd.f32 %v1159_v60, %v1158_v54  ;;  %v914_v40 = vshll.u32 %v913_v50, 16  ;;  %v14459_v60 = vld [vmem:[#allocation24_spill] sm:$0xff]  ;;  %v14466_v46 = vld [vmem:[#allocation31_spill] sm:$0xff] }
 0x26e   : > { %v6737_v34 = vsel %vm1429_vm11, %v6724_v4, %v6727_v10  ;;  %v1025_v19 = vcvt.f32.s32 %v6572_v36  ;;  %v912_v9 = vcvt.f32.s32 %v911_v49  ;;  %v14458_v36 = vld [vmem:[#allocation21_spill] sm:$0xff] }
 0x26f   : > { %14452 = vst [vmem:[#allocation63_spill] sm:$0xff] %v6733_v13  ;;  %14453 = vst [vmem:[#allocation64_spill] sm:$0xff] %v6739_v22  ;;  %v1432_v44 = vshra.s32 %v6737_v34, 16  ;;  %vm1112_vm12 = vcmp.eq.s32.totalorder %v6261_v47, %v6733_v13  ;;  %vm1113_vm13 = vcmp.eq.s32.totalorder %v14454_v24, %v6733_v13 }
 0x270   : > { %v6747_v1 = vadd.s32 %v914_v40, %v912_v9  ;;  %v6752_v8 = vsel %vm1112_vm12, 2147483647, %v6261_v47  ;;  %v6755_v50 = vsel %vm1113_vm13, 2147483647, %v14454_v24  ;;  %v1144_v54 = vsel %vm1112_vm12, %v14458_v36, 0.0  ;;  %v14460_v47 = vld [vmem:[#allocation40_spill] sm:$0xff] }
 0x271   : > { %v6749_v57 = vcvt.s32.f32 %v1432_v44  ;;  %14456 = vst [vmem:[#allocation65_spill] sm:$0xff] %v6752_v8  ;;  %14457 = vst [vmem:[#allocation66_spill] sm:$0xff] %v6755_v50  ;;  %vm1317_vm14 = vcmp.lt.s32.totalorder %v6752_v8, %v6755_v50  ;;  %v1145_v49 = vsel %vm1113_vm13, %v14459_v60, 0.0  ;;  %v1026_v22 = vshll.u32 %v1025_v19, 16  ;;  %v14461_v24 = vld [vmem:[#allocation41_spill] sm:$0xff] }
 0x272   : > { %14455 = vst [vmem:[#allocation38_spill] sm:$0xff] %v6747_v1  ;;  %v6764_v44 = vsel %vm1317_vm14, %v6752_v8, %v6755_v50  ;;  %vm1114_vm15 = vcmp.eq.s32.totalorder %v14460_v47, %v6747_v1  ;;  %vm1115_vm0 = vcmp.eq.s32.totalorder %v14461_v24, %v6747_v1  ;;  %v1041_v40 = vcvt.f32.s32 %v6578_v3  ;;  %v14465_v8 = vld [vmem:[#allocation27_spill] sm:$0xff] }
 0x273   : > { %1435 = vmin.xlane.f32.xlu1 %v6749_v57  ;;  %v1023_v9 = vpop.xlane.xlu0 %1022  ;;  %v1320_v36 = vshra.s32 %v6764_v44, 16  ;;  %v6773_v60 = vsel %vm1114_vm15, 2147483647, %v14460_v47  ;;  %v6776_v19 = vsel %vm1115_vm0, 2147483647, %v14461_v24  ;;  %v6780_v50 = vadd.f32 %v1145_v49, %v1144_v54 }
 0x274   : > { %14462 = vst [vmem:[#allocation40_spill] sm:$0xff] %v6773_v60  ;;  %14463 = vst [vmem:[#allocation41_spill] sm:$0xff] %v6776_v19  ;;  %v1024_v13 = vcvt.f32.s32 %v1023_v9  ;;  %vm1333_vm1 = vcmp.lt.s32.totalorder %v6773_v60, %v6776_v19  ;;  %v1146_v62 = vsel %vm1114_vm15, %v14465_v8, 0.0  ;;  %v1147_v47 = vsel %vm1115_vm0, %v14466_v46, 0.0 }
 0x275   : > { %14464 = vst [vmem:[#allocation67_spill] sm:$0xff] %v6780_v50  ;;  %v6783_v1 = vcvt.s32.f32 %v1320_v36  ;;  %v6787_v3 = vsel %vm1333_vm1, %v6773_v60, %v6776_v19  ;;  %v6793_v9 = vadd.f32 %v1147_v47, %v1146_v62  ;;  %v1042_v4 = vshll.u32 %v1041_v40, 16 }
 0x276   : > { %v6790_v10 = vadd.s32 %v1026_v22, %v1024_v13  ;;  %v1336_v24 = vshra.s32 %v6787_v3, 16  ;;  %v929_v54 = vcvt.f32.s32 %v6583_v35  ;;  %v945_v13 = vcvt.f32.s32 %v6587_v32  ;;  %v14471_v35 = vld [vmem:[#allocation20_spill] sm:$0xff] }
 0x277   : > { %14468 = vst [vmem:[#allocation69_spill] sm:$0xff] %v6793_v9  ;;  %1323 = vmin.xlane.f32.xlu0 %v6783_v1  ;;  %v1057_v19 = vcvt.f32.s32 %v6592_v27 }
 0x278   : > { %14467 = vst [vmem:[#allocation68_spill] sm:$0xff] %v6790_v10  ;;  %v1039_v49 = vpop.xlane.xlu1 %1038  ;;  %v6797_v36 = vcvt.s32.f32 %v1336_v24  ;;  %vm1128_vm2 = vcmp.eq.s32.totalorder %v6291_v0, %v6790_v10  ;;  %vm1129_vm3 = vcmp.eq.s32.totalorder %v6321_v17, %v6790_v10  ;;  %v14472_v24 = vld [vmem:[#allocation22_spill] sm:$0xff]  ;;  %v946_v8 = vshll.u32 %v945_v13, 16  ;;  %v14481_v13 = vld [vmem:[#allocation49_spill] sm:$0xff] }
 0x279   : > { %v1040_v22 = vcvt.f32.s32 %v1039_v49  ;;  %v6805_v62 = vsel %vm1128_vm2, 2147483647, %v6291_v0  ;;  %v6808_v40 = vsel %vm1129_vm3, 2147483647, %v6321_v17  ;;  %v1160_v47 = vsel %vm1128_vm2, %v14471_v35, 0.0  ;;  %v14475_v35 = vld [vmem:[#allocation43_spill] sm:$0xff] }
 0x27a   : > { %14469 = vst [vmem:[#allocation70_spill] sm:$0xff] %v6805_v62  ;;  %14470 = vst [vmem:[#allocation71_spill] sm:$0xff] %v6808_v40  ;;  %1339 = vmin.xlane.f32.xlu1 %v6797_v36  ;;  %vm1445_vm4 = vcmp.lt.s32.totalorder %v6805_v62, %v6808_v40  ;;  %v1161_v9 = vsel %vm1129_vm3, %v14472_v24, 0.0  ;;  %v930_v17 = vshll.u32 %v929_v54, 16 }
 0x27b   : > { %v6815_v50 = vadd.s32 %v1042_v4, %v1040_v22  ;;  %v927_v10 = vpop.xlane.xlu0 %926  ;;  %v6819_v32 = vsel %vm1445_vm4, %v6805_v62, %v6808_v40  ;;  %v6821_v0 = vadd.f32 %v1161_v9, %v1160_v47  ;;  %v14476_v4 = vld [vmem:[#allocation46_spill] sm:$0xff]  ;;  %v1073_v9 = vcvt.f32.s32 %v6597_v51 }
 0x27c   : > { %v928_v49 = vcvt.f32.s32 %v927_v10  ;;  %v1448_v46 = vshra.s32 %v6819_v32, 16 }
 0x27d   : > { %14473 = vst [vmem:[#allocation72_spill] sm:$0xff] %v6815_v50  ;;  %14474 = vst [vmem:[#allocation73_spill] sm:$0xff] %v6821_v0  ;;  %v943_v60 = vpop.xlane.xlu1 %942  ;;  %vm1130_vm5 = vcmp.eq.s32.totalorder %v14475_v35, %v6815_v50  ;;  %vm1131_vm6 = vcmp.eq.s32.totalorder %v14476_v4, %v6815_v50 }
 0x27e   : > { %v6829_v22 = vadd.s32 %v930_v17, %v928_v49  ;;  %v944_v24 = vcvt.f32.s32 %v943_v60  ;;  %v6831_v40 = vcvt.s32.f32 %v1448_v46  ;;  %v6837_v10 = vsel %vm1130_vm5, 2147483647, %v14475_v35  ;;  %v14480_v46 = vld [vmem:[#allocation47_spill] sm:$0xff]  ;;  %v14484_v49 = vld [vmem:[#allocation50_spill] sm:$0xff] }
 0x27f   : > { %14478 = vst [vmem:[#allocation46_spill] sm:$0xff] %v6837_v10  ;;  %v6843_v27 = vsel %vm1131_vm6, 2147483647, %v14476_v4  ;;  %v14496_v35 = vld [vmem:[#allocation39_spill] sm:$0xff] }
 0x280   : > { %14477 = vst [vmem:[#allocation43_spill] sm:$0xff] %v6829_v22  ;;  %14479 = vst [vmem:[#allocation74_spill] sm:$0xff] %v6843_v27  ;;  %v6846_v54 = vadd.s32 %v946_v8, %v944_v24  ;;  %1451 = vmin.xlane.f32.xlu0 %v6831_v40  ;;  %vm1461_vm7 = vcmp.lt.s32.totalorder %v6837_v10, %v6843_v27  ;;  %vm1116_vm8 = vcmp.eq.s32.totalorder %v14480_v46, %v6829_v22 }
 0x281   : > { %v6855_v60 = vsel %vm1461_vm7, %v6837_v10, %v6843_v27  ;;  %vm1117_vm9 = vcmp.eq.s32.totalorder %v14481_v13, %v6829_v22  ;;  %v6863_v51 = vsel %vm1116_vm8, 2147483647, %v14480_v46  ;;  %v1058_v8 = vshll.u32 %v1057_v19, 16  ;;  %v14485_v27 = vld [vmem:[#allocation51_spill] sm:$0xff]  ;;  %v14493_v46 = vld [vmem:[#allocation25_spill] sm:$0xff] }
 0x282   : > { %14482 = vst [vmem:[#allocation47_spill] sm:$0xff] %v6863_v51  ;;  %v1055_v47 = vpop.xlane.xlu0 %1054  ;;  %v1464_v24 = vshra.s32 %v6855_v60, 16  ;;  %v6870_v17 = vsel %vm1117_vm9, 2147483647, %v14481_v13  ;;  %vm1118_vm10 = vcmp.eq.s32.totalorder %v14484_v49, %v6846_v54  ;;  %vm1119_vm12 = vcmp.eq.s32.totalorder %v14485_v27, %v6846_v54 }
 0x283   : > { %14483 = vst [vmem:[#allocation49_spill] sm:$0xff] %v6870_v17  ;;  %v1056_v0 = vcvt.f32.s32 %v1055_v47  ;;  %vm1349_vm11 = vcmp.lt.s32.totalorder %v6863_v51, %v6870_v17  ;;  %v6882_v19 = vsel %vm1118_vm10, 2147483647, %v14484_v49  ;;  %v1074_v10 = vshll.u32 %v1073_v9, 16  ;;  %v14499_v49 = vld [vmem:[#allocation42_spill] sm:$0xff] }
 0x284   : > { %14486 = vst [vmem:[#allocation50_spill] sm:$0xff] %v6882_v19  ;;  %v6884_v62 = vcvt.s32.f32 %v1464_v24  ;;  %v6888_v58 = vsel %vm1349_vm11, %v6863_v51, %v6870_v17  ;;  %v6894_v47 = vsel %vm1119_vm12, 2147483647, %v14485_v27  ;;  %v14489_v24 = vld [vmem:[#allocation34_spill] sm:$0xff]  ;;  %v14490_v51 = vld [vmem:[#allocation37_spill] sm:$0xff]  ;;  %v977_v22 = vcvt.f32.s32 %v6607_v30 }
 0x285   : > { %14487 = vst [vmem:[#allocation51_spill] sm:$0xff] %v6894_v47  ;;  %v6897_v52 = vadd.s32 %v1058_v8, %v1056_v0  ;;  %v1352_v63 = vshra.s32 %v6888_v58, 16  ;;  %vm1365_vm13 = vcmp.lt.s32.totalorder %v6882_v19, %v6894_v47  ;;  %v1148_v17 = vsel %vm1116_vm8, %v14489_v24, 0.0  ;;  %v14491_v0 = vld [vmem:[#allocation23_spill] sm:$0xff]  ;;  %v14502_v27 = vld [vmem:[#allocation26_spill] sm:$0xff] }
 0x286   : > { %1467 = vmin.xlane.f32.xlu1 %v6884_v62  ;;  %v6905_v9 = vsel %vm1365_vm13, %v6882_v19, %v6894_v47  ;;  %v1149_v43 = vsel %vm1117_vm9, %v14490_v51, 0.0  ;;  %v1162_v8 = vsel %vm1130_vm5, %v14491_v0, 0.0  ;;  %v14492_v19 = vld [vmem:[#allocation53_spill] sm:$0xff]  ;;  %v1163_v24 = vsel %vm1131_vm6, %v14493_v46, 0.0  ;;  %v14494_v51 = vld [vmem:[#allocation54_spill] sm:$0xff] }
 0x287   : > { %14488 = vst [vmem:[#allocation75_spill] sm:$0xff] %v6897_v52  ;;  %v1071_v21 = vpop.xlane.xlu1 %1070  ;;  %v6919_v12 = vcvt.s32.f32 %v1352_v63  ;;  %v1368_v47 = vshra.s32 %v6905_v9, 16  ;;  %vm1132_vm14 = vcmp.eq.s32.totalorder %v14492_v19, %v6897_v52  ;;  %vm1133_vm15 = vcmp.eq.s32.totalorder %v14494_v51, %v6897_v52  ;;  %v14511_v52 = vld [vmem:[#allocation30_spill] sm:$0xff] }
 0x288   : > { %v1072_v13 = vcvt.f32.s32 %v1071_v21  ;;  %v6934_v63 = vsel %vm1132_vm14, 2147483647, %v14492_v19  ;;  %v1150_v0 = vsel %vm1118_vm10, %v14496_v35, 0.0  ;;  %v6948_v21 = vsel %vm1133_vm15, 2147483647, %v14494_v51 }
 0x289   : > { %14495 = vst [vmem:[#allocation53_spill] sm:$0xff] %v6934_v63  ;;  %1355 = vmin.xlane.f32.xlu0 %v6919_v12  ;;  %v6942_v4 = vcvt.s32.f32 %v1368_v47  ;;  %14497 = vst [vmem:[#allocation54_spill] sm:$0xff] %v6948_v21  ;;  %v6950_v46 = vadd.f32 %v1149_v43, %v1148_v17  ;;  %vm1477_vm0 = vcmp.lt.s32.totalorder %v6934_v63, %v6948_v21  ;;  %v1151_v30 = vsel %vm1119_vm12, %v14499_v49, 0.0 }
 0x28a   : > { %v6952_v50 = vadd.s32 %v1074_v10, %v1072_v13  ;;  %v6960_v47 = vadd.f32 %v1163_v24, %v1162_v8  ;;  %v962_v35 = vshll.u32 %v961_v16, 16  ;;  %v6965_v6 = vsel %vm1477_vm0, %v6934_v63, %v6948_v21 }
 0x28b   : > { %14498 = vst [vmem:[#allocation76_spill] sm:$0xff] %v6950_v46  ;;  %1371 = vmin.xlane.f32.xlu1 %v6942_v4  ;;  %v6967_v17 = vadd.f32 %v1151_v30, %v1150_v0  ;;  %v1480_v43 = vshra.s32 %v6965_v6, 16  ;;  %v1164_v16 = vsel %vm1132_vm14, %v14502_v27, 0.0  ;;  %v978_v24 = vshll.u32 %v977_v22, 16  ;;  %v14505_v22 = vld [vmem:[#allocation28_spill] sm:$0xff] }
 0x28c   : > { %14500 = vst [vmem:[#allocation77_spill] sm:$0xff] %v6960_v47  ;;  %vm1134_vm1 = vcmp.eq.s32.totalorder %v6441_v37, %v6952_v50  ;;  %vm1135_vm2 = vcmp.eq.s32.totalorder %v6447_v38, %v6952_v50  ;;  %v1165_v19 = vsel %vm1133_vm15, %v14505_v22, 0.0 }
 0x28d   : > { %14501 = vst [vmem:[#allocation78_spill] sm:$0xff] %v6967_v17  ;;  %v959_v10 = vpop.xlane.xlu0 %958  ;;  %v6982_v0 = vsel %vm1134_vm1, 2147483647, %v6441_v37  ;;  %v6988_v30 = vsel %vm1135_vm2, 2147483647, %v6447_v38  ;;  %v6990_v17 = vcvt.s32.f32 %v1480_v43  ;;  %v7005_v21 = vadd.f32 %v1165_v19, %v1164_v16 }
 0x28e   : > { %v960_v8 = vcvt.f32.s32 %v959_v10  ;;  %v975_v13 = vpop.xlane.xlu1 %974  ;;  %14503 = vst [vmem:[#allocation79_spill] sm:$0xff] %v6982_v0  ;;  %14504 = vst [vmem:[#allocation80_spill] sm:$0xff] %v6988_v30  ;;  %vm1493_vm3 = vcmp.lt.s32.totalorder %v6982_v0, %v6988_v30  ;;  %v1089_v10 = vcvt.f32.s32 %v6612_v42  ;;  %v1105_v42 = vcvt.f32.s32 %v6617_v55 }
 0x28f   : > { %v976_v47 = vcvt.f32.s32 %v975_v13  ;;  %v7003_v27 = vsel %vm1493_vm3, %v6982_v0, %v6988_v30  ;;  %14506 = vst [vmem:[#allocation81_spill] sm:$0xff] %v7005_v21  ;;  %1483 = vmin.xlane.f32.xlu0 %v6990_v17  ;;  %v14510_v30 = vld [vmem:[#allocation45_spill] sm:$0xff] }
 0x290   : > { %v6999_v46 = vadd.s32 %v962_v35, %v960_v8  ;;  %v1496_v13 = vshra.s32 %v7003_v27, 16  ;;  %v1090_v16 = vshll.u32 %v1089_v10, 16 }
 0x291   : > { %v7007_v43 = vadd.s32 %v978_v24, %v976_v47 }
 0x292   : > { %vm1120_vm4 = vcmp.eq.s32.totalorder %v6474_v31, %v6999_v46  ;;  %vm1121_vm5 = vcmp.eq.s32.totalorder %v6476_v41, %v6999_v46  ;;  %v7016_v51 = vcvt.s32.f32 %v1496_v13 }
 0x293   : > { %v7022_v35 = vsel %vm1120_vm4, 2147483647, %v6474_v31  ;;  %v7028_v47 = vsel %vm1121_vm5, 2147483647, %v6476_v41  ;;  %vm1122_vm7 = vcmp.eq.s32.totalorder %v6478_v26, %v7007_v43  ;;  %vm1123_vm8 = vcmp.eq.s32.totalorder %v6482_v53, %v7007_v43 }
 0x294   : > { %14507 = vst [vmem:[#allocation82_spill] sm:$0xff] %v7022_v35  ;;  %14508 = vst [vmem:[#allocation83_spill] sm:$0xff] %v7028_v47  ;;  %v1087_v24 = vpop.xlane.xlu0 %1086  ;;  %vm1381_vm6 = vcmp.lt.s32.totalorder %v7022_v35, %v7028_v47  ;;  %1499 = vmin.xlane.f32.xlu1 %v7016_v51  ;;  %v7045_v19 = vsel %vm1122_vm7, 2147483647, %v6478_v26  ;;  %v7051_v10 = vsel %vm1123_vm8, 2147483647, %v6482_v53 }
 0x295   : > { %v1088_v55 = vcvt.f32.s32 %v1087_v24  ;;  %v7039_v8 = vsel %vm1381_vm6, %v7022_v35, %v7028_v47  ;;  %vm1397_vm9 = vcmp.lt.s32.totalorder %v7045_v19, %v7051_v10  ;;  %v14509_v24 = vld [vmem:[#allocation44_spill] sm:$0xff]  ;;  %v1106_v47 = vshll.u32 %v1105_v42, 16 }
 0x296   : > { %v1384_v13 = vshra.s32 %v7039_v8, 16  ;;  %v1152_v21 = vsel %vm1120_vm4, %v14509_v24, 0.0  ;;  %v7064_v22 = vsel %vm1397_vm9, %v7045_v19, %v7051_v10  ;;  %v1153_v0 = vsel %vm1121_vm5, %v14510_v30, 0.0  ;;  %v14512_v42 = vld [vmem:[#allocation32_spill] sm:$0xff] }
 0x297   : > { %v7060_v35 = vadd.s32 %v1090_v16, %v1088_v55  ;;  %v1400_v49 = vshra.s32 %v7064_v22, 16  ;;  %v1166_v31 = vsel %vm1134_vm1, %v14511_v52, 0.0  ;;  %v1167_v16 = vsel %vm1135_vm2, %v14512_v42, 0.0  ;;  %v14515_v26 = vld [vmem:[#allocation52_spill] sm:$0xff]  ;;  %v14518_v42 = vld [vmem:[#allocation33_spill] sm:$0xff] }
 0x298   : > { %v7070_v63 = vcvt.s32.f32 %v1384_v13  ;;  %v7085_v41 = vadd.f32 %v1153_v0, %v1152_v21  ;;  %v14514_v13 = vld [vmem:[#allocation48_spill] sm:$0xff]  ;;  %v7112_v0 = vadd.f32 %v1167_v16, %v1166_v31 }
 0x299   : > { %v1103_v55 = vpop.xlane.xlu1 %1102  ;;  %vm1136_vm10 = vcmp.eq.s32.totalorder %v6505_v29, %v7060_v35  ;;  %vm1137_vm11 = vcmp.eq.s32.totalorder %v6511_v45, %v7060_v35  ;;  %v1154_v37 = vsel %vm1122_vm7, %v14514_v13, 0.0  ;;  %v7092_v52 = vcvt.s32.f32 %v1400_v49 }
 0x29a   : > { %14513 = vst [vmem:[#allocation84_spill] sm:$0xff] %v7085_v41  ;;  %v1104_v30 = vcvt.f32.s32 %v1103_v55  ;;  %1387 = vmin.xlane.f32.xlu0 %v7070_v63  ;;  %v7098_v38 = vsel %vm1136_vm10, 2147483647, %v6505_v29  ;;  %v7104_v21 = vsel %vm1137_vm11, 2147483647, %v6511_v45  ;;  %v1155_v49 = vsel %vm1123_vm8, %v14515_v26, 0.0 }
 0x29b   : > { %vm1509_vm12 = vcmp.lt.s32.totalorder %v7098_v38, %v7104_v21  ;;  %14516 = vst [vmem:[#allocation85_spill] sm:$0xff] %v7112_v0  ;;  %1403 = vmin.xlane.f32.xlu1 %v7092_v52  ;;  %v7121_v13 = vadd.f32 %v1155_v49, %v1154_v37  ;;  %v1168_v24 = vsel %vm1136_vm10, %v14518_v42, 0.0  ;;  %v14519_v26 = vld [vmem:[#allocation35_spill] sm:$0xff]  ;;  %v14521_v45 = vld [vmem:[#allocation36_spill] sm:$0xff] }
 0x29c   : > { %v7114_v55 = vadd.s32 %v1106_v47, %v1104_v30  ;;  %v7119_v41 = vsel %vm1509_vm12, %v7098_v38, %v7104_v21  ;;  %v1169_v30 = vsel %vm1137_vm11, %v14519_v26, 0.0  ;;  %v14522_v49 = vld [vmem:[#allocation55_spill] sm:$0xff] }
 0x29d   : > { %14517 = vst [vmem:[#allocation86_spill] sm:$0xff] %v7121_v13  ;;  %v1512_v53 = vshra.s32 %v7119_v41, 16  ;;  %v7136_v47 = vadd.f32 %v1169_v30, %v1168_v24 }
 0x29e   : > { %vm1138_vm13 = vcmp.eq.s32.totalorder %v6524_v5, %v7114_v55  ;;  %vm1139_vm14 = vcmp.eq.s32.totalorder %v6528_v25, %v7114_v55 }
 0x29f   : > { %14520 = vst [vmem:[#allocation87_spill] sm:$0xff] %v7136_v47  ;;  %v7138_v31 = vcvt.s32.f32 %v1512_v53  ;;  %v7141_v29 = vsel %vm1138_vm13, 2147483647, %v6524_v5  ;;  %v7144_v16 = vsel %vm1139_vm14, 2147483647, %v6528_v25  ;;  %v1170_v37 = vsel %vm1138_vm13, %v14521_v45, 0.0 }
 0x2a0   : > { %vm1525_vm15 = vcmp.lt.s32.totalorder %v7141_v29, %v7144_v16  ;;  %v1171_v0 = vsel %vm1139_vm14, %v14522_v49, 0.0  ;;  %v1287_v25 = vand.u32 65535, %v6646_v20  ;;  %v1303_v49 = vand.u32 65535, %v6688_v56 }
 0x2a1   : > { %1515 = vmin.xlane.f32.xlu0 %v7138_v31  ;;  %v7153_v24 = vsel %vm1525_vm15, %v7141_v29, %v7144_v16  ;;  %v7155_v53 = vadd.f32 %v1171_v0, %v1170_v37  ;;  %v1415_v45 = vand.u32 65535, %v6692_v59  ;;  %v1431_v56 = vand.u32 65535, %v6737_v34 }
 0x2a2   : > { %v1528_v5 = vshra.s32 %v7153_v24, 16  ;;  %v1289_v13 = vcvt.s32.f32 %v1287_v25 }
 0x2a3   : > { %14523 = vst [vmem:[#allocation88_spill] sm:$0xff] %v7155_v53  ;;  %v1305_v53 = vcvt.s32.f32 %v1303_v49  ;;  %v1417_v26 = vcvt.s32.f32 %v1415_v45  ;;  %v1319_v45 = vand.u32 65535, %v6764_v44  ;;  %v1447_v44 = vand.u32 65535, %v6819_v32 }
 0x2a4   : > { %v7158_v30 = vcvt.s32.f32 %v1528_v5 }
 0x2a6   : > { %1531 = vmin.xlane.f32.xlu1 %v7158_v30 }
 0x2ed   : > { %v7162_v47 = vpop.xlane.xlu0 %1291 }
 0x2ee   : > { %vm1293_vm0 = vcmp.eq.f32.partialorder %v6666_v14, %v7162_v47 }
 0x2ef   : > { %v1294_v0 = vsel %vm1293_vm0, %v1289_v13, inf  ;;  %v1433_v13 = vcvt.s32.f32 %v1431_v56 }
 0x2f0   : > { %1295 = vmin.xlane.f32.xlu0 %v1294_v0 }
 0x2f1   : > { %v7170_v5 = vpop.xlane.xlu0 %1419 }
 0x2f2   : > { %v7168_v37 = vpop.xlane.xlu1 %1307  ;;  %vm1421_vm2 = vcmp.eq.f32.partialorder %v6710_v15, %v7170_v5  ;;  %v1321_v15 = vcvt.s32.f32 %v1319_v45 }
 0x2f3   : > { %vm1309_vm1 = vcmp.eq.f32.partialorder %v6708_v61, %v7168_v37  ;;  %v1422_v14 = vsel %vm1421_vm2, %v1417_v26, inf  ;;  %v1335_v61 = vand.u32 65535, %v6787_v3  ;;  %v1449_v3 = vcvt.s32.f32 %v1447_v44 }
 0x2f4   : > { %v1310_v20 = vsel %vm1309_vm1, %v1305_v53, inf  ;;  %1423 = vmin.xlane.f32.xlu0 %v1422_v14  ;;  %v1351_v14 = vand.u32 65535, %v6888_v58  ;;  %v1399_v44 = vand.u32 65535, %v7064_v22 }
 0x2f5   : > { %1311 = vmin.xlane.f32.xlu1 %v1310_v20  ;;  %v1337_v53 = vcvt.s32.f32 %v1335_v61 }
 0x2fc   : > { %v7177_v59 = vpop.xlane.xlu1 %1435 }
 0x2fd   : > { %vm1437_vm3 = vcmp.eq.f32.partialorder %v6749_v57, %v7177_v59 }
 0x2fe   : > { %v1438_v49 = vsel %vm1437_vm3, %v1433_v13, inf }
 0x2ff   : > { %1439 = vmin.xlane.f32.xlu1 %v1438_v49  ;;  %v1353_v49 = vcvt.s32.f32 %v1351_v14 }
 0x300   : > { %v7183_v25 = vpop.xlane.xlu0 %1323 }
 0x301   : > { %vm1325_vm4 = vcmp.eq.f32.partialorder %v6783_v1, %v7183_v25  ;;  %v1463_v1 = vand.u32 65535, %v6855_v60 }
 0x302   : > { %v1326_v26 = vsel %vm1325_vm4, %v1321_v15, inf }
 0x303   : > { %1327 = vmin.xlane.f32.xlu0 %v1326_v26  ;;  %v7187_v34 = vpop.xlane.xlu1 %1339  ;;  %v1465_v13 = vcvt.s32.f32 %v1463_v1  ;;  %v1495_v26 = vand.u32 65535, %v7003_v27  ;;  %v1401_v1 = vcvt.s32.f32 %v1399_v44 }
 0x304   : > { %vm1341_vm5 = vcmp.eq.f32.partialorder %v6797_v36, %v7187_v34  ;;  %v1367_v36 = vand.u32 65535, %v6905_v9 }
 0x305   : > { %v1342_v57 = vsel %vm1341_vm5, %v1337_v53, inf }
 0x306   : > { %1343 = vmin.xlane.f32.xlu1 %v1342_v57  ;;  %v1369_v58 = vcvt.s32.f32 %v1367_v36  ;;  %v1497_v57 = vcvt.s32.f32 %v1495_v26 }
 0x309   : > { %v7192_v0 = vpop.xlane.xlu0 %1451 }
 0x30a   : > { %vm1453_vm6 = vcmp.eq.f32.partialorder %v6831_v40, %v7192_v0 }
 0x30b   : > { %v1454_v20 = vsel %vm1453_vm6, %v1449_v3, inf }
 0x30c   : > { %1455 = vmin.xlane.f32.xlu0 %v1454_v20 }
 0x30f   : > { %v7198_v56 = vpop.xlane.xlu1 %1467 }
 0x310   : > { %vm1469_vm7 = vcmp.eq.f32.partialorder %v6884_v62, %v7198_v56  ;;  %v1479_v62 = vand.u32 65535, %v6965_v6  ;;  %v1383_v6 = vand.u32 65535, %v7039_v8 }
 0x311   : > { %v1470_v32 = vsel %vm1469_vm7, %v1465_v13, inf }
 0x312   : > { %v7203_v45 = vpop.xlane.xlu0 %1355  ;;  %1471 = vmin.xlane.f32.xlu1 %v1470_v32  ;;  %v1481_v15 = vcvt.s32.f32 %v1479_v62  ;;  %v1385_v27 = vcvt.s32.f32 %v1383_v6 }
 0x313   : > { %vm1357_vm8 = vcmp.eq.f32.partialorder %v6919_v12, %v7203_v45 }
 0x314   : > { %v1358_v40 = vsel %vm1357_vm8, %v1353_v49, inf  ;;  %v7207_v60 = vpop.xlane.xlu1 %1371  ;;  %v1314_v49 = vcvt.f32.s32 %v7168_v37 }
 0x315   : > { %1359 = vmin.xlane.f32.xlu0 %v1358_v40  ;;  %vm1373_vm9 = vcmp.eq.f32.partialorder %v6942_v4, %v7207_v60 }
 0x316   : > { %v1374_v61 = vsel %vm1373_vm9, %v1369_v58, inf  ;;  %v14524_v58 = vld [vmem:[#allocation11_spill] sm:$0xff] }
 0x317   : > { %1375 = vmin.xlane.f32.xlu1 %v1374_v61  ;;  %vm14136_vm0 = vcmp.eq.s32.totalorder %v14524_v58, 0  ;;  %vm14060_vm1 = vcmp.eq.s32.totalorder %v14524_v58, 1 }
 0x318   : > { %v7212_v9 = vpop.xlane.xlu0 %1483 }
 0x319   : > { %vm1485_vm10 = vcmp.eq.f32.partialorder %v6990_v17, %v7212_v9 }
 0x31a   : > { %v1486_v12 = vsel %vm1485_vm10, %v1481_v15, inf  ;;  %v1315_v15 = vshll.u32 %v1314_v49, 16 }
 0x31b   : > { %1487 = vmin.xlane.f32.xlu0 %v1486_v12 }
 0x31d   : > { %v7217_v53 = vpop.xlane.xlu1 %1499 }
 0x31e   : > { %vm1501_vm11 = vcmp.eq.f32.partialorder %v7016_v51, %v7217_v53  ;;  %v1511_v51 = vand.u32 65535, %v7119_v41  ;;  %v1298_v41 = vcvt.f32.s32 %v7162_v47 }
 0x31f   : > { %v1502_v4 = vsel %vm1501_vm11, %v1497_v57, inf }
 0x320   : > { %1503 = vmin.xlane.f32.xlu1 %v1502_v4  ;;  %v1513_v22 = vcvt.s32.f32 %v1511_v51 }
 0x323   : > { %v7223_v3 = vpop.xlane.xlu0 %1387 }
 0x324   : > { %vm1389_vm12 = vcmp.eq.f32.partialorder %v7070_v63, %v7223_v3  ;;  %v7227_v20 = vpop.xlane.xlu1 %1403  ;;  %v1527_v63 = vand.u32 65535, %v7153_v24  ;;  %v1426_v24 = vcvt.f32.s32 %v7170_v5 }
 0x325   : > { %v1390_v17 = vsel %vm1389_vm12, %v1385_v27, inf  ;;  %vm1405_vm13 = vcmp.eq.f32.partialorder %v7092_v52, %v7227_v20 }
 0x326   : > { %1391 = vmin.xlane.f32.xlu0 %v1390_v17  ;;  %v1406_v8 = vsel %vm1405_vm13, %v1401_v1, inf  ;;  %v1529_v32 = vcvt.s32.f32 %v1527_v63  ;;  %v1427_v26 = vshll.u32 %v1426_v24, 16 }
 0x327   : > { %1407 = vmin.xlane.f32.xlu1 %v1406_v8 }
 0x32a   : > { %v7232_v14 = vpop.xlane.xlu0 %1515 }
 0x32b   : > { %vm1517_vm14 = vcmp.eq.f32.partialorder %v7138_v31, %v7232_v14  ;;  %v1299_v31 = vshll.u32 %v1298_v41, 16  ;;  %v14531_v41 = vld [vmem:[#allocation57_spill] sm:$0xff] }
 0x32c   : > { %v1518_v13 = vsel %vm1517_vm14, %v1513_v22, inf }
 0x32d   : > { %1519 = vmin.xlane.f32.xlu0 %v1518_v13 }
 0x32f   : > { %v7237_v36 = vpop.xlane.xlu1 %1531 }
 0x330   : > { %vm1533_vm15 = vcmp.eq.f32.partialorder %v7158_v30, %v7237_v36  ;;  %v1253_v30 = vsel %vm14136_vm0, %v6624_v18, 2147483647 }
 0x331   : > { %v1534_v52 = vsel %vm1533_vm15, %v1529_v32, inf  ;;  %v14530_v32 = vld [vmem:[#allocation29_spill] sm:$0xff] }
 0x332   : > { %1535 = vmin.xlane.f32.xlu1 %v1534_v52  ;;  %v1442_v52 = vcvt.f32.s32 %v7177_v59  ;;  %v14534_v59 = vld [vmem:[#allocation16_spill] sm:$0xff] }
 0x379   : > { %v1296_v40 = vpop.xlane.xlu0 %1295 }
 0x37a   : > { %v1297_v62 = vcvt.f32.s32 %v1296_v40 }
 0x37c   : > { %v1300_v61 = vadd.s32 %v1299_v31, %v1297_v62  ;;  %v14535_v31 = vld [vmem:[#allocation18_spill] sm:$0xff] }
 0x37d   : > { %v1424_v12 = vpop.xlane.xlu0 %1423 }
 0x37e   : > { %v7251_v47 = vsel %vm14060_vm1, %v1300_v61, %v1253_v30  ;;  %v1312_v37 = vpop.xlane.xlu1 %1311  ;;  %vm1541_vm2 = vcmp.eq.s32.totalorder %v6631_v33, %v1300_v61  ;;  %vm1542_vm3 = vcmp.eq.s32.totalorder %v6634_v23, %v1300_v61  ;;  %v1425_v57 = vcvt.f32.s32 %v1424_v12 }
 0x37f   : > { %v1313_v5 = vcvt.f32.s32 %v1312_v37  ;;  %v7256_v6 = vsel %vm1541_vm2, 2147483647, %v6631_v33  ;;  %v7259_v4 = vsel %vm1542_vm3, 2147483647, %v6634_v23  ;;  %v1573_v18 = vsel %vm1541_vm2, %v6037_v39, 0.0  ;;  %v14537_v37 = vld [vmem:[#allocation13_spill] sm:$0xff] }
 0x380   : > { %vm1718_vm4 = vcmp.lt.s32.totalorder %v7256_v6, %v7259_v4  ;;  %v1574_v44 = vsel %vm1542_vm3, %v6051_v48, 0.0  ;;  %v1428_v17 = vadd.s32 %v1427_v26, %v1425_v57  ;;  %v1254_v33 = vsel %vm14136_vm0, %v6642_v28, 2147483647 }
 0x381   : > { %v1316_v27 = vadd.s32 %v1315_v15, %v1313_v5  ;;  %v7267_v1 = vsel %vm1718_vm4, %v7256_v6, %v7259_v4  ;;  %v7269_v51 = vadd.f32 %v1574_v44, %v1573_v18  ;;  %v1261_v23 = vsel %vm14136_vm0, %v6637_v7, 2147483647  ;;  %v14538_v5 = vld [vmem:[#allocation15_spill] sm:$0xff] }
 0x382   : > { %v1721_v8 = vshra.s32 %v7267_v1, 16  ;;  %v7284_v63 = vsel %vm14060_vm1, %v1428_v17, %v1261_v23  ;;  %vm1557_vm7 = vcmp.eq.s32.totalorder %v14530_v32, %v1428_v17  ;;  %vm1558_vm9 = vcmp.eq.s32.totalorder %v14531_v41, %v1428_v17 }
 0x383   : > { %14525 = vst [vmem:[#allocation89_spill] sm:$0xff] %v7269_v51  ;;  %v7280_v22 = vsel %vm14060_vm1, %v1316_v27, %v1254_v33  ;;  %14527 = vst [vmem:[#allocation91_spill] sm:$0xff] %v7284_v63  ;;  %vm1543_vm5 = vcmp.eq.s32.totalorder %v6669_v11, %v1316_v27  ;;  %vm1544_vm6 = vcmp.eq.s32.totalorder %v6672_v2, %v1316_v27  ;;  %v7304_v49 = vsel %vm1557_vm7, 2147483647, %v14530_v32 }
 0x384   : > { %14526 = vst [vmem:[#allocation90_spill] sm:$0xff] %v7280_v22  ;;  %v7288_v13 = vcvt.s32.f32 %v1721_v8  ;;  %v7291_v28 = vsel %vm1543_vm5, 2147483647, %v6669_v11  ;;  %v7294_v7 = vsel %vm1544_vm6, 2147483647, %v6672_v2  ;;  %14532 = vst [vmem:[#allocation29_spill] sm:$0xff] %v7304_v49  ;;  %v1330_v30 = vcvt.f32.s32 %v7183_v25 }
 0x385   : > { %14528 = vst [vmem:[#allocation92_spill] sm:$0xff] %v7291_v28  ;;  %14529 = vst [vmem:[#allocation93_spill] sm:$0xff] %v7294_v7  ;;  %vm1734_vm8 = vcmp.lt.s32.totalorder %v7291_v28, %v7294_v7  ;;  %v7312_v2 = vsel %vm1558_vm9, 2147483647, %v14531_v41  ;;  %v1575_v40 = vsel %vm1543_vm5, %v14534_v59, 0.0  ;;  %v1576_v24 = vsel %vm1544_vm6, %v14535_v31, 0.0 }
 0x386   : > { %1724 = vmin.xlane.f32.xlu0 %v7288_v13  ;;  %v7309_v11 = vsel %vm1734_vm8, %v7291_v28, %v7294_v7  ;;  %14533 = vst [vmem:[#allocation57_spill] sm:$0xff] %v7312_v2  ;;  %vm1846_vm10 = vcmp.lt.s32.totalorder %v7304_v49, %v7312_v2  ;;  %v7319_v61 = vadd.f32 %v1576_v24, %v1575_v40  ;;  %v1589_v12 = vsel %vm1557_vm7, %v14537_v37, 0.0  ;;  %v14540_v41 = vld [vmem:[#allocation60_spill] sm:$0xff]  ;;  %v14597_v7 = vld [vmem:[#allocation42_spill] sm:$0xff] }
 0x387   : > { %v1737_v62 = vshra.s32 %v7309_v11, 16  ;;  %v7324_v26 = vsel %vm1846_vm10, %v7304_v49, %v7312_v2  ;;  %v1590_v57 = vsel %vm1558_vm9, %v14538_v5, 0.0  ;;  %v1443_v18 = vshll.u32 %v1442_v52, 16  ;;  %v14567_v37 = vld [vmem:[#allocation68_spill] sm:$0xff] }
 0x388   : > { %14536 = vst [vmem:[#allocation94_spill] sm:$0xff] %v7319_v61  ;;  %v1440_v15 = vpop.xlane.xlu1 %1439  ;;  %v1849_v33 = vshra.s32 %v7324_v26, 16  ;;  %v7333_v23 = vadd.f32 %v1590_v57, %v1589_v12  ;;  %v1262_v17 = vsel %vm14136_vm0, %v14540_v41, 2147483647  ;;  %v1331_v32 = vshll.u32 %v1330_v30, 16  ;;  %v14546_v30 = vld [vmem:[#allocation17_spill] sm:$0xff] }
 0x389   : > { %v1441_v44 = vcvt.f32.s32 %v1440_v15  ;;  %v7330_v27 = vcvt.s32.f32 %v1737_v62  ;;  %v1346_v40 = vcvt.f32.s32 %v7187_v34  ;;  %v14542_v62 = vld [vmem:[#allocation61_spill] sm:$0xff]  ;;  %v14543_v15 = vld [vmem:[#allocation62_spill] sm:$0xff] }
 0x38a   : > { %14539 = vst [vmem:[#allocation95_spill] sm:$0xff] %v7333_v23  ;;  %v7336_v8 = vcvt.s32.f32 %v1849_v33 }
 0x38b   : > { %v1444_v25 = vadd.s32 %v1443_v18, %v1441_v44  ;;  %1740 = vmin.xlane.f32.xlu1 %v7330_v27  ;;  %v14547_v44 = vld [vmem:[#allocation19_spill] sm:$0xff] }
 0x38c   : > { %v1328_v24 = vpop.xlane.xlu0 %1327  ;;  %1852 = vmin.xlane.f32.xlu0 %v7336_v8 }
 0x38d   : > { %v7344_v52 = vsel %vm14060_vm1, %v1444_v25, %v1262_v17  ;;  %vm1559_vm11 = vcmp.eq.s32.totalorder %v14542_v62, %v1444_v25  ;;  %vm1560_vm12 = vcmp.eq.s32.totalorder %v14543_v15, %v1444_v25  ;;  %v1329_v12 = vcvt.f32.s32 %v1328_v24  ;;  %v14549_v24 = vld [vmem:[#allocation63_spill] sm:$0xff] }
 0x38e   : > { %14541 = vst [vmem:[#allocation60_spill] sm:$0xff] %v7344_v52  ;;  %v7350_v57 = vsel %vm1559_vm11, 2147483647, %v14542_v62  ;;  %v7353_v18 = vsel %vm1560_vm12, 2147483647, %v14543_v15  ;;  %v1591_v34 = vsel %vm1559_vm11, %v14546_v30, 0.0  ;;  %v1458_v30 = vcvt.f32.s32 %v7192_v0 }
 0x38f   : > { %14544 = vst [vmem:[#allocation61_spill] sm:$0xff] %v7350_v57  ;;  %14545 = vst [vmem:[#allocation62_spill] sm:$0xff] %v7353_v18  ;;  %vm1862_vm13 = vcmp.lt.s32.totalorder %v7350_v57, %v7353_v18  ;;  %v1592_v33 = vsel %vm1560_vm12, %v14547_v44, 0.0  ;;  %v1332_v41 = vadd.s32 %v1331_v32, %v1329_v12  ;;  %v1344_v17 = vpop.xlane.xlu1 %1343  ;;  %v1255_v62 = vsel %vm14136_vm0, %v14549_v24, 2147483647  ;;  %v14551_v12 = vld [vmem:[#allocation65_spill] sm:$0xff] }
 0x390   : > { %v7361_v23 = vsel %vm1862_vm13, %v7350_v57, %v7353_v18  ;;  %v7363_v25 = vadd.f32 %v1592_v33, %v1591_v34  ;;  %v1347_v15 = vshll.u32 %v1346_v40, 16  ;;  %v1345_v61 = vcvt.f32.s32 %v1344_v17  ;;  %v14552_v44 = vld [vmem:[#allocation66_spill] sm:$0xff]  ;;  %v14556_v24 = vld [vmem:[#allocation21_spill] sm:$0xff] }
 0x391   : > { %v1865_v51 = vshra.s32 %v7361_v23, 16  ;;  %v7372_v32 = vsel %vm14060_vm1, %v1332_v41, %v1255_v62  ;;  %vm1545_vm14 = vcmp.eq.s32.totalorder %v14551_v12, %v1332_v41  ;;  %vm1546_vm15 = vcmp.eq.s32.totalorder %v14552_v44, %v1332_v41  ;;  %v14555_v17 = vld [vmem:[#allocation38_spill] sm:$0xff] }
 0x392   : > { %14548 = vst [vmem:[#allocation96_spill] sm:$0xff] %v7363_v25  ;;  %14550 = vst [vmem:[#allocation63_spill] sm:$0xff] %v7372_v32  ;;  %v1348_v34 = vadd.s32 %v1347_v15, %v1345_v61  ;;  %v7379_v25 = vsel %vm1545_vm14, 2147483647, %v14551_v12  ;;  %v7382_v40 = vsel %vm1546_vm15, 2147483647, %v14552_v44  ;;  %v1474_v57 = vcvt.f32.s32 %v7198_v56 }
 0x393   : > { %v7376_v33 = vcvt.s32.f32 %v1865_v51  ;;  %14553 = vst [vmem:[#allocation65_spill] sm:$0xff] %v7379_v25  ;;  %14554 = vst [vmem:[#allocation66_spill] sm:$0xff] %v7382_v40  ;;  %v1256_v0 = vsel %vm14136_vm0, %v14555_v17, 2147483647  ;;  %vm1750_vm2 = vcmp.lt.s32.totalorder %v7379_v25, %v7382_v40  ;;  %v1577_v62 = vsel %vm1545_vm14, %v14556_v24, 0.0  ;;  %v14557_v32 = vld [vmem:[#allocation24_spill] sm:$0xff] }
 0x394   : > { %v1578_v41 = vsel %vm1546_vm15, %v14557_v32, 0.0  ;;  %v7393_v51 = vsel %vm14060_vm1, %v1348_v34, %v1256_v0  ;;  %v7398_v61 = vsel %vm1750_vm2, %v7379_v25, %v7382_v40  ;;  %v14559_v44 = vld [vmem:[#allocation40_spill] sm:$0xff]  ;;  %v14560_v15 = vld [vmem:[#allocation41_spill] sm:$0xff]  ;;  %v1459_v12 = vshll.u32 %v1458_v30, 16  ;;  %v14564_v25 = vld [vmem:[#allocation27_spill] sm:$0xff] }
 0x395   : > { %14558 = vst [vmem:[#allocation38_spill] sm:$0xff] %v7393_v51  ;;  %1868 = vmin.xlane.f32.xlu1 %v7376_v33  ;;  %vm1547_vm3 = vcmp.eq.s32.totalorder %v14559_v44, %v1348_v34  ;;  %vm1548_vm4 = vcmp.eq.s32.totalorder %v14560_v15, %v1348_v34  ;;  %v1456_v17 = vpop.xlane.xlu0 %1455  ;;  %v1753_v24 = vshra.s32 %v7398_v61, 16  ;;  %v7411_v40 = vadd.f32 %v1578_v41, %v1577_v62  ;;  %v14565_v34 = vld [vmem:[#allocation31_spill] sm:$0xff]  ;;  %v14568_v41 = vld [vmem:[#allocation72_spill] sm:$0xff] }
 0x396   : > { %v7404_v32 = vsel %vm1547_vm3, 2147483647, %v14559_v44  ;;  %v7407_v0 = vsel %vm1548_vm4, 2147483647, %v14560_v15  ;;  %v1457_v51 = vcvt.f32.s32 %v1456_v17  ;;  %v1579_v52 = vsel %vm1547_vm3, %v14564_v25, 0.0 }
 0x397   : > { %14561 = vst [vmem:[#allocation40_spill] sm:$0xff] %v7404_v32  ;;  %14562 = vst [vmem:[#allocation41_spill] sm:$0xff] %v7407_v0  ;;  %vm1766_vm5 = vcmp.lt.s32.totalorder %v7404_v32, %v7407_v0  ;;  %v7414_v18 = vcvt.s32.f32 %v1753_v24  ;;  %v1580_v44 = vsel %vm1548_vm4, %v14565_v34, 0.0  ;;  %v1263_v62 = vsel %vm14136_vm0, %v14567_v37, 2147483647 }
 0x398   : > { %14563 = vst [vmem:[#allocation97_spill] sm:$0xff] %v7411_v40  ;;  %v7418_v30 = vsel %vm1766_vm5, %v7404_v32, %v7407_v0  ;;  %v1460_v15 = vadd.s32 %v1459_v12, %v1457_v51  ;;  %v7423_v5 = vadd.f32 %v1580_v44, %v1579_v52  ;;  %v1264_v24 = vsel %vm14136_vm0, %v14568_v41, 2147483647  ;;  %v14570_v52 = vld [vmem:[#allocation70_spill] sm:$0xff]  ;;  %v14571_v12 = vld [vmem:[#allocation71_spill] sm:$0xff]  ;;  %v14574_v41 = vld [vmem:[#allocation20_spill] sm:$0xff] }
 0x399   : > { %v1769_v17 = vshra.s32 %v7418_v30, 16  ;;  %v1362_v40 = vcvt.f32.s32 %v7203_v45  ;;  %1756 = vmin.xlane.f32.xlu0 %v7414_v18  ;;  %v1378_v37 = vcvt.f32.s32 %v7207_v60  ;;  %v1475_v25 = vshll.u32 %v1474_v57, 16 }
 0x39a   : > { %14566 = vst [vmem:[#allocation98_spill] sm:$0xff] %v7423_v5  ;;  %v7435_v56 = vsel %vm14060_vm1, %v1460_v15, %v1263_v62  ;;  %vm1561_vm6 = vcmp.eq.s32.totalorder %v14570_v52, %v1460_v15  ;;  %vm1562_vm7 = vcmp.eq.s32.totalorder %v14571_v12, %v1460_v15 }
 0x39b   : > { %14569 = vst [vmem:[#allocation68_spill] sm:$0xff] %v7435_v56  ;;  %v7437_v51 = vcvt.s32.f32 %v1769_v17  ;;  %v1472_v44 = vpop.xlane.xlu1 %1471  ;;  %v7443_v5 = vsel %vm1561_vm6, 2147483647, %v14570_v52  ;;  %v7446_v45 = vsel %vm1562_vm7, 2147483647, %v14571_v12  ;;  %v1593_v34 = vsel %vm1561_vm6, %v14574_v41, 0.0 }
 0x39c   : > { %14572 = vst [vmem:[#allocation72_spill] sm:$0xff] %v7443_v5  ;;  %14573 = vst [vmem:[#allocation70_spill] sm:$0xff] %v7446_v45  ;;  %v1473_v62 = vcvt.f32.s32 %v1472_v44  ;;  %vm1878_vm8 = vcmp.lt.s32.totalorder %v7443_v5, %v7446_v45  ;;  %v14575_v17 = vld [vmem:[#allocation22_spill] sm:$0xff]  ;;  %v14576_v56 = vld [vmem:[#allocation43_spill] sm:$0xff]  ;;  %v1258_v52 = vsel %vm14136_vm0, %v6846_v54, 2147483647  ;;  %v1506_v54 = vcvt.f32.s32 %v7217_v53 }
 0x39d   : > { %1772 = vmin.xlane.f32.xlu1 %v7437_v51  ;;  %v1594_v15 = vsel %vm1562_vm7, %v14575_v17, 0.0  ;;  %v1257_v60 = vsel %vm14136_vm0, %v14576_v56, 2147483647  ;;  %v7461_v12 = vsel %vm1878_vm8, %v7443_v5, %v7446_v45  ;;  %v14578_v44 = vld [vmem:[#allocation75_spill] sm:$0xff]  ;;  %v1490_v17 = vcvt.f32.s32 %v7212_v9  ;;  %v14580_v9 = vld [vmem:[#allocation46_spill] sm:$0xff] }
 0x39e   : > { %v7463_v57 = vadd.f32 %v1594_v15, %v1593_v34  ;;  %v1265_v41 = vsel %vm14136_vm0, %v14578_v44, 2147483647  ;;  %v7469_v0 = vadd.s32 %v1475_v25, %v1473_v62  ;;  %v1360_v32 = vpop.xlane.xlu0 %1359  ;;  %v1881_v56 = vshra.s32 %v7461_v12, 16  ;;  %v14581_v25 = vld [vmem:[#allocation74_spill] sm:$0xff] }
 0x39f   : > { %v1363_v31 = vshll.u32 %v1362_v40, 16  ;;  %v1379_v59 = vshll.u32 %v1378_v37, 16  ;;  %v1361_v63 = vcvt.f32.s32 %v1360_v32  ;;  %v1491_v37 = vshll.u32 %v1490_v17, 16 }
 0x3a0   : > { %14577 = vst [vmem:[#allocation71_spill] sm:$0xff] %v7463_v57  ;;  %v7476_v34 = vsel %vm14060_vm1, %v7469_v0, %v1264_v24  ;;  %v1376_v15 = vpop.xlane.xlu1 %1375  ;;  %v7478_v57 = vcvt.s32.f32 %v1881_v56  ;;  %vm1563_vm9 = vcmp.eq.s32.totalorder %v14580_v9, %v7469_v0  ;;  %vm1564_vm10 = vcmp.eq.s32.totalorder %v14581_v25, %v7469_v0 }
 0x3a1   : > { %14579 = vst [vmem:[#allocation43_spill] sm:$0xff] %v7476_v34  ;;  %v1364_v62 = vadd.s32 %v1363_v31, %v1361_v63  ;;  %v1377_v40 = vcvt.f32.s32 %v1376_v15  ;;  %v7488_v53 = vsel %vm1563_vm9, 2147483647, %v14580_v9  ;;  %v7494_v32 = vsel %vm1564_vm10, 2147483647, %v14581_v25  ;;  %v14585_v15 = vld [vmem:[#allocation47_spill] sm:$0xff] }
 0x3a2   : > { %14582 = vst [vmem:[#allocation75_spill] sm:$0xff] %v7488_v53  ;;  %14583 = vst [vmem:[#allocation46_spill] sm:$0xff] %v7494_v32  ;;  %v1266_v24 = vsel %vm14136_vm0, %v6952_v50, 2147483647  ;;  %v1394_v63 = vcvt.f32.s32 %v7223_v3  ;;  %1884 = vmin.xlane.f32.xlu0 %v7478_v57  ;;  %vm1894_vm11 = vcmp.lt.s32.totalorder %v7488_v53, %v7494_v32  ;;  %v1507_v50 = vshll.u32 %v1506_v54, 16  ;;  %v14586_v3 = vld [vmem:[#allocation49_spill] sm:$0xff] }
 0x3a3   : > { %v7505_v31 = vsel %vm14060_vm1, %v1364_v62, %v1257_v60  ;;  %v1380_v44 = vadd.s32 %v1379_v59, %v1377_v40  ;;  %v7509_v56 = vsel %vm1894_vm11, %v7488_v53, %v7494_v32  ;;  %vm1549_vm12 = vcmp.eq.s32.totalorder %v14585_v15, %v1364_v62  ;;  %v14590_v54 = vld [vmem:[#allocation50_spill] sm:$0xff] }
 0x3a4   : > { %14584 = vst [vmem:[#allocation74_spill] sm:$0xff] %v7505_v31  ;;  %v1897_v17 = vshra.s32 %v7509_v56, 16  ;;  %vm1550_vm13 = vcmp.eq.s32.totalorder %v14586_v3, %v1364_v62  ;;  %v7517_v34 = vsel %vm1549_vm12, 2147483647, %v14585_v15  ;;  %v1488_v59 = vpop.xlane.xlu0 %1487  ;;  %v14591_v31 = vld [vmem:[#allocation51_spill] sm:$0xff]  ;;  %v1410_v45 = vcvt.f32.s32 %v7227_v20  ;;  %v14599_v62 = vld [vmem:[#allocation53_spill] sm:$0xff] }
 0x3a5   : > { %14587 = vst [vmem:[#allocation47_spill] sm:$0xff] %v7517_v34  ;;  %v7521_v60 = vsel %vm14060_vm1, %v1380_v44, %v1258_v52  ;;  %v7526_v40 = vsel %vm1550_vm13, 2147483647, %v14586_v3  ;;  %vm1551_vm14 = vcmp.eq.s32.totalorder %v14590_v54, %v1380_v44  ;;  %vm1552_vm15 = vcmp.eq.s32.totalorder %v14591_v31, %v1380_v44  ;;  %v14600_v3 = vld [vmem:[#allocation54_spill] sm:$0xff] }
 0x3a6   : > { %14588 = vst [vmem:[#allocation49_spill] sm:$0xff] %v7521_v60  ;;  %14589 = vst [vmem:[#allocation99_spill] sm:$0xff] %v7526_v40  ;;  %v1489_v32 = vcvt.f32.s32 %v1488_v59  ;;  %v7530_v53 = vcvt.s32.f32 %v1897_v17  ;;  %vm1782_vm2 = vcmp.lt.s32.totalorder %v7517_v34, %v7526_v40  ;;  %v7537_v52 = vsel %vm1551_vm14, 2147483647, %v14590_v54  ;;  %v14601_v54 = vld [vmem:[#allocation23_spill] sm:$0xff] }
 0x3a7   : > { %14592 = vst [vmem:[#allocation50_spill] sm:$0xff] %v7537_v52  ;;  %v1395_v60 = vshll.u32 %v1394_v63, 16  ;;  %v7542_v5 = vsel %vm1782_vm2, %v7517_v34, %v7526_v40  ;;  %v7547_v17 = vsel %vm1552_vm15, 2147483647, %v14591_v31  ;;  %v14594_v63 = vld [vmem:[#allocation34_spill] sm:$0xff]  ;;  %v14595_v34 = vld [vmem:[#allocation37_spill] sm:$0xff] }
 0x3a8   : > { %14593 = vst [vmem:[#allocation51_spill] sm:$0xff] %v7547_v17  ;;  %v1492_v59 = vadd.s32 %v1491_v37, %v1489_v32  ;;  %1900 = vmin.xlane.f32.xlu1 %v7530_v53  ;;  %v1785_v2 = vshra.s32 %v7542_v5, 16  ;;  %vm1798_vm3 = vcmp.lt.s32.totalorder %v7537_v52, %v7547_v17  ;;  %v1581_v20 = vsel %vm1549_vm12, %v14594_v63, 0.0  ;;  %v14596_v37 = vld [vmem:[#allocation39_spill] sm:$0xff] }
 0x3a9   : > { %v1504_v49 = vpop.xlane.xlu1 %1503  ;;  %v7558_v40 = vsel %vm1798_vm3, %v7537_v52, %v7547_v17  ;;  %v1582_v32 = vsel %vm1550_vm13, %v14595_v34, 0.0  ;;  %v1583_v22 = vsel %vm1551_vm14, %v14596_v37, 0.0  ;;  %v1584_v28 = vsel %vm1552_vm15, %v14597_v7, 0.0 }
 0x3aa   : > { %v7571_v15 = vsel %vm14060_vm1, %v1492_v59, %v1265_v41  ;;  %v1505_v63 = vcvt.f32.s32 %v1504_v49  ;;  %v7573_v48 = vcvt.s32.f32 %v1785_v2  ;;  %v1801_v17 = vshra.s32 %v7558_v40, 16 }
 0x3ab   : > { %14598 = vst [vmem:[#allocation100_spill] sm:$0xff] %v7571_v15  ;;  %v1411_v52 = vshll.u32 %v1410_v45, 16  ;;  %vm1565_vm4 = vcmp.eq.s32.totalorder %v14599_v62, %v1492_v59  ;;  %vm1566_vm5 = vcmp.eq.s32.totalorder %v14600_v3, %v1492_v59  ;;  %v1595_v31 = vsel %vm1563_vm9, %v14601_v54, 0.0 }
 0x3ac   : > { %v1508_v44 = vadd.s32 %v1507_v50, %v1505_v63  ;;  %1788 = vmin.xlane.f32.xlu0 %v7573_v48  ;;  %v7583_v41 = vcvt.s32.f32 %v1801_v17  ;;  %v7588_v49 = vsel %vm1565_vm4, 2147483647, %v14599_v62  ;;  %v7593_v2 = vsel %vm1566_vm5, 2147483647, %v14600_v3  ;;  %v14606_v50 = vld [vmem:[#allocation25_spill] sm:$0xff] }
 0x3ad   : > { %14602 = vst [vmem:[#allocation53_spill] sm:$0xff] %v7588_v49  ;;  %14603 = vst [vmem:[#allocation54_spill] sm:$0xff] %v7593_v2  ;;  %vm1910_vm6 = vcmp.lt.s32.totalorder %v7588_v49, %v7593_v2  ;;  %v7597_v45 = vadd.f32 %v1582_v32, %v1581_v20  ;;  %v7599_v9 = vadd.f32 %v1584_v28, %v1583_v22  ;;  %v1596_v17 = vsel %vm1564_vm10, %v14606_v50, 0.0  ;;  %v14608_v20 = vld [vmem:[#allocation79_spill] sm:$0xff]  ;;  %v14609_v22 = vld [vmem:[#allocation80_spill] sm:$0xff] }
 0x3ae   : > { %v7607_v63 = vsel %vm14060_vm1, %v1508_v44, %v1266_v24  ;;  %1804 = vmin.xlane.f32.xlu1 %v7583_v41  ;;  %v7612_v37 = vsel %vm1910_vm6, %v7588_v49, %v7593_v2  ;;  %vm1567_vm7 = vcmp.eq.s32.totalorder %v14608_v20, %v1508_v44  ;;  %vm1568_vm8 = vcmp.eq.s32.totalorder %v14609_v22, %v1508_v44  ;;  %v14628_v44 = vld [vmem:[#allocation48_spill] sm:$0xff] }
 0x3af   : > { %14604 = vst [vmem:[#allocation101_spill] sm:$0xff] %v7597_v45  ;;  %14605 = vst [vmem:[#allocation102_spill] sm:$0xff] %v7599_v9  ;;  %v1392_v7 = vpop.xlane.xlu0 %1391  ;;  %v1522_v28 = vcvt.f32.s32 %v7232_v14  ;;  %v1913_v0 = vshra.s32 %v7612_v37, 16  ;;  %v7621_v25 = vsel %vm1567_vm7, 2147483647, %v14608_v20  ;;  %v7628_v45 = vadd.f32 %v1596_v17, %v1595_v31 }
 0x3b0   : > { %14607 = vst [vmem:[#allocation103_spill] sm:$0xff] %v7607_v63  ;;  %v1393_v32 = vcvt.f32.s32 %v1392_v7  ;;  %v1408_v24 = vpop.xlane.xlu1 %1407  ;;  %v7626_v9 = vsel %vm1568_vm8, 2147483647, %v14609_v22  ;;  %v14612_v63 = vld [vmem:[#allocation26_spill] sm:$0xff]  ;;  %v14613_v7 = vld [vmem:[#allocation28_spill] sm:$0xff] }
 0x3b1   : > { %14610 = vst [vmem:[#allocation79_spill] sm:$0xff] %v7626_v9  ;;  %14611 = vst [vmem:[#allocation80_spill] sm:$0xff] %v7628_v45  ;;  %v1597_v14 = vsel %vm1565_vm4, %v14612_v63, 0.0  ;;  %v1598_v15 = vsel %vm1566_vm5, %v14613_v7, 0.0  ;;  %v1409_v49 = vcvt.f32.s32 %v1408_v24  ;;  %v7636_v50 = vcvt.s32.f32 %v1913_v0  ;;  %v14616_v24 = vld [vmem:[#allocation82_spill] sm:$0xff]  ;;  %v14623_v63 = vld [vmem:[#allocation44_spill] sm:$0xff] }
 0x3b2   : > { %v1396_v2 = vadd.s32 %v1395_v60, %v1393_v32  ;;  %vm1926_vm9 = vcmp.lt.s32.totalorder %v7621_v25, %v7626_v9  ;;  %v1259_v31 = vsel %vm14136_vm0, %v6999_v46, 2147483647  ;;  %v7647_v62 = vadd.f32 %v1598_v15, %v1597_v14  ;;  %v14617_v15 = vld [vmem:[#allocation83_spill] sm:$0xff] }
 0x3b3   : > { %v7645_v17 = vsel %vm1926_vm9, %v7621_v25, %v7626_v9  ;;  %v1260_v60 = vsel %vm14136_vm0, %v7007_v43, 2147483647  ;;  %v1412_v3 = vadd.s32 %v1411_v52, %v1409_v49  ;;  %1916 = vmin.xlane.f32.xlu0 %v7636_v50  ;;  %v1523_v46 = vshll.u32 %v1522_v28, 16 }
 0x3b4   : > { %14614 = vst [vmem:[#allocation104_spill] sm:$0xff] %v7647_v62  ;;  %v7654_v59 = vsel %vm14060_vm1, %v1396_v2, %v1259_v31  ;;  %v1929_v32 = vshra.s32 %v7645_v17, 16  ;;  %v1538_v0 = vcvt.f32.s32 %v7237_v36  ;;  %vm1553_vm10 = vcmp.eq.s32.totalorder %v14616_v24, %v1396_v2 }
 0x3b5   : > { %14615 = vst [vmem:[#allocation105_spill] sm:$0xff] %v7654_v59  ;;  %vm1554_vm11 = vcmp.eq.s32.totalorder %v14617_v15, %v1396_v2  ;;  %v7663_v14 = vsel %vm14060_vm1, %v1412_v3, %v1260_v60  ;;  %v7670_v52 = vsel %vm1553_vm10, 2147483647, %v14616_v24  ;;  %vm1555_vm13 = vcmp.eq.s32.totalorder %v7045_v19, %v1412_v3  ;;  %v14624_v59 = vld [vmem:[#allocation30_spill] sm:$0xff] }
 0x3b6   : > { %14618 = vst [vmem:[#allocation82_spill] sm:$0xff] %v7663_v14  ;;  %v1520_v43 = vpop.xlane.xlu0 %1519  ;;  %v7665_v62 = vcvt.s32.f32 %v1929_v32  ;;  %14619 = vst [vmem:[#allocation83_spill] sm:$0xff] %v7670_v52  ;;  %v7675_v36 = vsel %vm1554_vm11, 2147483647, %v14617_v15  ;;  %vm1556_vm14 = vcmp.eq.s32.totalorder %v7051_v10, %v1412_v3  ;;  %v1267_v28 = vsel %vm14136_vm0, %v7060_v35, 2147483647 }
 0x3b7   : > { %14620 = vst [vmem:[#allocation106_spill] sm:$0xff] %v7675_v36  ;;  %v1521_v49 = vcvt.f32.s32 %v1520_v43  ;;  %vm1814_vm12 = vcmp.lt.s32.totalorder %v7670_v52, %v7675_v36  ;;  %v7692_v60 = vsel %vm1555_vm13, 2147483647, %v7045_v19  ;;  %v7697_v32 = vsel %vm1556_vm14, 2147483647, %v7051_v10 }
 0x3b8   : > { %1932 = vmin.xlane.f32.xlu1 %v7665_v62  ;;  %v7687_v31 = vsel %vm1814_vm12, %v7670_v52, %v7675_v36  ;;  %14621 = vst [vmem:[#allocation107_spill] sm:$0xff] %v7692_v60  ;;  %14622 = vst [vmem:[#allocation108_spill] sm:$0xff] %v7697_v32  ;;  %v1539_v43 = vshll.u32 %v1538_v0, 16  ;;  %vm1830_vm15 = vcmp.lt.s32.totalorder %v7692_v60, %v7697_v32  ;;  %v1585_v14 = vsel %vm1553_vm10, %v14623_v63, 0.0  ;;  %v14625_v52 = vld [vmem:[#allocation32_spill] sm:$0xff] }
 0x3b9   : > { %v1524_v45 = vadd.s32 %v1523_v46, %v1521_v49  ;;  %v1817_v35 = vshra.s32 %v7687_v31, 16  ;;  %v7704_v7 = vsel %vm1830_vm15, %v7692_v60, %v7697_v32  ;;  %v1599_v36 = vsel %vm1567_vm7, %v14624_v59, 0.0  ;;  %v14627_v60 = vld [vmem:[#allocation45_spill] sm:$0xff] }
 0x3ba   : > { %v1600_v46 = vsel %vm1568_vm8, %v14625_v52, 0.0  ;;  %v1833_v32 = vshra.s32 %v7704_v7, 16  ;;  %v1586_v24 = vsel %vm1554_vm11, %v14627_v60, 0.0  ;;  %v1587_v20 = vsel %vm1555_vm13, %v14628_v44, 0.0 }
 0x3bb   : > { %v7717_v0 = vsel %vm14060_vm1, %v1524_v45, %v1267_v28  ;;  %v1536_v49 = vpop.xlane.xlu1 %1535  ;;  %v7719_v9 = vcvt.s32.f32 %v1817_v35  ;;  %vm1569_vm2 = vcmp.eq.s32.totalorder %v7098_v38, %v1524_v45  ;;  %vm1570_vm3 = vcmp.eq.s32.totalorder %v7104_v21, %v1524_v45 }
 0x3bc   : > { %14626 = vst [vmem:[#allocation30_spill] sm:$0xff] %v7717_v0  ;;  %v1537_v63 = vcvt.f32.s32 %v1536_v49  ;;  %v1268_v22 = vsel %vm14136_vm0, %v7114_v55, 2147483647  ;;  %v7734_v28 = vcvt.s32.f32 %v1833_v32  ;;  %v7739_v2 = vsel %vm1569_vm2, 2147483647, %v7098_v38  ;;  %v14630_v55 = vld [vmem:[#allocation52_spill] sm:$0xff] }
 0x3bd   : > { %1820 = vmin.xlane.f32.xlu0 %v7719_v9  ;;  %v7744_v15 = vsel %vm1570_vm3, 2147483647, %v7104_v21  ;;  %v7748_v35 = vadd.f32 %v1586_v24, %v1585_v14  ;;  %v1588_v32 = vsel %vm1556_vm14, %v14630_v55, 0.0  ;;  %v7760_v0 = vadd.f32 %v1600_v46, %v1599_v36  ;;  %v14634_v46 = vld [vmem:[#allocation36_spill] sm:$0xff] }
 0x3be   : > { %v1540_v19 = vadd.s32 %v1539_v43, %v1537_v63  ;;  %vm1942_vm4 = vcmp.lt.s32.totalorder %v7739_v2, %v7744_v15  ;;  %1836 = vmin.xlane.f32.xlu1 %v7734_v28  ;;  %v7758_v52 = vadd.f32 %v1588_v32, %v1587_v20  ;;  %v1601_v63 = vsel %vm1569_vm2, %v14518_v42, 0.0  ;;  %v14633_v43 = vld [vmem:[#allocation35_spill] sm:$0xff] }
 0x3bf   : > { %14629 = vst [vmem:[#allocation109_spill] sm:$0xff] %v7748_v35  ;;  %v7756_v49 = vsel %vm1942_vm4, %v7739_v2, %v7744_v15  ;;  %14632 = vst [vmem:[#allocation111_spill] sm:$0xff] %v7760_v0  ;;  %v1602_v36 = vsel %vm1570_vm3, %v14633_v43, 0.0 }
 0x3c0   : > { %14631 = vst [vmem:[#allocation110_spill] sm:$0xff] %v7758_v52  ;;  %v7767_v14 = vsel %vm14060_vm1, %v1540_v19, %v1268_v22  ;;  %v1945_v10 = vshra.s32 %v7756_v49, 16  ;;  %vm1571_vm5 = vcmp.eq.s32.totalorder %v7141_v29, %v1540_v19  ;;  %vm1572_vm6 = vcmp.eq.s32.totalorder %v7144_v16, %v1540_v19  ;;  %v14636_v19 = vld [vmem:[#allocation55_spill] sm:$0xff] }
 0x3c1   : > { %v7773_v3 = vsel %vm1571_vm5, 2147483647, %v7141_v29  ;;  %v1603_v38 = vsel %vm1571_vm5, %v14634_v46, 0.0  ;;  %v7782_v20 = vsel %vm1572_vm6, 2147483647, %v7144_v16  ;;  %v7784_v22 = vadd.f32 %v1602_v36, %v1601_v63 }
 0x3c2   : > { %v7779_v24 = vcvt.s32.f32 %v1945_v10  ;;  %vm1958_vm7 = vcmp.lt.s32.totalorder %v7773_v3, %v7782_v20  ;;  %v1604_v32 = vsel %vm1572_vm6, %v14636_v19, 0.0  ;;  %v1720_v16 = vand.u32 65535, %v7267_v1 }
 0x3c3   : > { %14635 = vst [vmem:[#allocation112_spill] sm:$0xff] %v7784_v22  ;;  %v7792_v21 = vsel %vm1958_vm7, %v7773_v3, %v7782_v20  ;;  %v7794_v29 = vadd.f32 %v1604_v32, %v1603_v38  ;;  %v1736_v22 = vand.u32 65535, %v7309_v11  ;;  %v1848_v38 = vand.u32 65535, %v7324_v26 }
 0x3c4   : > { %1948 = vmin.xlane.f32.xlu0 %v7779_v24  ;;  %v1961_v45 = vshra.s32 %v7792_v21, 16  ;;  %v1722_v36 = vcvt.s32.f32 %v1720_v16  ;;  %v1864_v11 = vand.u32 65535, %v7361_v23  ;;  %v1768_v16 = vand.u32 65535, %v7418_v30 }
 0x3c5   : > { %14637 = vst [vmem:[#allocation113_spill] sm:$0xff] %v7794_v29  ;;  %v1850_v52 = vcvt.s32.f32 %v1848_v38 }
 0x3c6   : > { %v7797_v10 = vcvt.s32.f32 %v1961_v45  ;;  %v1738_v45 = vcvt.s32.f32 %v1736_v22  ;;  %v1752_v22 = vand.u32 65535, %v7398_v61 }
 0x3c8   : > { %1964 = vmin.xlane.f32.xlu1 %v7797_v10  ;;  %v1754_v38 = vcvt.s32.f32 %v1752_v22 }
 0x40f   : > { %v7801_v63 = vpop.xlane.xlu0 %1724 }
 0x410   : > { %vm1726_vm8 = vcmp.eq.f32.partialorder %v7288_v13, %v7801_v63 }
 0x411   : > { %v1727_v0 = vsel %vm1726_vm8, %v1722_v36, inf }
 0x412   : > { %1728 = vmin.xlane.f32.xlu0 %v1727_v0  ;;  %v1866_v0 = vcvt.s32.f32 %v1864_v11 }
 0x414   : > { %v7807_v32 = vpop.xlane.xlu1 %1740 }
 0x415   : > { %vm1742_vm9 = vcmp.eq.f32.partialorder %v7330_v27, %v7807_v32  ;;  %v7811_v29 = vpop.xlane.xlu0 %1852 }
 0x416   : > { %v1743_v1 = vsel %vm1742_vm9, %v1738_v45, inf  ;;  %vm1854_vm10 = vcmp.eq.f32.partialorder %v7336_v8, %v7811_v29 }
 0x417   : > { %1744 = vmin.xlane.f32.xlu1 %v1743_v1  ;;  %v1855_v13 = vsel %vm1854_vm10, %v1850_v52, inf  ;;  %v1770_v52 = vcvt.s32.f32 %v1768_v16  ;;  %v1912_v16 = vand.u32 65535, %v7612_v37  ;;  %v1816_v37 = vand.u32 65535, %v7687_v31 }
 0x418   : > { %1856 = vmin.xlane.f32.xlu0 %v1855_v13  ;;  %v1784_v13 = vand.u32 65535, %v7542_v5  ;;  %vm14059_vm10 = vcmp.eq.s32.totalorder %v14524_v58, 2 }
 0x41e   : > { %v7816_v26 = vpop.xlane.xlu1 %1868 }
 0x41f   : > { %vm1870_vm11 = vcmp.eq.f32.partialorder %v7376_v33, %v7816_v26  ;;  %v1880_v33 = vand.u32 65535, %v7461_v12 }
 0x420   : > { %v1871_v27 = vsel %vm1870_vm11, %v1866_v0, inf }
 0x421   : > { %1872 = vmin.xlane.f32.xlu1 %v1871_v27  ;;  %v1882_v30 = vcvt.s32.f32 %v1880_v33  ;;  %v1786_v27 = vcvt.s32.f32 %v1784_v13  ;;  %v1944_v13 = vand.u32 65535, %v7756_v49 }
 0x422   : > { %v7822_v36 = vpop.xlane.xlu0 %1756 }
 0x423   : > { %vm1758_vm12 = vcmp.eq.f32.partialorder %v7414_v18, %v7822_v36  ;;  %v1896_v18 = vand.u32 65535, %v7509_v56  ;;  %v1946_v31 = vcvt.s32.f32 %v1944_v13  ;;  %v14645_v13 = vld [vmem:[#allocation90_spill] sm:$0xff] }
 0x424   : > { %v1759_v8 = vsel %vm1758_vm12, %v1754_v38, inf }
 0x425   : > { %1760 = vmin.xlane.f32.xlu0 %v1759_v8  ;;  %v1898_v0 = vcvt.s32.f32 %v1896_v18  ;;  %v1914_v8 = vcvt.s32.f32 %v1912_v16 }
 0x426   : > { %v7826_v23 = vpop.xlane.xlu1 %1772 }
 0x427   : > { %vm1774_vm13 = vcmp.eq.f32.partialorder %v7437_v51, %v7826_v23  ;;  %v1800_v51 = vand.u32 65535, %v7558_v40  ;;  %v1928_v40 = vand.u32 65535, %v7645_v17 }
 0x428   : > { %v1775_v61 = vsel %vm1774_vm13, %v1770_v52, inf }
 0x429   : > { %1776 = vmin.xlane.f32.xlu1 %v1775_v61  ;;  %v1802_v5 = vcvt.s32.f32 %v1800_v51  ;;  %v1930_v33 = vcvt.s32.f32 %v1928_v40  ;;  %v1832_v61 = vand.u32 65535, %v7704_v7 }
 0x42b   : > { %v7831_v45 = vpop.xlane.xlu0 %1884 }
 0x42c   : > { %vm1886_vm14 = vcmp.eq.f32.partialorder %v7478_v57, %v7831_v45 }
 0x42d   : > { %v1887_v1 = vsel %vm1886_vm14, %v1882_v30, inf  ;;  %v1818_v30 = vcvt.s32.f32 %v1816_v37  ;;  %v14641_v37 = vld [vmem:[#allocation14_spill] sm:$0xff] }
 0x42e   : > { %1888 = vmin.xlane.f32.xlu0 %v1887_v1  ;;  %v1834_v1 = vcvt.s32.f32 %v1832_v61 }
 0x431   : > { %v7837_v11 = vpop.xlane.xlu1 %1900 }
 0x432   : > { %vm1902_vm15 = vcmp.eq.f32.partialorder %v7530_v53, %v7837_v11 }
 0x433   : > { %v1903_v12 = vsel %vm1902_vm15, %v1898_v0, inf  ;;  %v1960_v0 = vand.u32 65535, %v7792_v21 }
 0x434   : > { %1904 = vmin.xlane.f32.xlu1 %v1903_v12 }
 0x435   : > { %v7842_v22 = vpop.xlane.xlu0 %1788  ;;  %v1962_v12 = vcvt.s32.f32 %v1960_v0  ;;  %v1875_v0 = vcvt.f32.s32 %v7816_v26 }
 0x436   : > { %vm1790_vm2 = vcmp.eq.f32.partialorder %v7573_v48, %v7842_v22 }
 0x437   : > { %v1791_v57 = vsel %vm1790_vm2, %v1786_v27, inf  ;;  %v7846_v56 = vpop.xlane.xlu1 %1804 }
 0x438   : > { %1792 = vmin.xlane.f32.xlu0 %v1791_v57  ;;  %vm1806_vm3 = vcmp.eq.f32.partialorder %v7583_v41, %v7846_v56 }
 0x439   : > { %v1807_v53 = vsel %vm1806_vm3, %v1802_v5, inf  ;;  %v1747_v5 = vcvt.f32.s32 %v7807_v32 }
 0x43a   : > { %1808 = vmin.xlane.f32.xlu1 %v1807_v53 }
 0x43b   : > { %v1748_v53 = vshll.u32 %v1747_v5, 16 }
 0x43c   : > { %v7852_v38 = vpop.xlane.xlu0 %1916 }
 0x43d   : > { %vm1918_vm4 = vcmp.eq.f32.partialorder %v7636_v50, %v7852_v38 }
 0x43e   : > { %v1919_v48 = vsel %vm1918_vm4, %v1914_v8, inf }
 0x43f   : > { %1920 = vmin.xlane.f32.xlu0 %v1919_v48 }
 0x441   : > { %v7856_v52 = vpop.xlane.xlu1 %1932 }
 0x442   : > { %vm1934_vm5 = vcmp.eq.f32.partialorder %v7665_v62, %v7856_v52 }
 0x443   : > { %v1935_v41 = vsel %vm1934_vm5, %v1930_v33, inf }
 0x444   : > { %1936 = vmin.xlane.f32.xlu1 %v1935_v41 }
 0x446   : > { %v7862_v17 = vpop.xlane.xlu0 %1820 }
 0x447   : > { %vm1822_vm6 = vcmp.eq.f32.partialorder %v7719_v9, %v7862_v17  ;;  %v7866_v18 = vpop.xlane.xlu1 %1836 }
 0x448   : > { %v1823_v50 = vsel %vm1822_vm6, %v1818_v30, inf  ;;  %vm1838_vm7 = vcmp.eq.f32.partialorder %v7734_v28, %v7866_v18  ;;  %v1731_v28 = vcvt.f32.s32 %v7801_v63 }
 0x449   : > { %1824 = vmin.xlane.f32.xlu0 %v1823_v50  ;;  %v1839_v62 = vsel %vm1838_vm7, %v1834_v1, inf  ;;  %v14643_v50 = vld [vmem:[#allocation92_spill] sm:$0xff]  ;;  %v14644_v1 = vld [vmem:[#allocation93_spill] sm:$0xff] }
 0x44a   : > { %1840 = vmin.xlane.f32.xlu1 %v1839_v62  ;;  %v1732_v57 = vshll.u32 %v1731_v28, 16  ;;  %v14649_v28 = vld [vmem:[#allocation29_spill] sm:$0xff] }
 0x44d   : > { %v7871_v7 = vpop.xlane.xlu0 %1948 }
 0x44e   : > { %vm1950_vm8 = vcmp.eq.f32.partialorder %v7779_v24, %v7871_v7  ;;  %v1859_v24 = vcvt.f32.s32 %v7811_v29 }
 0x44f   : > { %v1951_v9 = vsel %vm1950_vm8, %v1946_v31, inf }
 0x450   : > { %1952 = vmin.xlane.f32.xlu0 %v1951_v9  ;;  %v1860_v48 = vshll.u32 %v1859_v24, 16 }
 0x451   : > { %v7876_v51 = vpop.xlane.xlu1 %1964 }
 0x452   : > { %vm1966_vm9 = vcmp.eq.f32.partialorder %v7797_v10, %v7876_v51 }
 0x453   : > { %v1967_v49 = vsel %vm1966_vm9, %v1962_v12, inf }
 0x454   : > { %1968 = vmin.xlane.f32.xlu1 %v1967_v49 }
 0x49b   : > { %v1729_v27 = vpop.xlane.xlu0 %1728 }
 0x49c   : > { %v1730_v21 = vcvt.f32.s32 %v1729_v27  ;;  %v14650_v27 = vld [vmem:[#allocation57_spill] sm:$0xff] }
 0x49e   : > { %v1733_v16 = vadd.s32 %v1732_v57, %v1730_v21  ;;  %v14651_v57 = vld [vmem:[#allocation91_spill] sm:$0xff] }
 0x4a0   : > { %vm1974_vm11 = vcmp.eq.s32.totalorder %v7256_v6, %v1733_v16  ;;  %vm1975_vm12 = vcmp.eq.s32.totalorder %v7259_v4, %v1733_v16  ;;  %v7889_v10 = vsel %vm14059_vm10, %v1733_v16, %v7251_v47  ;;  %v1745_v63 = vpop.xlane.xlu1 %1744  ;;  %v14655_v16 = vld [vmem:[#allocation16_spill] sm:$0xff] }
 0x4a1   : > { %14638 = vst [vmem:[#allocation114_spill] sm:$0xff] %v7889_v10  ;;  %v7892_v40 = vsel %vm1974_vm11, 2147483647, %v7256_v6  ;;  %v7895_v32 = vsel %vm1975_vm12, 2147483647, %v7259_v4  ;;  %v1746_v8 = vcvt.f32.s32 %v1745_v63  ;;  %v2006_v29 = vsel %vm1974_vm11, %v6037_v39, 0.0  ;;  %v1857_v33 = vpop.xlane.xlu0 %1856 }
 0x4a2   : > { %14639 = vst [vmem:[#allocation115_spill] sm:$0xff] %v7892_v40  ;;  %14640 = vst [vmem:[#allocation116_spill] sm:$0xff] %v7895_v32  ;;  %vm2151_vm13 = vcmp.lt.s32.totalorder %v7892_v40, %v7895_v32  ;;  %v2007_v41 = vsel %vm1975_vm12, %v14641_v37, 0.0  ;;  %v1858_v47 = vcvt.f32.s32 %v1857_v33  ;;  %v1763_v63 = vcvt.f32.s32 %v7822_v36  ;;  %v14735_v10 = vld [vmem:[#allocation105_spill] sm:$0xff] }
 0x4a3   : > { %v1749_v61 = vadd.s32 %v1748_v53, %v1746_v8  ;;  %v7903_v30 = vsel %vm2151_vm13, %v7892_v40, %v7895_v32  ;;  %v7905_v6 = vadd.f32 %v2007_v41, %v2006_v29  ;;  %v14656_v29 = vld [vmem:[#allocation18_spill] sm:$0xff] }
 0x4a4   : > { %v2154_v4 = vshra.s32 %v7903_v30, 16  ;;  %v1861_v31 = vadd.s32 %v1860_v48, %v1858_v47  ;;  %v14746_v32 = vld [vmem:[#allocation26_spill] sm:$0xff] }
 0x4a5   : > { %14642 = vst [vmem:[#allocation117_spill] sm:$0xff] %v7905_v6  ;;  %vm1976_vm14 = vcmp.eq.s32.totalorder %v14643_v50, %v1749_v61  ;;  %vm1977_vm15 = vcmp.eq.s32.totalorder %v14644_v1, %v1749_v61  ;;  %v7913_v62 = vsel %vm14059_vm10, %v1749_v61, %v14645_v13 }
 0x4a6   : > { %14646 = vst [vmem:[#allocation92_spill] sm:$0xff] %v7913_v62  ;;  %v7919_v9 = vsel %vm1976_vm14, 2147483647, %v14643_v50  ;;  %v7924_v12 = vsel %vm1977_vm15, 2147483647, %v14644_v1  ;;  %v7926_v49 = vcvt.s32.f32 %v2154_v4  ;;  %vm1990_vm2 = vcmp.eq.s32.totalorder %v14649_v28, %v1861_v31  ;;  %v14658_v4 = vld [vmem:[#allocation13_spill] sm:$0xff] }
 0x4a7   : > { %14647 = vst [vmem:[#allocation93_spill] sm:$0xff] %v7919_v9  ;;  %14648 = vst [vmem:[#allocation90_spill] sm:$0xff] %v7924_v12  ;;  %vm1991_vm3 = vcmp.eq.s32.totalorder %v14650_v27, %v1861_v31  ;;  %v7933_v26 = vsel %vm14059_vm10, %v1861_v31, %v14651_v57  ;;  %vm2167_vm4 = vcmp.lt.s32.totalorder %v7919_v9, %v7924_v12  ;;  %v7940_v5 = vsel %vm1990_vm2, 2147483647, %v14649_v28  ;;  %v14659_v50 = vld [vmem:[#allocation15_spill] sm:$0xff]  ;;  %v14662_v31 = vld [vmem:[#allocation62_spill] sm:$0xff] }
 0x4a8   : > { %14652 = vst [vmem:[#allocation29_spill] sm:$0xff] %v7933_v26  ;;  %14653 = vst [vmem:[#allocation57_spill] sm:$0xff] %v7940_v5  ;;  %v7945_v21 = vsel %vm1991_vm3, 2147483647, %v14650_v27  ;;  %2157 = vmin.xlane.f32.xlu0 %v7926_v49  ;;  %v7950_v24 = vsel %vm2167_vm4, %v7919_v9, %v7924_v12  ;;  %v2008_v53 = vsel %vm1976_vm14, %v14655_v16, 0.0  ;;  %v2009_v48 = vsel %vm1977_vm15, %v14656_v29, 0.0 }
 0x4a9   : > { %14654 = vst [vmem:[#allocation91_spill] sm:$0xff] %v7945_v21  ;;  %v2170_v8 = vshra.s32 %v7950_v24, 16  ;;  %vm2279_vm5 = vcmp.lt.s32.totalorder %v7940_v5, %v7945_v21  ;;  %v7966_v47 = vadd.f32 %v2009_v48, %v2008_v53  ;;  %v2022_v36 = vsel %vm1990_vm2, %v14658_v4, 0.0  ;;  %v14672_v4 = vld [vmem:[#allocation63_spill] sm:$0xff]  ;;  %v14698_v26 = vld [vmem:[#allocation46_spill] sm:$0xff] }
 0x4aa   : > { %v1873_v33 = vpop.xlane.xlu1 %1872  ;;  %v7964_v41 = vsel %vm2279_vm5, %v7940_v5, %v7945_v21  ;;  %v2023_v13 = vsel %vm1991_vm3, %v14659_v50, 0.0  ;;  %v1876_v57 = vshll.u32 %v1875_v0, 16  ;;  %v1764_v48 = vshll.u32 %v1763_v63, 16  ;;  %v14663_v0 = vld [vmem:[#allocation60_spill] sm:$0xff]  ;;  %v14671_v50 = vld [vmem:[#allocation66_spill] sm:$0xff] }
 0x4ab   : > { %14657 = vst [vmem:[#allocation118_spill] sm:$0xff] %v7966_v47  ;;  %v1874_v6 = vcvt.f32.s32 %v1873_v33  ;;  %v7974_v35 = vcvt.s32.f32 %v2170_v8  ;;  %v2282_v61 = vshra.s32 %v7964_v41, 16  ;;  %v7977_v1 = vadd.f32 %v2023_v13, %v2022_v36  ;;  %v14661_v47 = vld [vmem:[#allocation61_spill] sm:$0xff]  ;;  %v14668_v13 = vld [vmem:[#allocation19_spill] sm:$0xff]  ;;  %v14705_v21 = vld [vmem:[#allocation74_spill] sm:$0xff] }
 0x4ac   : > { %v1779_v28 = vcvt.f32.s32 %v7826_v23  ;;  %v14667_v23 = vld [vmem:[#allocation17_spill] sm:$0xff] }
 0x4ad   : > { %14660 = vst [vmem:[#allocation119_spill] sm:$0xff] %v7977_v1  ;;  %v1877_v29 = vadd.s32 %v1876_v57, %v1874_v6  ;;  %2173 = vmin.xlane.f32.xlu1 %v7974_v35  ;;  %v7980_v53 = vcvt.s32.f32 %v2282_v61 }
 0x4ae   : > { %v1761_v8 = vpop.xlane.xlu0 %1760 }
 0x4af   : > { %vm1992_vm6 = vcmp.eq.s32.totalorder %v14661_v47, %v1877_v29  ;;  %vm1993_vm7 = vcmp.eq.s32.totalorder %v14662_v31, %v1877_v29  ;;  %v7988_v27 = vsel %vm14059_vm10, %v1877_v29, %v14663_v0  ;;  %2285 = vmin.xlane.f32.xlu0 %v7980_v53  ;;  %v1762_v63 = vcvt.f32.s32 %v1761_v8 }
 0x4b0   : > { %14664 = vst [vmem:[#allocation61_spill] sm:$0xff] %v7988_v27  ;;  %v7992_v6 = vsel %vm1992_vm6, 2147483647, %v14661_v47  ;;  %v7995_v33 = vsel %vm1993_vm7, 2147483647, %v14662_v31  ;;  %v2024_v36 = vsel %vm1992_vm6, %v14667_v23, 0.0  ;;  %v1891_v8 = vcvt.f32.s32 %v7831_v45 }
 0x4b1   : > { %14665 = vst [vmem:[#allocation62_spill] sm:$0xff] %v7992_v6  ;;  %14666 = vst [vmem:[#allocation60_spill] sm:$0xff] %v7995_v33  ;;  %vm2295_vm8 = vcmp.lt.s32.totalorder %v7992_v6, %v7995_v33  ;;  %v2025_v57 = vsel %vm1993_vm7, %v14668_v13, 0.0  ;;  %v1765_v61 = vadd.s32 %v1764_v48, %v1762_v63  ;;  %v1780_v47 = vshll.u32 %v1779_v28, 16  ;;  %v14670_v23 = vld [vmem:[#allocation65_spill] sm:$0xff] }
 0x4b2   : > { %v1777_v29 = vpop.xlane.xlu1 %1776  ;;  %v8003_v0 = vsel %vm2295_vm8, %v7992_v6, %v7995_v33  ;;  %v8005_v1 = vadd.f32 %v2025_v57, %v2024_v36  ;;  %v14676_v45 = vld [vmem:[#allocation21_spill] sm:$0xff]  ;;  %v14678_v33 = vld [vmem:[#allocation40_spill] sm:$0xff] }
 0x4b3   : > { %v1778_v27 = vcvt.f32.s32 %v1777_v29  ;;  %v2298_v31 = vshra.s32 %v8003_v0, 16  ;;  %vm1978_vm9 = vcmp.eq.s32.totalorder %v14670_v23, %v1765_v61  ;;  %vm1979_vm11 = vcmp.eq.s32.totalorder %v14671_v50, %v1765_v61 }
 0x4b4   : > { %14669 = vst [vmem:[#allocation120_spill] sm:$0xff] %v8005_v1  ;;  %v8014_v48 = vsel %vm14059_vm10, %v1765_v61, %v14672_v4  ;;  %v8017_v63 = vsel %vm1978_vm9, 2147483647, %v14670_v23  ;;  %v8020_v36 = vsel %vm1979_vm11, 2147483647, %v14671_v50  ;;  %v2010_v29 = vsel %vm1978_vm9, %v14676_v45, 0.0 }
 0x4b5   : > { %14673 = vst [vmem:[#allocation65_spill] sm:$0xff] %v8014_v48  ;;  %14674 = vst [vmem:[#allocation66_spill] sm:$0xff] %v8017_v63  ;;  %v1781_v28 = vadd.s32 %v1780_v47, %v1778_v27  ;;  %v8022_v57 = vcvt.s32.f32 %v2298_v31  ;;  %vm2183_vm12 = vcmp.lt.s32.totalorder %v8017_v63, %v8020_v36  ;;  %v14677_v1 = vld [vmem:[#allocation24_spill] sm:$0xff]  ;;  %v14679_v4 = vld [vmem:[#allocation41_spill] sm:$0xff]  ;;  %v1892_v27 = vshll.u32 %v1891_v8, 16 }
 0x4b6   : > { %14675 = vst [vmem:[#allocation63_spill] sm:$0xff] %v8020_v36  ;;  %v2011_v13 = vsel %vm1979_vm11, %v14677_v1, 0.0  ;;  %v14680_v61 = vld [vmem:[#allocation38_spill] sm:$0xff]  ;;  %v8038_v50 = vsel %vm2183_vm12, %v8017_v63, %v8020_v36  ;;  %v14686_v8 = vld [vmem:[#allocation31_spill] sm:$0xff]  ;;  %v1907_v63 = vcvt.f32.s32 %v7837_v11  ;;  %v1795_v11 = vcvt.f32.s32 %v7842_v22 }
 0x4b7   : > { %vm1980_vm13 = vcmp.eq.s32.totalorder %v14678_v33, %v1781_v28  ;;  %vm1981_vm14 = vcmp.eq.s32.totalorder %v14679_v4, %v1781_v28  ;;  %v8033_v23 = vsel %vm14059_vm10, %v1781_v28, %v14680_v61  ;;  %2301 = vmin.xlane.f32.xlu1 %v8022_v57  ;;  %v1889_v1 = vpop.xlane.xlu0 %1888  ;;  %v2186_v45 = vshra.s32 %v8038_v50, 16  ;;  %v14685_v61 = vld [vmem:[#allocation27_spill] sm:$0xff] }
 0x4b8   : > { %14681 = vst [vmem:[#allocation40_spill] sm:$0xff] %v8033_v23  ;;  %v8041_v47 = vsel %vm1980_vm13, 2147483647, %v14678_v33  ;;  %v8044_v31 = vsel %vm1981_vm14, 2147483647, %v14679_v4  ;;  %v1890_v48 = vcvt.f32.s32 %v1889_v1  ;;  %v8049_v28 = vadd.f32 %v2011_v13, %v2010_v29  ;;  %v14688_v13 = vld [vmem:[#allocation72_spill] sm:$0xff] }
 0x4b9   : > { %14682 = vst [vmem:[#allocation41_spill] sm:$0xff] %v8041_v47  ;;  %14683 = vst [vmem:[#allocation38_spill] sm:$0xff] %v8044_v31  ;;  %vm2199_vm15 = vcmp.lt.s32.totalorder %v8041_v47, %v8044_v31  ;;  %v2012_v23 = vsel %vm1980_vm13, %v14685_v61, 0.0  ;;  %v8052_v36 = vcvt.s32.f32 %v2186_v45  ;;  %v2013_v4 = vsel %vm1981_vm14, %v14686_v8, 0.0  ;;  %v14689_v29 = vld [vmem:[#allocation70_spill] sm:$0xff]  ;;  %v14690_v45 = vld [vmem:[#allocation68_spill] sm:$0xff] }
 0x4ba   : > { %14684 = vst [vmem:[#allocation121_spill] sm:$0xff] %v8049_v28  ;;  %v8056_v33 = vsel %vm2199_vm15, %v8041_v47, %v8044_v31  ;;  %v1893_v6 = vadd.s32 %v1892_v27, %v1890_v48  ;;  %v8061_v16 = vadd.f32 %v2013_v4, %v2012_v23  ;;  %v14694_v4 = vld [vmem:[#allocation20_spill] sm:$0xff]  ;;  %v1908_v8 = vshll.u32 %v1907_v63, 16  ;;  %v14697_v47 = vld [vmem:[#allocation75_spill] sm:$0xff] }
 0x4bb   : > { %v2202_v1 = vshra.s32 %v8056_v33, 16  ;;  %2189 = vmin.xlane.f32.xlu0 %v8052_v36  ;;  %v1796_v63 = vshll.u32 %v1795_v11, 16 }
 0x4bc   : > { %14687 = vst [vmem:[#allocation122_spill] sm:$0xff] %v8061_v16  ;;  %vm1994_vm2 = vcmp.eq.s32.totalorder %v14688_v13, %v1893_v6  ;;  %vm1995_vm3 = vcmp.eq.s32.totalorder %v14689_v29, %v1893_v6  ;;  %v8069_v28 = vsel %vm14059_vm10, %v1893_v6, %v14690_v45  ;;  %v14695_v6 = vld [vmem:[#allocation22_spill] sm:$0xff] }
 0x4bd   : > { %14691 = vst [vmem:[#allocation72_spill] sm:$0xff] %v8069_v28  ;;  %v8071_v61 = vcvt.s32.f32 %v2202_v1  ;;  %v8075_v48 = vsel %vm1994_vm2, 2147483647, %v14688_v13  ;;  %v8078_v23 = vsel %vm1995_vm3, 2147483647, %v14689_v29  ;;  %v1905_v27 = vpop.xlane.xlu1 %1904  ;;  %v2026_v16 = vsel %vm1994_vm2, %v14694_v4, 0.0 }
 0x4be   : > { %14692 = vst [vmem:[#allocation70_spill] sm:$0xff] %v8075_v48  ;;  %14693 = vst [vmem:[#allocation68_spill] sm:$0xff] %v8078_v23  ;;  %v1906_v31 = vcvt.f32.s32 %v1905_v27  ;;  %vm2311_vm4 = vcmp.lt.s32.totalorder %v8075_v48, %v8078_v23  ;;  %v2027_v1 = vsel %vm1995_vm3, %v14695_v6, 0.0  ;;  %v1811_v29 = vcvt.f32.s32 %v7846_v56  ;;  %v14699_v6 = vld [vmem:[#allocation43_spill] sm:$0xff] }
 0x4bf   : > { %2205 = vmin.xlane.f32.xlu1 %v8071_v61  ;;  %v8087_v22 = vsel %vm2311_vm4, %v8075_v48, %v8078_v23  ;;  %v8089_v13 = vadd.f32 %v2027_v1, %v2026_v16  ;;  %v1923_v27 = vcvt.f32.s32 %v7852_v38  ;;  %v1939_v1 = vcvt.f32.s32 %v7856_v52  ;;  %v14704_v48 = vld [vmem:[#allocation99_spill] sm:$0xff] }
 0x4c0   : > { %v1909_v45 = vadd.s32 %v1908_v8, %v1906_v31  ;;  %v2314_v4 = vshra.s32 %v8087_v22, 16  ;;  %v1812_v11 = vshll.u32 %v1811_v29, 16 }
 0x4c1   : > { %14696 = vst [vmem:[#allocation123_spill] sm:$0xff] %v8089_v13  ;;  %v1793_v28 = vpop.xlane.xlu0 %1792  ;;  %v1924_v52 = vshll.u32 %v1923_v27, 16 }
 0x4c2   : > { %vm1996_vm5 = vcmp.eq.s32.totalorder %v14697_v47, %v1909_v45  ;;  %vm1997_vm6 = vcmp.eq.s32.totalorder %v14698_v26, %v1909_v45  ;;  %v8099_v23 = vsel %vm14059_vm10, %v1909_v45, %v14699_v6  ;;  %v1794_v16 = vcvt.f32.s32 %v1793_v28 }
 0x4c3   : > { %14700 = vst [vmem:[#allocation75_spill] sm:$0xff] %v8099_v23  ;;  %v8105_v56 = vsel %vm1996_vm5, 2147483647, %v14697_v47  ;;  %v8110_v38 = vsel %vm1997_vm6, 2147483647, %v14698_v26  ;;  %v1809_v31 = vpop.xlane.xlu1 %1808  ;;  %v8112_v8 = vcvt.s32.f32 %v2314_v4  ;;  %v14703_v23 = vld [vmem:[#allocation47_spill] sm:$0xff] }
 0x4c4   : > { %14701 = vst [vmem:[#allocation46_spill] sm:$0xff] %v8105_v56  ;;  %14702 = vst [vmem:[#allocation43_spill] sm:$0xff] %v8110_v38  ;;  %v1797_v13 = vadd.s32 %v1796_v63, %v1794_v16  ;;  %v1810_v6 = vcvt.f32.s32 %v1809_v31  ;;  %vm2327_vm7 = vcmp.lt.s32.totalorder %v8105_v56, %v8110_v38  ;;  %v1940_v63 = vshll.u32 %v1939_v1, 16  ;;  %v14718_v47 = vld [vmem:[#allocation54_spill] sm:$0xff] }
 0x4c5   : > { %2317 = vmin.xlane.f32.xlu0 %v8112_v8  ;;  %v8119_v28 = vsel %vm2327_vm7, %v8105_v56, %v8110_v38  ;;  %v14709_v38 = vld [vmem:[#allocation50_spill] sm:$0xff]  ;;  %v14710_v56 = vld [vmem:[#allocation51_spill] sm:$0xff] }
 0x4c6   : > { %vm1982_vm8 = vcmp.eq.s32.totalorder %v14703_v23, %v1797_v13  ;;  %vm1983_vm9 = vcmp.eq.s32.totalorder %v14704_v48, %v1797_v13  ;;  %v8126_v4 = vsel %vm14059_vm10, %v1797_v13, %v14705_v21  ;;  %v1813_v29 = vadd.s32 %v1812_v11, %v1810_v6  ;;  %v14711_v21 = vld [vmem:[#allocation49_spill] sm:$0xff] }
 0x4c7   : > { %14706 = vst [vmem:[#allocation47_spill] sm:$0xff] %v8126_v4  ;;  %v8131_v27 = vsel %vm1982_vm8, 2147483647, %v14703_v23  ;;  %v8136_v16 = vsel %vm1983_vm9, 2147483647, %v14704_v48  ;;  %v2330_v31 = vshra.s32 %v8119_v28, 16 }
 0x4c8   : > { %14707 = vst [vmem:[#allocation99_spill] sm:$0xff] %v8131_v27  ;;  %14708 = vst [vmem:[#allocation74_spill] sm:$0xff] %v8136_v16  ;;  %vm1984_vm11 = vcmp.eq.s32.totalorder %v14709_v38, %v1813_v29  ;;  %vm1985_vm12 = vcmp.eq.s32.totalorder %v14710_v56, %v1813_v29  ;;  %v8144_v1 = vsel %vm14059_vm10, %v1813_v29, %v14711_v21  ;;  %v1921_v11 = vpop.xlane.xlu0 %1920  ;;  %v1827_v21 = vcvt.f32.s32 %v7862_v17 }
 0x4c9   : > { %14712 = vst [vmem:[#allocation50_spill] sm:$0xff] %v8144_v1  ;;  %vm2215_vm13 = vcmp.lt.s32.totalorder %v8131_v27, %v8136_v16  ;;  %v8151_v6 = vsel %vm1984_vm11, 2147483647, %v14709_v38  ;;  %v8156_v4 = vsel %vm1985_vm12, 2147483647, %v14710_v56  ;;  %v1922_v5 = vcvt.f32.s32 %v1921_v11  ;;  %v14727_v38 = vld [vmem:[#allocation79_spill] sm:$0xff] }
 0x4ca   : > { %14713 = vst [vmem:[#allocation51_spill] sm:$0xff] %v8151_v6  ;;  %14714 = vst [vmem:[#allocation49_spill] sm:$0xff] %v8156_v4  ;;  %v8158_v62 = vcvt.s32.f32 %v2330_v31  ;;  %v1843_v1 = vcvt.f32.s32 %v7866_v18  ;;  %v8164_v12 = vsel %vm2215_vm13, %v8131_v27, %v8136_v16  ;;  %vm2231_vm14 = vcmp.lt.s32.totalorder %v8151_v6, %v8156_v4  ;;  %v14715_v16 = vld [vmem:[#allocation34_spill] sm:$0xff]  ;;  %v14716_v27 = vld [vmem:[#allocation25_spill] sm:$0xff] }
 0x4cb   : > { %v8168_v9 = vadd.s32 %v1924_v52, %v1922_v5  ;;  %v2218_v37 = vshra.s32 %v8164_v12, 16  ;;  %v8174_v31 = vsel %vm2231_vm14, %v8151_v6, %v8156_v4  ;;  %v2028_v17 = vsel %vm1996_vm5, %v14601_v54, 0.0  ;;  %v14717_v6 = vld [vmem:[#allocation53_spill] sm:$0xff]  ;;  %v14719_v54 = vld [vmem:[#allocation100_spill] sm:$0xff] }
 0x4cc   : > { %2333 = vmin.xlane.f32.xlu1 %v8158_v62  ;;  %v2234_v11 = vshra.s32 %v8174_v31, 16  ;;  %v2014_v5 = vsel %vm1982_vm8, %v14715_v16, 0.0  ;;  %v2015_v52 = vsel %vm1983_vm9, %v14595_v34, 0.0  ;;  %v2029_v4 = vsel %vm1997_vm6, %v14716_v27, 0.0 }
 0x4cd   : > { %v1937_v18 = vpop.xlane.xlu1 %1936  ;;  %vm1998_vm15 = vcmp.eq.s32.totalorder %v14717_v6, %v8168_v9  ;;  %vm1999_vm2 = vcmp.eq.s32.totalorder %v14718_v47, %v8168_v9  ;;  %v8197_v23 = vsel %vm14059_vm10, %v8168_v9, %v14719_v54  ;;  %v8211_v13 = vcvt.s32.f32 %v2218_v37 }
 0x4ce   : > { %14720 = vst [vmem:[#allocation53_spill] sm:$0xff] %v8197_v23  ;;  %v1938_v16 = vcvt.f32.s32 %v1937_v18  ;;  %v8203_v48 = vsel %vm1998_vm15, 2147483647, %v14717_v6  ;;  %v8209_v26 = vsel %vm1999_vm2, 2147483647, %v14718_v47  ;;  %v8213_v45 = vcvt.s32.f32 %v2234_v11  ;;  %v14723_v18 = vld [vmem:[#allocation39_spill] sm:$0xff] }
 0x4cf   : > { %14721 = vst [vmem:[#allocation54_spill] sm:$0xff] %v8203_v48  ;;  %14722 = vst [vmem:[#allocation100_spill] sm:$0xff] %v8209_v26  ;;  %v1955_v54 = vcvt.f32.s32 %v7871_v7  ;;  %vm2343_vm3 = vcmp.lt.s32.totalorder %v8203_v48, %v8209_v26  ;;  %v2016_v23 = vsel %vm1984_vm11, %v14723_v18, 0.0  ;;  %2221 = vmin.xlane.f32.xlu0 %v8211_v13  ;;  %v8229_v11 = vadd.f32 %v2015_v52, %v2014_v5  ;;  %v14725_v7 = vld [vmem:[#allocation42_spill] sm:$0xff]  ;;  %v14728_v18 = vld [vmem:[#allocation103_spill] sm:$0xff] }
 0x4d0   : > { %v8216_v34 = vadd.s32 %v1940_v63, %v1938_v16  ;;  %2237 = vmin.xlane.f32.xlu1 %v8213_v45  ;;  %v8227_v37 = vsel %vm2343_vm3, %v8203_v48, %v8209_v26  ;;  %v2017_v63 = vsel %vm1985_vm12, %v14725_v7, 0.0  ;;  %v8234_v16 = vadd.f32 %v2029_v4, %v2028_v17 }
 0x4d1   : > { %14724 = vst [vmem:[#allocation124_spill] sm:$0xff] %v8229_v11  ;;  %v2346_v52 = vshra.s32 %v8227_v37, 16  ;;  %v1828_v11 = vshll.u32 %v1827_v21, 16  ;;  %v1971_v17 = vcvt.f32.s32 %v7876_v51  ;;  %v8264_v21 = vadd.f32 %v2017_v63, %v2016_v23 }
 0x4d2   : > { %14726 = vst [vmem:[#allocation125_spill] sm:$0xff] %v8234_v16  ;;  %vm2000_vm4 = vcmp.eq.s32.totalorder %v7621_v25, %v8216_v34  ;;  %vm2001_vm5 = vcmp.eq.s32.totalorder %v14727_v38, %v8216_v34  ;;  %v8244_v26 = vsel %vm14059_vm10, %v8216_v34, %v14728_v18  ;;  %v1825_v5 = vpop.xlane.xlu0 %1824  ;;  %v1844_v7 = vshll.u32 %v1843_v1, 16 }
 0x4d3   : > { %14729 = vst [vmem:[#allocation79_spill] sm:$0xff] %v8244_v26  ;;  %v8251_v56 = vsel %vm2000_vm4, 2147483647, %v7621_v25  ;;  %v8257_v4 = vsel %vm2001_vm5, 2147483647, %v14727_v38  ;;  %v1826_v29 = vcvt.f32.s32 %v1825_v5  ;;  %v1841_v18 = vpop.xlane.xlu1 %1840  ;;  %v8260_v16 = vcvt.s32.f32 %v2346_v52  ;;  %14732 = vst [vmem:[#allocation127_spill] sm:$0xff] %v8264_v21 }
 0x4d4   : > { %14730 = vst [vmem:[#allocation103_spill] sm:$0xff] %v8251_v56  ;;  %14731 = vst [vmem:[#allocation126_spill] sm:$0xff] %v8257_v4  ;;  %vm2359_vm6 = vcmp.lt.s32.totalorder %v8251_v56, %v8257_v4  ;;  %v1842_v48 = vcvt.f32.s32 %v1841_v18  ;;  %v1956_v39 = vshll.u32 %v1955_v54, 16  ;;  %v14733_v5 = vld [vmem:[#allocation83_spill] sm:$0xff]  ;;  %v14734_v52 = vld [vmem:[#allocation106_spill] sm:$0xff]  ;;  %v2032_v6 = vsel %vm2000_vm4, %v14624_v59, 0.0 }
 0x4d5   : > { %v1829_v26 = vadd.s32 %v1828_v11, %v1826_v29  ;;  %v8268_v27 = vsel %vm2359_vm6, %v8251_v56, %v8257_v4  ;;  %2349 = vmin.xlane.f32.xlu0 %v8260_v16  ;;  %v1972_v11 = vshll.u32 %v1971_v17, 16  ;;  %v14740_v18 = vld [vmem:[#allocation107_spill] sm:$0xff]  ;;  %v14741_v21 = vld [vmem:[#allocation108_spill] sm:$0xff] }
 0x4d6   : > { %v2362_v51 = vshra.s32 %v8268_v27, 16  ;;  %v1845_v1 = vadd.s32 %v1844_v7, %v1842_v48  ;;  %v14745_v4 = vld [vmem:[#allocation44_spill] sm:$0xff] }
 0x4d7   : > { %vm1986_vm7 = vcmp.eq.s32.totalorder %v14733_v5, %v1829_v26  ;;  %vm1987_vm8 = vcmp.eq.s32.totalorder %v14734_v52, %v1829_v26  ;;  %v8277_v23 = vsel %vm14059_vm10, %v1829_v26, %v14735_v10  ;;  %v14742_v10 = vld [vmem:[#allocation82_spill] sm:$0xff] }
 0x4d8   : > { %14736 = vst [vmem:[#allocation83_spill] sm:$0xff] %v8277_v23  ;;  %v8282_v63 = vsel %vm1986_vm7, 2147483647, %v14733_v5  ;;  %v8287_v54 = vsel %vm1987_vm8, 2147483647, %v14734_v52  ;;  %v8289_v29 = vcvt.s32.f32 %v2362_v51  ;;  %vm1988_vm9 = vcmp.eq.s32.totalorder %v14740_v18, %v1845_v1  ;;  %v14748_v26 = vld [vmem:[#allocation30_spill] sm:$0xff] }
 0x4d9   : > { %14737 = vst [vmem:[#allocation106_spill] sm:$0xff] %v8282_v63  ;;  %14738 = vst [vmem:[#allocation105_spill] sm:$0xff] %v8287_v54  ;;  %vm1989_vm11 = vcmp.eq.s32.totalorder %v14741_v21, %v1845_v1  ;;  %v8296_v48 = vsel %vm14059_vm10, %v1845_v1, %v14742_v10  ;;  %v1953_v7 = vpop.xlane.xlu0 %1952  ;;  %vm2247_vm12 = vcmp.lt.s32.totalorder %v8282_v63, %v8287_v54  ;;  %v8303_v17 = vsel %vm1988_vm9, 2147483647, %v14740_v18 }
 0x4da   : > { %14739 = vst [vmem:[#allocation128_spill] sm:$0xff] %v8289_v29  ;;  %14743 = vst [vmem:[#allocation107_spill] sm:$0xff] %v8296_v48  ;;  %v8308_v51 = vsel %vm1989_vm11, 2147483647, %v14741_v21  ;;  %v1954_v23 = vcvt.f32.s32 %v1953_v7  ;;  %2365 = vmin.xlane.f32.xlu1 %v8289_v29  ;;  %v8313_v10 = vsel %vm2247_vm12, %v8282_v63, %v8287_v54  ;;  %v2018_v56 = vsel %vm1986_vm7, %v14745_v4, 0.0  ;;  %v14747_v63 = vld [vmem:[#allocation28_spill] sm:$0xff] }
 0x4db   : > { %14744 = vst [vmem:[#allocation108_spill] sm:$0xff] %v8313_v10  ;;  %v2250_v48 = vshra.s32 %v8313_v10, 16  ;;  %vm2263_vm13 = vcmp.lt.s32.totalorder %v8303_v17, %v8308_v51  ;;  %v2030_v7 = vsel %vm1998_vm15, %v14746_v32, 0.0  ;;  %v2019_v54 = vsel %vm1987_vm8, %v14627_v60, 0.0 }
 0x4dc   : > { %v1957_v40 = vadd.s32 %v1956_v39, %v1954_v23  ;;  %v8327_v29 = vsel %vm2263_vm13, %v8303_v17, %v8308_v51  ;;  %v2031_v5 = vsel %vm1999_vm2, %v14747_v63, 0.0  ;;  %v2020_v39 = vsel %vm1988_vm9, %v14628_v44, 0.0 }
 0x4dd   : > { %v8336_v4 = vcvt.s32.f32 %v2250_v48  ;;  %v2266_v10 = vshra.s32 %v8327_v29, 16  ;;  %v1969_v47 = vpop.xlane.xlu1 %1968  ;;  %v8353_v52 = vadd.f32 %v2019_v54, %v2018_v56  ;;  %v2021_v56 = vsel %vm1989_vm11, %v14630_v55, 0.0 }
 0x4de   : > { %vm2002_vm14 = vcmp.eq.s32.totalorder %v7739_v2, %v1957_v40  ;;  %vm2003_vm15 = vcmp.eq.s32.totalorder %v7744_v15, %v1957_v40  ;;  %v8351_v9 = vsel %vm14059_vm10, %v1957_v40, %v14748_v26  ;;  %v1970_v18 = vcvt.f32.s32 %v1969_v47 }
 0x4df   : > { %14749 = vst [vmem:[#allocation82_spill] sm:$0xff] %v8353_v52  ;;  %v8358_v23 = vsel %vm2002_vm14, 2147483647, %v7739_v2  ;;  %v8363_v25 = vsel %vm2003_vm15, 2147483647, %v7744_v15  ;;  %2253 = vmin.xlane.f32.xlu0 %v8336_v4  ;;  %v8366_v48 = vcvt.s32.f32 %v2266_v10  ;;  %v8373_v54 = vadd.f32 %v2031_v5, %v2030_v7  ;;  %v14752_v10 = vld [vmem:[#allocation32_spill] sm:$0xff] }
 0x4e0   : > { %vm2375_vm2 = vcmp.lt.s32.totalorder %v8358_v23, %v8363_v25  ;;  %v1973_v26 = vadd.s32 %v1972_v11, %v1970_v18  ;;  %v8380_v47 = vadd.f32 %v2021_v56, %v2020_v39  ;;  %v2033_v63 = vsel %vm2001_vm5, %v14752_v10, 0.0 }
 0x4e1   : > { %14750 = vst [vmem:[#allocation30_spill] sm:$0xff] %v8373_v54  ;;  %2269 = vmin.xlane.f32.xlu1 %v8366_v48  ;;  %v8378_v52 = vsel %vm2375_vm2, %v8358_v23, %v8363_v25  ;;  %v8387_v21 = vadd.f32 %v2033_v63, %v2032_v6  ;;  %v2034_v1 = vsel %vm2002_vm14, %v14518_v42, 0.0  ;;  %v2035_v34 = vsel %vm2003_vm15, %v14633_v43, 0.0 }
 0x4e2   : > { %14751 = vst [vmem:[#allocation129_spill] sm:$0xff] %v8380_v47  ;;  %v2378_v32 = vshra.s32 %v8378_v52, 16  ;;  %vm2004_vm3 = vcmp.eq.s32.totalorder %v7773_v3, %v1973_v26  ;;  %vm2005_vm4 = vcmp.eq.s32.totalorder %v7782_v20, %v1973_v26  ;;  %v8397_v11 = vsel %vm14059_vm10, %v1973_v26, %v7767_v14 }
 0x4e3   : > { %14753 = vst [vmem:[#allocation130_spill] sm:$0xff] %v8387_v21  ;;  %v8403_v38 = vsel %vm2004_vm3, 2147483647, %v7773_v3  ;;  %v8406_v63 = vsel %vm2005_vm4, 2147483647, %v7782_v20  ;;  %v8412_v7 = vadd.f32 %v2035_v34, %v2034_v1  ;;  %v2036_v14 = vsel %vm2004_vm3, %v14634_v46, 0.0 }
 0x4e4   : > { %v8408_v2 = vcvt.s32.f32 %v2378_v32  ;;  %vm2391_vm5 = vcmp.lt.s32.totalorder %v8403_v38, %v8406_v63  ;;  %v2037_v5 = vsel %vm2005_vm4, %v14636_v19, 0.0  ;;  %v2153_v32 = vand.u32 65535, %v7903_v30 }
 0x4e5   : > { %14754 = vst [vmem:[#allocation131_spill] sm:$0xff] %v8412_v7  ;;  %v8419_v15 = vsel %vm2391_vm5, %v8403_v38, %v8406_v63  ;;  %v8421_v3 = vadd.f32 %v2037_v5, %v2036_v14  ;;  %v2169_v18 = vand.u32 65535, %v7950_v24  ;;  %v2281_v26 = vand.u32 65535, %v7964_v41  ;;  %v14783_v7 = vld [vmem:[#allocation15_spill] sm:$0xff] }
 0x4e6   : > { %2381 = vmin.xlane.f32.xlu0 %v8408_v2  ;;  %v2394_v20 = vshra.s32 %v8419_v15, 16  ;;  %v2155_v6 = vcvt.s32.f32 %v2153_v32  ;;  %v2297_v24 = vand.u32 65535, %v8003_v0 }
 0x4e7   : > { %14755 = vst [vmem:[#allocation132_spill] sm:$0xff] %v8421_v3  ;;  %v2171_v34 = vcvt.s32.f32 %v2169_v18  ;;  %v2283_v5 = vcvt.s32.f32 %v2281_v26 }
 0x4e8   : > { %v8424_v40 = vcvt.s32.f32 %v2394_v20  ;;  %v2299_v41 = vcvt.s32.f32 %v2297_v24 }
 0x4ea   : > { %2397 = vmin.xlane.f32.xlu1 %v8424_v40 }
 0x531   : > { %v8428_v39 = vpop.xlane.xlu0 %2157 }
 0x532   : > { %vm2159_vm6 = vcmp.eq.f32.partialorder %v7926_v49, %v8428_v39 }
 0x533   : > { %v2160_v56 = vsel %vm2159_vm6, %v2155_v6, inf  ;;  %v2201_v6 = vand.u32 65535, %v8056_v33 }
 0x534   : > { %2161 = vmin.xlane.f32.xlu0 %v2160_v56 }
 0x535   : > { %v2203_v26 = vcvt.s32.f32 %v2201_v6 }
 0x536   : > { %v8434_v1 = vpop.xlane.xlu1 %2173 }
 0x537   : > { %vm2175_vm7 = vcmp.eq.f32.partialorder %v7974_v35, %v8434_v1  ;;  %v2185_v35 = vand.u32 65535, %v8038_v50  ;;  %v2313_v50 = vand.u32 65535, %v8087_v22  ;;  %v2233_v22 = vand.u32 65535, %v8174_v31 }
 0x538   : > { %v8438_v14 = vpop.xlane.xlu0 %2285  ;;  %v2176_v30 = vsel %vm2175_vm7, %v2171_v34, inf }
 0x539   : > { %2177 = vmin.xlane.f32.xlu1 %v2176_v30  ;;  %vm2287_vm8 = vcmp.eq.f32.partialorder %v7980_v53, %v8438_v14  ;;  %v2187_v56 = vcvt.s32.f32 %v2185_v35  ;;  %v2315_v33 = vcvt.s32.f32 %v2313_v50 }
 0x53a   : > { %v2288_v49 = vsel %vm2287_vm8, %v2283_v5, inf }
 0x53b   : > { %2289 = vmin.xlane.f32.xlu0 %v2288_v49 }
 0x540   : > { %v8443_v20 = vpop.xlane.xlu1 %2301 }
 0x541   : > { %vm2303_vm9 = vcmp.eq.f32.partialorder %v8022_v57, %v8443_v20 }
 0x542   : > { %v2304_v32 = vsel %vm2303_vm9, %v2299_v41, inf  ;;  %vm14058_vm9 = vcmp.eq.s32.totalorder %v14524_v58, 3 }
 0x543   : > { %2305 = vmin.xlane.f32.xlu1 %v2304_v32  ;;  %v2235_v32 = vcvt.s32.f32 %v2233_v22 }
 0x544   : > { %v8449_v18 = vpop.xlane.xlu0 %2189 }
 0x545   : > { %vm2191_vm11 = vcmp.eq.f32.partialorder %v8052_v36, %v8449_v18  ;;  %v2329_v36 = vand.u32 65535, %v8119_v28 }
 0x546   : > { %v2192_v53 = vsel %vm2191_vm11, %v2187_v56, inf  ;;  %v2361_v56 = vand.u32 65535, %v8268_v27 }
 0x547   : > { %2193 = vmin.xlane.f32.xlu0 %v2192_v53  ;;  %v2331_v49 = vcvt.s32.f32 %v2329_v36 }
 0x548   : > { %v8453_v0 = vpop.xlane.xlu1 %2205 }
 0x549   : > { %vm2207_vm12 = vcmp.eq.f32.partialorder %v8071_v61, %v8453_v0  ;;  %v2217_v61 = vand.u32 65535, %v8164_v12 }
 0x54a   : > { %v2208_v57 = vsel %vm2207_vm12, %v2203_v26, inf  ;;  %v2363_v26 = vcvt.s32.f32 %v2361_v56 }
 0x54b   : > { %2209 = vmin.xlane.f32.xlu1 %v2208_v57  ;;  %v2219_v35 = vcvt.s32.f32 %v2217_v61  ;;  %v2377_v61 = vand.u32 65535, %v8378_v52  ;;  %v2164_v52 = vcvt.f32.s32 %v8428_v39 }
 0x54e   : > { %v8458_v34 = vpop.xlane.xlu0 %2317 }
 0x54f   : > { %vm2319_vm13 = vcmp.eq.f32.partialorder %v8112_v8, %v8458_v34 }
 0x550   : > { %v2320_v30 = vsel %vm2319_vm13, %v2315_v33, inf  ;;  %v2265_v33 = vand.u32 65535, %v8327_v29  ;;  %v2379_v29 = vcvt.s32.f32 %v2377_v61 }
 0x551   : > { %2321 = vmin.xlane.f32.xlu0 %v2320_v30 }
 0x555   : > { %v8463_v5 = vpop.xlane.xlu1 %2333 }
 0x556   : > { %vm2335_vm14 = vcmp.eq.f32.partialorder %v8158_v62, %v8463_v5  ;;  %v2345_v62 = vand.u32 65535, %v8227_v37  ;;  %v14757_v37 = vld [vmem:[#allocation108_spill] sm:$0xff] }
 0x557   : > { %v2336_v24 = vsel %vm2335_vm14, %v2331_v49, inf  ;;  %v2249_v57 = vand.u32 65535, %v14757_v37  ;;  %v2267_v49 = vcvt.s32.f32 %v2265_v33 }
 0x558   : > { %2337 = vmin.xlane.f32.xlu1 %v2336_v24  ;;  %v8469_v41 = vpop.xlane.xlu0 %2221  ;;  %v2347_v6 = vcvt.s32.f32 %v2345_v62 }
 0x559   : > { %v8471_v8 = vpop.xlane.xlu1 %2237  ;;  %vm2223_vm15 = vcmp.eq.f32.partialorder %v8211_v13, %v8469_v41  ;;  %v2251_v27 = vcvt.s32.f32 %v2249_v57 }
 0x55a   : > { %vm2239_vm2 = vcmp.eq.f32.partialorder %v8213_v45, %v8471_v8  ;;  %v2224_v28 = vsel %vm2223_vm15, %v2219_v35, inf  ;;  %v14756_v45 = vld [vmem:[#allocation128_spill] sm:$0xff] }
 0x55b   : > { %v2240_v12 = vsel %vm2239_vm2, %v2235_v32, inf  ;;  %2225 = vmin.xlane.f32.xlu0 %v2224_v28 }
 0x55c   : > { %2241 = vmin.xlane.f32.xlu1 %v2240_v12  ;;  %v2165_v12 = vshll.u32 %v2164_v52, 16  ;;  %v14768_v52 = vld [vmem:[#allocation90_spill] sm:$0xff] }
 0x55e   : > { %v8478_v31 = vpop.xlane.xlu0 %2349 }
 0x55f   : > { %vm2351_vm3 = vcmp.eq.f32.partialorder %v8260_v16, %v8478_v31 }
 0x560   : > { %v2352_v53 = vsel %vm2351_vm3, %v2347_v6, inf  ;;  %v2180_v6 = vcvt.f32.s32 %v8434_v1 }
 0x561   : > { %2353 = vmin.xlane.f32.xlu0 %v2352_v53 }
 0x562   : > { %v2181_v53 = vshll.u32 %v2180_v6, 16 }
 0x563   : > { %v8483_v13 = vpop.xlane.xlu1 %2365 }
 0x564   : > { %vm2367_vm4 = vcmp.eq.f32.partialorder %v14756_v45, %v8483_v13  ;;  %v14759_v45 = vld [vmem:[#allocation116_spill] sm:$0xff] }
 0x565   : > { %v2368_v50 = vsel %vm2367_vm4, %v2363_v26, inf  ;;  %v14758_v26 = vld [vmem:[#allocation115_spill] sm:$0xff] }
 0x566   : > { %2369 = vmin.xlane.f32.xlu1 %v2368_v50 }
 0x568   : > { %v8489_v30 = vpop.xlane.xlu0 %2253 }
 0x569   : > { %vm2255_vm5 = vcmp.eq.f32.partialorder %v8336_v4, %v8489_v30  ;;  %v2393_v4 = vand.u32 65535, %v8419_v15 }
 0x56a   : > { %v2256_v16 = vsel %vm2255_vm5, %v2251_v27, inf  ;;  %v8493_v36 = vpop.xlane.xlu1 %2269 }
 0x56b   : > { %2257 = vmin.xlane.f32.xlu0 %v2256_v16  ;;  %vm2271_vm6 = vcmp.eq.f32.partialorder %v8366_v48, %v8493_v36  ;;  %v2395_v62 = vcvt.s32.f32 %v2393_v4 }
 0x56c   : > { %v2272_v22 = vsel %vm2271_vm6, %v2267_v49, inf  ;;  %v14765_v49 = vld [vmem:[#allocation14_spill] sm:$0xff] }
 0x56d   : > { %2273 = vmin.xlane.f32.xlu1 %v2272_v22 }
 0x56f   : > { %v8498_v24 = vpop.xlane.xlu0 %2381 }
 0x570   : > { %vm2383_vm7 = vcmp.eq.f32.partialorder %v8408_v2, %v8498_v24  ;;  %v2292_v2 = vcvt.f32.s32 %v8438_v14  ;;  %v14764_v14 = vld [vmem:[#allocation12_spill] sm:$0xff] }
 0x571   : > { %v2384_v35 = vsel %vm2383_vm7, %v2379_v29, inf }
 0x572   : > { %2385 = vmin.xlane.f32.xlu0 %v2384_v35  ;;  %v2293_v27 = vshll.u32 %v2292_v2, 16 }
 0x573   : > { %v8503_v32 = vpop.xlane.xlu1 %2397 }
 0x574   : > { %vm2399_vm8 = vcmp.eq.f32.partialorder %v8424_v40, %v8503_v32  ;;  %v14760_v40 = vld [vmem:[#allocation114_spill] sm:$0xff] }
 0x575   : > { %v2400_v48 = vsel %vm2399_vm8, %v2395_v62, inf }
 0x576   : > { %2401 = vmin.xlane.f32.xlu1 %v2400_v48  ;;  %v14767_v48 = vld [vmem:[#allocation93_spill] sm:$0xff] }
 0x5bd   : > { %v2162_v28 = vpop.xlane.xlu0 %2161 }
 0x5be   : > { %v2163_v56 = vcvt.f32.s32 %v2162_v28  ;;  %v14769_v28 = vld [vmem:[#allocation92_spill] sm:$0xff] }
 0x5c0   : > { %v2166_v15 = vadd.s32 %v2165_v12, %v2163_v56  ;;  %v2308_v56 = vcvt.f32.s32 %v8443_v20 }
 0x5c2   : > { %vm2407_vm11 = vcmp.eq.s32.totalorder %v14758_v26, %v2166_v15  ;;  %vm2408_vm12 = vcmp.eq.s32.totalorder %v14759_v45, %v2166_v15  ;;  %v8516_v37 = vsel %vm14058_vm9, %v2166_v15, %v14760_v40  ;;  %v2178_v39 = vpop.xlane.xlu1 %2177  ;;  %v14775_v40 = vld [vmem:[#allocation29_spill] sm:$0xff]  ;;  %v2309_v54 = vshll.u32 %v2308_v56, 16 }
 0x5c3   : > { %14761 = vst [vmem:[#allocation128_spill] sm:$0xff] %v8516_v37  ;;  %v8519_v57 = vsel %vm2407_vm11, 2147483647, %v14758_v26  ;;  %v8522_v1 = vsel %vm2408_vm12, 2147483647, %v14759_v45  ;;  %v2179_v50 = vcvt.f32.s32 %v2178_v39  ;;  %v2439_v33 = vsel %vm2407_vm11, %v14764_v14, 0.0 }
 0x5c4   : > { %14762 = vst [vmem:[#allocation108_spill] sm:$0xff] %v8519_v57  ;;  %14763 = vst [vmem:[#allocation115_spill] sm:$0xff] %v8522_v1  ;;  %v2290_v16 = vpop.xlane.xlu0 %2289  ;;  %vm2584_vm13 = vcmp.lt.s32.totalorder %v8519_v57, %v8522_v1  ;;  %v2440_v61 = vsel %vm2408_vm12, %v14765_v49, 0.0  ;;  %v14773_v26 = vld [vmem:[#allocation57_spill] sm:$0xff]  ;;  %v14774_v45 = vld [vmem:[#allocation91_spill] sm:$0xff] }
 0x5c5   : > { %v2182_v22 = vadd.s32 %v2181_v53, %v2179_v50  ;;  %v2291_v29 = vcvt.f32.s32 %v2290_v16  ;;  %v8530_v4 = vsel %vm2584_vm13, %v8519_v57, %v8522_v1  ;;  %v8532_v35 = vadd.f32 %v2440_v61, %v2439_v33  ;;  %v14787_v56 = vld [vmem:[#allocation61_spill] sm:$0xff]  ;;  %v14845_v49 = vld [vmem:[#allocation100_spill] sm:$0xff]  ;;  %v14854_v1 = vld [vmem:[#allocation103_spill] sm:$0xff] }
 0x5c6   : > { %v2587_v62 = vshra.s32 %v8530_v4, 16  ;;  %v2196_v61 = vcvt.f32.s32 %v8449_v18  ;;  %v14853_v14 = vld [vmem:[#allocation37_spill] sm:$0xff] }
 0x5c7   : > { %14766 = vst [vmem:[#allocation116_spill] sm:$0xff] %v8532_v35  ;;  %vm2409_vm14 = vcmp.eq.s32.totalorder %v14767_v48, %v2182_v22  ;;  %vm2410_vm15 = vcmp.eq.s32.totalorder %v14768_v52, %v2182_v22  ;;  %v8540_v12 = vsel %vm14058_vm9, %v2182_v22, %v14769_v28  ;;  %v2294_v6 = vadd.s32 %v2293_v27, %v2291_v29  ;;  %v14779_v27 = vld [vmem:[#allocation16_spill] sm:$0xff] }
 0x5c8   : > { %14770 = vst [vmem:[#allocation114_spill] sm:$0xff] %v8540_v12  ;;  %v8546_v2 = vsel %vm2409_vm14, 2147483647, %v14767_v48  ;;  %v8551_v15 = vsel %vm2410_vm15, 2147483647, %v14768_v52  ;;  %v8553_v53 = vcvt.s32.f32 %v2587_v62  ;;  %v2441_v16 = vsel %vm2409_vm14, %v14779_v27, 0.0 }
 0x5c9   : > { %14771 = vst [vmem:[#allocation93_spill] sm:$0xff] %v8546_v2  ;;  %14772 = vst [vmem:[#allocation90_spill] sm:$0xff] %v8551_v15  ;;  %vm2423_vm2 = vcmp.eq.s32.totalorder %v14773_v26, %v2294_v6  ;;  %vm2424_vm3 = vcmp.eq.s32.totalorder %v14774_v45, %v2294_v6  ;;  %v8560_v20 = vsel %vm14058_vm9, %v2294_v6, %v14775_v40  ;;  %v14780_v62 = vld [vmem:[#allocation18_spill] sm:$0xff]  ;;  %v14782_v48 = vld [vmem:[#allocation13_spill] sm:$0xff] }
 0x5ca   : > { %14776 = vst [vmem:[#allocation92_spill] sm:$0xff] %v8560_v20  ;;  %vm2600_vm4 = vcmp.lt.s32.totalorder %v8546_v2, %v8551_v15  ;;  %v8567_v39 = vsel %vm2423_vm2, 2147483647, %v14773_v26  ;;  %v8572_v50 = vsel %vm2424_vm3, 2147483647, %v14774_v45  ;;  %2590 = vmin.xlane.f32.xlu0 %v8553_v53  ;;  %v2442_v28 = vsel %vm2410_vm15, %v14780_v62, 0.0 }
 0x5cb   : > { %14777 = vst [vmem:[#allocation57_spill] sm:$0xff] %v8567_v39  ;;  %14778 = vst [vmem:[#allocation91_spill] sm:$0xff] %v8572_v50  ;;  %v8577_v33 = vsel %vm2600_vm4, %v8546_v2, %v8551_v15  ;;  %vm2712_vm5 = vcmp.lt.s32.totalorder %v8567_v39, %v8572_v50  ;;  %v8593_v3 = vadd.f32 %v2442_v28, %v2441_v16  ;;  %v2455_v18 = vsel %vm2423_vm2, %v14782_v48, 0.0  ;;  %v14786_v6 = vld [vmem:[#allocation60_spill] sm:$0xff]  ;;  %v14830_v12 = vld [vmem:[#allocation99_spill] sm:$0xff] }
 0x5cc   : > { %v2603_v29 = vshra.s32 %v8577_v33, 16  ;;  %v2306_v40 = vpop.xlane.xlu1 %2305  ;;  %v8591_v35 = vsel %vm2712_vm5, %v8567_v39, %v8572_v50  ;;  %v2456_v21 = vsel %vm2424_vm3, %v14783_v7, 0.0  ;;  %v2197_v28 = vshll.u32 %v2196_v61, 16  ;;  %v14796_v7 = vld [vmem:[#allocation65_spill] sm:$0xff] }
 0x5cd   : > { %14781 = vst [vmem:[#allocation29_spill] sm:$0xff] %v8593_v3  ;;  %v2307_v47 = vcvt.f32.s32 %v2306_v40  ;;  %v2715_v22 = vshra.s32 %v8591_v35, 16  ;;  %v8604_v52 = vadd.f32 %v2456_v21, %v2455_v18  ;;  %v2212_v26 = vcvt.f32.s32 %v8453_v0  ;;  %v14785_v3 = vld [vmem:[#allocation62_spill] sm:$0xff]  ;;  %v14791_v0 = vld [vmem:[#allocation17_spill] sm:$0xff]  ;;  %v14792_v40 = vld [vmem:[#allocation19_spill] sm:$0xff] }
 0x5ce   : > { %v8601_v27 = vcvt.s32.f32 %v2603_v29  ;;  %v2340_v50 = vcvt.f32.s32 %v8463_v5 }
 0x5cf   : > { %14784 = vst [vmem:[#allocation133_spill] sm:$0xff] %v8604_v52  ;;  %v2310_v62 = vadd.s32 %v2309_v54, %v2307_v47  ;;  %v8607_v16 = vcvt.s32.f32 %v2715_v22 }
 0x5d0   : > { %2606 = vmin.xlane.f32.xlu1 %v8601_v27  ;;  %v2194_v29 = vpop.xlane.xlu0 %2193 }
 0x5d1   : > { %vm2425_vm6 = vcmp.eq.s32.totalorder %v14785_v3, %v2310_v62  ;;  %vm2426_vm7 = vcmp.eq.s32.totalorder %v14786_v6, %v2310_v62  ;;  %v8615_v45 = vsel %vm14058_vm9, %v2310_v62, %v14787_v56  ;;  %2718 = vmin.xlane.f32.xlu0 %v8607_v16  ;;  %v2195_v21 = vcvt.f32.s32 %v2194_v29  ;;  %v14794_v29 = vld [vmem:[#allocation66_spill] sm:$0xff] }
 0x5d2   : > { %14788 = vst [vmem:[#allocation62_spill] sm:$0xff] %v8615_v45  ;;  %v8619_v54 = vsel %vm2425_vm6, 2147483647, %v14785_v3  ;;  %v8622_v47 = vsel %vm2426_vm7, 2147483647, %v14786_v6  ;;  %v2457_v61 = vsel %vm2425_vm6, %v14791_v0, 0.0 }
 0x5d3   : > { %14789 = vst [vmem:[#allocation60_spill] sm:$0xff] %v8619_v54  ;;  %14790 = vst [vmem:[#allocation61_spill] sm:$0xff] %v8622_v47  ;;  %vm2728_vm8 = vcmp.lt.s32.totalorder %v8619_v54, %v8622_v47  ;;  %v2458_v18 = vsel %vm2426_vm7, %v14792_v40, 0.0  ;;  %v2198_v22 = vadd.s32 %v2197_v28, %v2195_v21  ;;  %v2213_v3 = vshll.u32 %v2212_v26, 16  ;;  %v14795_v0 = vld [vmem:[#allocation63_spill] sm:$0xff] }
 0x5d4   : > { %v2210_v62 = vpop.xlane.xlu1 %2209  ;;  %v8630_v56 = vsel %vm2728_vm8, %v8619_v54, %v8622_v47  ;;  %v8632_v52 = vadd.f32 %v2458_v18, %v2457_v61  ;;  %v2324_v18 = vcvt.f32.s32 %v8458_v34  ;;  %v14801_v47 = vld [vmem:[#allocation24_spill] sm:$0xff] }
 0x5d5   : > { %v2211_v45 = vcvt.f32.s32 %v2210_v62  ;;  %v2731_v6 = vshra.s32 %v8630_v56, 16  ;;  %vm2411_vm11 = vcmp.eq.s32.totalorder %v14794_v29, %v2198_v22  ;;  %vm2412_vm12 = vcmp.eq.s32.totalorder %v14795_v0, %v2198_v22  ;;  %v14800_v62 = vld [vmem:[#allocation21_spill] sm:$0xff] }
 0x5d6   : > { %14793 = vst [vmem:[#allocation134_spill] sm:$0xff] %v8632_v52  ;;  %v8640_v40 = vsel %vm14058_vm9, %v2198_v22, %v14796_v7  ;;  %v8643_v28 = vsel %vm2411_vm11, 2147483647, %v14794_v29  ;;  %v8646_v21 = vsel %vm2412_vm12, 2147483647, %v14795_v0  ;;  %v2443_v52 = vsel %vm2411_vm11, %v14800_v62, 0.0 }
 0x5d7   : > { %14797 = vst [vmem:[#allocation66_spill] sm:$0xff] %v8640_v40  ;;  %14798 = vst [vmem:[#allocation63_spill] sm:$0xff] %v8643_v28  ;;  %v2214_v61 = vadd.s32 %v2213_v3, %v2211_v45  ;;  %v8648_v26 = vcvt.s32.f32 %v2731_v6  ;;  %vm2616_vm13 = vcmp.lt.s32.totalorder %v8643_v28, %v8646_v21  ;;  %v2444_v54 = vsel %vm2412_vm12, %v14801_v47, 0.0  ;;  %v14802_v7 = vld [vmem:[#allocation41_spill] sm:$0xff]  ;;  %v14803_v22 = vld [vmem:[#allocation38_spill] sm:$0xff] }
 0x5d8   : > { %14799 = vst [vmem:[#allocation65_spill] sm:$0xff] %v8646_v21  ;;  %v14804_v29 = vld [vmem:[#allocation40_spill] sm:$0xff]  ;;  %v8665_v34 = vsel %vm2616_vm13, %v8643_v28, %v8646_v21  ;;  %v14810_v62 = vld [vmem:[#allocation31_spill] sm:$0xff]  ;;  %v2325_v21 = vshll.u32 %v2324_v18, 16  ;;  %v14812_v18 = vld [vmem:[#allocation70_spill] sm:$0xff] }
 0x5d9   : > { %vm2413_vm14 = vcmp.eq.s32.totalorder %v14802_v7, %v2214_v61  ;;  %vm2414_vm15 = vcmp.eq.s32.totalorder %v14803_v22, %v2214_v61  ;;  %v8660_v0 = vsel %vm14058_vm9, %v2214_v61, %v14804_v29  ;;  %2734 = vmin.xlane.f32.xlu1 %v8648_v26  ;;  %v2619_v6 = vshra.s32 %v8665_v34, 16  ;;  %v14809_v29 = vld [vmem:[#allocation27_spill] sm:$0xff] }
 0x5da   : > { %14805 = vst [vmem:[#allocation41_spill] sm:$0xff] %v8660_v0  ;;  %v8668_v45 = vsel %vm2413_vm14, 2147483647, %v14802_v7  ;;  %v8671_v3 = vsel %vm2414_vm15, 2147483647, %v14803_v22  ;;  %v2322_v47 = vpop.xlane.xlu0 %2321  ;;  %v8676_v61 = vadd.f32 %v2444_v54, %v2443_v52  ;;  %v2445_v0 = vsel %vm2413_vm14, %v14809_v29, 0.0 }
 0x5db   : > { %14806 = vst [vmem:[#allocation38_spill] sm:$0xff] %v8668_v45  ;;  %14807 = vst [vmem:[#allocation40_spill] sm:$0xff] %v8671_v3  ;;  %vm2632_vm2 = vcmp.lt.s32.totalorder %v8668_v45, %v8671_v3  ;;  %v2446_v40 = vsel %vm2414_vm15, %v14810_v62, 0.0  ;;  %v2323_v28 = vcvt.f32.s32 %v2322_v47  ;;  %v8680_v48 = vcvt.s32.f32 %v2619_v6  ;;  %v14813_v6 = vld [vmem:[#allocation68_spill] sm:$0xff] }
 0x5dc   : > { %14808 = vst [vmem:[#allocation135_spill] sm:$0xff] %v8676_v61  ;;  %v8684_v7 = vsel %vm2632_vm2, %v8668_v45, %v8671_v3  ;;  %v8687_v20 = vadd.f32 %v2446_v40, %v2445_v0  ;;  %v2228_v54 = vcvt.f32.s32 %v8469_v41  ;;  %v2244_v47 = vcvt.f32.s32 %v8471_v8  ;;  %v14814_v62 = vld [vmem:[#allocation72_spill] sm:$0xff]  ;;  %v14819_v0 = vld [vmem:[#allocation22_spill] sm:$0xff] }
 0x5dd   : > { %v2635_v22 = vshra.s32 %v8684_v7, 16  ;;  %v2326_v52 = vadd.s32 %v2325_v21, %v2323_v28  ;;  %2622 = vmin.xlane.f32.xlu0 %v8680_v48  ;;  %v14818_v21 = vld [vmem:[#allocation20_spill] sm:$0xff]  ;;  %v14821_v45 = vld [vmem:[#allocation46_spill] sm:$0xff] }
 0x5de   : > { %14811 = vst [vmem:[#allocation136_spill] sm:$0xff] %v8687_v20  ;;  %v2341_v20 = vshll.u32 %v2340_v50, 16  ;;  %v2245_v3 = vshll.u32 %v2244_v47, 16  ;;  %v14822_v50 = vld [vmem:[#allocation43_spill] sm:$0xff] }
 0x5df   : > { %v8692_v61 = vcvt.s32.f32 %v2635_v22  ;;  %vm2427_vm3 = vcmp.eq.s32.totalorder %v14812_v18, %v2326_v52  ;;  %vm2428_vm4 = vcmp.eq.s32.totalorder %v14813_v6, %v2326_v52  ;;  %v8700_v40 = vsel %vm14058_vm9, %v2326_v52, %v14814_v62  ;;  %v14827_v47 = vld [vmem:[#allocation23_spill] sm:$0xff] }
 0x5e0   : > { %14815 = vst [vmem:[#allocation70_spill] sm:$0xff] %v8700_v40  ;;  %v8703_v5 = vsel %vm2427_vm3, 2147483647, %v14812_v18  ;;  %v8706_v28 = vsel %vm2428_vm4, 2147483647, %v14813_v6  ;;  %v2459_v8 = vsel %vm2427_vm3, %v14818_v21, 0.0  ;;  %v2356_v21 = vcvt.f32.s32 %v8478_v31 }
 0x5e1   : > { %14816 = vst [vmem:[#allocation68_spill] sm:$0xff] %v8703_v5  ;;  %14817 = vst [vmem:[#allocation72_spill] sm:$0xff] %v8706_v28  ;;  %v2338_v41 = vpop.xlane.xlu1 %2337  ;;  %2638 = vmin.xlane.f32.xlu1 %v8692_v61  ;;  %v2460_v22 = vsel %vm2428_vm4, %v14819_v0, 0.0  ;;  %vm2744_vm5 = vcmp.lt.s32.totalorder %v8703_v5, %v8706_v28  ;;  %v2229_v40 = vshll.u32 %v2228_v54, 16 }
 0x5e2   : > { %v2339_v29 = vcvt.f32.s32 %v2338_v41  ;;  %v8713_v62 = vadd.f32 %v2460_v22, %v2459_v8  ;;  %v8717_v52 = vsel %vm2744_vm5, %v8703_v5, %v8706_v28  ;;  %v14823_v41 = vld [vmem:[#allocation75_spill] sm:$0xff]  ;;  %v2260_v5 = vcvt.f32.s32 %v8489_v30 }
 0x5e3   : > { %v2747_v6 = vshra.s32 %v8717_v52, 16 }
 0x5e4   : > { %14820 = vst [vmem:[#allocation137_spill] sm:$0xff] %v8713_v62  ;;  %v2342_v18 = vadd.s32 %v2341_v20, %v2339_v29  ;;  %v2226_v22 = vpop.xlane.xlu0 %2225 }
 0x5e5   : > { %v2242_v62 = vpop.xlane.xlu1 %2241  ;;  %v8728_v0 = vcvt.s32.f32 %v2747_v6  ;;  %v2227_v31 = vcvt.f32.s32 %v2226_v22  ;;  %v2357_v22 = vshll.u32 %v2356_v21, 16  ;;  %v14837_v21 = vld [vmem:[#allocation49_spill] sm:$0xff] }
 0x5e6   : > { %vm2429_vm6 = vcmp.eq.s32.totalorder %v14821_v45, %v2342_v18  ;;  %vm2430_vm7 = vcmp.eq.s32.totalorder %v14822_v50, %v2342_v18  ;;  %v8726_v8 = vsel %vm14058_vm9, %v2342_v18, %v14823_v41  ;;  %v2243_v54 = vcvt.f32.s32 %v2242_v62  ;;  %v14828_v41 = vld [vmem:[#allocation25_spill] sm:$0xff] }
 0x5e7   : > { %14824 = vst [vmem:[#allocation46_spill] sm:$0xff] %v8726_v8  ;;  %v8731_v20 = vsel %vm2429_vm6, 2147483647, %v14821_v45  ;;  %v8734_v29 = vsel %vm2430_vm7, 2147483647, %v14822_v50  ;;  %2750 = vmin.xlane.f32.xlu0 %v8728_v0  ;;  %v2461_v18 = vsel %vm2429_vm6, %v14827_v47, 0.0  ;;  %v2230_v28 = vadd.s32 %v2229_v40, %v2227_v31 }
 0x5e8   : > { %14825 = vst [vmem:[#allocation43_spill] sm:$0xff] %v8731_v20  ;;  %14826 = vst [vmem:[#allocation75_spill] sm:$0xff] %v8734_v29  ;;  %vm2760_vm8 = vcmp.lt.s32.totalorder %v8731_v20, %v8734_v29  ;;  %v2462_v8 = vsel %vm2430_vm7, %v14828_v41, 0.0  ;;  %v8741_v6 = vadd.s32 %v2245_v3, %v2243_v54  ;;  %v2372_v62 = vcvt.f32.s32 %v8483_v13  ;;  %v14831_v47 = vld [vmem:[#allocation74_spill] sm:$0xff]  ;;  %v14832_v40 = vld [vmem:[#allocation47_spill] sm:$0xff] }
 0x5e9   : > { %v8745_v45 = vsel %vm2760_vm8, %v8731_v20, %v8734_v29  ;;  %v8747_v50 = vadd.f32 %v2462_v8, %v2461_v18  ;;  %vm2415_vm11 = vcmp.eq.s32.totalorder %v14830_v12, %v2230_v28  ;;  %vm2416_vm12 = vcmp.eq.s32.totalorder %v14831_v47, %v2230_v28  ;;  %v14834_v31 = vld [vmem:[#allocation51_spill] sm:$0xff] }
 0x5ea   : > { %v2763_v39 = vshra.s32 %v8745_v45, 16  ;;  %v8757_v3 = vsel %vm14058_vm9, %v2230_v28, %v14832_v40  ;;  %vm2417_vm13 = vcmp.eq.s32.totalorder %v14834_v31, %v8741_v6  ;;  %v2354_v8 = vpop.xlane.xlu0 %2353  ;;  %v8764_v13 = vsel %vm2415_vm11, 2147483647, %v14830_v12  ;;  %v14840_v40 = vld [vmem:[#allocation50_spill] sm:$0xff] }
 0x5eb   : > { %14829 = vst [vmem:[#allocation138_spill] sm:$0xff] %v8747_v50  ;;  %14833 = vst [vmem:[#allocation99_spill] sm:$0xff] %v8757_v3  ;;  %v8769_v30 = vsel %vm2416_vm12, 2147483647, %v14831_v47  ;;  %vm2418_vm14 = vcmp.eq.s32.totalorder %v14837_v21, %v8741_v6  ;;  %v8777_v54 = vsel %vm2417_vm13, 2147483647, %v14834_v31  ;;  %v8789_v50 = vsel %vm14058_vm9, %v8741_v6, %v14840_v40 }
 0x5ec   : > { %14835 = vst [vmem:[#allocation74_spill] sm:$0xff] %v8764_v13  ;;  %14836 = vst [vmem:[#allocation47_spill] sm:$0xff] %v8769_v30  ;;  %v8783_v18 = vsel %vm2418_vm14, 2147483647, %v14837_v21  ;;  %v2355_v3 = vcvt.f32.s32 %v2354_v8  ;;  %v8791_v41 = vcvt.s32.f32 %v2763_v39  ;;  %v2373_v29 = vshll.u32 %v2372_v62, 16 }
 0x5ed   : > { %14838 = vst [vmem:[#allocation51_spill] sm:$0xff] %v8777_v54  ;;  %14839 = vst [vmem:[#allocation49_spill] sm:$0xff] %v8783_v18  ;;  %vm2648_vm15 = vcmp.lt.s32.totalorder %v8764_v13, %v8769_v30  ;;  %vm2664_vm2 = vcmp.lt.s32.totalorder %v8777_v54, %v8783_v18  ;;  %v2261_v20 = vshll.u32 %v2260_v5, 16  ;;  %v2276_v62 = vcvt.f32.s32 %v8493_v36 }
 0x5ee   : > { %14841 = vst [vmem:[#allocation50_spill] sm:$0xff] %v8789_v50  ;;  %v8797_v15 = vadd.s32 %v2357_v22, %v2355_v3  ;;  %2766 = vmin.xlane.f32.xlu1 %v8791_v41  ;;  %v8802_v40 = vsel %vm2648_vm15, %v8764_v13, %v8769_v30  ;;  %v8806_v39 = vsel %vm2664_vm2, %v8777_v54, %v8783_v18  ;;  %v2388_v22 = vcvt.f32.s32 %v8498_v24  ;;  %v14844_v3 = vld [vmem:[#allocation54_spill] sm:$0xff]  ;;  %v14846_v30 = vld [vmem:[#allocation53_spill] sm:$0xff] }
 0x5ef   : > { %v2370_v2 = vpop.xlane.xlu1 %2369  ;;  %14842 = vst [vmem:[#allocation139_spill] sm:$0xff] %v8802_v40  ;;  %14843 = vst [vmem:[#allocation140_spill] sm:$0xff] %v8806_v39  ;;  %v2651_v50 = vshra.s32 %v8802_v40, 16  ;;  %v2667_v5 = vshra.s32 %v8806_v39, 16  ;;  %v2448_v37 = vsel %vm2416_vm12, %v14853_v14, 0.0 }
 0x5f0   : > { %v2371_v8 = vcvt.f32.s32 %v2370_v2  ;;  %vm2431_vm3 = vcmp.eq.s32.totalorder %v14844_v3, %v8797_v15  ;;  %vm2432_vm4 = vcmp.eq.s32.totalorder %v14845_v49, %v8797_v15  ;;  %v8820_v18 = vsel %vm14058_vm9, %v8797_v15, %v14846_v30  ;;  %v14852_v30 = vld [vmem:[#allocation34_spill] sm:$0xff] }
 0x5f1   : > { %14847 = vst [vmem:[#allocation54_spill] sm:$0xff] %v8820_v18  ;;  %v8826_v36 = vsel %vm2431_vm3, 2147483647, %v14844_v3  ;;  %v8832_v24 = vsel %vm2432_vm4, 2147483647, %v14845_v49  ;;  %v8836_v54 = vcvt.s32.f32 %v2651_v50  ;;  %v8838_v13 = vcvt.s32.f32 %v2667_v5  ;;  %v14856_v50 = vld [vmem:[#allocation79_spill] sm:$0xff] }
 0x5f2   : > { %14848 = vst [vmem:[#allocation100_spill] sm:$0xff] %v8826_v36  ;;  %14849 = vst [vmem:[#allocation53_spill] sm:$0xff] %v8832_v24  ;;  %v8834_v2 = vadd.s32 %v2373_v29, %v2371_v8  ;;  %vm2776_vm5 = vcmp.lt.s32.totalorder %v8826_v36, %v8832_v24  ;;  %v2447_v18 = vsel %vm2415_vm11, %v14852_v30, 0.0  ;;  %v14855_v29 = vld [vmem:[#allocation126_spill] sm:$0xff]  ;;  %v2277_v30 = vshll.u32 %v2276_v62, 16  ;;  %v14862_v62 = vld [vmem:[#allocation39_spill] sm:$0xff] }
 0x5f3   : > { %14850 = vst [vmem:[#allocation141_spill] sm:$0xff] %v8836_v54  ;;  %14851 = vst [vmem:[#allocation142_spill] sm:$0xff] %v8838_v13  ;;  %2654 = vmin.xlane.f32.xlu0 %v8836_v54  ;;  %v8861_v12 = vsel %vm2776_vm5, %v8826_v36, %v8832_v24  ;;  %2670 = vmin.xlane.f32.xlu1 %v8838_v13  ;;  %v8879_v24 = vadd.f32 %v2448_v37, %v2447_v18  ;;  %v2404_v13 = vcvt.f32.s32 %v8503_v32  ;;  %v14863_v37 = vld [vmem:[#allocation106_spill] sm:$0xff]  ;;  %v14879_v3 = vld [vmem:[#allocation28_spill] sm:$0xff] }
 0x5f4   : > { %vm2433_vm6 = vcmp.eq.s32.totalorder %v14854_v1, %v8834_v2  ;;  %vm2434_vm7 = vcmp.eq.s32.totalorder %v14855_v29, %v8834_v2  ;;  %v8856_v8 = vsel %vm14058_vm9, %v8834_v2, %v14856_v50  ;;  %v2258_v5 = vpop.xlane.xlu0 %2257  ;;  %14858 = vst [vmem:[#allocation126_spill] sm:$0xff] %v8861_v12  ;;  %v2779_v14 = vshra.s32 %v8861_v12, 16 }
 0x5f5   : > { %14857 = vst [vmem:[#allocation103_spill] sm:$0xff] %v8856_v8  ;;  %v8867_v28 = vsel %vm2433_vm6, 2147483647, %v14854_v1  ;;  %v8873_v47 = vsel %vm2434_vm7, 2147483647, %v14855_v29  ;;  %v2259_v50 = vcvt.f32.s32 %v2258_v5  ;;  %14861 = vst [vmem:[#allocation144_spill] sm:$0xff] %v8879_v24 }
 0x5f6   : > { %14859 = vst [vmem:[#allocation79_spill] sm:$0xff] %v8867_v28  ;;  %14860 = vst [vmem:[#allocation143_spill] sm:$0xff] %v8873_v47  ;;  %v2274_v8 = vpop.xlane.xlu1 %2273  ;;  %vm2792_vm8 = vcmp.lt.s32.totalorder %v8867_v28, %v8873_v47  ;;  %v8881_v54 = vcvt.s32.f32 %v2779_v14  ;;  %v2389_v5 = vshll.u32 %v2388_v22, 16  ;;  %v2449_v40 = vsel %vm2417_vm13, %v14862_v62, 0.0  ;;  %v14865_v14 = vld [vmem:[#allocation83_spill] sm:$0xff] }
 0x5f7   : > { %v2262_v36 = vadd.s32 %v2261_v20, %v2259_v50  ;;  %v2275_v57 = vcvt.f32.s32 %v2274_v8  ;;  %v8885_v39 = vsel %vm2792_vm8, %v8867_v28, %v8873_v47  ;;  %v14864_v20 = vld [vmem:[#allocation105_spill] sm:$0xff]  ;;  %v14869_v50 = vld [vmem:[#allocation42_spill] sm:$0xff]  ;;  %v14874_v47 = vld [vmem:[#allocation44_spill] sm:$0xff] }
 0x5f8   : > { %v2795_v12 = vshra.s32 %v8885_v39, 16  ;;  %2782 = vmin.xlane.f32.xlu0 %v8881_v54 }
 0x5f9   : > { %vm2419_vm11 = vcmp.eq.s32.totalorder %v14863_v37, %v2262_v36  ;;  %vm2420_vm12 = vcmp.eq.s32.totalorder %v14864_v20, %v2262_v36  ;;  %v8898_v18 = vsel %vm14058_vm9, %v2262_v36, %v14865_v14  ;;  %v2278_v8 = vadd.s32 %v2277_v30, %v2275_v57  ;;  %v14870_v57 = vld [vmem:[#allocation107_spill] sm:$0xff] }
 0x5fa   : > { %14866 = vst [vmem:[#allocation106_spill] sm:$0xff] %v8898_v18  ;;  %v8904_v32 = vsel %vm2419_vm11, 2147483647, %v14863_v37  ;;  %v8909_v31 = vsel %vm2420_vm12, 2147483647, %v14864_v20  ;;  %v8911_v22 = vcvt.s32.f32 %v2795_v12  ;;  %v2450_v14 = vsel %vm2418_vm14, %v14869_v50, 0.0 }
 0x5fb   : > { %14867 = vst [vmem:[#allocation105_spill] sm:$0xff] %v8904_v32  ;;  %14868 = vst [vmem:[#allocation83_spill] sm:$0xff] %v8909_v31  ;;  %vm2421_vm13 = vcmp.eq.s32.totalorder %v8303_v17, %v2278_v8  ;;  %vm2422_vm15 = vcmp.eq.s32.totalorder %v8308_v51, %v2278_v8  ;;  %v8922_v30 = vsel %vm14058_vm9, %v2278_v8, %v14870_v57  ;;  %v2386_v24 = vpop.xlane.xlu0 %2385  ;;  %v14877_v8 = vld [vmem:[#allocation26_spill] sm:$0xff] }
 0x5fc   : > { %14871 = vst [vmem:[#allocation107_spill] sm:$0xff] %v8922_v30  ;;  %vm2680_vm2 = vcmp.lt.s32.totalorder %v8904_v32, %v8909_v31  ;;  %v8929_v12 = vsel %vm2421_vm13, 2147483647, %v8303_v17  ;;  %v8934_v6 = vsel %vm2422_vm15, 2147483647, %v8308_v51  ;;  %v2387_v21 = vcvt.f32.s32 %v2386_v24  ;;  %2798 = vmin.xlane.f32.xlu1 %v8911_v22 }
 0x5fd   : > { %v8939_v57 = vsel %vm2680_vm2, %v8904_v32, %v8909_v31  ;;  %vm2696_vm14 = vcmp.lt.s32.totalorder %v8929_v12, %v8934_v6  ;;  %v8944_v62 = vadd.f32 %v2450_v14, %v2449_v40  ;;  %v2451_v24 = vsel %vm2419_vm11, %v14874_v47, 0.0 }
 0x5fe   : > { %14872 = vst [vmem:[#allocation145_spill] sm:$0xff] %v8939_v57  ;;  %v2683_v50 = vshra.s32 %v8939_v57, 16  ;;  %v2390_v30 = vadd.s32 %v2389_v5, %v2387_v21  ;;  %v8948_v18 = vsel %vm2696_vm14, %v8929_v12, %v8934_v6  ;;  %v2452_v31 = vsel %vm2420_vm12, %v14627_v60, 0.0 }
 0x5ff   : > { %14873 = vst [vmem:[#allocation146_spill] sm:$0xff] %v8944_v62  ;;  %v2405_v32 = vshll.u32 %v2404_v13, 16  ;;  %v2699_v57 = vshra.s32 %v8948_v18, 16  ;;  %v2402_v5 = vpop.xlane.xlu1 %2401  ;;  %v8966_v37 = vadd.f32 %v2452_v31, %v2451_v24  ;;  %v2454_v31 = vsel %vm2422_vm15, %v14630_v55, 0.0  ;;  %v14914_v62 = vld [vmem:[#allocation15_spill] sm:$0xff] }
 0x600   : > { %v8956_v28 = vcvt.s32.f32 %v2683_v50  ;;  %vm2435_vm5 = vcmp.eq.s32.totalorder %v8358_v23, %v2390_v30  ;;  %vm2436_vm8 = vcmp.eq.s32.totalorder %v8363_v25, %v2390_v30  ;;  %v8964_v40 = vsel %vm14058_vm9, %v2390_v30, %v8351_v9 }
 0x601   : > { %14875 = vst [vmem:[#allocation147_spill] sm:$0xff] %v8966_v37  ;;  %v8971_v13 = vsel %vm2435_vm5, 2147483647, %v8358_v23  ;;  %v8976_v36 = vsel %vm2436_vm8, 2147483647, %v8363_v25  ;;  %v2403_v20 = vcvt.f32.s32 %v2402_v5  ;;  %v8979_v50 = vcvt.s32.f32 %v2699_v57 }
 0x602   : > { %2686 = vmin.xlane.f32.xlu0 %v8956_v28  ;;  %vm2808_vm11 = vcmp.lt.s32.totalorder %v8971_v13, %v8976_v36  ;;  %v2453_v9 = vsel %vm2421_vm13, %v14628_v44, 0.0  ;;  %v2465_v24 = vsel %vm2433_vm6, %v14624_v59, 0.0  ;;  %v2466_v51 = vsel %vm2434_vm7, %v14752_v10, 0.0 }
 0x603   : > { %v2406_v14 = vadd.s32 %v2405_v32, %v2403_v20  ;;  %2702 = vmin.xlane.f32.xlu1 %v8979_v50  ;;  %v8992_v21 = vsel %vm2808_vm11, %v8971_v13, %v8976_v36  ;;  %v8994_v57 = vadd.f32 %v2454_v31, %v2453_v9  ;;  %v2463_v32 = vsel %vm2431_vm3, %v14877_v8, 0.0 }
 0x604   : > { %v2811_v17 = vshra.s32 %v8992_v21, 16  ;;  %v9016_v5 = vadd.f32 %v2466_v51, %v2465_v24  ;;  %v2464_v9 = vsel %vm2432_vm4, %v14879_v3, 0.0  ;;  %v2467_v24 = vsel %vm2435_vm5, %v14518_v42, 0.0 }
 0x605   : > { %14876 = vst [vmem:[#allocation148_spill] sm:$0xff] %v8994_v57  ;;  %vm2437_vm12 = vcmp.eq.s32.totalorder %v8403_v38, %v2406_v14  ;;  %vm2438_vm13 = vcmp.eq.s32.totalorder %v8406_v63, %v2406_v14  ;;  %v9014_v1 = vsel %vm14058_vm9, %v2406_v14, %v8397_v11  ;;  %v2468_v15 = vsel %vm2436_vm8, %v14633_v43, 0.0 }
 0x606   : > { %14878 = vst [vmem:[#allocation26_spill] sm:$0xff] %v9016_v5  ;;  %v9019_v20 = vsel %vm2437_vm12, 2147483647, %v8403_v38  ;;  %v9022_v2 = vsel %vm2438_vm13, 2147483647, %v8406_v63  ;;  %v9024_v29 = vcvt.s32.f32 %v2811_v17  ;;  %v2469_v11 = vsel %vm2437_vm12, %v14634_v46, 0.0 }
 0x607   : > { %vm2824_vm3 = vcmp.lt.s32.totalorder %v9019_v20, %v9022_v2  ;;  %v2470_v31 = vsel %vm2438_vm13, %v14636_v19, 0.0  ;;  %v9039_v63 = vadd.f32 %v2464_v9, %v2463_v32  ;;  %v9050_v17 = vadd.f32 %v2468_v15, %v2467_v24 }
 0x608   : > { %2814 = vmin.xlane.f32.xlu0 %v9024_v29  ;;  %v9037_v38 = vsel %vm2824_vm3, %v9019_v20, %v9022_v2  ;;  %v9041_v14 = vadd.f32 %v2470_v31, %v2469_v11  ;;  %v2586_v32 = vand.u32 65535, %v8530_v4  ;;  %v2602_v23 = vand.u32 65535, %v8577_v33 }
 0x609   : > { %14880 = vst [vmem:[#allocation28_spill] sm:$0xff] %v9039_v63  ;;  %v2827_v49 = vshra.s32 %v9037_v38, 16  ;;  %14882 = vst [vmem:[#allocation150_spill] sm:$0xff] %v9050_v17  ;;  %v2714_v25 = vand.u32 65535, %v8591_v35  ;;  %v2730_v33 = vand.u32 65535, %v8630_v56 }
 0x60a   : > { %14881 = vst [vmem:[#allocation149_spill] sm:$0xff] %v9041_v14  ;;  %v2588_v11 = vcvt.s32.f32 %v2586_v32  ;;  %v2604_v24 = vcvt.s32.f32 %v2602_v23  ;;  %v2634_v23 = vand.u32 65535, %v8684_v7  ;;  %v14911_v14 = vld [vmem:[#allocation18_spill] sm:$0xff] }
 0x60b   : > { %v9052_v51 = vcvt.s32.f32 %v2827_v49  ;;  %v2716_v15 = vcvt.s32.f32 %v2714_v25  ;;  %v2732_v35 = vcvt.s32.f32 %v2730_v33 }
 0x60d   : > { %2830 = vmin.xlane.f32.xlu1 %v9052_v51 }
 0x653   : > { %v9056_v9 = vpop.xlane.xlu0 %2590 }
 0x654   : > { %vm2592_vm4 = vcmp.eq.f32.partialorder %v8553_v53, %v9056_v9 }
 0x655   : > { %v2593_v31 = vsel %vm2592_vm4, %v2588_v11, inf }
 0x656   : > { %2594 = vmin.xlane.f32.xlu0 %v2593_v31 }
 0x659   : > { %v9062_v30 = vpop.xlane.xlu1 %2606 }
 0x65a   : > { %vm2608_vm6 = vcmp.eq.f32.partialorder %v8601_v27, %v9062_v30  ;;  %v9066_v49 = vpop.xlane.xlu0 %2718  ;;  %v2618_v27 = vand.u32 65535, %v8665_v34  ;;  %v2746_v34 = vand.u32 65535, %v8717_v52  ;;  %v14884_v52 = vld [vmem:[#allocation140_spill] sm:$0xff] }
 0x65b   : > { %v2609_v4 = vsel %vm2608_vm6, %v2604_v24, inf  ;;  %vm2720_vm7 = vcmp.eq.f32.partialorder %v8607_v16, %v9066_v49  ;;  %v2636_v24 = vcvt.s32.f32 %v2634_v23 }
 0x65c   : > { %2610 = vmin.xlane.f32.xlu1 %v2609_v4  ;;  %v2721_v53 = vsel %vm2720_vm7, %v2716_v15, inf  ;;  %v2620_v25 = vcvt.s32.f32 %v2618_v27  ;;  %v2748_v7 = vcvt.s32.f32 %v2746_v34 }
 0x65d   : > { %2722 = vmin.xlane.f32.xlu0 %v2721_v53 }
 0x662   : > { %v9071_v32 = vpop.xlane.xlu1 %2734 }
 0x663   : > { %vm2736_vm15 = vcmp.eq.f32.partialorder %v8648_v26, %v9071_v32 }
 0x664   : > { %v2737_v11 = vsel %vm2736_vm15, %v2732_v35, inf }
 0x665   : > { %2738 = vmin.xlane.f32.xlu1 %v2737_v11  ;;  %v2666_v11 = vand.u32 65535, %v14884_v52  ;;  %v14888_v52 = vld [vmem:[#allocation145_spill] sm:$0xff] }
 0x666   : > { %v9077_v31 = vpop.xlane.xlu0 %2622 }
 0x667   : > { %vm2624_vm2 = vcmp.eq.f32.partialorder %v8680_v48, %v9077_v31  ;;  %v2762_v48 = vand.u32 65535, %v8745_v45  ;;  %v2668_v45 = vcvt.s32.f32 %v2666_v11  ;;  %v2682_v11 = vand.u32 65535, %v14888_v52 }
 0x668   : > { %v2625_v16 = vsel %vm2624_vm2, %v2620_v25, inf  ;;  %v2613_v52 = vcvt.f32.s32 %v9062_v30  ;;  %vm14131_vm2 = vcmp.eq.s32.totalorder %v14524_v58, 4 }
 0x669   : > { %2626 = vmin.xlane.f32.xlu0 %v2625_v16  ;;  %v2764_v33 = vcvt.s32.f32 %v2762_v48 }
 0x66a   : > { %v9081_v56 = vpop.xlane.xlu1 %2638 }
 0x66b   : > { %vm2640_vm14 = vcmp.eq.f32.partialorder %v8692_v61, %v9081_v56  ;;  %v14883_v61 = vld [vmem:[#allocation139_spill] sm:$0xff] }
 0x66c   : > { %v2641_v26 = vsel %vm2640_vm14, %v2636_v24, inf  ;;  %v2650_v35 = vand.u32 65535, %v14883_v61  ;;  %v14886_v24 = vld [vmem:[#allocation126_spill] sm:$0xff] }
 0x66d   : > { %2642 = vmin.xlane.f32.xlu1 %v2641_v26  ;;  %v2778_v26 = vand.u32 65535, %v14886_v24 }
 0x66e   : > { %v2652_v25 = vcvt.s32.f32 %v2650_v35 }
 0x670   : > { %v9086_v4 = vpop.xlane.xlu0 %2750 }
 0x671   : > { %vm2752_vm5 = vcmp.eq.f32.partialorder %v8728_v0, %v9086_v4  ;;  %v14885_v0 = vld [vmem:[#allocation141_spill] sm:$0xff] }
 0x672   : > { %v2753_v15 = vsel %vm2752_vm5, %v2748_v7, inf }
 0x673   : > { %2754 = vmin.xlane.f32.xlu0 %v2753_v15  ;;  %v2794_v15 = vand.u32 65535, %v8885_v39  ;;  %v2698_v39 = vand.u32 65535, %v8948_v18 }
 0x677   : > { %v9091_v53 = vpop.xlane.xlu1 %2766 }
 0x678   : > { %vm2768_vm8 = vcmp.eq.f32.partialorder %v8791_v41, %v9091_v53  ;;  %v14887_v41 = vld [vmem:[#allocation142_spill] sm:$0xff] }
 0x679   : > { %v2769_v27 = vsel %vm2768_vm8, %v2764_v33, inf  ;;  %v2780_v33 = vcvt.s32.f32 %v2778_v26  ;;  %v2700_v26 = vcvt.s32.f32 %v2698_v39  ;;  %v14889_v39 = vld [vmem:[#allocation108_spill] sm:$0xff] }
 0x67a   : > { %2770 = vmin.xlane.f32.xlu1 %v2769_v27  ;;  %v2796_v27 = vcvt.s32.f32 %v2794_v15 }
 0x67c   : > { %v9097_v23 = vpop.xlane.xlu0 %2654  ;;  %v9101_v16 = vpop.xlane.xlu1 %2670 }
 0x67d   : > { %vm2656_vm11 = vcmp.eq.f32.partialorder %v14885_v0, %v9097_v23  ;;  %vm2672_vm12 = vcmp.eq.f32.partialorder %v14887_v41, %v9101_v16 }
 0x67e   : > { %v2657_v34 = vsel %vm2656_vm11, %v2652_v25, inf  ;;  %v2673_v7 = vsel %vm2672_vm12, %v2668_v45, inf  ;;  %v2684_v45 = vcvt.s32.f32 %v2682_v11 }
 0x67f   : > { %2658 = vmin.xlane.f32.xlu0 %v2657_v34  ;;  %2674 = vmin.xlane.f32.xlu1 %v2673_v7 }
 0x681   : > { %v9107_v48 = vpop.xlane.xlu0 %2782 }
 0x682   : > { %vm2784_vm13 = vcmp.eq.f32.partialorder %v8881_v54, %v9107_v48 }
 0x683   : > { %v2785_v61 = vsel %vm2784_vm13, %v2780_v33, inf }
 0x684   : > { %2786 = vmin.xlane.f32.xlu0 %v2785_v61 }
 0x685   : > { %v9111_v35 = vpop.xlane.xlu1 %2798 }
 0x686   : > { %vm2800_vm3 = vcmp.eq.f32.partialorder %v8911_v22, %v9111_v35  ;;  %v2810_v22 = vand.u32 65535, %v8992_v21  ;;  %v2597_v21 = vcvt.f32.s32 %v9056_v9 }
 0x687   : > { %v2801_v25 = vsel %vm2800_vm3, %v2796_v27, inf }
 0x688   : > { %2802 = vmin.xlane.f32.xlu1 %v2801_v25  ;;  %v2812_v18 = vcvt.s32.f32 %v2810_v22  ;;  %v2598_v27 = vshll.u32 %v2597_v21, 16  ;;  %v2614_v25 = vshll.u32 %v2613_v52, 16 }
 0x68b   : > { %v9117_v0 = vpop.xlane.xlu0 %2686 }
 0x68c   : > { %vm2688_vm4 = vcmp.eq.f32.partialorder %v8956_v28, %v9117_v0  ;;  %v9121_v24 = vpop.xlane.xlu1 %2702  ;;  %v2826_v28 = vand.u32 65535, %v9037_v38 }
 0x68d   : > { %v2689_v54 = vsel %vm2688_vm4, %v2684_v45, inf  ;;  %vm2704_vm6 = vcmp.eq.f32.partialorder %v8979_v50, %v9121_v24  ;;  %v14890_v45 = vld [vmem:[#allocation115_spill] sm:$0xff] }
 0x68e   : > { %2690 = vmin.xlane.f32.xlu0 %v2689_v54  ;;  %v2705_v34 = vsel %vm2704_vm6, %v2700_v26, inf  ;;  %v2828_v33 = vcvt.s32.f32 %v2826_v28 }
 0x68f   : > { %2706 = vmin.xlane.f32.xlu1 %v2705_v34 }
 0x691   : > { %v9126_v41 = vpop.xlane.xlu0 %2814 }
 0x692   : > { %vm2816_vm7 = vcmp.eq.f32.partialorder %v9024_v29, %v9126_v41  ;;  %v2725_v29 = vcvt.f32.s32 %v9066_v49  ;;  %v14895_v49 = vld [vmem:[#allocation12_spill] sm:$0xff] }
 0x693   : > { %v2817_v7 = vsel %vm2816_vm7, %v2812_v18, inf }
 0x694   : > { %2818 = vmin.xlane.f32.xlu0 %v2817_v7  ;;  %v2726_v18 = vshll.u32 %v2725_v29, 16  ;;  %v14896_v7 = vld [vmem:[#allocation14_spill] sm:$0xff] }
 0x695   : > { %v14900_v29 = vld [vmem:[#allocation114_spill] sm:$0xff] }
 0x696   : > { %v9131_v15 = vpop.xlane.xlu1 %2830 }
 0x697   : > { %vm2832_vm15 = vcmp.eq.f32.partialorder %v9052_v51, %v9131_v15  ;;  %v14891_v51 = vld [vmem:[#allocation128_spill] sm:$0xff] }
 0x698   : > { %v2833_v50 = vsel %vm2832_vm15, %v2828_v33, inf }
 0x699   : > { %2834 = vmin.xlane.f32.xlu1 %v2833_v50 }
 0x6df   : > { %v2595_v61 = vpop.xlane.xlu0 %2594 }
 0x6e0   : > { %v2596_v11 = vcvt.f32.s32 %v2595_v61 }
 0x6e2   : > { %v2599_v38 = vadd.s32 %v2598_v27, %v2596_v11  ;;  %v14898_v11 = vld [vmem:[#allocation93_spill] sm:$0xff] }
 0x6e4   : > { %vm2840_vm14 = vcmp.eq.s32.totalorder %v14889_v39, %v2599_v38  ;;  %vm2841_vm5 = vcmp.eq.s32.totalorder %v14890_v45, %v2599_v38  ;;  %v9144_v54 = vsel %vm14131_vm2, %v2599_v38, %v14891_v51  ;;  %v14899_v38 = vld [vmem:[#allocation90_spill] sm:$0xff] }
 0x6e5   : > { %14892 = vst [vmem:[#allocation139_spill] sm:$0xff] %v9144_v54  ;;  %v2611_v9 = vpop.xlane.xlu1 %2610  ;;  %v9147_v26 = vsel %vm2840_vm14, 2147483647, %v14889_v39  ;;  %v9150_v30 = vsel %vm2841_vm5, 2147483647, %v14890_v45  ;;  %v2872_v34 = vsel %vm2840_vm14, %v14895_v49, 0.0 }
 0x6e6   : > { %14893 = vst [vmem:[#allocation140_spill] sm:$0xff] %v9147_v26  ;;  %14894 = vst [vmem:[#allocation141_spill] sm:$0xff] %v9150_v30  ;;  %v2612_v22 = vcvt.f32.s32 %v2611_v9  ;;  %v2723_v28 = vpop.xlane.xlu0 %2722  ;;  %vm3017_vm8 = vcmp.lt.s32.totalorder %v9147_v26, %v9150_v30  ;;  %v2873_v33 = vsel %vm2841_vm5, %v14896_v7, 0.0 }
 0x6e7   : > { %v2724_v21 = vcvt.f32.s32 %v2723_v28  ;;  %v9158_v61 = vsel %vm3017_vm8, %v9147_v26, %v9150_v30  ;;  %v9160_v27 = vadd.f32 %v2873_v33, %v2872_v34  ;;  %v14904_v34 = vld [vmem:[#allocation57_spill] sm:$0xff]  ;;  %v14905_v28 = vld [vmem:[#allocation91_spill] sm:$0xff]  ;;  %v14906_v33 = vld [vmem:[#allocation92_spill] sm:$0xff] }
 0x6e8   : > { %v2615_v50 = vadd.s32 %v2614_v25, %v2612_v22  ;;  %v3020_v52 = vshra.s32 %v9158_v61, 16  ;;  %v2741_v25 = vcvt.f32.s32 %v9071_v32 }
 0x6e9   : > { %14897 = vst [vmem:[#allocation126_spill] sm:$0xff] %v9160_v27  ;;  %v2727_v45 = vadd.s32 %v2726_v18, %v2724_v21  ;;  %v2629_v27 = vcvt.f32.s32 %v9077_v31 }
 0x6ea   : > { %vm2842_vm11 = vcmp.eq.s32.totalorder %v14898_v11, %v2615_v50  ;;  %vm2843_vm12 = vcmp.eq.s32.totalorder %v14899_v38, %v2615_v50  ;;  %v9168_v39 = vsel %vm14131_vm2, %v2615_v50, %v14900_v29  ;;  %v9181_v22 = vcvt.s32.f32 %v3020_v52  ;;  %v14910_v29 = vld [vmem:[#allocation16_spill] sm:$0xff] }
 0x6eb   : > { %14901 = vst [vmem:[#allocation142_spill] sm:$0xff] %v9168_v39  ;;  %v9174_v51 = vsel %vm2842_vm11, 2147483647, %v14898_v11  ;;  %v9179_v9 = vsel %vm2843_vm12, 2147483647, %v14899_v38  ;;  %vm2856_vm13 = vcmp.eq.s32.totalorder %v14904_v34, %v2727_v45  ;;  %vm2857_vm3 = vcmp.eq.s32.totalorder %v14905_v28, %v2727_v45  ;;  %v14913_v11 = vld [vmem:[#allocation13_spill] sm:$0xff] }
 0x6ec   : > { %14902 = vst [vmem:[#allocation145_spill] sm:$0xff] %v9174_v51  ;;  %14903 = vst [vmem:[#allocation108_spill] sm:$0xff] %v9179_v9  ;;  %v9188_v32 = vsel %vm14131_vm2, %v2727_v45, %v14906_v33  ;;  %vm3033_vm4 = vcmp.lt.s32.totalorder %v9174_v51, %v9179_v9  ;;  %v9195_v18 = vsel %vm2856_vm13, 2147483647, %v14904_v34  ;;  %v9200_v21 = vsel %vm2857_vm3, 2147483647, %v14905_v28  ;;  %3023 = vmin.xlane.f32.xlu0 %v9181_v22 }
 0x6ed   : > { %14907 = vst [vmem:[#allocation115_spill] sm:$0xff] %v9188_v32  ;;  %14908 = vst [vmem:[#allocation128_spill] sm:$0xff] %v9195_v18  ;;  %v9205_v52 = vsel %vm3033_vm4, %v9174_v51, %v9179_v9  ;;  %v2874_v33 = vsel %vm2842_vm11, %v14910_v29, 0.0  ;;  %vm3145_vm6 = vcmp.lt.s32.totalorder %v9195_v18, %v9200_v21  ;;  %v2875_v63 = vsel %vm2843_vm12, %v14911_v14, 0.0  ;;  %v14917_v45 = vld [vmem:[#allocation61_spill] sm:$0xff] }
 0x6ee   : > { %14909 = vst [vmem:[#allocation93_spill] sm:$0xff] %v9200_v21  ;;  %v3036_v17 = vshra.s32 %v9205_v52, 16  ;;  %v2739_v5 = vpop.xlane.xlu1 %2738  ;;  %v9219_v57 = vsel %vm3145_vm6, %v9195_v18, %v9200_v21  ;;  %v9221_v37 = vadd.f32 %v2875_v63, %v2874_v33  ;;  %v2888_v31 = vsel %vm2856_vm13, %v14913_v11, 0.0 }
 0x6ef   : > { %v2889_v29 = vsel %vm2857_vm3, %v14914_v62, 0.0  ;;  %v2742_v32 = vshll.u32 %v2741_v25, 16  ;;  %v2740_v39 = vcvt.f32.s32 %v2739_v5  ;;  %v3148_v50 = vshra.s32 %v9219_v57, 16  ;;  %v14918_v25 = vld [vmem:[#allocation62_spill] sm:$0xff] }
 0x6f0   : > { %14912 = vst [vmem:[#allocation90_spill] sm:$0xff] %v9221_v37  ;;  %v9229_v9 = vcvt.s32.f32 %v3036_v17  ;;  %v9232_v38 = vadd.f32 %v2889_v29, %v2888_v31  ;;  %v2630_v33 = vshll.u32 %v2629_v27, 16  ;;  %v2645_v34 = vcvt.f32.s32 %v9081_v56  ;;  %v14916_v37 = vld [vmem:[#allocation60_spill] sm:$0xff]  ;;  %v14922_v56 = vld [vmem:[#allocation17_spill] sm:$0xff]  ;;  %v14923_v29 = vld [vmem:[#allocation19_spill] sm:$0xff] }
 0x6f1   : > { %v2743_v14 = vadd.s32 %v2742_v32, %v2740_v39  ;;  %v9235_v63 = vcvt.s32.f32 %v3148_v50  ;;  %v14927_v62 = vld [vmem:[#allocation66_spill] sm:$0xff] }
 0x6f2   : > { %14915 = vst [vmem:[#allocation114_spill] sm:$0xff] %v9232_v38  ;;  %3039 = vmin.xlane.f32.xlu1 %v9229_v9  ;;  %v2627_v17 = vpop.xlane.xlu0 %2626 }
 0x6f3   : > { %vm2858_vm7 = vcmp.eq.s32.totalorder %v14916_v37, %v2743_v14  ;;  %vm2859_vm15 = vcmp.eq.s32.totalorder %v14917_v45, %v2743_v14  ;;  %v9243_v5 = vsel %vm14131_vm2, %v2743_v14, %v14918_v25  ;;  %3151 = vmin.xlane.f32.xlu0 %v9235_v63  ;;  %v2628_v27 = vcvt.f32.s32 %v2627_v17  ;;  %v14925_v17 = vld [vmem:[#allocation63_spill] sm:$0xff] }
 0x6f4   : > { %14919 = vst [vmem:[#allocation57_spill] sm:$0xff] %v9243_v5  ;;  %v9247_v39 = vsel %vm2858_vm7, 2147483647, %v14916_v37  ;;  %v9250_v28 = vsel %vm2859_vm15, 2147483647, %v14917_v45  ;;  %v2890_v32 = vsel %vm2858_vm7, %v14922_v56, 0.0 }
 0x6f5   : > { %14920 = vst [vmem:[#allocation91_spill] sm:$0xff] %v9247_v39  ;;  %14921 = vst [vmem:[#allocation92_spill] sm:$0xff] %v9250_v28  ;;  %vm3161_vm14 = vcmp.lt.s32.totalorder %v9247_v39, %v9250_v28  ;;  %v2891_v31 = vsel %vm2859_vm15, %v14923_v29, 0.0  ;;  %v2631_v50 = vadd.s32 %v2630_v33, %v2628_v27  ;;  %v2646_v37 = vshll.u32 %v2645_v34, 16  ;;  %v14926_v56 = vld [vmem:[#allocation65_spill] sm:$0xff] }
 0x6f6   : > { %v2643_v14 = vpop.xlane.xlu1 %2642  ;;  %v9258_v25 = vsel %vm3161_vm14, %v9247_v39, %v9250_v28  ;;  %v9260_v38 = vadd.f32 %v2891_v31, %v2890_v32  ;;  %v2757_v31 = vcvt.f32.s32 %v9086_v4  ;;  %v14932_v28 = vld [vmem:[#allocation24_spill] sm:$0xff] }
 0x6f7   : > { %v2644_v5 = vcvt.f32.s32 %v2643_v14  ;;  %v3164_v45 = vshra.s32 %v9258_v25, 16  ;;  %vm2844_vm5 = vcmp.eq.s32.totalorder %v14925_v17, %v2631_v50  ;;  %vm2845_vm8 = vcmp.eq.s32.totalorder %v14926_v56, %v2631_v50  ;;  %v14931_v14 = vld [vmem:[#allocation21_spill] sm:$0xff] }
 0x6f8   : > { %14924 = vst [vmem:[#allocation60_spill] sm:$0xff] %v9260_v38  ;;  %v9268_v29 = vsel %vm14131_vm2, %v2631_v50, %v14927_v62  ;;  %v9271_v33 = vsel %vm2844_vm5, 2147483647, %v14925_v17  ;;  %v9274_v27 = vsel %vm2845_vm8, 2147483647, %v14926_v56  ;;  %v2876_v38 = vsel %vm2844_vm5, %v14931_v14, 0.0 }
 0x6f9   : > { %14928 = vst [vmem:[#allocation61_spill] sm:$0xff] %v9268_v29  ;;  %14929 = vst [vmem:[#allocation62_spill] sm:$0xff] %v9271_v33  ;;  %v2647_v32 = vadd.s32 %v2646_v37, %v2644_v5  ;;  %v9276_v34 = vcvt.s32.f32 %v3164_v45  ;;  %vm3049_vm11 = vcmp.lt.s32.totalorder %v9271_v33, %v9274_v27  ;;  %v2877_v39 = vsel %vm2845_vm8, %v14932_v28, 0.0  ;;  %v14933_v62 = vld [vmem:[#allocation38_spill] sm:$0xff]  ;;  %v14934_v50 = vld [vmem:[#allocation40_spill] sm:$0xff] }
 0x6fa   : > { %14930 = vst [vmem:[#allocation63_spill] sm:$0xff] %v9274_v27  ;;  %v14935_v17 = vld [vmem:[#allocation41_spill] sm:$0xff]  ;;  %v9293_v4 = vsel %vm3049_vm11, %v9271_v33, %v9274_v27  ;;  %v9306_v29 = vadd.f32 %v2877_v39, %v2876_v38  ;;  %v2758_v27 = vshll.u32 %v2757_v31, 16  ;;  %v14944_v38 = vld [vmem:[#allocation68_spill] sm:$0xff] }
 0x6fb   : > { %vm2846_vm12 = vcmp.eq.s32.totalorder %v14933_v62, %v2647_v32  ;;  %vm2847_vm13 = vcmp.eq.s32.totalorder %v14934_v50, %v2647_v32  ;;  %v9288_v56 = vsel %vm14131_vm2, %v2647_v32, %v14935_v17  ;;  %3167 = vmin.xlane.f32.xlu1 %v9276_v34  ;;  %v3052_v45 = vshra.s32 %v9293_v4, 16  ;;  %v14939_v32 = vld [vmem:[#allocation27_spill] sm:$0xff]  ;;  %v14945_v39 = vld [vmem:[#allocation72_spill] sm:$0xff] }
 0x6fc   : > { %14936 = vst [vmem:[#allocation65_spill] sm:$0xff] %v9288_v56  ;;  %v9296_v5 = vsel %vm2846_vm12, 2147483647, %v14933_v62  ;;  %v9299_v37 = vsel %vm2847_vm13, 2147483647, %v14934_v50  ;;  %v2755_v28 = vpop.xlane.xlu0 %2754  ;;  %v2878_v17 = vsel %vm2846_vm12, %v14939_v32, 0.0  ;;  %v2773_v32 = vcvt.f32.s32 %v9091_v53 }
 0x6fd   : > { %14937 = vst [vmem:[#allocation66_spill] sm:$0xff] %v9296_v5  ;;  %14938 = vst [vmem:[#allocation38_spill] sm:$0xff] %v9299_v37  ;;  %vm3065_vm3 = vcmp.lt.s32.totalorder %v9296_v5, %v9299_v37  ;;  %v14940_v56 = vld [vmem:[#allocation31_spill] sm:$0xff]  ;;  %v2756_v33 = vcvt.f32.s32 %v2755_v28  ;;  %v9308_v11 = vcvt.s32.f32 %v3052_v45  ;;  %v14946_v28 = vld [vmem:[#allocation70_spill] sm:$0xff] }
 0x6fe   : > { %v2879_v14 = vsel %vm2847_vm13, %v14940_v56, 0.0  ;;  %14941 = vst [vmem:[#allocation40_spill] sm:$0xff] %v9306_v29  ;;  %v9312_v62 = vsel %vm3065_vm3, %v9296_v5, %v9299_v37  ;;  %v14950_v53 = vld [vmem:[#allocation20_spill] sm:$0xff]  ;;  %v2805_v5 = vcvt.f32.s32 %v9111_v35  ;;  %v14961_v35 = vld [vmem:[#allocation23_spill] sm:$0xff] }
 0x6ff   : > { %v3068_v50 = vshra.s32 %v9312_v62, 16  ;;  %v9315_v21 = vadd.f32 %v2879_v14, %v2878_v17  ;;  %v2759_v18 = vadd.s32 %v2758_v27, %v2756_v33  ;;  %3055 = vmin.xlane.f32.xlu0 %v9308_v11  ;;  %v14951_v14 = vld [vmem:[#allocation22_spill] sm:$0xff] }
 0x701   : > { %14942 = vst [vmem:[#allocation41_spill] sm:$0xff] %v9315_v21  ;;  %v9319_v56 = vcvt.s32.f32 %v3068_v50  ;;  %vm2860_vm4 = vcmp.eq.s32.totalorder %v14944_v38, %v2759_v18  ;;  %vm2861_vm6 = vcmp.eq.s32.totalorder %v14945_v39, %v2759_v18  ;;  %v9326_v31 = vsel %vm14131_vm2, %v2759_v18, %v14946_v28 }
 0x702   : > { %14947 = vst [vmem:[#allocation68_spill] sm:$0xff] %v9326_v31  ;;  %v9329_v45 = vsel %vm2860_vm4, 2147483647, %v14944_v38  ;;  %v9332_v33 = vsel %vm2861_vm6, 2147483647, %v14945_v39  ;;  %v2892_v27 = vsel %vm2860_vm4, %v14950_v53, 0.0  ;;  %v2661_v50 = vcvt.f32.s32 %v9097_v23 }
 0x703   : > { %14943 = vst [vmem:[#allocation151_spill] sm:$0xff] %v9319_v56  ;;  %14948 = vst [vmem:[#allocation72_spill] sm:$0xff] %v9329_v45  ;;  %3071 = vmin.xlane.f32.xlu1 %v9319_v56  ;;  %v2893_v17 = vsel %vm2861_vm6, %v14951_v14, 0.0  ;;  %v2771_v29 = vpop.xlane.xlu1 %2770  ;;  %vm3177_vm7 = vcmp.lt.s32.totalorder %v9329_v45, %v9332_v33  ;;  %v2774_v28 = vshll.u32 %v2773_v32, 16  ;;  %v2677_v53 = vcvt.f32.s32 %v9101_v16  ;;  %v14956_v32 = vld [vmem:[#allocation75_spill] sm:$0xff] }
 0x704   : > { %14949 = vst [vmem:[#allocation70_spill] sm:$0xff] %v9332_v33  ;;  %v9340_v18 = vadd.f32 %v2893_v17, %v2892_v27  ;;  %v2772_v38 = vcvt.f32.s32 %v2771_v29  ;;  %v9344_v39 = vsel %vm3177_vm7, %v9329_v45, %v9332_v33  ;;  %v2662_v14 = vshll.u32 %v2661_v50, 16  ;;  %v14955_v27 = vld [vmem:[#allocation43_spill] sm:$0xff]  ;;  %v14957_v29 = vld [vmem:[#allocation46_spill] sm:$0xff] }
 0x705   : > { %14953 = vst [vmem:[#allocation153_spill] sm:$0xff] %v9344_v39  ;;  %v3180_v21 = vshra.s32 %v9344_v39, 16  ;;  %v2789_v23 = vcvt.f32.s32 %v9107_v48  ;;  %v2693_v45 = vcvt.f32.s32 %v9117_v0 }
 0x706   : > { %14952 = vst [vmem:[#allocation152_spill] sm:$0xff] %v9340_v18  ;;  %v2775_v31 = vadd.s32 %v2774_v28, %v2772_v38  ;;  %v2678_v38 = vshll.u32 %v2677_v53, 16 }
 0x707   : > { %v9349_v37 = vcvt.s32.f32 %v3180_v21 }
 0x708   : > { %vm2862_vm15 = vcmp.eq.s32.totalorder %v14955_v27, %v2775_v31  ;;  %vm2863_vm14 = vcmp.eq.s32.totalorder %v14956_v32, %v2775_v31  ;;  %v9357_v17 = vsel %vm14131_vm2, %v2775_v31, %v14957_v29  ;;  %v2659_v18 = vpop.xlane.xlu0 %2658  ;;  %v2675_v21 = vpop.xlane.xlu1 %2674  ;;  %v14962_v31 = vld [vmem:[#allocation25_spill] sm:$0xff] }
 0x709   : > { %14954 = vst [vmem:[#allocation154_spill] sm:$0xff] %v9349_v37  ;;  %14958 = vst [vmem:[#allocation43_spill] sm:$0xff] %v9357_v17  ;;  %v9360_v16 = vsel %vm2862_vm15, 2147483647, %v14955_v27  ;;  %v9363_v50 = vsel %vm2863_vm14, 2147483647, %v14956_v32  ;;  %v2660_v48 = vcvt.f32.s32 %v2659_v18  ;;  %3183 = vmin.xlane.f32.xlu0 %v9349_v37  ;;  %v2676_v33 = vcvt.f32.s32 %v2675_v21 }
 0x70a   : > { %14959 = vst [vmem:[#allocation75_spill] sm:$0xff] %v9360_v16  ;;  %14960 = vst [vmem:[#allocation46_spill] sm:$0xff] %v9363_v50  ;;  %v2894_v28 = vsel %vm2862_vm15, %v14961_v35, 0.0  ;;  %vm3193_vm5 = vcmp.lt.s32.totalorder %v9360_v16, %v9363_v50  ;;  %v2895_v29 = vsel %vm2863_vm14, %v14962_v31, 0.0  ;;  %v2790_v18 = vshll.u32 %v2789_v23, 16  ;;  %v14965_v35 = vld [vmem:[#allocation74_spill] sm:$0xff] }
 0x70b   : > { %v9370_v17 = vadd.s32 %v2662_v14, %v2660_v48  ;;  %v9374_v27 = vsel %vm3193_vm5, %v9360_v16, %v9363_v50  ;;  %v9376_v32 = vadd.f32 %v2895_v29, %v2894_v28  ;;  %v9379_v51 = vadd.s32 %v2678_v38, %v2676_v33  ;;  %v14966_v14 = vld [vmem:[#allocation47_spill] sm:$0xff]  ;;  %v14972_v38 = vld [vmem:[#allocation49_spill] sm:$0xff] }
 0x70c   : > { %14963 = vst [vmem:[#allocation155_spill] sm:$0xff] %v9374_v27  ;;  %v3196_v53 = vshra.s32 %v9374_v27, 16  ;;  %v2806_v21 = vshll.u32 %v2805_v5, 16  ;;  %v14967_v48 = vld [vmem:[#allocation99_spill] sm:$0xff]  ;;  %v2694_v50 = vshll.u32 %v2693_v45, 16  ;;  %v2709_v45 = vcvt.f32.s32 %v9121_v24 }
 0x70d   : > { %14964 = vst [vmem:[#allocation156_spill] sm:$0xff] %v9376_v32  ;;  %vm2848_vm8 = vcmp.eq.s32.totalorder %v14965_v35, %v9370_v17  ;;  %vm2849_vm11 = vcmp.eq.s32.totalorder %v14966_v14, %v9370_v17  ;;  %v9390_v28 = vsel %vm14131_vm2, %v9370_v17, %v14967_v48  ;;  %v2787_v23 = vpop.xlane.xlu0 %2786  ;;  %v14971_v33 = vld [vmem:[#allocation51_spill] sm:$0xff]  ;;  %vm2851_vm13 = vcmp.eq.s32.totalorder %v14972_v38, %v9379_v51  ;;  %v14975_v32 = vld [vmem:[#allocation50_spill] sm:$0xff] }
 0x70e   : > { %14968 = vst [vmem:[#allocation74_spill] sm:$0xff] %v9390_v28  ;;  %v9396_v0 = vsel %vm2848_vm8, 2147483647, %v14965_v35  ;;  %v9402_v5 = vsel %vm2849_vm11, 2147483647, %v14966_v14  ;;  %vm2850_vm12 = vcmp.eq.s32.totalorder %v14971_v33, %v9379_v51  ;;  %v9424_v28 = vsel %vm14131_vm2, %v9379_v51, %v14975_v32 }
 0x70f   : > { %14969 = vst [vmem:[#allocation47_spill] sm:$0xff] %v9396_v0  ;;  %14970 = vst [vmem:[#allocation99_spill] sm:$0xff] %v9402_v5  ;;  %v9412_v29 = vsel %vm2850_vm12, 2147483647, %v14971_v33  ;;  %v9418_v48 = vsel %vm2851_vm13, 2147483647, %v14972_v38  ;;  %v2788_v31 = vcvt.f32.s32 %v2787_v23  ;;  %v9426_v7 = vcvt.s32.f32 %v3196_v53 }
 0x710   : > { %14973 = vst [vmem:[#allocation51_spill] sm:$0xff] %v9412_v29  ;;  %14974 = vst [vmem:[#allocation49_spill] sm:$0xff] %v9418_v48  ;;  %vm3081_vm3 = vcmp.lt.s32.totalorder %v9396_v0, %v9402_v5  ;;  %vm3097_vm4 = vcmp.lt.s32.totalorder %v9412_v29, %v9418_v48  ;;  %v2821_v53 = vcvt.f32.s32 %v9126_v41 }
 0x711   : > { %14976 = vst [vmem:[#allocation50_spill] sm:$0xff] %v9424_v28  ;;  %v2803_v16 = vpop.xlane.xlu1 %2802  ;;  %14977 = vst [vmem:[#allocation157_spill] sm:$0xff] %v9426_v7  ;;  %v9432_v49 = vadd.s32 %v2790_v18, %v2788_v31  ;;  %v9436_v30 = vsel %vm3081_vm3, %v9396_v0, %v9402_v5  ;;  %v9440_v32 = vsel %vm3097_vm4, %v9412_v29, %v9418_v48  ;;  %3199 = vmin.xlane.f32.xlu1 %v9426_v7  ;;  %v14981_v18 = vld [vmem:[#allocation53_spill] sm:$0xff]  ;;  %v14982_v28 = vld [vmem:[#allocation54_spill] sm:$0xff] }
 0x712   : > { %v2804_v54 = vcvt.f32.s32 %v2803_v16  ;;  %14978 = vst [vmem:[#allocation158_spill] sm:$0xff] %v9436_v30  ;;  %14979 = vst [vmem:[#allocation159_spill] sm:$0xff] %v9440_v32  ;;  %v3084_v23 = vshra.s32 %v9436_v30, 16  ;;  %v3100_v31 = vshra.s32 %v9440_v32, 16  ;;  %v14980_v16 = vld [vmem:[#allocation100_spill] sm:$0xff]  ;;  %v2710_v30 = vshll.u32 %v2709_v45, 16 }
 0x713   : > { %vm2864_vm6 = vcmp.eq.s32.totalorder %v14980_v16, %v9432_v49  ;;  %vm2865_vm7 = vcmp.eq.s32.totalorder %v14981_v18, %v9432_v49  ;;  %v9455_v48 = vsel %vm14131_vm2, %v9432_v49, %v14982_v28  ;;  %v14988_v28 = vld [vmem:[#allocation79_spill] sm:$0xff] }
 0x714   : > { %14983 = vst [vmem:[#allocation100_spill] sm:$0xff] %v9455_v48  ;;  %v9457_v24 = vadd.s32 %v2806_v21, %v2804_v54  ;;  %v9463_v41 = vsel %vm2864_vm6, 2147483647, %v14980_v16  ;;  %v9469_v29 = vsel %vm2865_vm7, 2147483647, %v14981_v18  ;;  %v9471_v5 = vcvt.s32.f32 %v3084_v23  ;;  %v14989_v54 = vld [vmem:[#allocation143_spill] sm:$0xff] }
 0x715   : > { %14984 = vst [vmem:[#allocation53_spill] sm:$0xff] %v9463_v41  ;;  %14985 = vst [vmem:[#allocation54_spill] sm:$0xff] %v9469_v29  ;;  %v9473_v0 = vcvt.s32.f32 %v3100_v31  ;;  %v14990_v21 = vld [vmem:[#allocation103_spill] sm:$0xff]  ;;  %vm3209_vm5 = vcmp.lt.s32.totalorder %v9463_v41, %v9469_v29  ;;  %v3019_v16 = vand.u32 65535, %v9158_v61 }
 0x716   : > { %14986 = vst [vmem:[#allocation160_spill] sm:$0xff] %v9471_v5  ;;  %vm2866_vm15 = vcmp.eq.s32.totalorder %v14988_v28, %v9457_v24  ;;  %vm2867_vm14 = vcmp.eq.s32.totalorder %v14989_v54, %v9457_v24  ;;  %v9483_v48 = vsel %vm14131_vm2, %v9457_v24, %v14990_v21  ;;  %3087 = vmin.xlane.f32.xlu0 %v9471_v5  ;;  %v2822_v5 = vshll.u32 %v2821_v53, 16 }
 0x717   : > { %14987 = vst [vmem:[#allocation161_spill] sm:$0xff] %v9473_v0  ;;  %14991 = vst [vmem:[#allocation79_spill] sm:$0xff] %v9483_v48  ;;  %v2691_v26 = vpop.xlane.xlu0 %2690  ;;  %v9491_v23 = vsel %vm2866_vm15, 2147483647, %v14988_v28  ;;  %v9497_v31 = vsel %vm2867_vm14, 2147483647, %v14989_v54  ;;  %3103 = vmin.xlane.f32.xlu1 %v9473_v0  ;;  %v9503_v21 = vsel %vm3209_vm5, %v9463_v41, %v9469_v29  ;;  %v3021_v18 = vcvt.s32.f32 %v3019_v16 }
 0x718   : > { %14992 = vst [vmem:[#allocation143_spill] sm:$0xff] %v9491_v23  ;;  %14993 = vst [vmem:[#allocation103_spill] sm:$0xff] %v9497_v31  ;;  %v2692_v7 = vcvt.f32.s32 %v2691_v26  ;;  %v2707_v48 = vpop.xlane.xlu1 %2706  ;;  %v3212_v32 = vshra.s32 %v9503_v21, 16  ;;  %vm3225_vm3 = vcmp.lt.s32.totalorder %v9491_v23, %v9497_v31  ;;  %v14997_v29 = vld [vmem:[#allocation105_spill] sm:$0xff]  ;;  %v14998_v41 = vld [vmem:[#allocation83_spill] sm:$0xff]  ;;  %v2896_v24 = vsel %vm2864_vm6, %v14877_v8, 0.0 }
 0x719   : > { %14994 = vst [vmem:[#allocation162_spill] sm:$0xff] %v9503_v21  ;;  %v2708_v37 = vcvt.f32.s32 %v2707_v48  ;;  %v9510_v26 = vsel %vm3225_vm3, %v9491_v23, %v9497_v31  ;;  %v14999_v21 = vld [vmem:[#allocation106_spill] sm:$0xff]  ;;  %v2897_v54 = vsel %vm2865_vm7, %v14879_v3, 0.0 }
 0x71a   : > { %v2695_v27 = vadd.s32 %v2694_v50, %v2692_v7  ;;  %14995 = vst [vmem:[#allocation163_spill] sm:$0xff] %v9510_v26  ;;  %v9512_v39 = vcvt.s32.f32 %v3212_v32  ;;  %v3228_v0 = vshra.s32 %v9510_v26, 16  ;;  %v2837_v50 = vcvt.f32.s32 %v9131_v15  ;;  %v15009_v26 = vld [vmem:[#allocation34_spill] sm:$0xff] }
 0x71b   : > { %v2711_v7 = vadd.s32 %v2710_v30, %v2708_v37  ;;  %v15004_v30 = vld [vmem:[#allocation107_spill] sm:$0xff]  ;;  %v2880_v33 = vsel %vm2848_vm8, %v15009_v26, 0.0 }
 0x71c   : > { %14996 = vst [vmem:[#allocation164_spill] sm:$0xff] %v9512_v39  ;;  %vm2852_vm4 = vcmp.eq.s32.totalorder %v14997_v29, %v2695_v27  ;;  %vm2853_vm5 = vcmp.eq.s32.totalorder %v14998_v41, %v2695_v27  ;;  %v9520_v56 = vsel %vm14131_vm2, %v2695_v27, %v14999_v21  ;;  %3215 = vmin.xlane.f32.xlu0 %v9512_v39  ;;  %v9534_v45 = vcvt.s32.f32 %v3228_v0 }
 0x71d   : > { %15000 = vst [vmem:[#allocation105_spill] sm:$0xff] %v9520_v56  ;;  %v9526_v48 = vsel %vm2852_vm4, 2147483647, %v14997_v29  ;;  %v9531_v32 = vsel %vm2853_vm5, 2147483647, %v14998_v41  ;;  %vm2854_vm3 = vcmp.eq.s32.totalorder %v8929_v12, %v2711_v7  ;;  %vm2855_vm9 = vcmp.eq.s32.totalorder %v8934_v6, %v2711_v7  ;;  %v2819_v37 = vpop.xlane.xlu0 %2818  ;;  %v15007_v56 = vld [vmem:[#allocation39_spill] sm:$0xff] }
 0x71e   : > { %15001 = vst [vmem:[#allocation83_spill] sm:$0xff] %v9526_v48  ;;  %15002 = vst [vmem:[#allocation106_spill] sm:$0xff] %v9531_v32  ;;  %v9541_v15 = vsel %vm14131_vm2, %v2711_v7, %v15004_v30  ;;  %vm3113_vm10 = vcmp.lt.s32.totalorder %v9526_v48, %v9531_v32  ;;  %v9548_v53 = vsel %vm2854_vm3, 2147483647, %v8929_v12  ;;  %v9553_v0 = vsel %vm2855_vm9, 2147483647, %v8934_v6  ;;  %3231 = vmin.xlane.f32.xlu1 %v9534_v45 }
 0x71f   : > { %15003 = vst [vmem:[#allocation165_spill] sm:$0xff] %v9534_v45  ;;  %15005 = vst [vmem:[#allocation107_spill] sm:$0xff] %v9541_v15  ;;  %v2820_v21 = vcvt.f32.s32 %v2819_v37  ;;  %v9558_v30 = vsel %vm3113_vm10, %v9526_v48, %v9531_v32  ;;  %vm3129_vm1 = vcmp.lt.s32.totalorder %v9548_v53, %v9553_v0  ;;  %v2882_v31 = vsel %vm2850_vm12, %v15007_v56, 0.0  ;;  %v15008_v45 = vld [vmem:[#allocation42_spill] sm:$0xff] }
 0x720   : > { %15006 = vst [vmem:[#allocation166_spill] sm:$0xff] %v9558_v30  ;;  %v3116_v15 = vshra.s32 %v9558_v30, 16  ;;  %v9569_v37 = vsel %vm3129_vm1, %v9548_v53, %v9553_v0  ;;  %v2883_v32 = vsel %vm2851_vm13, %v15008_v45, 0.0  ;;  %v2838_v48 = vshll.u32 %v2837_v50, 16 }
 0x721   : > { %v2823_v23 = vadd.s32 %v2822_v5, %v2820_v21  ;;  %v3132_v39 = vshra.s32 %v9569_v37, 16  ;;  %v9589_v38 = vadd.f32 %v2883_v32, %v2882_v31  ;;  %v2886_v32 = vsel %vm2854_vm3, %v14628_v44, 0.0 }
 0x722   : > { %v9575_v30 = vcvt.s32.f32 %v3116_v15  ;;  %v2835_v51 = vpop.xlane.xlu1 %2834  ;;  %v2887_v26 = vsel %vm2855_vm9, %v14630_v55, 0.0  ;;  %v2884_v12 = vsel %vm2852_vm4, %v14874_v47, 0.0  ;;  %v2885_v6 = vsel %vm2853_vm5, %v14627_v60, 0.0 }
 0x723   : > { %vm2868_vm10 = vcmp.eq.s32.totalorder %v8971_v13, %v2823_v23  ;;  %vm2869_vm1 = vcmp.eq.s32.totalorder %v8976_v36, %v2823_v23  ;;  %v9587_v5 = vsel %vm14131_vm2, %v2823_v23, %v8964_v40  ;;  %15010 = vst [vmem:[#allocation39_spill] sm:$0xff] %v9589_v38  ;;  %v2836_v15 = vcvt.f32.s32 %v2835_v51  ;;  %v15011_v40 = vld [vmem:[#allocation37_spill] sm:$0xff] }
 0x724   : > { %v9594_v50 = vsel %vm2868_vm10, 2147483647, %v8971_v13  ;;  %v9599_v35 = vsel %vm2869_vm1, 2147483647, %v8976_v36  ;;  %3119 = vmin.xlane.f32.xlu0 %v9575_v30  ;;  %v9602_v21 = vcvt.s32.f32 %v3132_v39  ;;  %v2881_v31 = vsel %vm2849_vm11, %v15011_v40, 0.0 }
 0x725   : > { %vm3241_vm8 = vcmp.lt.s32.totalorder %v9594_v50, %v9599_v35  ;;  %v2839_v38 = vadd.s32 %v2838_v48, %v2836_v15  ;;  %v9618_v39 = vadd.f32 %v2881_v31, %v2880_v33  ;;  %v9624_v14 = vadd.f32 %v2887_v26, %v2886_v32 }
 0x726   : > { %3135 = vmin.xlane.f32.xlu1 %v9602_v21  ;;  %v9616_v51 = vsel %vm3241_vm8, %v9594_v50, %v9599_v35  ;;  %v9649_v33 = vadd.f32 %v2885_v6, %v2884_v12  ;;  %v2900_v31 = vsel %vm2868_vm10, %v14518_v42, 0.0  ;;  %v2901_v32 = vsel %vm2869_vm1, %v14633_v43, 0.0 }
 0x727   : > { %15012 = vst [vmem:[#allocation42_spill] sm:$0xff] %v9618_v39  ;;  %v3244_v17 = vshra.s32 %v9616_v51, 16  ;;  %15013 = vst [vmem:[#allocation37_spill] sm:$0xff] %v9624_v14  ;;  %vm2870_vm11 = vcmp.eq.s32.totalorder %v9019_v20, %v2839_v38  ;;  %vm2871_vm12 = vcmp.eq.s32.totalorder %v9022_v2, %v2839_v38  ;;  %v9634_v48 = vsel %vm14131_vm2, %v2839_v38, %v9014_v1 }
 0x728   : > { %v9640_v26 = vsel %vm2870_vm11, 2147483647, %v9019_v20  ;;  %v9643_v7 = vsel %vm2871_vm12, 2147483647, %v9022_v2  ;;  %15014 = vst [vmem:[#allocation167_spill] sm:$0xff] %v9649_v33  ;;  %v2898_v1 = vsel %vm2866_vm15, %v14624_v59, 0.0  ;;  %v9687_v12 = vadd.f32 %v2897_v54, %v2896_v24 }
 0x729   : > { %v9645_v29 = vcvt.s32.f32 %v3244_v17  ;;  %vm3257_vm9 = vcmp.lt.s32.totalorder %v9640_v26, %v9643_v7  ;;  %v2899_v20 = vsel %vm2867_vm14, %v14752_v10, 0.0  ;;  %v2902_v41 = vsel %vm2870_vm11, %v14634_v46, 0.0  ;;  %v15055_v33 = vld [vmem:[#allocation18_spill] sm:$0xff] }
 0x72a   : > { %v9662_v2 = vsel %vm3257_vm9, %v9640_v26, %v9643_v7  ;;  %v9664_v27 = vadd.f32 %v2899_v20, %v2898_v1  ;;  %v2903_v38 = vsel %vm2871_vm12, %v14636_v19, 0.0  ;;  %15017 = vst [vmem:[#allocation170_spill] sm:$0xff] %v9687_v12  ;;  %v9689_v6 = vadd.f32 %v2901_v32, %v2900_v31 }
 0x72b   : > { %3247 = vmin.xlane.f32.xlu0 %v9645_v29  ;;  %v3260_v28 = vshra.s32 %v9662_v2, 16  ;;  %v9669_v15 = vadd.f32 %v2903_v38, %v2902_v41  ;;  %v3035_v13 = vand.u32 65535, %v9205_v52  ;;  %v3147_v23 = vand.u32 65535, %v9219_v57 }
 0x72c   : > { %15015 = vst [vmem:[#allocation168_spill] sm:$0xff] %v9664_v27  ;;  %15018 = vst [vmem:[#allocation171_spill] sm:$0xff] %v9689_v6  ;;  %v3163_v52 = vand.u32 65535, %v9258_v25  ;;  %v3067_v54 = vand.u32 65535, %v9312_v62 }
 0x72d   : > { %15016 = vst [vmem:[#allocation169_spill] sm:$0xff] %v9669_v15  ;;  %v9685_v17 = vcvt.s32.f32 %v3260_v28  ;;  %v3037_v20 = vcvt.s32.f32 %v3035_v13  ;;  %v3149_v38 = vcvt.s32.f32 %v3147_v23  ;;  %v15021_v23 = vld [vmem:[#allocation154_spill] sm:$0xff] }
 0x72e   : > { %v3165_v57 = vcvt.s32.f32 %v3163_v52  ;;  %v3069_v16 = vcvt.s32.f32 %v3067_v54  ;;  %v15023_v52 = vld [vmem:[#allocation158_spill] sm:$0xff]  ;;  %v15025_v54 = vld [vmem:[#allocation157_spill] sm:$0xff] }
 0x72f   : > { %3263 = vmin.xlane.f32.xlu1 %v9685_v17 }
 0x775   : > { %v9693_v49 = vpop.xlane.xlu0 %3023 }
 0x776   : > { %vm3025_vm13 = vcmp.eq.f32.partialorder %v9181_v22, %v9693_v49 }
 0x777   : > { %v3026_v36 = vsel %vm3025_vm13, %v3021_v18, inf  ;;  %v15019_v18 = vld [vmem:[#allocation151_spill] sm:$0xff] }
 0x778   : > { %3027 = vmin.xlane.f32.xlu0 %v3026_v36 }
 0x77b   : > { %v9699_v1 = vpop.xlane.xlu1 %3039 }
 0x77c   : > { %vm3041_vm6 = vcmp.eq.f32.partialorder %v9229_v9, %v9699_v1  ;;  %v9703_v41 = vpop.xlane.xlu0 %3151  ;;  %v3051_v9 = vand.u32 65535, %v9293_v4  ;;  %v15020_v4 = vld [vmem:[#allocation153_spill] sm:$0xff] }
 0x77d   : > { %v3042_v61 = vsel %vm3041_vm6, %v3037_v20, inf  ;;  %vm3153_vm7 = vcmp.eq.f32.partialorder %v9235_v63, %v9703_v41  ;;  %v3179_v13 = vand.u32 65535, %v15020_v4  ;;  %v15026_v4 = vld [vmem:[#allocation160_spill] sm:$0xff] }
 0x77e   : > { %3043 = vmin.xlane.f32.xlu1 %v3042_v61  ;;  %v3154_v22 = vsel %vm3153_vm7, %v3149_v38, inf  ;;  %v3053_v32 = vcvt.s32.f32 %v3051_v9  ;;  %v15024_v9 = vld [vmem:[#allocation159_spill] sm:$0xff]  ;;  %vm14206_vm7 = vcmp.eq.s32.totalorder %v14524_v58, 5 }
 0x77f   : > { %3155 = vmin.xlane.f32.xlu0 %v3154_v22  ;;  %v3181_v62 = vcvt.s32.f32 %v3179_v13  ;;  %v15027_v13 = vld [vmem:[#allocation161_spill] sm:$0xff] }
 0x784   : > { %v9708_v28 = vpop.xlane.xlu1 %3167 }
 0x785   : > { %vm3169_vm15 = vcmp.eq.f32.partialorder %v9276_v34, %v9708_v28 }
 0x786   : > { %v3170_v24 = vsel %vm3169_vm15, %v3165_v57, inf  ;;  %v3083_v57 = vand.u32 65535, %v15023_v52 }
 0x787   : > { %3171 = vmin.xlane.f32.xlu1 %v3170_v24  ;;  %v3099_v24 = vand.u32 65535, %v15024_v9  ;;  %v15030_v9 = vld [vmem:[#allocation164_spill] sm:$0xff] }
 0x788   : > { %v9714_v31 = vpop.xlane.xlu0 %3055 }
 0x789   : > { %vm3057_vm14 = vcmp.eq.f32.partialorder %v9308_v11, %v9714_v31  ;;  %v15022_v11 = vld [vmem:[#allocation155_spill] sm:$0xff]  ;;  %v3062_v12 = vcvt.f32.s32 %v9714_v31 }
 0x78a   : > { %v3058_v63 = vsel %vm3057_vm14, %v3053_v32, inf  ;;  %v3195_v61 = vand.u32 65535, %v15022_v11 }
 0x78b   : > { %3059 = vmin.xlane.f32.xlu0 %v3058_v63 }
 0x78c   : > { %v9718_v25 = vpop.xlane.xlu1 %3071  ;;  %v3197_v22 = vcvt.s32.f32 %v3195_v61  ;;  %v15029_v61 = vld [vmem:[#allocation163_spill] sm:$0xff] }
 0x78d   : > { %vm3073_vm4 = vcmp.eq.f32.partialorder %v15019_v18, %v9718_v25 }
 0x78e   : > { %v3074_v34 = vsel %vm3073_vm4, %v3069_v16, inf  ;;  %v3085_v16 = vcvt.s32.f32 %v3083_v57 }
 0x78f   : > { %3075 = vmin.xlane.f32.xlu1 %v3074_v34  ;;  %v3101_v34 = vcvt.s32.f32 %v3099_v24 }
 0x792   : > { %v9723_v36 = vpop.xlane.xlu0 %3183 }
 0x793   : > { %vm3185_vm5 = vcmp.eq.f32.partialorder %v15021_v23, %v9723_v36 }
 0x794   : > { %v3186_v20 = vsel %vm3185_vm5, %v3181_v62, inf  ;;  %v15028_v62 = vld [vmem:[#allocation162_spill] sm:$0xff] }
 0x795   : > { %3187 = vmin.xlane.f32.xlu0 %v3186_v20  ;;  %v3211_v23 = vand.u32 65535, %v15028_v62  ;;  %v3131_v62 = vand.u32 65535, %v9569_v37 }
 0x797   : > { %v3213_v57 = vcvt.s32.f32 %v3211_v23 }
 0x79a   : > { %v9728_v38 = vpop.xlane.xlu1 %3199 }
 0x79b   : > { %vm3201_vm3 = vcmp.eq.f32.partialorder %v15025_v54, %v9728_v38 }
 0x79c   : > { %v3202_v32 = vsel %vm3201_vm3, %v3197_v22, inf  ;;  %v3227_v22 = vand.u32 65535, %v15029_v61 }
 0x79d   : > { %3203 = vmin.xlane.f32.xlu1 %v3202_v32 }
 0x79e   : > { %v3229_v32 = vcvt.s32.f32 %v3227_v22  ;;  %v3133_v22 = vcvt.s32.f32 %v3131_v62  ;;  %v3046_v62 = vcvt.f32.s32 %v9699_v1 }
 0x79f   : > { %v9734_v63 = vpop.xlane.xlu0 %3087 }
 0x7a0   : > { %v9736_v18 = vpop.xlane.xlu1 %3103  ;;  %vm3089_vm10 = vcmp.eq.f32.partialorder %v15026_v4, %v9734_v63  ;;  %v15031_v4 = vld [vmem:[#allocation165_spill] sm:$0xff] }
 0x7a1   : > { %vm3105_vm1 = vcmp.eq.f32.partialorder %v15027_v13, %v9736_v18  ;;  %v3090_v20 = vsel %vm3089_vm10, %v3085_v16, inf  ;;  %v15032_v16 = vld [vmem:[#allocation166_spill] sm:$0xff] }
 0x7a2   : > { %v3106_v11 = vsel %vm3105_vm1, %v3101_v34, inf  ;;  %3091 = vmin.xlane.f32.xlu0 %v3090_v20  ;;  %v3115_v34 = vand.u32 65535, %v15032_v16 }
 0x7a3   : > { %3107 = vmin.xlane.f32.xlu1 %v3106_v11 }
 0x7a4   : > { %v3117_v23 = vcvt.s32.f32 %v3115_v34 }
 0x7a5   : > { %v9744_v52 = vpop.xlane.xlu0 %3215 }
 0x7a6   : > { %vm3217_vm8 = vcmp.eq.f32.partialorder %v15030_v9, %v9744_v52 }
 0x7a7   : > { %v3218_v24 = vsel %vm3217_vm8, %v3213_v57, inf  ;;  %v9748_v54 = vpop.xlane.xlu1 %3231  ;;  %v3243_v57 = vand.u32 65535, %v9616_v51  ;;  %v3030_v51 = vcvt.f32.s32 %v9693_v49 }
 0x7a8   : > { %3219 = vmin.xlane.f32.xlu0 %v3218_v24  ;;  %vm3233_vm11 = vcmp.eq.f32.partialorder %v15031_v4, %v9748_v54 }
 0x7a9   : > { %v3234_v13 = vsel %vm3233_vm11, %v3229_v32, inf  ;;  %v3245_v37 = vcvt.s32.f32 %v3243_v57  ;;  %v15034_v57 = vld [vmem:[#allocation141_spill] sm:$0xff] }
 0x7aa   : > { %3235 = vmin.xlane.f32.xlu1 %v3234_v13  ;;  %v3031_v13 = vshll.u32 %v3030_v51, 16  ;;  %v15040_v51 = vld [vmem:[#allocation14_spill] sm:$0xff] }
 0x7ad   : > { %v9754_v20 = vpop.xlane.xlu0 %3119 }
 0x7ae   : > { %vm3121_vm12 = vcmp.eq.f32.partialorder %v9575_v30, %v9754_v20  ;;  %v3259_v30 = vand.u32 65535, %v9662_v2 }
 0x7af   : > { %v3122_v11 = vsel %vm3121_vm12, %v3117_v23, inf  ;;  %v9758_v61 = vpop.xlane.xlu1 %3135 }
 0x7b0   : > { %3123 = vmin.xlane.f32.xlu0 %v3122_v11  ;;  %vm3137_vm9 = vcmp.eq.f32.partialorder %v9602_v21, %v9758_v61  ;;  %v3261_v16 = vcvt.s32.f32 %v3259_v30  ;;  %v3047_v11 = vshll.u32 %v3046_v62, 16 }
 0x7b1   : > { %v3138_v9 = vsel %vm3137_vm9, %v3133_v22, inf  ;;  %v15033_v22 = vld [vmem:[#allocation140_spill] sm:$0xff] }
 0x7b2   : > { %3139 = vmin.xlane.f32.xlu1 %v3138_v9 }
 0x7b4   : > { %v9763_v24 = vpop.xlane.xlu0 %3247 }
 0x7b5   : > { %vm3249_vm13 = vcmp.eq.f32.partialorder %v9645_v29, %v9763_v24  ;;  %v3158_v29 = vcvt.f32.s32 %v9703_v41  ;;  %v15039_v41 = vld [vmem:[#allocation12_spill] sm:$0xff] }
 0x7b6   : > { %v3250_v32 = vsel %vm3249_vm13, %v3245_v37, inf }
 0x7b7   : > { %3251 = vmin.xlane.f32.xlu0 %v3250_v32 }
 0x7b8   : > { %v9768_v4 = vpop.xlane.xlu1 %3263 }
 0x7b9   : > { %vm3265_vm6 = vcmp.eq.f32.partialorder %v9685_v17, %v9768_v4  ;;  %v15035_v17 = vld [vmem:[#allocation139_spill] sm:$0xff] }
 0x7ba   : > { %v3266_v21 = vsel %vm3265_vm6, %v3261_v16, inf  ;;  %v3159_v16 = vshll.u32 %v3158_v29, 16  ;;  %v15044_v29 = vld [vmem:[#allocation142_spill] sm:$0xff] }
 0x7bb   : > { %3267 = vmin.xlane.f32.xlu1 %v3266_v21 }
 0x801   : > { %v3028_v34 = vpop.xlane.xlu0 %3027 }
 0x802   : > { %v3029_v23 = vcvt.f32.s32 %v3028_v34 }
 0x804   : > { %v3032_v2 = vadd.s32 %v3031_v13, %v3029_v23 }
 0x806   : > { %vm3273_vm15 = vcmp.eq.s32.totalorder %v15033_v22, %v3032_v2  ;;  %vm3274_vm14 = vcmp.eq.s32.totalorder %v15034_v57, %v3032_v2  ;;  %v9781_v9 = vsel %vm14206_vm7, %v3032_v2, %v15035_v17  ;;  %v15043_v17 = vld [vmem:[#allocation108_spill] sm:$0xff] }
 0x807   : > { %15036 = vst [vmem:[#allocation151_spill] sm:$0xff] %v9781_v9  ;;  %v3044_v49 = vpop.xlane.xlu1 %3043  ;;  %v9784_v37 = vsel %vm3273_vm15, 2147483647, %v15033_v22  ;;  %v9787_v1 = vsel %vm3274_vm14, 2147483647, %v15034_v57  ;;  %v3305_v32 = vsel %vm3273_vm15, %v15039_v41, 0.0 }
 0x808   : > { %15037 = vst [vmem:[#allocation153_spill] sm:$0xff] %v9784_v37  ;;  %15038 = vst [vmem:[#allocation154_spill] sm:$0xff] %v9787_v1  ;;  %v3045_v30 = vcvt.f32.s32 %v3044_v49  ;;  %v3156_v21 = vpop.xlane.xlu0 %3155  ;;  %vm3450_vm4 = vcmp.lt.s32.totalorder %v9784_v37, %v9787_v1  ;;  %v3306_v34 = vsel %vm3274_vm14, %v15040_v51, 0.0  ;;  %v15042_v57 = vld [vmem:[#allocation145_spill] sm:$0xff] }
 0x809   : > { %v3157_v62 = vcvt.f32.s32 %v3156_v21  ;;  %v9795_v23 = vsel %vm3450_vm4, %v9784_v37, %v9787_v1  ;;  %v9797_v2 = vadd.f32 %v3306_v34, %v3305_v32  ;;  %v15048_v34 = vld [vmem:[#allocation128_spill] sm:$0xff]  ;;  %v15109_v9 = vld [vmem:[#allocation25_spill] sm:$0xff] }
 0x80a   : > { %v3048_v13 = vadd.s32 %v3047_v11, %v3045_v30  ;;  %v3453_v22 = vshra.s32 %v9795_v23, 16  ;;  %v3174_v11 = vcvt.f32.s32 %v9708_v28 }
 0x80b   : > { %15041 = vst [vmem:[#allocation155_spill] sm:$0xff] %v9797_v2  ;;  %v3160_v6 = vadd.s32 %v3159_v16, %v3157_v62  ;;  %v15049_v2 = vld [vmem:[#allocation93_spill] sm:$0xff] }
 0x80c   : > { %vm3275_vm5 = vcmp.eq.s32.totalorder %v15042_v57, %v3048_v13  ;;  %vm3276_vm3 = vcmp.eq.s32.totalorder %v15043_v17, %v3048_v13  ;;  %v9805_v49 = vsel %vm14206_vm7, %v3048_v13, %v15044_v29  ;;  %v9818_v21 = vcvt.s32.f32 %v3453_v22  ;;  %v15050_v29 = vld [vmem:[#allocation115_spill] sm:$0xff] }
 0x80d   : > { %15045 = vst [vmem:[#allocation158_spill] sm:$0xff] %v9805_v49  ;;  %v9811_v30 = vsel %vm3275_vm5, 2147483647, %v15042_v57  ;;  %v9816_v32 = vsel %vm3276_vm3, 2147483647, %v15043_v17  ;;  %vm3289_vm10 = vcmp.eq.s32.totalorder %v15048_v34, %v3160_v6  ;;  %vm3290_vm1 = vcmp.eq.s32.totalorder %v15049_v2, %v3160_v6  ;;  %v15057_v57 = vld [vmem:[#allocation13_spill] sm:$0xff] }
 0x80e   : > { %15046 = vst [vmem:[#allocation159_spill] sm:$0xff] %v9811_v30  ;;  %15047 = vst [vmem:[#allocation157_spill] sm:$0xff] %v9816_v32  ;;  %v9825_v28 = vsel %vm14206_vm7, %v3160_v6, %v15050_v29  ;;  %vm3466_vm8 = vcmp.lt.s32.totalorder %v9811_v30, %v9816_v32  ;;  %v9832_v16 = vsel %vm3289_vm10, 2147483647, %v15048_v34  ;;  %v9837_v62 = vsel %vm3290_vm1, 2147483647, %v15049_v2  ;;  %3456 = vmin.xlane.f32.xlu0 %v9818_v21 }
 0x80f   : > { %15051 = vst [vmem:[#allocation160_spill] sm:$0xff] %v9825_v28  ;;  %15052 = vst [vmem:[#allocation161_spill] sm:$0xff] %v9832_v16  ;;  %v9842_v22 = vsel %vm3466_vm8, %v9811_v30, %v9816_v32  ;;  %v15054_v29 = vld [vmem:[#allocation16_spill] sm:$0xff]  ;;  %vm3578_vm11 = vcmp.lt.s32.totalorder %v9832_v16, %v9837_v62  ;;  %v3308_v14 = vsel %vm3276_vm3, %v15055_v33, 0.0  ;;  %v3321_v31 = vsel %vm3289_vm10, %v15057_v57, 0.0  ;;  %v15062_v2 = vld [vmem:[#allocation57_spill] sm:$0xff] }
 0x810   : > { %15053 = vst [vmem:[#allocation162_spill] sm:$0xff] %v9837_v62  ;;  %v3307_v15 = vsel %vm3275_vm5, %v15054_v29, 0.0  ;;  %v3469_v27 = vshra.s32 %v9842_v22, 16  ;;  %v3172_v39 = vpop.xlane.xlu1 %3171  ;;  %v9856_v28 = vsel %vm3578_vm11, %v9832_v16, %v9837_v62  ;;  %v15058_v29 = vld [vmem:[#allocation15_spill] sm:$0xff]  ;;  %v3175_v30 = vshll.u32 %v3174_v11, 16  ;;  %v15061_v6 = vld [vmem:[#allocation92_spill] sm:$0xff] }
 0x811   : > { %v9858_v49 = vadd.f32 %v3308_v14, %v3307_v15  ;;  %v3322_v32 = vsel %vm3290_vm1, %v15058_v29, 0.0  ;;  %v3173_v51 = vcvt.f32.s32 %v3172_v39  ;;  %v3581_v13 = vshra.s32 %v9856_v28, 16  ;;  %v15071_v29 = vld [vmem:[#allocation61_spill] sm:$0xff] }
 0x812   : > { %v9866_v41 = vcvt.s32.f32 %v3469_v27  ;;  %v9869_v17 = vadd.f32 %v3322_v32, %v3321_v31  ;;  %v3063_v15 = vshll.u32 %v3062_v12, 16  ;;  %v3078_v34 = vcvt.f32.s32 %v9718_v25  ;;  %v15066_v25 = vld [vmem:[#allocation17_spill] sm:$0xff]  ;;  %v15067_v32 = vld [vmem:[#allocation19_spill] sm:$0xff] }
 0x813   : > { %15056 = vst [vmem:[#allocation163_spill] sm:$0xff] %v9858_v49  ;;  %v3176_v33 = vadd.s32 %v3175_v30, %v3173_v51  ;;  %v9872_v14 = vcvt.s32.f32 %v3581_v13  ;;  %v15060_v49 = vld [vmem:[#allocation91_spill] sm:$0xff] }
 0x814   : > { %15059 = vst [vmem:[#allocation164_spill] sm:$0xff] %v9869_v17  ;;  %3472 = vmin.xlane.f32.xlu1 %v9866_v41  ;;  %v3060_v27 = vpop.xlane.xlu0 %3059 }
 0x815   : > { %vm3291_vm12 = vcmp.eq.s32.totalorder %v15060_v49, %v3176_v33  ;;  %vm3292_vm9 = vcmp.eq.s32.totalorder %v15061_v6, %v3176_v33  ;;  %v9880_v39 = vsel %vm14206_vm7, %v3176_v33, %v15062_v2  ;;  %3584 = vmin.xlane.f32.xlu0 %v9872_v14  ;;  %v3061_v12 = vcvt.f32.s32 %v3060_v27  ;;  %v15069_v27 = vld [vmem:[#allocation62_spill] sm:$0xff] }
 0x816   : > { %15063 = vst [vmem:[#allocation165_spill] sm:$0xff] %v9880_v39  ;;  %v9884_v51 = vsel %vm3291_vm12, 2147483647, %v15060_v49  ;;  %v9887_v11 = vsel %vm3292_vm9, 2147483647, %v15061_v6  ;;  %v3323_v30 = vsel %vm3291_vm12, %v15066_v25, 0.0 }
 0x817   : > { %15064 = vst [vmem:[#allocation166_spill] sm:$0xff] %v9884_v51  ;;  %15065 = vst [vmem:[#allocation140_spill] sm:$0xff] %v9887_v11  ;;  %vm3594_vm13 = vcmp.lt.s32.totalorder %v9884_v51, %v9887_v11  ;;  %v3324_v31 = vsel %vm3292_vm9, %v15067_v32, 0.0  ;;  %v3064_v13 = vadd.s32 %v3063_v15, %v3061_v12  ;;  %v3079_v49 = vshll.u32 %v3078_v34, 16  ;;  %v15070_v25 = vld [vmem:[#allocation63_spill] sm:$0xff] }
 0x818   : > { %v3076_v33 = vpop.xlane.xlu1 %3075  ;;  %v9895_v2 = vsel %vm3594_vm13, %v9884_v51, %v9887_v11  ;;  %v9897_v17 = vadd.f32 %v3324_v31, %v3323_v30  ;;  %v3190_v31 = vcvt.f32.s32 %v9723_v36  ;;  %v15076_v11 = vld [vmem:[#allocation24_spill] sm:$0xff] }
 0x819   : > { %v3077_v39 = vcvt.f32.s32 %v3076_v33  ;;  %v3597_v6 = vshra.s32 %v9895_v2, 16  ;;  %vm3277_vm6 = vcmp.eq.s32.totalorder %v15069_v27, %v3064_v13  ;;  %vm3278_vm15 = vcmp.eq.s32.totalorder %v15070_v25, %v3064_v13  ;;  %v15075_v33 = vld [vmem:[#allocation21_spill] sm:$0xff] }
 0x81a   : > { %15068 = vst [vmem:[#allocation141_spill] sm:$0xff] %v9897_v17  ;;  %v9905_v32 = vsel %vm14206_vm7, %v3064_v13, %v15071_v29  ;;  %v9908_v15 = vsel %vm3277_vm6, 2147483647, %v15069_v27  ;;  %v9911_v12 = vsel %vm3278_vm15, 2147483647, %v15070_v25  ;;  %v3309_v17 = vsel %vm3277_vm6, %v15075_v33, 0.0 }
 0x81b   : > { %15072 = vst [vmem:[#allocation139_spill] sm:$0xff] %v9905_v32  ;;  %15073 = vst [vmem:[#allocation145_spill] sm:$0xff] %v9908_v15  ;;  %v3080_v30 = vadd.s32 %v3079_v49, %v3077_v39  ;;  %v9913_v34 = vcvt.s32.f32 %v3597_v6  ;;  %vm3482_vm14 = vcmp.lt.s32.totalorder %v9908_v15, %v9911_v12  ;;  %v3310_v51 = vsel %vm3278_vm15, %v15076_v11, 0.0  ;;  %v15077_v29 = vld [vmem:[#allocation66_spill] sm:$0xff]  ;;  %v15079_v27 = vld [vmem:[#allocation65_spill] sm:$0xff] }
 0x81c   : > { %15074 = vst [vmem:[#allocation108_spill] sm:$0xff] %v9911_v12  ;;  %v15078_v13 = vld [vmem:[#allocation38_spill] sm:$0xff]  ;;  %v9930_v36 = vsel %vm3482_vm14, %v9908_v15, %v9911_v12  ;;  %v9943_v32 = vadd.f32 %v3310_v51, %v3309_v17  ;;  %v3191_v12 = vshll.u32 %v3190_v31, 16  ;;  %v3206_v17 = vcvt.f32.s32 %v9728_v38  ;;  %v15091_v51 = vld [vmem:[#allocation72_spill] sm:$0xff] }
 0x81d   : > { %vm3279_vm4 = vcmp.eq.s32.totalorder %v15077_v29, %v3080_v30  ;;  %vm3280_vm5 = vcmp.eq.s32.totalorder %v15078_v13, %v3080_v30  ;;  %v9925_v25 = vsel %vm14206_vm7, %v3080_v30, %v15079_v27  ;;  %3600 = vmin.xlane.f32.xlu1 %v9913_v34  ;;  %15081 = vst [vmem:[#allocation128_spill] sm:$0xff] %v9930_v36  ;;  %v3485_v6 = vshra.s32 %v9930_v36, 16  ;;  %v15084_v30 = vld [vmem:[#allocation27_spill] sm:$0xff]  ;;  %v15093_v31 = vld [vmem:[#allocation68_spill] sm:$0xff]  ;;  %v15098_v38 = vld [vmem:[#allocation22_spill] sm:$0xff] }
 0x81e   : > { %15080 = vst [vmem:[#allocation142_spill] sm:$0xff] %v9925_v25  ;;  %v9933_v39 = vsel %vm3279_vm4, 2147483647, %v15077_v29  ;;  %v9936_v49 = vsel %vm3280_vm5, 2147483647, %v15078_v13  ;;  %v3188_v11 = vpop.xlane.xlu0 %3187  ;;  %v3311_v27 = vsel %vm3279_vm4, %v15084_v30, 0.0 }
 0x81f   : > { %15082 = vst [vmem:[#allocation93_spill] sm:$0xff] %v9933_v39  ;;  %15083 = vst [vmem:[#allocation115_spill] sm:$0xff] %v9936_v49  ;;  %vm3498_vm3 = vcmp.lt.s32.totalorder %v9933_v39, %v9936_v49  ;;  %v15085_v25 = vld [vmem:[#allocation31_spill] sm:$0xff]  ;;  %v3189_v15 = vcvt.f32.s32 %v3188_v11  ;;  %v9945_v57 = vcvt.s32.f32 %v3485_v6  ;;  %v15092_v11 = vld [vmem:[#allocation70_spill] sm:$0xff] }
 0x820   : > { %v3312_v33 = vsel %vm3280_vm5, %v15085_v25, 0.0  ;;  %15086 = vst [vmem:[#allocation91_spill] sm:$0xff] %v9943_v32  ;;  %v9949_v29 = vsel %vm3498_vm3, %v9933_v39, %v9936_v49 }
 0x821   : > { %15087 = vst [vmem:[#allocation92_spill] sm:$0xff] %v9945_v57  ;;  %15088 = vst [vmem:[#allocation57_spill] sm:$0xff] %v9949_v29  ;;  %v3501_v13 = vshra.s32 %v9949_v29, 16  ;;  %v9952_v62 = vadd.f32 %v3312_v33, %v3311_v27  ;;  %v3192_v16 = vadd.s32 %v3191_v12, %v3189_v15  ;;  %3488 = vmin.xlane.f32.xlu0 %v9945_v57  ;;  %v15097_v12 = vld [vmem:[#allocation20_spill] sm:$0xff] }
 0x823   : > { %15089 = vst [vmem:[#allocation62_spill] sm:$0xff] %v9952_v62  ;;  %v9955_v30 = vcvt.s32.f32 %v3501_v13  ;;  %vm3293_vm10 = vcmp.eq.s32.totalorder %v15091_v51, %v3192_v16  ;;  %vm3294_vm1 = vcmp.eq.s32.totalorder %v15092_v11, %v3192_v16  ;;  %v9963_v6 = vsel %vm14206_vm7, %v3192_v16, %v15093_v31 }
 0x824   : > { %15094 = vst [vmem:[#allocation61_spill] sm:$0xff] %v9963_v6  ;;  %v9966_v32 = vsel %vm3293_vm10, 2147483647, %v15091_v51  ;;  %v9969_v15 = vsel %vm3294_vm1, 2147483647, %v15092_v11  ;;  %v3325_v33 = vsel %vm3293_vm10, %v15097_v12, 0.0  ;;  %v3094_v16 = vcvt.f32.s32 %v9734_v63 }
 0x825   : > { %15090 = vst [vmem:[#allocation63_spill] sm:$0xff] %v9955_v30  ;;  %15095 = vst [vmem:[#allocation66_spill] sm:$0xff] %v9966_v32  ;;  %3504 = vmin.xlane.f32.xlu1 %v9955_v30  ;;  %v3326_v27 = vsel %vm3294_vm1, %v15098_v38, 0.0  ;;  %vm3610_vm8 = vcmp.lt.s32.totalorder %v9966_v32, %v9969_v15  ;;  %v3110_v11 = vcvt.f32.s32 %v9736_v18  ;;  %v3222_v31 = vcvt.f32.s32 %v9744_v52  ;;  %v15102_v18 = vld [vmem:[#allocation75_spill] sm:$0xff]  ;;  %v15103_v52 = vld [vmem:[#allocation46_spill] sm:$0xff] }
 0x826   : > { %15096 = vst [vmem:[#allocation38_spill] sm:$0xff] %v9969_v15  ;;  %v9976_v13 = vadd.f32 %v3326_v27, %v3325_v33  ;;  %v9981_v51 = vsel %vm3610_vm8, %v9966_v32, %v9969_v15  ;;  %v3238_v62 = vcvt.f32.s32 %v9748_v54  ;;  %v3204_v12 = vpop.xlane.xlu1 %3203  ;;  %v3207_v6 = vshll.u32 %v3206_v17, 16  ;;  %v15104_v54 = vld [vmem:[#allocation43_spill] sm:$0xff] }
 0x827   : > { %15100 = vst [vmem:[#allocation72_spill] sm:$0xff] %v9981_v51  ;;  %v3613_v38 = vshra.s32 %v9981_v51, 16  ;;  %v3205_v25 = vcvt.f32.s32 %v3204_v12  ;;  %v3095_v27 = vshll.u32 %v3094_v16, 16  ;;  %v3111_v63 = vshll.u32 %v3110_v11, 16 }
 0x828   : > { %15099 = vst [vmem:[#allocation65_spill] sm:$0xff] %v9976_v13  ;;  %v3223_v13 = vshll.u32 %v3222_v31, 16  ;;  %v3239_v39 = vshll.u32 %v3238_v62, 16  ;;  %v3126_v11 = vcvt.f32.s32 %v9754_v20  ;;  %v15113_v20 = vld [vmem:[#allocation99_spill] sm:$0xff] }
 0x829   : > { %v9987_v49 = vcvt.s32.f32 %v3613_v38  ;;  %v3208_v33 = vadd.s32 %v3207_v6, %v3205_v25  ;;  %v15108_v38 = vld [vmem:[#allocation23_spill] sm:$0xff] }
 0x82a   : > { %v3127_v37 = vshll.u32 %v3126_v11, 16  ;;  %v15128_v11 = vld [vmem:[#allocation54_spill] sm:$0xff] }
 0x82b   : > { %15101 = vst [vmem:[#allocation70_spill] sm:$0xff] %v9987_v49  ;;  %v3092_v15 = vpop.xlane.xlu0 %3091  ;;  %3616 = vmin.xlane.f32.xlu0 %v9987_v49  ;;  %vm3295_vm11 = vcmp.eq.s32.totalorder %v15102_v18, %v3208_v33  ;;  %vm3296_vm12 = vcmp.eq.s32.totalorder %v15103_v52, %v3208_v33  ;;  %v9995_v17 = vsel %vm14206_vm7, %v3208_v33, %v15104_v54 }
 0x82c   : > { %v3108_v32 = vpop.xlane.xlu1 %3107  ;;  %15105 = vst [vmem:[#allocation68_spill] sm:$0xff] %v9995_v17  ;;  %v3093_v12 = vcvt.f32.s32 %v3092_v15  ;;  %v9998_v25 = vsel %vm3295_vm11, 2147483647, %v15102_v18  ;;  %v10001_v6 = vsel %vm3296_vm12, 2147483647, %v15103_v52  ;;  %v3327_v16 = vsel %vm3295_vm11, %v15108_v38, 0.0 }
 0x82d   : > { %15106 = vst [vmem:[#allocation75_spill] sm:$0xff] %v9998_v25  ;;  %15107 = vst [vmem:[#allocation46_spill] sm:$0xff] %v10001_v6  ;;  %v3109_v62 = vcvt.f32.s32 %v3108_v32  ;;  %vm3626_vm9 = vcmp.lt.s32.totalorder %v9998_v25, %v10001_v6  ;;  %v3328_v33 = vsel %vm3296_vm12, %v15109_v9, 0.0  ;;  %v3142_v15 = vcvt.f32.s32 %v9758_v61  ;;  %v15112_v52 = vld [vmem:[#allocation47_spill] sm:$0xff]  ;;  %v15122_v9 = vld [vmem:[#allocation50_spill] sm:$0xff] }
 0x82e   : > { %v10005_v31 = vadd.s32 %v3095_v27, %v3093_v12  ;;  %v10015_v18 = vsel %vm3626_vm9, %v9998_v25, %v10001_v6  ;;  %v10017_v32 = vadd.f32 %v3328_v33, %v3327_v16  ;;  %v15114_v27 = vld [vmem:[#allocation74_spill] sm:$0xff]  ;;  %v15118_v33 = vld [vmem:[#allocation51_spill] sm:$0xff] }
 0x82f   : > { %v10011_v54 = vadd.s32 %v3111_v63, %v3109_v62  ;;  %15110 = vst [vmem:[#allocation43_spill] sm:$0xff] %v10015_v18  ;;  %v3629_v63 = vshra.s32 %v10015_v18, 16 }
 0x830   : > { %15111 = vst [vmem:[#allocation172_spill] sm:$0xff] %v10017_v32  ;;  %vm3281_vm13 = vcmp.eq.s32.totalorder %v15112_v52, %v10005_v31  ;;  %vm3282_vm6 = vcmp.eq.s32.totalorder %v15113_v20, %v10005_v31  ;;  %v10027_v12 = vsel %vm14206_vm7, %v10005_v31, %v15114_v27  ;;  %v15119_v27 = vld [vmem:[#allocation49_spill] sm:$0xff] }
 0x831   : > { %15115 = vst [vmem:[#allocation47_spill] sm:$0xff] %v10027_v12  ;;  %v3220_v61 = vpop.xlane.xlu0 %3219  ;;  %v10034_v62 = vsel %vm3281_vm13, 2147483647, %v15112_v52  ;;  %v10040_v16 = vsel %vm3282_vm6, 2147483647, %v15113_v20  ;;  %vm3283_vm15 = vcmp.eq.s32.totalorder %v15118_v33, %v10011_v54  ;;  %vm3284_vm14 = vcmp.eq.s32.totalorder %v15119_v27, %v10011_v54 }
 0x832   : > { %15116 = vst [vmem:[#allocation99_spill] sm:$0xff] %v10034_v62  ;;  %15117 = vst [vmem:[#allocation74_spill] sm:$0xff] %v10040_v16  ;;  %v10050_v32 = vsel %vm3283_vm15, 2147483647, %v15118_v33  ;;  %v10056_v12 = vsel %vm3284_vm14, 2147483647, %v15119_v27  ;;  %v10062_v38 = vsel %vm14206_vm7, %v10011_v54, %v15122_v9  ;;  %v3221_v17 = vcvt.f32.s32 %v3220_v61 }
 0x833   : > { %15120 = vst [vmem:[#allocation51_spill] sm:$0xff] %v10050_v32  ;;  %15121 = vst [vmem:[#allocation49_spill] sm:$0xff] %v10056_v12  ;;  %v3236_v6 = vpop.xlane.xlu1 %3235  ;;  %v10064_v1 = vcvt.s32.f32 %v3629_v63  ;;  %vm3514_vm4 = vcmp.lt.s32.totalorder %v10034_v62, %v10040_v16  ;;  %vm3530_vm5 = vcmp.lt.s32.totalorder %v10050_v32, %v10056_v12 }
 0x834   : > { %15123 = vst [vmem:[#allocation50_spill] sm:$0xff] %v10062_v38  ;;  %v3237_v25 = vcvt.f32.s32 %v3236_v6  ;;  %v10070_v18 = vadd.s32 %v3223_v13, %v3221_v17  ;;  %v10074_v49 = vsel %vm3514_vm4, %v10034_v62, %v10040_v16  ;;  %v10078_v9 = vsel %vm3530_vm5, %v10050_v32, %v10056_v12  ;;  %v15127_v17 = vld [vmem:[#allocation53_spill] sm:$0xff]  ;;  %v15129_v16 = vld [vmem:[#allocation100_spill] sm:$0xff]  ;;  %v15134_v12 = vld [vmem:[#allocation103_spill] sm:$0xff] }
 0x835   : > { %15124 = vst [vmem:[#allocation173_spill] sm:$0xff] %v10064_v1  ;;  %15125 = vst [vmem:[#allocation174_spill] sm:$0xff] %v10074_v49  ;;  %v3143_v6 = vshll.u32 %v3142_v15, 16  ;;  %3632 = vmin.xlane.f32.xlu1 %v10064_v1  ;;  %v3517_v63 = vshra.s32 %v10074_v49, 16  ;;  %v3533_v38 = vshra.s32 %v10078_v9, 16  ;;  %v3254_v13 = vcvt.f32.s32 %v9763_v24  ;;  %v15133_v15 = vld [vmem:[#allocation143_spill] sm:$0xff] }
 0x836   : > { %15126 = vst [vmem:[#allocation175_spill] sm:$0xff] %v10078_v9  ;;  %v10080_v61 = vadd.s32 %v3239_v39, %v3237_v25  ;;  %vm3297_vm3 = vcmp.eq.s32.totalorder %v15127_v17, %v10070_v18  ;;  %vm3298_vm10 = vcmp.eq.s32.totalorder %v15128_v11, %v10070_v18  ;;  %v10094_v39 = vsel %vm14206_vm7, %v10070_v18, %v15129_v16  ;;  %v15137_v62 = vld [vmem:[#allocation79_spill] sm:$0xff] }
 0x837   : > { %15130 = vst [vmem:[#allocation53_spill] sm:$0xff] %v10094_v39  ;;  %v10100_v25 = vsel %vm3297_vm3, 2147483647, %v15127_v17  ;;  %v10106_v24 = vsel %vm3298_vm10, 2147483647, %v15128_v11  ;;  %v10130_v51 = vcvt.s32.f32 %v3517_v63  ;;  %v10132_v30 = vcvt.s32.f32 %v3533_v38 }
 0x838   : > { %15131 = vst [vmem:[#allocation54_spill] sm:$0xff] %v10100_v25  ;;  %15132 = vst [vmem:[#allocation100_spill] sm:$0xff] %v10106_v24  ;;  %vm3299_vm1 = vcmp.eq.s32.totalorder %v15133_v15, %v10080_v61  ;;  %vm3300_vm8 = vcmp.eq.s32.totalorder %v15134_v12, %v10080_v61  ;;  %v10128_v9 = vsel %vm14206_vm7, %v10080_v61, %v15137_v62  ;;  %v3255_v63 = vshll.u32 %v3254_v13, 16 }
 0x839   : > { %v3124_v16 = vpop.xlane.xlu0 %3123  ;;  %v10116_v39 = vsel %vm3299_vm1, 2147483647, %v15133_v15  ;;  %v10122_v32 = vsel %vm3300_vm8, 2147483647, %v15134_v12  ;;  %15138 = vst [vmem:[#allocation79_spill] sm:$0xff] %v10128_v9  ;;  %15139 = vst [vmem:[#allocation176_spill] sm:$0xff] %v10130_v51  ;;  %vm3642_vm11 = vcmp.lt.s32.totalorder %v10100_v25, %v10106_v24  ;;  %v3270_v38 = vcvt.f32.s32 %v9768_v4  ;;  %3520 = vmin.xlane.f32.xlu0 %v10130_v51  ;;  %3536 = vmin.xlane.f32.xlu1 %v10132_v30 }
 0x83a   : > { %15135 = vst [vmem:[#allocation143_spill] sm:$0xff] %v10116_v39  ;;  %15136 = vst [vmem:[#allocation103_spill] sm:$0xff] %v10122_v32  ;;  %v3125_v49 = vcvt.f32.s32 %v3124_v16  ;;  %vm3658_vm12 = vcmp.lt.s32.totalorder %v10116_v39, %v10122_v32  ;;  %v10142_v36 = vsel %vm3642_vm11, %v10100_v25, %v10106_v24  ;;  %v15144_v9 = vld [vmem:[#allocation105_spill] sm:$0xff]  ;;  %v3331_v31 = vsel %vm3299_vm1, %v14624_v59, 0.0 }
 0x83b   : > { %v3140_v1 = vpop.xlane.xlu1 %3139  ;;  %15140 = vst [vmem:[#allocation177_spill] sm:$0xff] %v10132_v30  ;;  %v10146_v62 = vsel %vm3658_vm12, %v10116_v39, %v10122_v32  ;;  %v3645_v16 = vshra.s32 %v10142_v36, 16  ;;  %v3330_v12 = vsel %vm3298_vm10, %v14879_v3, 0.0  ;;  %v3468_v11 = vand.u32 65535, %v9842_v22 }
 0x83c   : > { %v10138_v57 = vadd.s32 %v3127_v37, %v3125_v49  ;;  %v3141_v29 = vcvt.f32.s32 %v3140_v1  ;;  %15141 = vst [vmem:[#allocation178_spill] sm:$0xff] %v10146_v62  ;;  %v3661_v37 = vshra.s32 %v10146_v62, 16  ;;  %v15142_v1 = vld [vmem:[#allocation83_spill] sm:$0xff]  ;;  %v15143_v49 = vld [vmem:[#allocation106_spill] sm:$0xff]  ;;  %v3596_v22 = vand.u32 65535, %v9895_v2 }
 0x83d   : > { %v10175_v24 = vcvt.s32.f32 %v3645_v16 }
 0x83e   : > { %vm3285_vm9 = vcmp.eq.s32.totalorder %v15142_v1, %v10138_v57  ;;  %vm3286_vm4 = vcmp.eq.s32.totalorder %v15143_v49, %v10138_v57  ;;  %v10161_v13 = vsel %vm14206_vm7, %v10138_v57, %v15144_v9  ;;  %v3144_v4 = vadd.s32 %v3143_v6, %v3141_v29  ;;  %v15149_v29 = vld [vmem:[#allocation107_spill] sm:$0xff] }
 0x83f   : > { %15145 = vst [vmem:[#allocation83_spill] sm:$0xff] %v10161_v13  ;;  %v10167_v32 = vsel %vm3285_vm9, 2147483647, %v15142_v1  ;;  %v10173_v39 = vsel %vm3286_vm4, 2147483647, %v15143_v49  ;;  %15148 = vst [vmem:[#allocation179_spill] sm:$0xff] %v10175_v24  ;;  %v10177_v25 = vcvt.s32.f32 %v3661_v37  ;;  %3648 = vmin.xlane.f32.xlu0 %v10175_v24 }
 0x840   : > { %15146 = vst [vmem:[#allocation106_spill] sm:$0xff] %v10167_v32  ;;  %15147 = vst [vmem:[#allocation105_spill] sm:$0xff] %v10173_v39  ;;  %vm3287_vm5 = vcmp.eq.s32.totalorder %v9548_v53, %v3144_v4  ;;  %vm3288_vm11 = vcmp.eq.s32.totalorder %v9553_v0, %v3144_v4  ;;  %v10184_v9 = vsel %vm14206_vm7, %v3144_v4, %v15149_v29  ;;  %v3252_v6 = vpop.xlane.xlu0 %3251  ;;  %v3271_v24 = vshll.u32 %v3270_v38, 16 }
 0x841   : > { %15150 = vst [vmem:[#allocation107_spill] sm:$0xff] %v10184_v9  ;;  %vm3546_vm12 = vcmp.lt.s32.totalorder %v10167_v32, %v10173_v39  ;;  %v10191_v16 = vsel %vm3287_vm5, 2147483647, %v9548_v53  ;;  %v10196_v37 = vsel %vm3288_vm11, 2147483647, %v9553_v0  ;;  %v3253_v13 = vcvt.f32.s32 %v3252_v6  ;;  %3664 = vmin.xlane.f32.xlu1 %v10177_v25 }
 0x842   : > { %15151 = vst [vmem:[#allocation180_spill] sm:$0xff] %v10191_v16  ;;  %15152 = vst [vmem:[#allocation181_spill] sm:$0xff] %v10196_v37  ;;  %v10202_v29 = vsel %vm3546_vm12, %v10167_v32, %v10173_v39  ;;  %vm3562_vm2 = vcmp.lt.s32.totalorder %v10191_v16, %v10196_v37  ;;  %v3318_v52 = vsel %vm3286_vm4, %v14627_v60, 0.0  ;;  %v3329_v49 = vsel %vm3297_vm3, %v14877_v8, 0.0 }
 0x843   : > { %v3549_v9 = vshra.s32 %v10202_v29, 16  ;;  %v3256_v30 = vadd.s32 %v3255_v63, %v3253_v13  ;;  %v10209_v51 = vsel %vm3562_vm2, %v10191_v16, %v10196_v37 }
 0x844   : > { %v3565_v6 = vshra.s32 %v10209_v51, 16  ;;  %v3268_v32 = vpop.xlane.xlu1 %3267 }
 0x845   : > { %v10211_v62 = vcvt.s32.f32 %v3549_v9  ;;  %vm3301_vm0 = vcmp.eq.s32.totalorder %v9594_v50, %v3256_v30  ;;  %vm3302_vm12 = vcmp.eq.s32.totalorder %v9599_v35, %v3256_v30  ;;  %v10219_v39 = vsel %vm14206_vm7, %v3256_v30, %v9587_v5 }
 0x846   : > { %15153 = vst [vmem:[#allocation182_spill] sm:$0xff] %v10219_v39  ;;  %v10224_v63 = vsel %vm3301_vm0, 2147483647, %v9594_v50  ;;  %v10229_v13 = vsel %vm3302_vm12, 2147483647, %v9599_v35  ;;  %v3269_v38 = vcvt.f32.s32 %v3268_v32  ;;  %v10232_v9 = vcvt.s32.f32 %v3565_v6 }
 0x847   : > { %3552 = vmin.xlane.f32.xlu0 %v10211_v62  ;;  %vm3674_vm2 = vcmp.lt.s32.totalorder %v10224_v63, %v10229_v13  ;;  %v3315_v5 = vsel %vm3283_vm15, %v15007_v56, 0.0  ;;  %v3316_v32 = vsel %vm3284_vm14, %v15008_v45, 0.0  ;;  %v3319_v6 = vsel %vm3287_vm5, %v14628_v44, 0.0 }
 0x848   : > { %v3272_v39 = vadd.s32 %v3271_v24, %v3269_v38  ;;  %3568 = vmin.xlane.f32.xlu1 %v10232_v9  ;;  %v10243_v37 = vsel %vm3674_vm2, %v10224_v63, %v10229_v13  ;;  %v10253_v33 = vadd.f32 %v3316_v32, %v3315_v5  ;;  %v3320_v24 = vsel %vm3288_vm11, %v14630_v55, 0.0  ;;  %v15156_v38 = vld [vmem:[#allocation34_spill] sm:$0xff] }
 0x849   : > { %v3677_v16 = vshra.s32 %v10243_v37, 16  ;;  %v10265_v27 = vadd.f32 %v3320_v24, %v3319_v6  ;;  %v3314_v5 = vsel %vm3282_vm6, %v15011_v40, 0.0  ;;  %v3317_v32 = vsel %vm3285_vm9, %v14874_v47, 0.0 }
 0x84a   : > { %15154 = vst [vmem:[#allocation183_spill] sm:$0xff] %v10253_v33  ;;  %vm3303_vm15 = vcmp.eq.s32.totalorder %v9640_v26, %v3272_v39  ;;  %vm3304_vm2 = vcmp.eq.s32.totalorder %v9643_v7, %v3272_v39  ;;  %v10263_v54 = vsel %vm14206_vm7, %v3272_v39, %v9634_v48  ;;  %v3313_v48 = vsel %vm3281_vm13, %v15156_v38, 0.0 }
 0x84b   : > { %15155 = vst [vmem:[#allocation184_spill] sm:$0xff] %v10265_v27  ;;  %v10270_v53 = vsel %vm3303_vm15, 2147483647, %v9640_v26  ;;  %v10275_v0 = vsel %vm3304_vm2, 2147483647, %v9643_v7  ;;  %v10277_v4 = vcvt.s32.f32 %v3677_v16  ;;  %v10298_v6 = vadd.f32 %v3314_v5, %v3313_v48 }
 0x84c   : > { %vm3690_vm14 = vcmp.lt.s32.totalorder %v10270_v53, %v10275_v0  ;;  %v10309_v1 = vadd.f32 %v3318_v52, %v3317_v32  ;;  %v3332_v24 = vsel %vm3300_vm8, %v14752_v10, 0.0  ;;  %v3335_v57 = vsel %vm3303_vm15, %v14634_v46, 0.0 }
 0x84d   : > { %3680 = vmin.xlane.f32.xlu0 %v10277_v4  ;;  %v10296_v16 = vsel %vm3690_vm14, %v10270_v53, %v10275_v0  ;;  %15157 = vst [vmem:[#allocation34_spill] sm:$0xff] %v10298_v6  ;;  %v10315_v48 = vadd.f32 %v3332_v24, %v3331_v31  ;;  %v3336_v15 = vsel %vm3304_vm2, %v14636_v19, 0.0  ;;  %v10335_v26 = vadd.f32 %v3330_v12, %v3329_v49  ;;  %v15164_v12 = vld [vmem:[#allocation57_spill] sm:$0xff] }
 0x84e   : > { %v3693_v20 = vshra.s32 %v10296_v16, 16  ;;  %15158 = vst [vmem:[#allocation185_spill] sm:$0xff] %v10309_v1  ;;  %v10329_v32 = vadd.f32 %v3336_v15, %v3335_v57  ;;  %v3333_v7 = vsel %vm3301_vm0, %v14518_v42, 0.0  ;;  %v3334_v61 = vsel %vm3302_vm12, %v14633_v43, 0.0  ;;  %v15163_v15 = vld [vmem:[#allocation128_spill] sm:$0xff] }
 0x84f   : > { %15159 = vst [vmem:[#allocation186_spill] sm:$0xff] %v10315_v48  ;;  %15161 = vst [vmem:[#allocation188_spill] sm:$0xff] %v10335_v26  ;;  %v10344_v17 = vadd.f32 %v3334_v61, %v3333_v7  ;;  %v3452_v39 = vand.u32 65535, %v9795_v23  ;;  %v3580_v31 = vand.u32 65535, %v9856_v28  ;;  %v3470_v30 = vcvt.s32.f32 %v3468_v11  ;;  %v15209_v48 = vld [vmem:[#allocation18_spill] sm:$0xff] }
 0x850   : > { %v10327_v5 = vcvt.s32.f32 %v3693_v20  ;;  %15160 = vst [vmem:[#allocation187_spill] sm:$0xff] %v10329_v32  ;;  %v3598_v28 = vcvt.s32.f32 %v3596_v22  ;;  %v3500_v7 = vand.u32 65535, %v15164_v12  ;;  %v15170_v12 = vld [vmem:[#allocation173_spill] sm:$0xff] }
 0x851   : > { %15162 = vst [vmem:[#allocation189_spill] sm:$0xff] %v10344_v17  ;;  %v3454_v18 = vcvt.s32.f32 %v3452_v39  ;;  %v3582_v24 = vcvt.s32.f32 %v3580_v31  ;;  %v15167_v31 = vld [vmem:[#allocation72_spill] sm:$0xff] }
 0x852   : > { %3696 = vmin.xlane.f32.xlu1 %v10327_v5  ;;  %v3502_v11 = vcvt.s32.f32 %v3500_v7 }
 0x897   : > { %v10347_v52 = vpop.xlane.xlu0 %3456 }
 0x898   : > { %vm3458_vm13 = vcmp.eq.f32.partialorder %v9818_v21, %v10347_v52 }
 0x899   : > { %v3459_v50 = vsel %vm3458_vm13, %v3454_v18, inf }
 0x89a   : > { %3460 = vmin.xlane.f32.xlu0 %v3459_v50  ;;  %v15166_v50 = vld [vmem:[#allocation63_spill] sm:$0xff] }
 0x89d   : > { %v10353_v35 = vpop.xlane.xlu1 %3472 }
 0x89e   : > { %vm3474_vm0 = vcmp.eq.f32.partialorder %v9866_v41, %v10353_v35  ;;  %v10357_v20 = vpop.xlane.xlu0 %3584  ;;  %v3484_v41 = vand.u32 65535, %v15163_v15 }
 0x89f   : > { %v3475_v23 = vsel %vm3474_vm0, %v3470_v30, inf  ;;  %vm3586_vm6 = vcmp.eq.f32.partialorder %v9872_v14, %v10357_v20  ;;  %v15165_v14 = vld [vmem:[#allocation92_spill] sm:$0xff]  ;;  %v3612_v30 = vand.u32 65535, %v15167_v31  ;;  %vm14282_vm0 = vcmp.eq.s32.totalorder %v14524_v58, 6 }
 0x8a0   : > { %3476 = vmin.xlane.f32.xlu1 %v3475_v23  ;;  %v3587_v21 = vsel %vm3586_vm6, %v3582_v24, inf  ;;  %v3486_v39 = vcvt.s32.f32 %v3484_v41 }
 0x8a1   : > { %3588 = vmin.xlane.f32.xlu0 %v3587_v21  ;;  %v3614_v24 = vcvt.s32.f32 %v3612_v30  ;;  %v15168_v21 = vld [vmem:[#allocation70_spill] sm:$0xff] }
 0x8a6   : > { %v10362_v57 = vpop.xlane.xlu1 %3600 }
 0x8a7   : > { %vm3602_vm3 = vcmp.eq.f32.partialorder %v9913_v34, %v10362_v57 }
 0x8a8   : > { %v3603_v49 = vsel %vm3602_vm3, %v3598_v28, inf  ;;  %v15169_v28 = vld [vmem:[#allocation43_spill] sm:$0xff] }
 0x8a9   : > { %3604 = vmin.xlane.f32.xlu1 %v3603_v49  ;;  %v3628_v15 = vand.u32 65535, %v15169_v28  ;;  %v15174_v28 = vld [vmem:[#allocation176_spill] sm:$0xff] }
 0x8aa   : > { %v10368_v61 = vpop.xlane.xlu0 %3488 }
 0x8ab   : > { %vm3490_vm10 = vcmp.eq.f32.partialorder %v15165_v14, %v10368_v61  ;;  %v3630_v49 = vcvt.s32.f32 %v3628_v15  ;;  %v15175_v15 = vld [vmem:[#allocation177_spill] sm:$0xff]  ;;  %v3495_v32 = vcvt.f32.s32 %v10368_v61 }
 0x8ac   : > { %v3491_v18 = vsel %vm3490_vm10, %v3486_v39, inf  ;;  %v15171_v39 = vld [vmem:[#allocation174_spill] sm:$0xff] }
 0x8ad   : > { %3492 = vmin.xlane.f32.xlu0 %v3491_v18  ;;  %v3516_v14 = vand.u32 65535, %v15171_v39  ;;  %v15172_v18 = vld [vmem:[#allocation175_spill] sm:$0xff] }
 0x8ae   : > { %v10372_v2 = vpop.xlane.xlu1 %3504 }
 0x8af   : > { %vm3506_vm1 = vcmp.eq.f32.partialorder %v15166_v50, %v10372_v2 }
 0x8b0   : > { %v3507_v34 = vsel %vm3506_vm1, %v3502_v11, inf  ;;  %v3532_v11 = vand.u32 65535, %v15172_v18 }
 0x8b1   : > { %3508 = vmin.xlane.f32.xlu1 %v3507_v34  ;;  %v3518_v34 = vcvt.s32.f32 %v3516_v14 }
 0x8b2   : > { %v3534_v30 = vcvt.s32.f32 %v3532_v11  ;;  %v3548_v11 = vand.u32 65535, %v10202_v29 }
 0x8b4   : > { %v10377_v23 = vpop.xlane.xlu0 %3616 }
 0x8b5   : > { %vm3618_vm8 = vcmp.eq.f32.partialorder %v15168_v21, %v10377_v23  ;;  %v15173_v21 = vld [vmem:[#allocation178_spill] sm:$0xff] }
 0x8b6   : > { %v3619_v22 = vsel %vm3618_vm8, %v3614_v24, inf  ;;  %v3644_v24 = vand.u32 65535, %v10142_v36  ;;  %v15176_v36 = vld [vmem:[#allocation179_spill] sm:$0xff] }
 0x8b7   : > { %3620 = vmin.xlane.f32.xlu0 %v3619_v22  ;;  %v3660_v22 = vand.u32 65535, %v15173_v21 }
 0x8b8   : > { %v3646_v39 = vcvt.s32.f32 %v3644_v24  ;;  %v3550_v24 = vcvt.s32.f32 %v3548_v11  ;;  %v15178_v11 = vld [vmem:[#allocation67_spill] sm:$0xff] }
 0x8b9   : > { %v3662_v18 = vcvt.s32.f32 %v3660_v22 }
 0x8be   : > { %v10382_v41 = vpop.xlane.xlu1 %3632 }
 0x8bf   : > { %vm3634_vm9 = vcmp.eq.f32.partialorder %v15170_v12, %v10382_v41 }
 0x8c0   : > { %v3635_v7 = vsel %vm3634_vm9, %v3630_v49, inf }
 0x8c1   : > { %3636 = vmin.xlane.f32.xlu1 %v3635_v7 }
 0x8c2   : > { %v10388_v50 = vpop.xlane.xlu0 %3520  ;;  %v10390_v31 = vpop.xlane.xlu1 %3536 }
 0x8c3   : > { %vm3522_vm4 = vcmp.eq.f32.partialorder %v15174_v28, %v10388_v50  ;;  %vm3538_vm5 = vcmp.eq.f32.partialorder %v15175_v15, %v10390_v31 }
 0x8c4   : > { %v3523_v49 = vsel %vm3522_vm4, %v3518_v34, inf  ;;  %v3539_v12 = vsel %vm3538_vm5, %v3534_v30, inf  ;;  %v3564_v34 = vand.u32 65535, %v10209_v51 }
 0x8c5   : > { %3524 = vmin.xlane.f32.xlu0 %v3523_v49  ;;  %3540 = vmin.xlane.f32.xlu1 %v3539_v12 }
 0x8c6   : > { %v3566_v49 = vcvt.s32.f32 %v3564_v34  ;;  %v15183_v34 = vld [vmem:[#allocation78_spill] sm:$0xff] }
 0x8c8   : > { %v10398_v7 = vpop.xlane.xlu0 %3648 }
 0x8c9   : > { %vm3650_vm11 = vcmp.eq.f32.partialorder %v15176_v36, %v10398_v7 }
 0x8ca   : > { %v10400_v14 = vpop.xlane.xlu1 %3664  ;;  %v3651_v21 = vsel %vm3650_vm11, %v3646_v39, inf }
 0x8cb   : > { %vm3666_vm12 = vcmp.eq.f32.partialorder %v10177_v25, %v10400_v14  ;;  %3652 = vmin.xlane.f32.xlu0 %v3651_v21  ;;  %v3676_v25 = vand.u32 65535, %v10243_v37  ;;  %v15177_v37 = vld [vmem:[#allocation56_spill] sm:$0xff]  ;;  %v15179_v21 = vld [vmem:[#allocation58_spill] sm:$0xff] }
 0x8cc   : > { %v3667_v28 = vsel %vm3666_vm12, %v3662_v18, inf }
 0x8cd   : > { %3668 = vmin.xlane.f32.xlu1 %v3667_v28  ;;  %v3678_v51 = vcvt.s32.f32 %v3676_v25  ;;  %v15180_v28 = vld [vmem:[#allocation76_spill] sm:$0xff] }
 0x8d0   : > { %v10408_v30 = vpop.xlane.xlu0 %3552 }
 0x8d1   : > { %vm3554_vm15 = vcmp.eq.f32.partialorder %v10211_v62, %v10408_v30  ;;  %v10412_v15 = vpop.xlane.xlu1 %3568  ;;  %v3692_v62 = vand.u32 65535, %v10296_v16  ;;  %v15182_v16 = vld [vmem:[#allocation84_spill] sm:$0xff] }
 0x8d2   : > { %v3555_v22 = vsel %vm3554_vm15, %v3550_v24, inf  ;;  %vm3570_vm2 = vcmp.eq.f32.partialorder %v10232_v9, %v10412_v15  ;;  %v15184_v24 = vld [vmem:[#allocation59_spill] sm:$0xff] }
 0x8d3   : > { %3556 = vmin.xlane.f32.xlu0 %v3555_v22  ;;  %v3571_v29 = vsel %vm3570_vm2, %v3566_v49, inf  ;;  %v3694_v36 = vcvt.s32.f32 %v3692_v62  ;;  %v15185_v22 = vld [vmem:[#allocation86_spill] sm:$0xff]  ;;  %v3463_v49 = vcvt.f32.s32 %v10347_v52 }
 0x8d4   : > { %3572 = vmin.xlane.f32.xlu1 %v3571_v29 }
 0x8d5   : > { %v3464_v29 = vshll.u32 %v3463_v49, 16 }
 0x8d6   : > { %v10417_v12 = vpop.xlane.xlu0 %3680 }
 0x8d7   : > { %vm3682_vm14 = vcmp.eq.f32.partialorder %v10277_v4, %v10417_v12  ;;  %v15181_v4 = vld [vmem:[#allocation69_spill] sm:$0xff] }
 0x8d8   : > { %v3683_v39 = vsel %vm3682_vm14, %v3678_v51, inf  ;;  %v3479_v51 = vcvt.f32.s32 %v10353_v35 }
 0x8d9   : > { %3684 = vmin.xlane.f32.xlu0 %v3683_v39  ;;  %v3591_v39 = vcvt.f32.s32 %v10357_v20  ;;  %v15193_v20 = vld [vmem:[#allocation12_spill] sm:$0xff] }
 0x8db   : > { %v10422_v18 = vpop.xlane.xlu1 %3696 }
 0x8dc   : > { %vm3698_vm13 = vcmp.eq.f32.partialorder %v10327_v5, %v10422_v18  ;;  %v15186_v5 = vld [vmem:[#allocation64_spill] sm:$0xff] }
 0x8dd   : > { %v3699_v9 = vsel %vm3698_vm13, %v3694_v36, inf  ;;  %1173 = vadd.xlane.f32.xlu0 %v15177_v37  ;;  %v15187_v37 = vld [vmem:[#allocation153_spill] sm:$0xff] }
 0x8de   : > { %3700 = vmin.xlane.f32.xlu1 %v3699_v9  ;;  %v3480_v9 = vshll.u32 %v3479_v51, 16 }
 0x8e1   : > { %1179 = vadd.xlane.f32.xlu0 %v15178_v11  ;;  %v15188_v11 = vld [vmem:[#allocation154_spill] sm:$0xff] }
 0x8e2   : > { %1176 = vadd.xlane.f32.xlu1 %v15179_v21  ;;  %v15189_v21 = vld [vmem:[#allocation151_spill] sm:$0xff] }
 0x8e5   : > { %1185 = vadd.xlane.f32.xlu0 %v15180_v28 }
 0x8e6   : > { %1182 = vadd.xlane.f32.xlu1 %v15181_v4 }
 0x8e9   : > { %1191 = vadd.xlane.f32.xlu0 %v15182_v16 }
 0x8ea   : > { %1188 = vadd.xlane.f32.xlu1 %v15183_v34 }
 0x8ed   : > { %1197 = vadd.xlane.f32.xlu0 %v15184_v24  ;;  %v3592_v24 = vshll.u32 %v3591_v39, 16  ;;  %v15198_v39 = vld [vmem:[#allocation158_spill] sm:$0xff] }
 0x8ee   : > { %1194 = vadd.xlane.f32.xlu1 %v15185_v22 }
 0x8f2   : > { %1200 = vadd.xlane.f32.xlu1 %v15186_v5  ;;  %v15194_v5 = vld [vmem:[#allocation14_spill] sm:$0xff] }
 0x923   : > { %v3461_v25 = vpop.xlane.xlu0 %3460 }
 0x924   : > { %v3462_v62 = vcvt.f32.s32 %v3461_v25 }
 0x926   : > { %v3465_v36 = vadd.s32 %v3464_v29, %v3462_v62 }
 0x928   : > { %vm3706_vm6 = vcmp.eq.s32.totalorder %v15187_v37, %v3465_v36  ;;  %vm3707_vm3 = vcmp.eq.s32.totalorder %v15188_v11, %v3465_v36  ;;  %v10445_v28 = vsel %vm14282_vm0, %v3465_v36, %v15189_v21 }
 0x929   : > { %15190 = vst [vmem:[#allocation128_spill] sm:$0xff] %v10445_v28  ;;  %v3477_v52 = vpop.xlane.xlu1 %3476  ;;  %v10448_v4 = vsel %vm3706_vm6, 2147483647, %v15187_v37  ;;  %v10451_v35 = vsel %vm3707_vm3, 2147483647, %v15188_v11  ;;  %v3738_v34 = vsel %vm3706_vm6, %v15193_v20, 0.0 }
 0x92a   : > { %15191 = vst [vmem:[#allocation57_spill] sm:$0xff] %v10448_v4  ;;  %15192 = vst [vmem:[#allocation92_spill] sm:$0xff] %v10451_v35  ;;  %v3478_v16 = vcvt.f32.s32 %v3477_v52  ;;  %v3589_v22 = vpop.xlane.xlu0 %3588  ;;  %vm3883_vm10 = vcmp.lt.s32.totalorder %v10448_v4, %v10451_v35  ;;  %v3739_v49 = vsel %vm3707_vm3, %v15194_v5, 0.0  ;;  %v15196_v37 = vld [vmem:[#allocation159_spill] sm:$0xff]  ;;  %v15197_v11 = vld [vmem:[#allocation157_spill] sm:$0xff] }
 0x92b   : > { %v3590_v29 = vcvt.f32.s32 %v3589_v22  ;;  %v10459_v51 = vsel %vm3883_vm10, %v10448_v4, %v10451_v35  ;;  %v10461_v62 = vadd.f32 %v3739_v49, %v3738_v34  ;;  %v15202_v49 = vld [vmem:[#allocation161_spill] sm:$0xff] }
 0x92c   : > { %v3481_v25 = vadd.s32 %v3480_v9, %v3478_v16  ;;  %v3886_v36 = vshra.s32 %v10459_v51, 16  ;;  %v3607_v9 = vcvt.f32.s32 %v10362_v57 }
 0x92d   : > { %15195 = vst [vmem:[#allocation63_spill] sm:$0xff] %v10461_v62  ;;  %v3593_v52 = vadd.s32 %v3592_v24, %v3590_v29  ;;  %v15203_v62 = vld [vmem:[#allocation162_spill] sm:$0xff] }
 0x92e   : > { %vm3708_vm1 = vcmp.eq.s32.totalorder %v15196_v37, %v3481_v25  ;;  %vm3709_vm8 = vcmp.eq.s32.totalorder %v15197_v11, %v3481_v25  ;;  %v10469_v21 = vsel %vm14282_vm0, %v3481_v25, %v15198_v39  ;;  %v10482_v22 = vcvt.s32.f32 %v3886_v36  ;;  %v15204_v39 = vld [vmem:[#allocation160_spill] sm:$0xff] }
 0x92f   : > { %15199 = vst [vmem:[#allocation72_spill] sm:$0xff] %v10469_v21  ;;  %v10475_v16 = vsel %vm3708_vm1, 2147483647, %v15196_v37  ;;  %v10480_v34 = vsel %vm3709_vm8, 2147483647, %v15197_v11  ;;  %vm3722_vm9 = vcmp.eq.s32.totalorder %v15202_v49, %v3593_v52  ;;  %vm3723_vm4 = vcmp.eq.s32.totalorder %v15203_v62, %v3593_v52  ;;  %v15211_v37 = vld [vmem:[#allocation13_spill] sm:$0xff] }
 0x930   : > { %15200 = vst [vmem:[#allocation70_spill] sm:$0xff] %v10475_v16  ;;  %15201 = vst [vmem:[#allocation43_spill] sm:$0xff] %v10480_v34  ;;  %v10489_v57 = vsel %vm14282_vm0, %v3593_v52, %v15204_v39  ;;  %vm3899_vm5 = vcmp.lt.s32.totalorder %v10475_v16, %v10480_v34  ;;  %v10496_v24 = vsel %vm3722_vm9, 2147483647, %v15202_v49  ;;  %v10501_v29 = vsel %vm3723_vm4, 2147483647, %v15203_v62  ;;  %3889 = vmin.xlane.f32.xlu0 %v10482_v22 }
 0x931   : > { %15205 = vst [vmem:[#allocation173_spill] sm:$0xff] %v10489_v57  ;;  %15206 = vst [vmem:[#allocation174_spill] sm:$0xff] %v10496_v24  ;;  %v10506_v36 = vsel %vm3899_vm5, %v10475_v16, %v10480_v34  ;;  %v15208_v39 = vld [vmem:[#allocation16_spill] sm:$0xff]  ;;  %vm4011_vm11 = vcmp.lt.s32.totalorder %v10496_v24, %v10501_v29  ;;  %v3741_v1 = vsel %vm3709_vm8, %v15209_v48, 0.0  ;;  %v3754_v61 = vsel %vm3722_vm9, %v15211_v37, 0.0  ;;  %v15216_v52 = vld [vmem:[#allocation165_spill] sm:$0xff] }
 0x932   : > { %15207 = vst [vmem:[#allocation175_spill] sm:$0xff] %v10501_v29  ;;  %v3740_v17 = vsel %vm3708_vm1, %v15208_v39, 0.0  ;;  %v3902_v26 = vshra.s32 %v10506_v36, 16  ;;  %v3605_v27 = vpop.xlane.xlu1 %3604  ;;  %v10520_v6 = vsel %vm4011_vm11, %v10496_v24, %v10501_v29  ;;  %v15212_v39 = vld [vmem:[#allocation15_spill] sm:$0xff]  ;;  %v3608_v21 = vshll.u32 %v3607_v9, 16  ;;  %v15215_v62 = vld [vmem:[#allocation140_spill] sm:$0xff] }
 0x933   : > { %v10522_v33 = vadd.f32 %v3741_v1, %v3740_v17  ;;  %v3755_v57 = vsel %vm3723_vm4, %v15212_v39, 0.0  ;;  %v3606_v34 = vcvt.f32.s32 %v3605_v27  ;;  %v4014_v25 = vshra.s32 %v10520_v6, 16  ;;  %v15225_v39 = vld [vmem:[#allocation139_spill] sm:$0xff] }
 0x934   : > { %v10530_v16 = vcvt.s32.f32 %v3902_v26  ;;  %v10533_v11 = vadd.f32 %v3755_v57, %v3754_v61  ;;  %v3496_v17 = vshll.u32 %v3495_v32, 16  ;;  %v3511_v49 = vcvt.f32.s32 %v10372_v2  ;;  %v15220_v2 = vld [vmem:[#allocation17_spill] sm:$0xff]  ;;  %v15221_v57 = vld [vmem:[#allocation19_spill] sm:$0xff] }
 0x935   : > { %15210 = vst [vmem:[#allocation178_spill] sm:$0xff] %v10522_v33  ;;  %v3609_v48 = vadd.s32 %v3608_v21, %v3606_v34  ;;  %v10536_v1 = vcvt.s32.f32 %v4014_v25  ;;  %v15214_v33 = vld [vmem:[#allocation166_spill] sm:$0xff] }
 0x936   : > { %15213 = vst [vmem:[#allocation176_spill] sm:$0xff] %v10533_v11  ;;  %3905 = vmin.xlane.f32.xlu1 %v10530_v16  ;;  %v3493_v26 = vpop.xlane.xlu0 %3492 }
 0x937   : > { %vm3724_vm12 = vcmp.eq.s32.totalorder %v15214_v33, %v3609_v48  ;;  %vm3725_vm15 = vcmp.eq.s32.totalorder %v15215_v62, %v3609_v48  ;;  %v10544_v27 = vsel %vm14282_vm0, %v3609_v48, %v15216_v52  ;;  %4017 = vmin.xlane.f32.xlu0 %v10536_v1  ;;  %v3494_v32 = vcvt.f32.s32 %v3493_v26  ;;  %v15223_v26 = vld [vmem:[#allocation145_spill] sm:$0xff] }
 0x938   : > { %15217 = vst [vmem:[#allocation177_spill] sm:$0xff] %v10544_v27  ;;  %v10548_v21 = vsel %vm3724_vm12, 2147483647, %v15214_v33  ;;  %v10551_v9 = vsel %vm3725_vm15, 2147483647, %v15215_v62  ;;  %v3756_v34 = vsel %vm3724_vm12, %v15220_v2, 0.0 }
 0x939   : > { %15218 = vst [vmem:[#allocation179_spill] sm:$0xff] %v10548_v21  ;;  %15219 = vst [vmem:[#allocation56_spill] sm:$0xff] %v10551_v9  ;;  %vm4027_vm2 = vcmp.lt.s32.totalorder %v10548_v21, %v10551_v9  ;;  %v3757_v61 = vsel %vm3725_vm15, %v15221_v57, 0.0  ;;  %v3497_v25 = vadd.s32 %v3496_v17, %v3494_v32  ;;  %v3512_v33 = vshll.u32 %v3511_v49, 16  ;;  %v15224_v2 = vld [vmem:[#allocation108_spill] sm:$0xff] }
 0x93a   : > { %v3509_v48 = vpop.xlane.xlu1 %3508  ;;  %v10559_v52 = vsel %vm4027_vm2, %v10548_v21, %v10551_v9  ;;  %v10561_v11 = vadd.f32 %v3757_v61, %v3756_v34  ;;  %v3623_v61 = vcvt.f32.s32 %v10377_v23  ;;  %v15230_v9 = vld [vmem:[#allocation24_spill] sm:$0xff] }
 0x93b   : > { %v3510_v27 = vcvt.f32.s32 %v3509_v48  ;;  %v4030_v62 = vshra.s32 %v10559_v52, 16  ;;  %vm3710_vm14 = vcmp.eq.s32.totalorder %v15223_v26, %v3497_v25  ;;  %vm3711_vm13 = vcmp.eq.s32.totalorder %v15224_v2, %v3497_v25  ;;  %v15229_v48 = vld [vmem:[#allocation21_spill] sm:$0xff] }
 0x93c   : > { %15222 = vst [vmem:[#allocation67_spill] sm:$0xff] %v10561_v11  ;;  %v10569_v57 = vsel %vm14282_vm0, %v3497_v25, %v15225_v39  ;;  %v10572_v17 = vsel %vm3710_vm14, 2147483647, %v15223_v26  ;;  %v10575_v32 = vsel %vm3711_vm13, 2147483647, %v15224_v2  ;;  %v3742_v11 = vsel %vm3710_vm14, %v15229_v48, 0.0 }
 0x93d   : > { %15226 = vst [vmem:[#allocation58_spill] sm:$0xff] %v10569_v57  ;;  %15227 = vst [vmem:[#allocation76_spill] sm:$0xff] %v10572_v17  ;;  %v3513_v34 = vadd.s32 %v3512_v33, %v3510_v27  ;;  %v10577_v49 = vcvt.s32.f32 %v4030_v62  ;;  %vm3915_vm6 = vcmp.lt.s32.totalorder %v10572_v17, %v10575_v32  ;;  %v3743_v21 = vsel %vm3711_vm13, %v15230_v9, 0.0  ;;  %v15231_v39 = vld [vmem:[#allocation93_spill] sm:$0xff]  ;;  %v15232_v25 = vld [vmem:[#allocation115_spill] sm:$0xff] }
 0x93e   : > { %15228 = vst [vmem:[#allocation69_spill] sm:$0xff] %v10575_v32  ;;  %v15233_v26 = vld [vmem:[#allocation142_spill] sm:$0xff]  ;;  %v10594_v23 = vsel %vm3915_vm6, %v10572_v17, %v10575_v32  ;;  %v10607_v57 = vadd.f32 %v3743_v21, %v3742_v11  ;;  %v3624_v32 = vshll.u32 %v3623_v61, 16  ;;  %v15247_v21 = vld [vmem:[#allocation61_spill] sm:$0xff] }
 0x93f   : > { %vm3712_vm3 = vcmp.eq.s32.totalorder %v15231_v39, %v3513_v34  ;;  %vm3713_vm10 = vcmp.eq.s32.totalorder %v15232_v25, %v3513_v34  ;;  %v10589_v2 = vsel %vm14282_vm0, %v3513_v34, %v15233_v26  ;;  %4033 = vmin.xlane.f32.xlu1 %v10577_v49  ;;  %15235 = vst [vmem:[#allocation78_spill] sm:$0xff] %v10594_v23  ;;  %v3918_v62 = vshra.s32 %v10594_v23, 16  ;;  %v15238_v34 = vld [vmem:[#allocation27_spill] sm:$0xff]  ;;  %v15246_v11 = vld [vmem:[#allocation38_spill] sm:$0xff] }
 0x940   : > { %15234 = vst [vmem:[#allocation84_spill] sm:$0xff] %v10589_v2  ;;  %v10597_v27 = vsel %vm3712_vm3, 2147483647, %v15231_v39  ;;  %v10600_v33 = vsel %vm3713_vm10, 2147483647, %v15232_v25  ;;  %v3621_v9 = vpop.xlane.xlu0 %3620  ;;  %v3744_v26 = vsel %vm3712_vm3, %v15238_v34, 0.0 }
 0x941   : > { %15236 = vst [vmem:[#allocation59_spill] sm:$0xff] %v10597_v27  ;;  %15237 = vst [vmem:[#allocation86_spill] sm:$0xff] %v10600_v33  ;;  %vm3931_vm1 = vcmp.lt.s32.totalorder %v10597_v27, %v10600_v33  ;;  %v15239_v2 = vld [vmem:[#allocation31_spill] sm:$0xff]  ;;  %v3622_v17 = vcvt.f32.s32 %v3621_v9  ;;  %v10609_v37 = vcvt.s32.f32 %v3918_v62  ;;  %v15252_v62 = vld [vmem:[#allocation22_spill] sm:$0xff] }
 0x942   : > { %v3745_v48 = vsel %vm3713_vm10, %v15239_v2, 0.0  ;;  %15240 = vst [vmem:[#allocation64_spill] sm:$0xff] %v10607_v57  ;;  %v10613_v39 = vsel %vm3931_vm1, %v10597_v27, %v10600_v33  ;;  %v15245_v2 = vld [vmem:[#allocation66_spill] sm:$0xff] }
 0x943   : > { %15241 = vst [vmem:[#allocation153_spill] sm:$0xff] %v10609_v37  ;;  %15242 = vst [vmem:[#allocation154_spill] sm:$0xff] %v10613_v39  ;;  %v3934_v25 = vshra.s32 %v10613_v39, 16  ;;  %v10616_v29 = vadd.f32 %v3745_v48, %v3744_v26  ;;  %v3625_v24 = vadd.s32 %v3624_v32, %v3622_v17  ;;  %3921 = vmin.xlane.f32.xlu0 %v10609_v37  ;;  %v15251_v17 = vld [vmem:[#allocation20_spill] sm:$0xff]  ;;  %v15296_v37 = vld [vmem:[#allocation105_spill] sm:$0xff] }
 0x945   : > { %15243 = vst [vmem:[#allocation151_spill] sm:$0xff] %v10616_v29  ;;  %v10619_v34 = vcvt.s32.f32 %v3934_v25  ;;  %vm3726_vm8 = vcmp.eq.s32.totalorder %v15245_v2, %v3625_v24  ;;  %vm3727_vm9 = vcmp.eq.s32.totalorder %v15246_v11, %v3625_v24  ;;  %v10626_v9 = vsel %vm14282_vm0, %v3625_v24, %v15247_v21 }
 0x946   : > { %15248 = vst [vmem:[#allocation157_spill] sm:$0xff] %v10626_v9  ;;  %v10629_v61 = vsel %vm3726_vm8, 2147483647, %v15245_v2  ;;  %v10632_v48 = vsel %vm3727_vm9, 2147483647, %v15246_v11  ;;  %v3758_v32 = vsel %vm3726_vm8, %v15251_v17, 0.0  ;;  %v3639_v25 = vcvt.f32.s32 %v10382_v41 }
 0x947   : > { %15244 = vst [vmem:[#allocation159_spill] sm:$0xff] %v10619_v34  ;;  %15249 = vst [vmem:[#allocation158_spill] sm:$0xff] %v10629_v61  ;;  %3937 = vmin.xlane.f32.xlu1 %v10619_v34  ;;  %v3759_v26 = vsel %vm3727_vm9, %v15252_v62, 0.0  ;;  %vm4043_vm4 = vcmp.lt.s32.totalorder %v10629_v61, %v10632_v48  ;;  %v3527_v2 = vcvt.f32.s32 %v10388_v50  ;;  %v3543_v21 = vcvt.f32.s32 %v10390_v31  ;;  %v15257_v31 = vld [vmem:[#allocation46_spill] sm:$0xff] }
 0x948   : > { %15250 = vst [vmem:[#allocation161_spill] sm:$0xff] %v10632_v48  ;;  %v10640_v57 = vadd.f32 %v3759_v26, %v3758_v32  ;;  %v10644_v24 = vsel %vm4043_vm4, %v10629_v61, %v10632_v48  ;;  %v3640_v17 = vshll.u32 %v3639_v25, 16  ;;  %v3655_v26 = vcvt.f32.s32 %v10398_v7  ;;  %v15256_v61 = vld [vmem:[#allocation75_spill] sm:$0xff]  ;;  %v15295_v34 = vld [vmem:[#allocation106_spill] sm:$0xff] }
 0x949   : > { %15254 = vst [vmem:[#allocation160_spill] sm:$0xff] %v10644_v24  ;;  %v4046_v11 = vshra.s32 %v10644_v24, 16  ;;  %v3528_v41 = vshll.u32 %v3527_v2, 16  ;;  %v3544_v32 = vshll.u32 %v3543_v21, 16  ;;  %v3559_v50 = vcvt.f32.s32 %v10408_v30  ;;  %v15262_v30 = vld [vmem:[#allocation23_spill] sm:$0xff] }
 0x94a   : > { %15253 = vst [vmem:[#allocation162_spill] sm:$0xff] %v10640_v57  ;;  %v3637_v29 = vpop.xlane.xlu1 %3636  ;;  %v3671_v57 = vcvt.f32.s32 %v10400_v14  ;;  %v3575_v48 = vcvt.f32.s32 %v10412_v15  ;;  %v15263_v15 = vld [vmem:[#allocation25_spill] sm:$0xff] }
 0x94b   : > { %v3638_v62 = vcvt.f32.s32 %v3637_v29  ;;  %v10649_v9 = vcvt.s32.f32 %v4046_v11  ;;  %v15258_v29 = vld [vmem:[#allocation68_spill] sm:$0xff] }
 0x94c   : > { %v3576_v20 = vshll.u32 %v3575_v48, 16 }
 0x94d   : > { %15255 = vst [vmem:[#allocation166_spill] sm:$0xff] %v10649_v9  ;;  %v3641_v33 = vadd.s32 %v3640_v17, %v3638_v62  ;;  %4049 = vmin.xlane.f32.xlu0 %v10649_v9 }
 0x94e   : > { %v3525_v14 = vpop.xlane.xlu0 %3524  ;;  %v3541_v62 = vpop.xlane.xlu1 %3540 }
 0x94f   : > { %vm3728_vm5 = vcmp.eq.s32.totalorder %v15256_v61, %v3641_v33  ;;  %vm3729_vm11 = vcmp.eq.s32.totalorder %v15257_v31, %v3641_v33  ;;  %v10661_v25 = vsel %vm14282_vm0, %v3641_v33, %v15258_v29  ;;  %v3526_v21 = vcvt.f32.s32 %v3525_v14 }
 0x950   : > { %15259 = vst [vmem:[#allocation140_spill] sm:$0xff] %v10661_v25  ;;  %v10664_v17 = vsel %vm3728_vm5, 2147483647, %v15256_v61  ;;  %v10667_v7 = vsel %vm3729_vm11, 2147483647, %v15257_v31  ;;  %v3760_v2 = vsel %vm3728_vm5, %v15262_v30, 0.0  ;;  %v3542_v27 = vcvt.f32.s32 %v3541_v62 }
 0x951   : > { %15260 = vst [vmem:[#allocation165_spill] sm:$0xff] %v10664_v17  ;;  %15261 = vst [vmem:[#allocation145_spill] sm:$0xff] %v10667_v7  ;;  %v3761_v11 = vsel %vm3729_vm11, %v15263_v15, 0.0  ;;  %vm4059_vm12 = vcmp.lt.s32.totalorder %v10664_v17, %v10667_v7  ;;  %v3656_v61 = vshll.u32 %v3655_v26, 16  ;;  %v3672_v31 = vshll.u32 %v3671_v57, 16  ;;  %v15268_v26 = vld [vmem:[#allocation47_spill] sm:$0xff] }
 0x952   : > { %v10673_v5 = vadd.f32 %v3761_v11, %v3760_v2  ;;  %v10677_v33 = vsel %vm4059_vm12, %v10664_v17, %v10667_v7  ;;  %v10679_v29 = vadd.s32 %v3528_v41, %v3526_v21  ;;  %v10681_v25 = vadd.s32 %v3544_v32, %v3542_v27  ;;  %v15266_v2 = vld [vmem:[#allocation99_spill] sm:$0xff]  ;;  %v15267_v11 = vld [vmem:[#allocation74_spill] sm:$0xff]  ;;  %v15273_v41 = vld [vmem:[#allocation49_spill] sm:$0xff] }
 0x953   : > { %15265 = vst [vmem:[#allocation139_spill] sm:$0xff] %v10677_v33  ;;  %v3560_v30 = vshll.u32 %v3559_v50, 16  ;;  %v3687_v14 = vcvt.f32.s32 %v10417_v12  ;;  %v4062_v28 = vshra.s32 %v10677_v33, 16  ;;  %v15270_v27 = vld [vmem:[#allocation51_spill] sm:$0xff]  ;;  %v15276_v21 = vld [vmem:[#allocation50_spill] sm:$0xff] }
 0x954   : > { %15264 = vst [vmem:[#allocation108_spill] sm:$0xff] %v10673_v5  ;;  %v3653_v62 = vpop.xlane.xlu0 %3652  ;;  %vm3714_vm15 = vcmp.eq.s32.totalorder %v15266_v2, %v10679_v29  ;;  %vm3715_vm2 = vcmp.eq.s32.totalorder %v15267_v11, %v10679_v29  ;;  %v10693_v57 = vsel %vm14282_vm0, %v10679_v29, %v15268_v26  ;;  %vm3716_vm14 = vcmp.eq.s32.totalorder %v15270_v27, %v10681_v25 }
 0x955   : > { %15269 = vst [vmem:[#allocation93_spill] sm:$0xff] %v10693_v57  ;;  %v10701_v12 = vsel %vm3714_vm15, 2147483647, %v15266_v2  ;;  %v10707_v48 = vsel %vm3715_vm2, 2147483647, %v15267_v11  ;;  %vm3717_vm13 = vcmp.eq.s32.totalorder %v15273_v41, %v10681_v25  ;;  %v10727_v26 = vsel %vm14282_vm0, %v10681_v25, %v15276_v21 }
 0x956   : > { %v3669_v15 = vpop.xlane.xlu1 %3668  ;;  %15271 = vst [vmem:[#allocation115_spill] sm:$0xff] %v10701_v12  ;;  %15272 = vst [vmem:[#allocation142_spill] sm:$0xff] %v10707_v48  ;;  %v10715_v32 = vsel %vm3716_vm14, 2147483647, %v15270_v27  ;;  %v10721_v50 = vsel %vm3717_vm13, 2147483647, %v15273_v41  ;;  %v3654_v5 = vcvt.f32.s32 %v3653_v62  ;;  %v10729_v17 = vcvt.s32.f32 %v4062_v28 }
 0x957   : > { %15274 = vst [vmem:[#allocation66_spill] sm:$0xff] %v10715_v32  ;;  %15275 = vst [vmem:[#allocation38_spill] sm:$0xff] %v10721_v50  ;;  %v3670_v57 = vcvt.f32.s32 %v3669_v15  ;;  %v3688_v7 = vshll.u32 %v3687_v14, 16  ;;  %vm3947_vm6 = vcmp.lt.s32.totalorder %v10701_v12, %v10707_v48  ;;  %vm3963_vm3 = vcmp.lt.s32.totalorder %v10715_v32, %v10721_v50 }
 0x958   : > { %15277 = vst [vmem:[#allocation61_spill] sm:$0xff] %v10727_v26  ;;  %15278 = vst [vmem:[#allocation75_spill] sm:$0xff] %v10729_v17  ;;  %v10735_v35 = vadd.s32 %v3656_v61, %v3654_v5  ;;  %v10741_v21 = vsel %vm3947_vm6, %v10701_v12, %v10707_v48  ;;  %v10745_v15 = vsel %vm3963_vm3, %v10715_v32, %v10721_v50  ;;  %v3703_v28 = vcvt.f32.s32 %v10422_v18  ;;  %v15281_v61 = vld [vmem:[#allocation54_spill] sm:$0xff]  ;;  %v15285_v18 = vld [vmem:[#allocation143_spill] sm:$0xff] }
 0x959   : > { %v10737_v4 = vadd.s32 %v3672_v31, %v3670_v57  ;;  %15279 = vst [vmem:[#allocation46_spill] sm:$0xff] %v10741_v21  ;;  %15280 = vst [vmem:[#allocation68_spill] sm:$0xff] %v10745_v15  ;;  %4065 = vmin.xlane.f32.xlu1 %v10729_v17  ;;  %v3950_v62 = vshra.s32 %v10741_v21, 16  ;;  %v3966_v5 = vshra.s32 %v10745_v15, 16  ;;  %v15282_v31 = vld [vmem:[#allocation100_spill] sm:$0xff]  ;;  %v15283_v57 = vld [vmem:[#allocation53_spill] sm:$0xff] }
 0x95a   : > { %vm3730_vm10 = vcmp.eq.s32.totalorder %v15281_v61, %v10735_v35  ;;  %vm3731_vm1 = vcmp.eq.s32.totalorder %v15282_v31, %v10735_v35  ;;  %v10759_v26 = vsel %vm14282_vm0, %v10735_v35, %v15283_v57  ;;  %v15288_v48 = vld [vmem:[#allocation103_spill] sm:$0xff]  ;;  %v3748_v29 = vsel %vm3716_vm14, %v15007_v56, 0.0 }
 0x95b   : > { %15284 = vst [vmem:[#allocation99_spill] sm:$0xff] %v10759_v26  ;;  %vm14217_vm8 = vcmp.eq.s32.totalorder %v15285_v18, %v10737_v4  ;;  %v10767_v50 = vsel %vm3730_vm10, 2147483647, %v15281_v61  ;;  %v10773_v32 = vsel %vm3731_vm1, 2147483647, %v15282_v31  ;;  %vm14207_vm9 = vcmp.eq.s32.totalorder %v15288_v48, %v10737_v4  ;;  %v15291_v12 = vld [vmem:[#allocation79_spill] sm:$0xff] }
 0x95c   : > { %v3557_v33 = vpop.xlane.xlu0 %3556  ;;  %15286 = vst [vmem:[#allocation74_spill] sm:$0xff] %v10767_v50  ;;  %15287 = vst [vmem:[#allocation47_spill] sm:$0xff] %v10773_v32  ;;  %v10781_v57 = vsel %vm14217_vm8, 2147483647, %v15285_v18  ;;  %v10787_v26 = vsel %vm14207_vm9, 2147483647, %v15288_v48  ;;  %v10793_v15 = vsel %vm14282_vm0, %v10737_v4, %v15291_v12  ;;  %v10797_v9 = vcvt.s32.f32 %v3950_v62 }
 0x95d   : > { %v3558_v14 = vcvt.f32.s32 %v3557_v33  ;;  %v3573_v33 = vpop.xlane.xlu1 %3572  ;;  %15289 = vst [vmem:[#allocation51_spill] sm:$0xff] %v10781_v57  ;;  %15290 = vst [vmem:[#allocation49_spill] sm:$0xff] %v10787_v26  ;;  %v10799_v24 = vcvt.s32.f32 %v3966_v5  ;;  %vm4075_vm4 = vcmp.lt.s32.totalorder %v10767_v50, %v10773_v32  ;;  %vm4091_vm5 = vcmp.lt.s32.totalorder %v10781_v57, %v10787_v26  ;;  %v15297_v12 = vld [vmem:[#allocation83_spill] sm:$0xff] }
 0x95e   : > { %15292 = vst [vmem:[#allocation50_spill] sm:$0xff] %v10793_v15  ;;  %v3574_v17 = vcvt.f32.s32 %v3573_v33  ;;  %15293 = vst [vmem:[#allocation54_spill] sm:$0xff] %v10797_v9  ;;  %3953 = vmin.xlane.f32.xlu0 %v10797_v9  ;;  %v15305_v15 = vld [vmem:[#allocation107_spill] sm:$0xff]  ;;  %v3762_v25 = vsel %vm3730_vm10, %v14877_v8, 0.0  ;;  %v3763_v41 = vsel %vm3731_vm1, %v14879_v3, 0.0 }
 0x95f   : > { %v10795_v21 = vadd.s32 %v3560_v30, %v3558_v14  ;;  %15294 = vst [vmem:[#allocation100_spill] sm:$0xff] %v10799_v24  ;;  %3969 = vmin.xlane.f32.xlu1 %v10799_v24 }
 0x960   : > { %v10815_v14 = vadd.s32 %v3576_v20, %v3574_v17  ;;  %v10833_v20 = vsel %vm4075_vm4, %v10767_v50, %v10773_v32  ;;  %v10837_v17 = vsel %vm4091_vm5, %v10781_v57, %v10787_v26 }
 0x961   : > { %vm3718_vm11 = vcmp.eq.s32.totalorder %v15295_v34, %v10795_v21  ;;  %vm3719_vm12 = vcmp.eq.s32.totalorder %v15296_v37, %v10795_v21  ;;  %v10813_v30 = vsel %vm14282_vm0, %v10795_v21, %v15297_v12  ;;  %15301 = vst [vmem:[#allocation79_spill] sm:$0xff] %v10833_v20  ;;  %15302 = vst [vmem:[#allocation106_spill] sm:$0xff] %v10837_v17  ;;  %v15303_v12 = vld [vmem:[#allocation180_spill] sm:$0xff]  ;;  %v4078_v57 = vshra.s32 %v10833_v20, 16 }
 0x962   : > { %15298 = vst [vmem:[#allocation53_spill] sm:$0xff] %v10813_v30  ;;  %v10821_v62 = vsel %vm3718_vm11, 2147483647, %v15295_v34  ;;  %v10827_v5 = vsel %vm3719_vm12, 2147483647, %v15296_v37  ;;  %v3685_v33 = vpop.xlane.xlu0 %3684  ;;  %vm3720_vm6 = vcmp.eq.s32.totalorder %v15303_v12, %v10815_v14  ;;  %v15304_v30 = vld [vmem:[#allocation181_spill] sm:$0xff]  ;;  %v10847_v9 = vsel %vm14282_vm0, %v10815_v14, %v15305_v15 }
 0x963   : > { %15299 = vst [vmem:[#allocation143_spill] sm:$0xff] %v10821_v62  ;;  %15300 = vst [vmem:[#allocation103_spill] sm:$0xff] %v10827_v5  ;;  %vm3721_vm3 = vcmp.eq.s32.totalorder %v15304_v30, %v10815_v14  ;;  %v3686_v24 = vcvt.f32.s32 %v3685_v33  ;;  %v10853_v32 = vsel %vm3720_vm6, 2147483647, %v15303_v12  ;;  %v4094_v50 = vshra.s32 %v10837_v17, 16 }
 0x964   : > { %15306 = vst [vmem:[#allocation105_spill] sm:$0xff] %v10847_v9  ;;  %15307 = vst [vmem:[#allocation83_spill] sm:$0xff] %v10853_v32  ;;  %v10859_v26 = vsel %vm3721_vm3, 2147483647, %v15304_v30  ;;  %vm3979_vm4 = vcmp.lt.s32.totalorder %v10821_v62, %v10827_v5  ;;  %v10867_v15 = vcvt.s32.f32 %v4078_v57  ;;  %v3704_v17 = vshll.u32 %v3703_v28, 16 }
 0x965   : > { %15308 = vst [vmem:[#allocation180_spill] sm:$0xff] %v10859_v26  ;;  %v3689_v39 = vadd.s32 %v3688_v7, %v3686_v24  ;;  %vm3995_vm5 = vcmp.lt.s32.totalorder %v10853_v32, %v10859_v26  ;;  %v10869_v33 = vcvt.s32.f32 %v4094_v50  ;;  %v10873_v9 = vsel %vm3979_vm4, %v10821_v62, %v10827_v5  ;;  %v15310_v24 = vld [vmem:[#allocation182_spill] sm:$0xff] }
 0x966   : > { %v10877_v20 = vsel %vm3995_vm5, %v10853_v32, %v10859_v26  ;;  %4081 = vmin.xlane.f32.xlu0 %v10867_v15  ;;  %v3982_v32 = vshra.s32 %v10873_v9, 16  ;;  %v3751_v2 = vsel %vm3719_vm12, %v14627_v60, 0.0  ;;  %v3749_v34 = vsel %vm3717_vm13, %v15008_v45, 0.0 }
 0x967   : > { %15309 = vst [vmem:[#allocation181_spill] sm:$0xff] %v10877_v20  ;;  %vm3734_vm7 = vcmp.eq.s32.totalorder %v10224_v63, %v3689_v39  ;;  %vm3735_vm9 = vcmp.eq.s32.totalorder %v10229_v13, %v3689_v39  ;;  %v10884_v7 = vsel %vm14282_vm0, %v3689_v39, %v15310_v24  ;;  %v3701_v50 = vpop.xlane.xlu1 %3700  ;;  %4097 = vmin.xlane.f32.xlu1 %v10869_v33  ;;  %v3998_v24 = vshra.s32 %v10877_v20, 16  ;;  %v15327_v39 = vld [vmem:[#allocation81_spill] sm:$0xff] }
 0x968   : > { %15311 = vst [vmem:[#allocation107_spill] sm:$0xff] %v10884_v7  ;;  %v10889_v57 = vsel %vm3734_vm7, 2147483647, %v10224_v63  ;;  %v10894_v26 = vsel %vm3735_vm9, 2147483647, %v10229_v13  ;;  %v3702_v28 = vcvt.f32.s32 %v3701_v50  ;;  %v10902_v5 = vcvt.s32.f32 %v3982_v32  ;;  %v15326_v13 = vld [vmem:[#allocation77_spill] sm:$0xff] }
 0x969   : > { %15312 = vst [vmem:[#allocation182_spill] sm:$0xff] %v10894_v26  ;;  %vm4107_vm4 = vcmp.lt.s32.totalorder %v10889_v57, %v10894_v26  ;;  %v10908_v23 = vcvt.s32.f32 %v3998_v24  ;;  %v3746_v24 = vsel %vm3714_vm15, %v15156_v38, 0.0  ;;  %v3752_v37 = vsel %vm3720_vm6, %v14628_v44, 0.0 }
 0x96a   : > { %v3705_v7 = vadd.s32 %v3704_v17, %v3702_v28  ;;  %v10906_v62 = vsel %vm4107_vm4, %v10889_v57, %v10894_v26  ;;  %3985 = vmin.xlane.f32.xlu0 %v10902_v5  ;;  %v3753_v27 = vsel %vm3721_vm3, %v14630_v55, 0.0  ;;  %v3766_v12 = vsel %vm3734_vm7, %v14518_v42, 0.0 }
 0x96b   : > { %v4110_v50 = vshra.s32 %v10906_v62, 16  ;;  %4001 = vmin.xlane.f32.xlu1 %v10908_v23  ;;  %v10982_v21 = vadd.f32 %v3753_v27, %v3752_v37  ;;  %v3767_v30 = vsel %vm3735_vm9, %v14633_v43, 0.0  ;;  %vm15322_vm15 = vcmp.eq.s32.totalorder %v15285_v18, %v10737_v4  ;;  %v15336_v37 = vld [vmem:[#allocation101_spill] sm:$0xff]  ;;  %v15339_v27 = vld [vmem:[#allocation110_spill] sm:$0xff] }
 0x96c   : > { %vm3736_vm5 = vcmp.eq.s32.totalorder %v10270_v53, %v3705_v7  ;;  %vm3737_vm8 = vcmp.eq.s32.totalorder %v10275_v0, %v3705_v7  ;;  %v10916_v20 = vsel %vm14282_vm0, %v3705_v7, %v10263_v54  ;;  %v3764_v61 = vsel %vm15322_vm15, %v14624_v59, 0.0  ;;  %v15338_v7 = vld [vmem:[#allocation109_spill] sm:$0xff] }
 0x96d   : > { %15313 = vst [vmem:[#allocation190_spill] sm:$0xff] %v10916_v20  ;;  %v10922_v32 = vsel %vm3736_vm5, 2147483647, %v10270_v53  ;;  %v10927_v17 = vsel %vm3737_vm8, 2147483647, %v10275_v0  ;;  %v10930_v28 = vcvt.s32.f32 %v4110_v50  ;;  %v3747_v50 = vsel %vm3715_vm2, %v15011_v40, 0.0 }
 0x96e   : > { %15314 = vst [vmem:[#allocation191_spill] sm:$0xff] %v10922_v32  ;;  %15315 = vst [vmem:[#allocation192_spill] sm:$0xff] %v10927_v17  ;;  %vm4123_vm4 = vcmp.lt.s32.totalorder %v10922_v32, %v10927_v17  ;;  %v10954_v26 = vadd.f32 %v3747_v50, %v3746_v24  ;;  %v10972_v24 = vadd.f32 %v3749_v34, %v3748_v29  ;;  %v3768_v14 = vsel %vm3736_vm5, %v14634_v46, 0.0  ;;  %v15332_v29 = vld [vmem:[#allocation89_spill] sm:$0xff]  ;;  %v15333_v53 = vld [vmem:[#allocation94_spill] sm:$0xff] }
 0x96f   : > { %v10936_v54 = vsel %vm4123_vm4, %v10922_v32, %v10927_v17  ;;  %4113 = vmin.xlane.f32.xlu0 %v10930_v28  ;;  %v3750_v17 = vsel %vm3718_vm11, %v14874_v47, 0.0  ;;  %15320 = vst [vmem:[#allocation195_spill] sm:$0xff] %v10982_v21  ;;  %vm15323_vm2 = vcmp.eq.s32.totalorder %v15288_v48, %v10737_v4  ;;  %v11008_v31 = vadd.f32 %v3767_v30, %v3766_v12  ;;  %v15329_v4 = vld [vmem:[#allocation85_spill] sm:$0xff]  ;;  %v15330_v48 = vld [vmem:[#allocation87_spill] sm:$0xff]  ;;  %v15337_v0 = vld [vmem:[#allocation102_spill] sm:$0xff] }
 0x970   : > { %v4126_v20 = vshra.s32 %v10936_v54, 16  ;;  %15316 = vst [vmem:[#allocation193_spill] sm:$0xff] %v10954_v26  ;;  %v10964_v11 = vadd.f32 %v3751_v2, %v3750_v17  ;;  %v10995_v17 = vadd.f32 %v3763_v41, %v3762_v25  ;;  %v3765_v35 = vsel %vm15323_vm2, %v14752_v10, 0.0  ;;  %v15331_v2 = vld [vmem:[#allocation88_spill] sm:$0xff]  ;;  %v15334_v34 = vld [vmem:[#allocation97_spill] sm:$0xff]  ;;  %v15340_v25 = vld [vmem:[#allocation95_spill] sm:$0xff] }
 0x971   : > { %15324 = vst [vmem:[#allocation197_spill] sm:$0xff] %v11008_v31  ;;  %v11010_v63 = vadd.f32 %v3765_v35, %v3764_v61  ;;  %v3769_v18 = vsel %vm3737_vm8, %v14636_v19, 0.0  ;;  %v15341_v41 = vld [vmem:[#allocation96_spill] sm:$0xff]  ;;  %v15342_v12 = vld [vmem:[#allocation71_spill] sm:$0xff] }
 0x972   : > { %v10952_v32 = vcvt.s32.f32 %v4126_v20  ;;  %15317 = vst [vmem:[#allocation194_spill] sm:$0xff] %v10964_v11  ;;  %v15318_v20 = vld [vmem:[#allocation73_spill] sm:$0xff]  ;;  %15321 = vst [vmem:[#allocation196_spill] sm:$0xff] %v10995_v17  ;;  %v11020_v50 = vadd.f32 %v3769_v18, %v3768_v14  ;;  %v15343_v30 = vld [vmem:[#allocation80_spill] sm:$0xff]  ;;  %v11039_v14 = vpop.xlane.xlu0 %1173 }
 0x973   : > { %1203 = vadd.xlane.f32.xlu0 %v15318_v20  ;;  %15319 = vst [vmem:[#allocation73_spill] sm:$0xff] %v10972_v24  ;;  %15325 = vst [vmem:[#allocation198_spill] sm:$0xff] %v11010_v63  ;;  %v15335_v20 = vld [vmem:[#allocation98_spill] sm:$0xff]  ;;  %v15344_v61 = vld [vmem:[#allocation104_spill] sm:$0xff] }
 0x974   : > { %4129 = vmin.xlane.f32.xlu1 %v10952_v32  ;;  %15328 = vst [vmem:[#allocation77_spill] sm:$0xff] %v11020_v50  ;;  %v15345_v35 = vld [vmem:[#allocation111_spill] sm:$0xff]  ;;  %15346 = vst [vmem:[#allocation81_spill] sm:$0xff] %v11039_v14  ;;  %v15439_v50 = vld [vmem:[#allocation18_spill] sm:$0xff] }
 0x975   : > { %v15442_v21 = vld [vmem:[#allocation15_spill] sm:$0xff] }
 0x977   : > { %1209 = vadd.xlane.f32.xlu0 %v15327_v39  ;;  %v11043_v39 = vpop.xlane.xlu0 %1179 }
 0x978   : > { %1206 = vadd.xlane.f32.xlu1 %v15326_v13  ;;  %v11041_v13 = vpop.xlane.xlu1 %1176  ;;  %15348 = vst [vmem:[#allocation87_spill] sm:$0xff] %v11043_v39 }
 0x979   : > { %15347 = vst [vmem:[#allocation85_spill] sm:$0xff] %v11041_v13 }
 0x97b   : > { %1215 = vadd.xlane.f32.xlu0 %v15330_v48 }
 0x97c   : > { %1212 = vadd.xlane.f32.xlu1 %v15329_v4  ;;  %v11045_v18 = vpop.xlane.xlu1 %1182  ;;  %v11047_v4 = vpop.xlane.xlu0 %1185 }
 0x97d   : > { %15349 = vst [vmem:[#allocation88_spill] sm:$0xff] %v11045_v18  ;;  %15350 = vst [vmem:[#allocation89_spill] sm:$0xff] %v11047_v4  ;;  %v3981_v18 = vand.u32 65535, %v10873_v9 }
 0x97f   : > { %1606 = vadd.xlane.f32.xlu0 %v15332_v29 }
 0x980   : > { %1218 = vadd.xlane.f32.xlu1 %v15331_v2  ;;  %v11049_v48 = vpop.xlane.xlu1 %1188  ;;  %v11051_v2 = vpop.xlane.xlu0 %1191 }
 0x981   : > { %15351 = vst [vmem:[#allocation94_spill] sm:$0xff] %v11049_v48  ;;  %15352 = vst [vmem:[#allocation97_spill] sm:$0xff] %v11051_v2 }
 0x983   : > { %1612 = vadd.xlane.f32.xlu0 %v15334_v34  ;;  %v3885_v34 = vand.u32 65535, %v10459_v51 }
 0x984   : > { %1609 = vadd.xlane.f32.xlu1 %v15333_v53  ;;  %v11053_v29 = vpop.xlane.xlu1 %1194  ;;  %v11055_v53 = vpop.xlane.xlu0 %1197 }
 0x985   : > { %15353 = vst [vmem:[#allocation98_spill] sm:$0xff] %v11053_v29  ;;  %15354 = vst [vmem:[#allocation101_spill] sm:$0xff] %v11055_v53 }
 0x987   : > { %1618 = vadd.xlane.f32.xlu0 %v15336_v37  ;;  %v3887_v37 = vcvt.s32.f32 %v3885_v34  ;;  %v15356_v34 = vld [vmem:[#allocation78_spill] sm:$0xff] }
 0x988   : > { %1615 = vadd.xlane.f32.xlu1 %v15335_v20 }
 0x98b   : > { %1624 = vadd.xlane.f32.xlu0 %v15338_v7  ;;  %v3901_v7 = vand.u32 65535, %v10506_v36  ;;  %v4029_v36 = vand.u32 65535, %v10559_v52 }
 0x98c   : > { %1621 = vadd.xlane.f32.xlu1 %v15337_v0  ;;  %v11060_v0 = vpop.xlane.xlu1 %1200 }
 0x98d   : > { %15355 = vst [vmem:[#allocation102_spill] sm:$0xff] %v11060_v0  ;;  %v15363_v0 = vld [vmem:[#allocation75_spill] sm:$0xff] }
 0x98f   : > { %1630 = vadd.xlane.f32.xlu0 %v15340_v25  ;;  %v4013_v25 = vand.u32 65535, %v10520_v6  ;;  %v4031_v6 = vcvt.s32.f32 %v4029_v36  ;;  %v15360_v36 = vld [vmem:[#allocation160_spill] sm:$0xff] }
 0x990   : > { %1627 = vadd.xlane.f32.xlu1 %v15339_v27 }
 0x993   : > { %1636 = vadd.xlane.f32.xlu0 %v15342_v12  ;;  %v3903_v12 = vcvt.s32.f32 %v3901_v7  ;;  %v15357_v7 = vld [vmem:[#allocation154_spill] sm:$0xff] }
 0x994   : > { %1633 = vadd.xlane.f32.xlu1 %v15341_v41 }
 0x997   : > { %1642 = vadd.xlane.f32.xlu0 %v15344_v61  ;;  %v4015_v61 = vcvt.s32.f32 %v4013_v25 }
 0x998   : > { %1639 = vadd.xlane.f32.xlu1 %v15343_v30 }
 0x99c   : > { %1645 = vadd.xlane.f32.xlu1 %v15345_v35 }
 0x9b9   : > { %v11058_v20 = vpop.xlane.xlu0 %3889 }
 0x9ba   : > { %vm3891_vm7 = vcmp.eq.f32.partialorder %v10482_v22, %v11058_v20 }
 0x9bb   : > { %v3892_v27 = vsel %vm3891_vm7, %v3887_v37, inf }
 0x9bc   : > { %3893 = vmin.xlane.f32.xlu0 %v3892_v27  ;;  %v3933_v27 = vand.u32 65535, %v15357_v7 }
 0x9bf   : > { %v11066_v41 = vpop.xlane.xlu1 %3905 }
 0x9c0   : > { %vm3907_vm14 = vcmp.eq.f32.partialorder %v10530_v16, %v11066_v41  ;;  %v11070_v51 = vpop.xlane.xlu0 %4017  ;;  %v3917_v16 = vand.u32 65535, %v15356_v34 }
 0x9c1   : > { %v3908_v30 = vsel %vm3907_vm14, %v3903_v12, inf  ;;  %vm4019_vm13 = vcmp.eq.f32.partialorder %v10536_v1, %v11070_v51  ;;  %v15358_v1 = vld [vmem:[#allocation153_spill] sm:$0xff]  ;;  %vm14292_vm14 = vcmp.eq.s32.totalorder %v14524_v58, 7 }
 0x9c2   : > { %3909 = vmin.xlane.f32.xlu1 %v3908_v30  ;;  %v4020_v22 = vsel %vm4019_vm13, %v4015_v61, inf  ;;  %v3919_v12 = vcvt.s32.f32 %v3917_v16  ;;  %v3935_v61 = vcvt.s32.f32 %v3933_v27  ;;  %v15361_v16 = vld [vmem:[#allocation166_spill] sm:$0xff] }
 0x9c3   : > { %4021 = vmin.xlane.f32.xlu0 %v4020_v22  ;;  %v15359_v22 = vld [vmem:[#allocation159_spill] sm:$0xff] }
 0x9c8   : > { %v11075_v35 = vpop.xlane.xlu1 %4033 }
 0x9c9   : > { %vm4035_vm10 = vcmp.eq.f32.partialorder %v10577_v49, %v11075_v35 }
 0x9ca   : > { %v4036_v37 = vsel %vm4035_vm10, %v4031_v6, inf  ;;  %v4045_v6 = vand.u32 65535, %v15360_v36  ;;  %v15365_v36 = vld [vmem:[#allocation68_spill] sm:$0xff] }
 0x9cb   : > { %4037 = vmin.xlane.f32.xlu1 %v4036_v37  ;;  %v3965_v53 = vand.u32 65535, %v15365_v36 }
 0x9cc   : > { %v11081_v25 = vpop.xlane.xlu0 %3921  ;;  %v4047_v37 = vcvt.s32.f32 %v4045_v6 }
 0x9cd   : > { %vm3923_vm1 = vcmp.eq.f32.partialorder %v15358_v1, %v11081_v25  ;;  %v3928_v14 = vcvt.f32.s32 %v11081_v25 }
 0x9ce   : > { %v3924_v30 = vsel %vm3923_vm1, %v3919_v12, inf  ;;  %v15362_v12 = vld [vmem:[#allocation139_spill] sm:$0xff] }
 0x9cf   : > { %3925 = vmin.xlane.f32.xlu0 %v3924_v30  ;;  %v4061_v1 = vand.u32 65535, %v15362_v12  ;;  %v15367_v12 = vld [vmem:[#allocation100_spill] sm:$0xff] }
 0x9d0   : > { %v11085_v52 = vpop.xlane.xlu1 %3937 }
 0x9d1   : > { %vm3939_vm8 = vcmp.eq.f32.partialorder %v15359_v22, %v11085_v52  ;;  %v4063_v27 = vcvt.s32.f32 %v4061_v1  ;;  %v15364_v22 = vld [vmem:[#allocation46_spill] sm:$0xff] }
 0x9d2   : > { %v3940_v49 = vsel %vm3939_vm8, %v3935_v61, inf }
 0x9d3   : > { %3941 = vmin.xlane.f32.xlu1 %v3940_v49  ;;  %v3949_v49 = vand.u32 65535, %v15364_v22  ;;  %v15369_v22 = vld [vmem:[#allocation106_spill] sm:$0xff] }
 0x9d4   : > { %v4093_v2 = vand.u32 65535, %v15369_v22 }
 0x9d5   : > { %v3951_v29 = vcvt.s32.f32 %v3949_v49 }
 0x9d6   : > { %v11090_v34 = vpop.xlane.xlu0 %4049 }
 0x9d7   : > { %vm4051_vm9 = vcmp.eq.f32.partialorder %v15361_v16, %v11090_v34 }
 0x9d8   : > { %v4052_v7 = vsel %vm4051_vm9, %v4047_v37, inf  ;;  %v3967_v37 = vcvt.s32.f32 %v3965_v53  ;;  %v4095_v53 = vcvt.s32.f32 %v4093_v2 }
 0x9d9   : > { %4053 = vmin.xlane.f32.xlu0 %v4052_v7  ;;  %v15366_v7 = vld [vmem:[#allocation54_spill] sm:$0xff] }
 0x9e2   : > { %v11095_v30 = vpop.xlane.xlu1 %4065 }
 0x9e3   : > { %vm4067_vm11 = vcmp.eq.f32.partialorder %v15363_v0, %v11095_v30 }
 0x9e4   : > { %v4068_v61 = vsel %vm4067_vm11, %v4063_v27, inf  ;;  %v15368_v27 = vld [vmem:[#allocation79_spill] sm:$0xff] }
 0x9e5   : > { %4069 = vmin.xlane.f32.xlu1 %v4068_v61  ;;  %v4077_v48 = vand.u32 65535, %v15368_v27 }
 0x9e7   : > { %v11101_v6 = vpop.xlane.xlu0 %3953  ;;  %v4079_v49 = vcvt.s32.f32 %v4077_v48  ;;  %v3983_v48 = vcvt.s32.f32 %v3981_v18  ;;  %v4125_v18 = vand.u32 65535, %v10936_v54  ;;  %v15374_v54 = vld [vmem:[#allocation118_spill] sm:$0xff] }
 0x9e8   : > { %v11103_v16 = vpop.xlane.xlu1 %3969  ;;  %vm3955_vm12 = vcmp.eq.f32.partialorder %v15366_v7, %v11101_v6 }
 0x9e9   : > { %vm3971_vm6 = vcmp.eq.f32.partialorder %v15367_v12, %v11103_v16  ;;  %v3956_v1 = vsel %vm3955_vm12, %v3951_v29, inf  ;;  %v15370_v29 = vld [vmem:[#allocation181_spill] sm:$0xff] }
 0x9ea   : > { %v3972_v0 = vsel %vm3971_vm6, %v3967_v37, inf  ;;  %3957 = vmin.xlane.f32.xlu0 %v3956_v1  ;;  %v3997_v37 = vand.u32 65535, %v15370_v29  ;;  %v15372_v29 = vld [vmem:[#allocation113_spill] sm:$0xff] }
 0x9eb   : > { %3973 = vmin.xlane.f32.xlu1 %v3972_v0  ;;  %v4109_v0 = vand.u32 65535, %v10906_v62 }
 0x9ed   : > { %v4111_v22 = vcvt.s32.f32 %v4109_v0  ;;  %v15379_v0 = vld [vmem:[#allocation127_spill] sm:$0xff] }
 0x9ef   : > { %v11111_v61 = vpop.xlane.xlu0 %4081 }
 0x9f0   : > { %v11113_v36 = vpop.xlane.xlu1 %4097  ;;  %vm4083_vm3 = vcmp.eq.f32.partialorder %v10867_v15, %v11111_v61  ;;  %v3999_v15 = vcvt.s32.f32 %v3997_v37  ;;  %v15373_v37 = vld [vmem:[#allocation117_spill] sm:$0xff] }
 0x9f1   : > { %vm4099_vm5 = vcmp.eq.f32.partialorder %v10869_v33, %v11113_v36  ;;  %v4084_v7 = vsel %vm4083_vm3, %v4079_v49, inf  ;;  %v4127_v49 = vcvt.s32.f32 %v4125_v18 }
 0x9f2   : > { %v4100_v12 = vsel %vm4099_vm5, %v4095_v53, inf  ;;  %4085 = vmin.xlane.f32.xlu0 %v4084_v7  ;;  %v15371_v53 = vld [vmem:[#allocation112_spill] sm:$0xff]  ;;  %v15375_v7 = vld [vmem:[#allocation121_spill] sm:$0xff] }
 0x9f3   : > { %4101 = vmin.xlane.f32.xlu1 %v4100_v12  ;;  %v11121_v1 = vpop.xlane.xlu0 %3985  ;;  %v15377_v12 = vld [vmem:[#allocation122_spill] sm:$0xff] }
 0x9f4   : > { %vm3987_vm4 = vcmp.eq.f32.partialorder %v10902_v5, %v11121_v1  ;;  %v11126_v9 = vpop.xlane.xlu1 %4001 }
 0x9f5   : > { %v3988_v2 = vsel %vm3987_vm4, %v3983_v48, inf  ;;  %vm4003_vm15 = vcmp.eq.f32.partialorder %v10908_v23, %v11126_v9  ;;  %v15378_v48 = vld [vmem:[#allocation124_spill] sm:$0xff] }
 0x9f6   : > { %3989 = vmin.xlane.f32.xlu0 %v3988_v2  ;;  %v4004_v33 = vsel %vm4003_vm15, %v3999_v15, inf }
 0x9f7   : > { %4005 = vmin.xlane.f32.xlu1 %v4004_v33  ;;  %v15383_v33 = vld [vmem:[#allocation129_spill] sm:$0xff] }
 0x9f8   : > { %v11130_v27 = vpop.xlane.xlu0 %4113 }
 0x9f9   : > { %vm4115_vm2 = vcmp.eq.f32.partialorder %v10930_v28, %v11130_v27 }
 0x9fa   : > { %v4116_v62 = vsel %vm4115_vm2, %v4111_v22, inf  ;;  %v15384_v22 = vld [vmem:[#allocation119_spill] sm:$0xff] }
 0x9fb   : > { %4117 = vmin.xlane.f32.xlu0 %v4116_v62 }
 0x9fc   : > { %v11144_v28 = vpop.xlane.xlu0 %1203 }
 0x9fd   : > { %v11135_v5 = vpop.xlane.xlu1 %4129  ;;  %15376 = vst [vmem:[#allocation109_spill] sm:$0xff] %v11144_v28 }
 0x9fe   : > { %vm4131_vm7 = vcmp.eq.f32.partialorder %v10952_v32, %v11135_v5  ;;  %v15380_v32 = vld [vmem:[#allocation82_spill] sm:$0xff] }
 0x9ff   : > { %v4132_v23 = vsel %vm4131_vm7, %v4127_v49, inf  ;;  %1648 = vadd.xlane.f32.xlu0 %v15371_v53  ;;  %v15387_v49 = vld [vmem:[#allocation120_spill] sm:$0xff]  ;;  %v15389_v53 = vld [vmem:[#allocation125_spill] sm:$0xff] }
 0xa00   : > { %4133 = vmin.xlane.f32.xlu1 %v4132_v23  ;;  %v11152_v2 = vpop.xlane.xlu0 %1209  ;;  %v15388_v23 = vld [vmem:[#allocation123_spill] sm:$0xff] }
 0xa01   : > { %v11150_v15 = vpop.xlane.xlu1 %1206  ;;  %15382 = vst [vmem:[#allocation95_spill] sm:$0xff] %v11152_v2  ;;  %v15407_v2 = vld [vmem:[#allocation146_spill] sm:$0xff] }
 0xa02   : > { %15381 = vst [vmem:[#allocation110_spill] sm:$0xff] %v11150_v15 }
 0xa03   : > { %2039 = vadd.xlane.f32.xlu0 %v15373_v37 }
 0xa04   : > { %1651 = vadd.xlane.f32.xlu1 %v15372_v29  ;;  %v11158_v62 = vpop.xlane.xlu0 %1215  ;;  %v15390_v29 = vld [vmem:[#allocation30_spill] sm:$0xff] }
 0xa05   : > { %v11156_v18 = vpop.xlane.xlu1 %1212  ;;  %15386 = vst [vmem:[#allocation71_spill] sm:$0xff] %v11158_v62 }
 0xa06   : > { %15385 = vst [vmem:[#allocation96_spill] sm:$0xff] %v11156_v18 }
 0xa07   : > { %2045 = vadd.xlane.f32.xlu0 %v15375_v7  ;;  %v15393_v7 = vld [vmem:[#allocation130_spill] sm:$0xff] }
 0xa08   : > { %2042 = vadd.xlane.f32.xlu1 %v15374_v54  ;;  %v11166_v54 = vpop.xlane.xlu0 %1606 }
 0xa09   : > { %v11164_v37 = vpop.xlane.xlu1 %1218  ;;  %15392 = vst [vmem:[#allocation104_spill] sm:$0xff] %v11166_v54 }
 0xa0a   : > { %15391 = vst [vmem:[#allocation80_spill] sm:$0xff] %v11164_v37  ;;  %v15433_v37 = vld [vmem:[#allocation175_spill] sm:$0xff] }
 0xa0b   : > { %2051 = vadd.xlane.f32.xlu0 %v15378_v48 }
 0xa0c   : > { %2048 = vadd.xlane.f32.xlu1 %v15377_v12  ;;  %v15394_v12 = vld [vmem:[#allocation131_spill] sm:$0xff] }
 0xa0d   : > { %v11170_v48 = vpop.xlane.xlu1 %1609 }
 0xa0e   : > { %15395 = vst [vmem:[#allocation111_spill] sm:$0xff] %v11170_v48 }
 0xa0f   : > { %2057 = vadd.xlane.f32.xlu0 %v15380_v32  ;;  %v15397_v32 = vld [vmem:[#allocation132_spill] sm:$0xff] }
 0xa10   : > { %2054 = vadd.xlane.f32.xlu1 %v15379_v0  ;;  %v11172_v0 = vpop.xlane.xlu0 %1612 }
 0xa11   : > { %15396 = vst [vmem:[#allocation78_spill] sm:$0xff] %v11172_v0  ;;  %v15427_v0 = vld [vmem:[#allocation43_spill] sm:$0xff] }
 0xa13   : > { %2063 = vadd.xlane.f32.xlu0 %v15384_v22  ;;  %v15399_v22 = vld [vmem:[#allocation29_spill] sm:$0xff] }
 0xa14   : > { %2060 = vadd.xlane.f32.xlu1 %v15383_v33  ;;  %v15398_v33 = vld [vmem:[#allocation116_spill] sm:$0xff] }
 0xa17   : > { %2069 = vadd.xlane.f32.xlu0 %v15388_v23  ;;  %v11178_v23 = vpop.xlane.xlu1 %1615 }
 0xa18   : > { %2066 = vadd.xlane.f32.xlu1 %v15387_v49  ;;  %v15400_v49 = vld [vmem:[#allocation135_spill] sm:$0xff]  ;;  %15401 = vst [vmem:[#allocation154_spill] sm:$0xff] %v11178_v23 }
 0xa1b   : > { %2075 = vadd.xlane.f32.xlu0 %v15390_v29  ;;  %v15403_v29 = vld [vmem:[#allocation136_spill] sm:$0xff] }
 0xa1c   : > { %2072 = vadd.xlane.f32.xlu1 %v15389_v53  ;;  %v11180_v53 = vpop.xlane.xlu0 %1618 }
 0xa1d   : > { %15402 = vst [vmem:[#allocation153_spill] sm:$0xff] %v11180_v53  ;;  %v15424_v53 = vld [vmem:[#allocation14_spill] sm:$0xff] }
 0xa1f   : > { %2081 = vadd.xlane.f32.xlu0 %v15394_v12  ;;  %v11184_v12 = vpop.xlane.xlu1 %1621 }
 0xa20   : > { %2078 = vadd.xlane.f32.xlu1 %v15393_v7  ;;  %v15404_v7 = vld [vmem:[#allocation144_spill] sm:$0xff]  ;;  %15405 = vst [vmem:[#allocation159_spill] sm:$0xff] %v11184_v12  ;;  %v11186_v18 = vpop.xlane.xlu0 %1624  ;;  %v3896_v12 = vcvt.f32.s32 %v11058_v20 }
 0xa21   : > { %15406 = vst [vmem:[#allocation160_spill] sm:$0xff] %v11186_v18 }
 0xa23   : > { %2472 = vadd.xlane.f32.xlu0 %v15398_v33  ;;  %v15409_v33 = vld [vmem:[#allocation148_spill] sm:$0xff] }
 0xa24   : > { %2084 = vadd.xlane.f32.xlu1 %v15397_v32  ;;  %v15408_v32 = vld [vmem:[#allocation147_spill] sm:$0xff] }
 0xa27   : > { %2478 = vadd.xlane.f32.xlu0 %v15400_v49  ;;  %v11193_v49 = vpop.xlane.xlu0 %1630 }
 0xa28   : > { %2475 = vadd.xlane.f32.xlu1 %v15399_v22  ;;  %v11191_v22 = vpop.xlane.xlu1 %1627  ;;  %15411 = vst [vmem:[#allocation139_spill] sm:$0xff] %v11193_v49  ;;  %v4024_v49 = vcvt.f32.s32 %v11070_v51  ;;  %v15423_v51 = vld [vmem:[#allocation12_spill] sm:$0xff] }
 0xa29   : > { %15410 = vst [vmem:[#allocation166_spill] sm:$0xff] %v11191_v22 }
 0xa2b   : > { %2484 = vadd.xlane.f32.xlu0 %v15404_v7  ;;  %v11197_v28 = vpop.xlane.xlu0 %1636 }
 0xa2c   : > { %2481 = vadd.xlane.f32.xlu1 %v15403_v29  ;;  %v11195_v15 = vpop.xlane.xlu1 %1633  ;;  %15413 = vst [vmem:[#allocation46_spill] sm:$0xff] %v11197_v28  ;;  %v15417_v28 = vld [vmem:[#allocation57_spill] sm:$0xff] }
 0xa2d   : > { %15412 = vst [vmem:[#allocation75_spill] sm:$0xff] %v11195_v15 }
 0xa2f   : > { %2490 = vadd.xlane.f32.xlu0 %v15408_v32  ;;  %v11201_v7 = vpop.xlane.xlu0 %1642  ;;  %v3912_v32 = vcvt.f32.s32 %v11066_v41 }
 0xa30   : > { %2487 = vadd.xlane.f32.xlu1 %v15407_v2  ;;  %v11199_v29 = vpop.xlane.xlu1 %1639  ;;  %15415 = vst [vmem:[#allocation54_spill] sm:$0xff] %v11201_v7  ;;  %v3897_v2 = vshll.u32 %v3896_v12, 16  ;;  %v15419_v7 = vld [vmem:[#allocation128_spill] sm:$0xff] }
 0xa31   : > { %15414 = vst [vmem:[#allocation68_spill] sm:$0xff] %v11199_v29  ;;  %v3913_v22 = vshll.u32 %v3912_v32, 16  ;;  %v15418_v29 = vld [vmem:[#allocation92_spill] sm:$0xff]  ;;  %v4025_v32 = vshll.u32 %v4024_v49, 16 }
 0xa32   : > { %v15428_v49 = vld [vmem:[#allocation72_spill] sm:$0xff] }
 0xa34   : > { %2493 = vadd.xlane.f32.xlu1 %v15409_v33  ;;  %v11205_v23 = vpop.xlane.xlu1 %1645 }
 0xa35   : > { %15416 = vst [vmem:[#allocation100_spill] sm:$0xff] %v11205_v23 }
 0xa45   : > { %v3894_v18 = vpop.xlane.xlu0 %3893 }
 0xa46   : > { %v3895_v33 = vcvt.f32.s32 %v3894_v18 }
 0xa48   : > { %v3898_v15 = vadd.s32 %v3897_v2, %v3895_v33 }
 0xa4a   : > { %vm4139_vm13 = vcmp.eq.s32.totalorder %v15417_v28, %v3898_v15  ;;  %vm4140_vm10 = vcmp.eq.s32.totalorder %v15418_v29, %v3898_v15  ;;  %v11214_v20 = vsel %vm14292_vm14, %v3898_v15, %v15419_v7 }
 0xa4b   : > { %15420 = vst [vmem:[#allocation79_spill] sm:$0xff] %v11214_v20  ;;  %v3910_v12 = vpop.xlane.xlu1 %3909  ;;  %v11217_v41 = vsel %vm4139_vm13, 2147483647, %v15417_v28  ;;  %v11220_v18 = vsel %vm4140_vm10, 2147483647, %v15418_v29  ;;  %v4171_v2 = vsel %vm4139_vm13, %v15423_v51, 0.0 }
 0xa4c   : > { %15421 = vst [vmem:[#allocation106_spill] sm:$0xff] %v11217_v41  ;;  %15422 = vst [vmem:[#allocation181_spill] sm:$0xff] %v11220_v18  ;;  %v3911_v23 = vcvt.f32.s32 %v3910_v12  ;;  %v4022_v33 = vpop.xlane.xlu0 %4021  ;;  %vm4316_vm1 = vcmp.lt.s32.totalorder %v11217_v41, %v11220_v18  ;;  %v4172_v4 = vsel %vm4140_vm10, %v15424_v53, 0.0  ;;  %v15426_v12 = vld [vmem:[#allocation70_spill] sm:$0xff] }
 0xa4d   : > { %v4023_v15 = vcvt.f32.s32 %v4022_v33  ;;  %v11228_v7 = vsel %vm4316_vm1, %v11217_v41, %v11220_v18  ;;  %v11230_v28 = vadd.f32 %v4172_v4, %v4171_v2  ;;  %v15432_v33 = vld [vmem:[#allocation174_spill] sm:$0xff] }
 0xa4e   : > { %v3914_v48 = vadd.s32 %v3913_v22, %v3911_v23  ;;  %v4319_v29 = vshra.s32 %v11228_v7, 16  ;;  %v4040_v23 = vcvt.f32.s32 %v11075_v35 }
 0xa4f   : > { %15425 = vst [vmem:[#allocation112_spill] sm:$0xff] %v11230_v28  ;;  %v4026_v39 = vadd.s32 %v4025_v32, %v4023_v15 }
 0xa50   : > { %vm4141_vm8 = vcmp.eq.s32.totalorder %v15426_v12, %v3914_v48  ;;  %vm4142_vm9 = vcmp.eq.s32.totalorder %v15427_v0, %v3914_v48  ;;  %v11238_v13 = vsel %vm14292_vm14, %v3914_v48, %v15428_v49  ;;  %v11251_v2 = vcvt.s32.f32 %v4319_v29  ;;  %v15434_v49 = vld [vmem:[#allocation173_spill] sm:$0xff] }
 0xa51   : > { %15429 = vst [vmem:[#allocation113_spill] sm:$0xff] %v11238_v13  ;;  %v11244_v22 = vsel %vm4141_vm8, 2147483647, %v15426_v12  ;;  %v11249_v4 = vsel %vm4142_vm9, 2147483647, %v15427_v0  ;;  %vm4155_vm11 = vcmp.eq.s32.totalorder %v15432_v33, %v4026_v39  ;;  %vm4156_vm12 = vcmp.eq.s32.totalorder %v15433_v37, %v4026_v39  ;;  %v15441_v12 = vld [vmem:[#allocation13_spill] sm:$0xff] }
 0xa52   : > { %15430 = vst [vmem:[#allocation117_spill] sm:$0xff] %v11244_v22  ;;  %15431 = vst [vmem:[#allocation118_spill] sm:$0xff] %v11249_v4  ;;  %v11258_v35 = vsel %vm14292_vm14, %v4026_v39, %v15434_v49  ;;  %vm4332_vm6 = vcmp.lt.s32.totalorder %v11244_v22, %v11249_v4  ;;  %v11265_v32 = vsel %vm4155_vm11, 2147483647, %v15432_v33  ;;  %v11270_v15 = vsel %vm4156_vm12, 2147483647, %v15433_v37  ;;  %4322 = vmin.xlane.f32.xlu1 %v11251_v2 }
 0xa53   : > { %15435 = vst [vmem:[#allocation121_spill] sm:$0xff] %v11258_v35  ;;  %15436 = vst [vmem:[#allocation122_spill] sm:$0xff] %v11265_v32  ;;  %v11275_v29 = vsel %vm4332_vm6, %v11244_v22, %v11249_v4  ;;  %v15438_v49 = vld [vmem:[#allocation16_spill] sm:$0xff]  ;;  %vm4444_vm3 = vcmp.lt.s32.totalorder %v11265_v32, %v11270_v15  ;;  %v4174_v28 = vsel %vm4142_vm9, %v15439_v50, 0.0  ;;  %v4187_v25 = vsel %vm4155_vm11, %v15441_v12, 0.0  ;;  %v15446_v37 = vld [vmem:[#allocation177_spill] sm:$0xff] }
 0xa54   : > { %15437 = vst [vmem:[#allocation124_spill] sm:$0xff] %v11270_v15  ;;  %v4173_v54 = vsel %vm4141_vm8, %v15438_v49, 0.0  ;;  %v4335_v62 = vshra.s32 %v11275_v29, 16  ;;  %v4038_v63 = vpop.xlane.xlu1 %4037  ;;  %v11289_v31 = vsel %vm4444_vm3, %v11265_v32, %v11270_v15  ;;  %v4188_v24 = vsel %vm4156_vm12, %v15442_v21, 0.0  ;;  %v15445_v39 = vld [vmem:[#allocation56_spill] sm:$0xff]  ;;  %v15455_v21 = vld [vmem:[#allocation58_spill] sm:$0xff] }
 0xa55   : > { %v11291_v17 = vadd.f32 %v4174_v28, %v4173_v54  ;;  %v4041_v11 = vshll.u32 %v4040_v23, 16  ;;  %v4039_v26 = vcvt.f32.s32 %v4038_v63  ;;  %v4447_v48 = vshra.s32 %v11289_v31, 16  ;;  %v15451_v23 = vld [vmem:[#allocation19_spill] sm:$0xff] }
 0xa56   : > { %v11299_v49 = vcvt.s32.f32 %v4335_v62  ;;  %v11302_v0 = vadd.f32 %v4188_v24, %v4187_v25  ;;  %v3929_v28 = vshll.u32 %v3928_v14, 16  ;;  %v3944_v33 = vcvt.f32.s32 %v11085_v52  ;;  %v15450_v14 = vld [vmem:[#allocation17_spill] sm:$0xff] }
 0xa57   : > { %15440 = vst [vmem:[#allocation127_spill] sm:$0xff] %v11291_v17  ;;  %v4042_v50 = vadd.s32 %v4041_v11, %v4039_v26  ;;  %v11305_v54 = vcvt.s32.f32 %v4447_v48  ;;  %v15444_v17 = vld [vmem:[#allocation179_spill] sm:$0xff] }
 0xa58   : > { %15443 = vst [vmem:[#allocation82_spill] sm:$0xff] %v11302_v0  ;;  %4338 = vmin.xlane.f32.xlu0 %v11299_v49  ;;  %v3926_v62 = vpop.xlane.xlu0 %3925 }
 0xa59   : > { %vm4157_vm5 = vcmp.eq.s32.totalorder %v15444_v17, %v4042_v50  ;;  %vm4158_vm4 = vcmp.eq.s32.totalorder %v15445_v39, %v4042_v50  ;;  %v11313_v63 = vsel %vm14292_vm14, %v4042_v50, %v15446_v37  ;;  %4450 = vmin.xlane.f32.xlu1 %v11305_v54  ;;  %v3927_v24 = vcvt.f32.s32 %v3926_v62  ;;  %v15453_v62 = vld [vmem:[#allocation76_spill] sm:$0xff] }
 0xa5a   : > { %15447 = vst [vmem:[#allocation129_spill] sm:$0xff] %v11313_v63  ;;  %v11317_v26 = vsel %vm4157_vm5, 2147483647, %v15444_v17  ;;  %v11320_v11 = vsel %vm4158_vm4, 2147483647, %v15445_v39  ;;  %v4189_v52 = vsel %vm4157_vm5, %v15450_v14, 0.0 }
 0xa5b   : > { %15448 = vst [vmem:[#allocation119_spill] sm:$0xff] %v11317_v26  ;;  %15449 = vst [vmem:[#allocation120_spill] sm:$0xff] %v11320_v11  ;;  %vm4460_vm15 = vcmp.lt.s32.totalorder %v11317_v26, %v11320_v11  ;;  %v4190_v25 = vsel %vm4158_vm4, %v15451_v23, 0.0  ;;  %v3930_v48 = vadd.s32 %v3929_v28, %v3927_v24  ;;  %v3945_v17 = vshll.u32 %v3944_v33, 16  ;;  %v15454_v14 = vld [vmem:[#allocation69_spill] sm:$0xff] }
 0xa5c   : > { %v3942_v50 = vpop.xlane.xlu1 %3941  ;;  %v11328_v37 = vsel %vm4460_vm15, %v11317_v26, %v11320_v11  ;;  %v11330_v0 = vadd.f32 %v4190_v25, %v4189_v52  ;;  %v4056_v25 = vcvt.f32.s32 %v11090_v34  ;;  %v15460_v11 = vld [vmem:[#allocation24_spill] sm:$0xff] }
 0xa5d   : > { %v3943_v63 = vcvt.f32.s32 %v3942_v50  ;;  %v4463_v39 = vshra.s32 %v11328_v37, 16  ;;  %vm4143_vm2 = vcmp.eq.s32.totalorder %v15453_v62, %v3930_v48  ;;  %vm4144_vm7 = vcmp.eq.s32.totalorder %v15454_v14, %v3930_v48  ;;  %v15459_v50 = vld [vmem:[#allocation21_spill] sm:$0xff] }
 0xa5e   : > { %15452 = vst [vmem:[#allocation123_spill] sm:$0xff] %v11330_v0  ;;  %v11338_v23 = vsel %vm14292_vm14, %v3930_v48, %v15455_v21  ;;  %v11341_v28 = vsel %vm4143_vm2, 2147483647, %v15453_v62  ;;  %v11344_v24 = vsel %vm4144_vm7, 2147483647, %v15454_v14  ;;  %v4175_v0 = vsel %vm4143_vm2, %v15459_v50, 0.0 }
 0xa5f   : > { %15456 = vst [vmem:[#allocation125_spill] sm:$0xff] %v11338_v23  ;;  %15457 = vst [vmem:[#allocation30_spill] sm:$0xff] %v11341_v28  ;;  %v3946_v52 = vadd.s32 %v3945_v17, %v3943_v63  ;;  %v11346_v33 = vcvt.s32.f32 %v4463_v39  ;;  %vm4348_vm13 = vcmp.lt.s32.totalorder %v11341_v28, %v11344_v24  ;;  %v4176_v26 = vsel %vm4144_vm7, %v15460_v11, 0.0  ;;  %v15461_v21 = vld [vmem:[#allocation59_spill] sm:$0xff]  ;;  %v15462_v48 = vld [vmem:[#allocation86_spill] sm:$0xff] }
 0xa60   : > { %15458 = vst [vmem:[#allocation130_spill] sm:$0xff] %v11344_v24  ;;  %v15463_v62 = vld [vmem:[#allocation84_spill] sm:$0xff]  ;;  %v11363_v34 = vsel %vm4348_vm13, %v11341_v28, %v11344_v24  ;;  %v15469_v50 = vld [vmem:[#allocation31_spill] sm:$0xff]  ;;  %v4057_v24 = vshll.u32 %v4056_v25, 16 }
 0xa61   : > { %vm4145_vm10 = vcmp.eq.s32.totalorder %v15461_v21, %v3946_v52  ;;  %vm4146_vm1 = vcmp.eq.s32.totalorder %v15462_v48, %v3946_v52  ;;  %v11358_v14 = vsel %vm14292_vm14, %v3946_v52, %v15463_v62  ;;  %4466 = vmin.xlane.f32.xlu0 %v11346_v33  ;;  %v4351_v39 = vshra.s32 %v11363_v34, 16  ;;  %v15468_v62 = vld [vmem:[#allocation27_spill] sm:$0xff] }
 0xa62   : > { %15464 = vst [vmem:[#allocation131_spill] sm:$0xff] %v11358_v14  ;;  %v11366_v63 = vsel %vm4145_vm10, 2147483647, %v15461_v21  ;;  %v11369_v17 = vsel %vm4146_vm1, 2147483647, %v15462_v48  ;;  %v4054_v11 = vpop.xlane.xlu0 %4053  ;;  %v11374_v52 = vadd.f32 %v4176_v26, %v4175_v0  ;;  %v4177_v14 = vsel %vm4145_vm10, %v15468_v62, 0.0 }
 0xa63   : > { %15465 = vst [vmem:[#allocation132_spill] sm:$0xff] %v11366_v63  ;;  %15466 = vst [vmem:[#allocation116_spill] sm:$0xff] %v11369_v17  ;;  %vm4364_vm8 = vcmp.lt.s32.totalorder %v11366_v63, %v11369_v17  ;;  %v4178_v23 = vsel %vm4146_vm1, %v15469_v50, 0.0  ;;  %v4055_v28 = vcvt.f32.s32 %v4054_v11  ;;  %v11378_v12 = vcvt.s32.f32 %v4351_v39  ;;  %v15473_v26 = vld [vmem:[#allocation158_spill] sm:$0xff]  ;;  %v15475_v11 = vld [vmem:[#allocation157_spill] sm:$0xff] }
 0xa64   : > { %15467 = vst [vmem:[#allocation29_spill] sm:$0xff] %v11374_v52  ;;  %v11382_v21 = vsel %vm4364_vm8, %v11366_v63, %v11369_v17  ;;  %v11385_v35 = vadd.f32 %v4178_v23, %v4177_v14  ;;  %v15474_v52 = vld [vmem:[#allocation161_spill] sm:$0xff]  ;;  %v15480_v14 = vld [vmem:[#allocation22_spill] sm:$0xff] }
 0xa65   : > { %15470 = vst [vmem:[#allocation135_spill] sm:$0xff] %v11378_v12  ;;  %v4367_v48 = vshra.s32 %v11382_v21, 16  ;;  %v4058_v15 = vadd.s32 %v4057_v24, %v4055_v28  ;;  %4354 = vmin.xlane.f32.xlu1 %v11378_v12  ;;  %v15479_v28 = vld [vmem:[#allocation20_spill] sm:$0xff]  ;;  %v15485_v17 = vld [vmem:[#allocation145_spill] sm:$0xff] }
 0xa66   : > { %15471 = vst [vmem:[#allocation136_spill] sm:$0xff] %v11385_v35 }
 0xa67   : > { %v11388_v0 = vcvt.s32.f32 %v4367_v48  ;;  %vm4159_vm9 = vcmp.eq.s32.totalorder %v15473_v26, %v4058_v15  ;;  %vm4160_vm11 = vcmp.eq.s32.totalorder %v15474_v52, %v4058_v15  ;;  %v11395_v25 = vsel %vm14292_vm14, %v4058_v15, %v15475_v11 }
 0xa68   : > { %15476 = vst [vmem:[#allocation146_spill] sm:$0xff] %v11395_v25  ;;  %v11398_v39 = vsel %vm4159_vm9, 2147483647, %v15473_v26  ;;  %v11401_v23 = vsel %vm4160_vm11, 2147483647, %v15474_v52  ;;  %v4191_v24 = vsel %vm4159_vm9, %v15479_v28, 0.0  ;;  %v4072_v52 = vcvt.f32.s32 %v11095_v30 }
 0xa69   : > { %15472 = vst [vmem:[#allocation144_spill] sm:$0xff] %v11388_v0  ;;  %15477 = vst [vmem:[#allocation147_spill] sm:$0xff] %v11398_v39  ;;  %4370 = vmin.xlane.f32.xlu0 %v11388_v0  ;;  %v4192_v48 = vsel %vm4160_vm11, %v15480_v14, 0.0  ;;  %vm4476_vm12 = vcmp.lt.s32.totalorder %v11398_v39, %v11401_v23  ;;  %v3960_v25 = vcvt.f32.s32 %v11101_v6  ;;  %v3976_v28 = vcvt.f32.s32 %v11103_v16  ;;  %v15486_v6 = vld [vmem:[#allocation140_spill] sm:$0xff] }
 0xa6a   : > { %15478 = vst [vmem:[#allocation148_spill] sm:$0xff] %v11401_v23  ;;  %v11408_v35 = vadd.f32 %v4192_v48, %v4191_v24  ;;  %v11412_v15 = vsel %vm4476_vm12, %v11398_v39, %v11401_v23  ;;  %v4073_v50 = vshll.u32 %v4072_v52, 16  ;;  %v4088_v23 = vcvt.f32.s32 %v11111_v61 }
 0xa6b   : > { %15482 = vst [vmem:[#allocation92_spill] sm:$0xff] %v11412_v15  ;;  %v4479_v26 = vshra.s32 %v11412_v15, 16  ;;  %v3977_v62 = vshll.u32 %v3976_v28, 16  ;;  %v4104_v39 = vcvt.f32.s32 %v11113_v36  ;;  %v3992_v30 = vcvt.f32.s32 %v11121_v1  ;;  %v15490_v36 = vld [vmem:[#allocation23_spill] sm:$0xff]  ;;  %v15491_v1 = vld [vmem:[#allocation25_spill] sm:$0xff] }
 0xa6c   : > { %15481 = vst [vmem:[#allocation57_spill] sm:$0xff] %v11408_v35  ;;  %v3961_v35 = vshll.u32 %v3960_v25, 16 }
 0xa6d   : > { %v11416_v11 = vcvt.s32.f32 %v4479_v26  ;;  %v15484_v26 = vld [vmem:[#allocation165_spill] sm:$0xff] }
 0xa6e   : > { %v4070_v14 = vpop.xlane.xlu1 %4069 }
 0xa6f   : > { %15483 = vst [vmem:[#allocation128_spill] sm:$0xff] %v11416_v11  ;;  %4482 = vmin.xlane.f32.xlu1 %v11416_v11  ;;  %v4071_v24 = vcvt.f32.s32 %v4070_v14 }
 0xa71   : > { %v4074_v48 = vadd.s32 %v4073_v50, %v4071_v24 }
 0xa73   : > { %vm4161_vm6 = vcmp.eq.s32.totalorder %v15484_v26, %v4074_v48  ;;  %vm4162_vm3 = vcmp.eq.s32.totalorder %v15485_v17, %v4074_v48  ;;  %v11429_v16 = vsel %vm14292_vm14, %v4074_v48, %v15486_v6  ;;  %v3958_v61 = vpop.xlane.xlu0 %3957 }
 0xa74   : > { %15487 = vst [vmem:[#allocation70_spill] sm:$0xff] %v11429_v16  ;;  %v11432_v14 = vsel %vm4161_vm6, 2147483647, %v15484_v26  ;;  %v11435_v50 = vsel %vm4162_vm3, 2147483647, %v15485_v17  ;;  %v3974_v25 = vpop.xlane.xlu1 %3973  ;;  %v4193_v28 = vsel %vm4161_vm6, %v15490_v36, 0.0  ;;  %v3959_v24 = vcvt.f32.s32 %v3958_v61 }
 0xa75   : > { %15488 = vst [vmem:[#allocation43_spill] sm:$0xff] %v11432_v14  ;;  %15489 = vst [vmem:[#allocation72_spill] sm:$0xff] %v11435_v50  ;;  %v4194_v52 = vsel %vm4162_vm3, %v15491_v1, 0.0  ;;  %v3975_v63 = vcvt.f32.s32 %v3974_v25  ;;  %vm4492_vm5 = vcmp.lt.s32.totalorder %v11432_v14, %v11435_v50  ;;  %v4089_v26 = vshll.u32 %v4088_v23, 16  ;;  %v15494_v25 = vld [vmem:[#allocation115_spill] sm:$0xff] }
 0xa76   : > { %v11441_v32 = vadd.f32 %v4194_v52, %v4193_v28  ;;  %v11445_v48 = vsel %vm4492_vm5, %v11432_v14, %v11435_v50  ;;  %v11447_v17 = vadd.s32 %v3961_v35, %v3959_v24  ;;  %v4105_v16 = vshll.u32 %v4104_v39, 16  ;;  %v15495_v28 = vld [vmem:[#allocation142_spill] sm:$0xff]  ;;  %v15496_v52 = vld [vmem:[#allocation93_spill] sm:$0xff] }
 0xa77   : > { %15493 = vst [vmem:[#allocation175_spill] sm:$0xff] %v11445_v48  ;;  %v11449_v6 = vadd.s32 %v3977_v62, %v3975_v63  ;;  %v3993_v36 = vshll.u32 %v3992_v30, 16  ;;  %v4008_v1 = vcvt.f32.s32 %v11126_v9  ;;  %v4495_v61 = vshra.s32 %v11445_v48, 16  ;;  %v15498_v63 = vld [vmem:[#allocation66_spill] sm:$0xff] }
 0xa78   : > { %15492 = vst [vmem:[#allocation174_spill] sm:$0xff] %v11441_v32  ;;  %vm4147_vm4 = vcmp.eq.s32.totalorder %v15494_v25, %v11447_v17  ;;  %vm4148_vm15 = vcmp.eq.s32.totalorder %v15495_v28, %v11447_v17  ;;  %v11461_v35 = vsel %vm14292_vm14, %v11447_v17, %v15496_v52  ;;  %v15501_v39 = vld [vmem:[#allocation38_spill] sm:$0xff]  ;;  %v15504_v32 = vld [vmem:[#allocation61_spill] sm:$0xff] }
 0xa79   : > { %15497 = vst [vmem:[#allocation173_spill] sm:$0xff] %v11461_v35  ;;  %vm4149_vm2 = vcmp.eq.s32.totalorder %v15498_v63, %v11449_v6  ;;  %v11469_v9 = vsel %vm4147_vm4, 2147483647, %v15494_v25  ;;  %v11475_v62 = vsel %vm4148_vm15, 2147483647, %v15495_v28  ;;  %vm4150_vm7 = vcmp.eq.s32.totalorder %v15501_v39, %v11449_v6 }
 0xa7a   : > { %15499 = vst [vmem:[#allocation179_spill] sm:$0xff] %v11469_v9  ;;  %15500 = vst [vmem:[#allocation56_spill] sm:$0xff] %v11475_v62  ;;  %v11483_v23 = vsel %vm4149_vm2, 2147483647, %v15498_v63  ;;  %v11489_v52 = vsel %vm4150_vm7, 2147483647, %v15501_v39  ;;  %v11495_v35 = vsel %vm14292_vm14, %v11449_v6, %v15504_v32  ;;  %v11497_v4 = vcvt.s32.f32 %v4495_v61 }
 0xa7b   : > { %15502 = vst [vmem:[#allocation177_spill] sm:$0xff] %v11483_v23  ;;  %v4086_v30 = vpop.xlane.xlu0 %4085  ;;  %15503 = vst [vmem:[#allocation76_spill] sm:$0xff] %v11489_v52  ;;  %v4009_v13 = vshll.u32 %v4008_v1, 16  ;;  %vm4380_vm13 = vcmp.lt.s32.totalorder %v11469_v9, %v11475_v62  ;;  %vm4396_vm10 = vcmp.lt.s32.totalorder %v11483_v23, %v11489_v52  ;;  %v4120_v1 = vcvt.f32.s32 %v11130_v27 }
 0xa7c   : > { %v4102_v24 = vpop.xlane.xlu1 %4101  ;;  %15505 = vst [vmem:[#allocation69_spill] sm:$0xff] %v11495_v35  ;;  %v4087_v50 = vcvt.f32.s32 %v4086_v30  ;;  %15506 = vst [vmem:[#allocation58_spill] sm:$0xff] %v11497_v4  ;;  %v11509_v51 = vsel %vm4380_vm13, %v11469_v9, %v11475_v62  ;;  %v11513_v32 = vsel %vm4396_vm10, %v11483_v23, %v11489_v52  ;;  %v4136_v61 = vcvt.f32.s32 %v11135_v5  ;;  %4498 = vmin.xlane.f32.xlu0 %v11497_v4  ;;  %v15513_v5 = vld [vmem:[#allocation51_spill] sm:$0xff]  ;;  %v15516_v62 = vld [vmem:[#allocation49_spill] sm:$0xff] }
 0xa7d   : > { %v4103_v14 = vcvt.f32.s32 %v4102_v24  ;;  %15507 = vst [vmem:[#allocation59_spill] sm:$0xff] %v11509_v51  ;;  %15508 = vst [vmem:[#allocation86_spill] sm:$0xff] %v11513_v32  ;;  %v15511_v24 = vld [vmem:[#allocation99_spill] sm:$0xff]  ;;  %v15519_v9 = vld [vmem:[#allocation50_spill] sm:$0xff]  ;;  %v4181_v25 = vsel %vm4149_vm2, %v15007_v56, 0.0  ;;  %v4182_v17 = vsel %vm4150_vm7, %v15008_v45, 0.0 }
 0xa7e   : > { %v11503_v22 = vadd.s32 %v4089_v26, %v4087_v50  ;;  %v4383_v50 = vshra.s32 %v11509_v51, 16  ;;  %v15510_v26 = vld [vmem:[#allocation47_spill] sm:$0xff] }
 0xa7f   : > { %v11505_v53 = vadd.s32 %v4105_v16, %v4103_v14  ;;  %v3990_v30 = vpop.xlane.xlu0 %3989  ;;  %v4399_v16 = vshra.s32 %v11513_v32, 16  ;;  %v15509_v14 = vld [vmem:[#allocation74_spill] sm:$0xff] }
 0xa80   : > { %vm4163_vm1 = vcmp.eq.s32.totalorder %v15509_v14, %v11503_v22  ;;  %vm4164_vm8 = vcmp.eq.s32.totalorder %v15510_v26, %v11503_v22  ;;  %v11528_v27 = vsel %vm14292_vm14, %v11503_v22, %v15511_v24  ;;  %v4006_v35 = vpop.xlane.xlu1 %4005  ;;  %v3991_v18 = vcvt.f32.s32 %v3990_v30 }
 0xa81   : > { %15512 = vst [vmem:[#allocation84_spill] sm:$0xff] %v11528_v27  ;;  %vm14285_vm9 = vcmp.eq.s32.totalorder %v15513_v5, %v11505_v53  ;;  %v11536_v52 = vsel %vm4163_vm1, 2147483647, %v15509_v14  ;;  %v11542_v23 = vsel %vm4164_vm8, 2147483647, %v15510_v26  ;;  %vm14284_vm11 = vcmp.eq.s32.totalorder %v15516_v62, %v11505_v53 }
 0xa82   : > { %15514 = vst [vmem:[#allocation158_spill] sm:$0xff] %v11536_v52  ;;  %15515 = vst [vmem:[#allocation161_spill] sm:$0xff] %v11542_v23  ;;  %v11550_v24 = vsel %vm14285_vm9, 2147483647, %v15513_v5  ;;  %v11556_v27 = vsel %vm14284_vm11, 2147483647, %v15516_v62  ;;  %v11562_v20 = vsel %vm14292_vm14, %v11505_v53, %v15519_v9  ;;  %v4007_v41 = vcvt.f32.s32 %v4006_v35 }
 0xa83   : > { %15517 = vst [vmem:[#allocation157_spill] sm:$0xff] %v11550_v24  ;;  %15518 = vst [vmem:[#allocation165_spill] sm:$0xff] %v11556_v27  ;;  %v11564_v51 = vcvt.s32.f32 %v4383_v50  ;;  %v11566_v4 = vcvt.s32.f32 %v4399_v16  ;;  %vm4508_vm12 = vcmp.lt.s32.totalorder %v11536_v52, %v11542_v23  ;;  %vm4524_vm6 = vcmp.lt.s32.totalorder %v11550_v24, %v11556_v27 }
 0xa84   : > { %15520 = vst [vmem:[#allocation145_spill] sm:$0xff] %v11562_v20  ;;  %v4118_v32 = vpop.xlane.xlu0 %4117  ;;  %v11572_v48 = vadd.s32 %v3993_v36, %v3991_v18  ;;  %v11574_v11 = vadd.s32 %v4009_v13, %v4007_v41  ;;  %v11578_v9 = vsel %vm4508_vm12, %v11536_v52, %v11542_v23  ;;  %v4121_v35 = vshll.u32 %v4120_v1, 16  ;;  %v15525_v18 = vld [vmem:[#allocation143_spill] sm:$0xff]  ;;  %v15527_v41 = vld [vmem:[#allocation53_spill] sm:$0xff] }
 0xa85   : > { %15521 = vst [vmem:[#allocation140_spill] sm:$0xff] %v11564_v51  ;;  %15522 = vst [vmem:[#allocation115_spill] sm:$0xff] %v11566_v4  ;;  %v4119_v15 = vcvt.f32.s32 %v4118_v32  ;;  %4386 = vmin.xlane.f32.xlu1 %v11564_v51  ;;  %4402 = vmin.xlane.f32.xlu0 %v11566_v4  ;;  %v4511_v30 = vshra.s32 %v11578_v9, 16  ;;  %v11585_v50 = vsel %vm4524_vm6, %v11550_v24, %v11556_v27  ;;  %v15526_v13 = vld [vmem:[#allocation103_spill] sm:$0xff]  ;;  %v4137_v1 = vshll.u32 %v4136_v61, 16  ;;  %v15532_v27 = vld [vmem:[#allocation180_spill] sm:$0xff] }
 0xa86   : > { %15523 = vst [vmem:[#allocation142_spill] sm:$0xff] %v11578_v9  ;;  %15524 = vst [vmem:[#allocation93_spill] sm:$0xff] %v11585_v50  ;;  %vm4151_vm3 = vcmp.eq.s32.totalorder %v15525_v18, %v11572_v48  ;;  %vm4152_vm5 = vcmp.eq.s32.totalorder %v15526_v13, %v11572_v48  ;;  %v11595_v36 = vsel %vm14292_vm14, %v11572_v48, %v15527_v41  ;;  %v15529_v32 = vld [vmem:[#allocation83_spill] sm:$0xff]  ;;  %v4527_v51 = vshra.s32 %v11585_v50, 16 }
 0xa87   : > { %15528 = vst [vmem:[#allocation66_spill] sm:$0xff] %v11595_v36  ;;  %vm4153_vm13 = vcmp.eq.s32.totalorder %v15529_v32, %v11574_v11  ;;  %v11603_v16 = vsel %vm4151_vm3, 2147483647, %v15525_v18  ;;  %v11609_v20 = vsel %vm4152_vm5, 2147483647, %v15526_v13  ;;  %vm4154_vm10 = vcmp.eq.s32.totalorder %v15532_v27, %v11574_v11  ;;  %v15534_v36 = vld [vmem:[#allocation105_spill] sm:$0xff] }
 0xa88   : > { %15530 = vst [vmem:[#allocation38_spill] sm:$0xff] %v11603_v16  ;;  %15531 = vst [vmem:[#allocation61_spill] sm:$0xff] %v11609_v20  ;;  %v11617_v61 = vsel %vm4153_vm13, 2147483647, %v15529_v32  ;;  %v11623_v24 = vsel %vm14292_vm14, %v11574_v11, %v15534_v36  ;;  %v11625_v23 = vadd.s32 %v4121_v35, %v4119_v15  ;;  %v11631_v9 = vsel %vm4154_vm10, 2147483647, %v15532_v27 }
 0xa89   : > { %v4134_v41 = vpop.xlane.xlu1 %4133  ;;  %15533 = vst [vmem:[#allocation74_spill] sm:$0xff] %v11617_v61  ;;  %15535 = vst [vmem:[#allocation47_spill] sm:$0xff] %v11623_v24  ;;  %v11633_v4 = vcvt.s32.f32 %v4511_v30  ;;  %vm4412_vm12 = vcmp.lt.s32.totalorder %v11603_v16, %v11609_v20  ;;  %v15538_v15 = vld [vmem:[#allocation182_spill] sm:$0xff]  ;;  %v15539_v35 = vld [vmem:[#allocation107_spill] sm:$0xff]  ;;  %v11661_v50 = vcvt.s32.f32 %v4527_v51  ;;  %v11752_v18 = vadd.f32 %v4182_v17, %v4181_v25 }
 0xa8a   : > { %v4135_v52 = vcvt.f32.s32 %v4134_v41  ;;  %15536 = vst [vmem:[#allocation99_spill] sm:$0xff] %v11631_v9  ;;  %vm4167_vm6 = vcmp.eq.s32.totalorder %v10889_v57, %v11625_v23  ;;  %vm4168_vm0 = vcmp.eq.s32.totalorder %v15538_v15, %v11625_v23  ;;  %v11646_v36 = vsel %vm14292_vm14, %v11625_v23, %v15539_v35  ;;  %v15554_v13 = vld [vmem:[#allocation134_spill] sm:$0xff] }
 0xa8b   : > { %15537 = vst [vmem:[#allocation51_spill] sm:$0xff] %v11633_v4  ;;  %15540 = vst [vmem:[#allocation49_spill] sm:$0xff] %v11646_v36  ;;  %v11652_v30 = vsel %vm4167_vm6, 2147483647, %v10889_v57  ;;  %v11658_v24 = vsel %vm4168_vm0, 2147483647, %v15538_v15  ;;  %4514 = vmin.xlane.f32.xlu1 %v11633_v4  ;;  %v11665_v35 = vsel %vm4412_vm12, %v11603_v16, %v11609_v20  ;;  %4530 = vmin.xlane.f32.xlu0 %v11661_v50 }
 0xa8c   : > { %v4138_v41 = vadd.s32 %v4137_v1, %v4135_v52  ;;  %15541 = vst [vmem:[#allocation50_spill] sm:$0xff] %v11658_v24  ;;  %15542 = vst [vmem:[#allocation143_spill] sm:$0xff] %v11661_v50  ;;  %v15544_v52 = vld [vmem:[#allocation191_spill] sm:$0xff]  ;;  %v15545_v1 = vld [vmem:[#allocation192_spill] sm:$0xff]  ;;  %v4415_v20 = vshra.s32 %v11665_v35, 16  ;;  %vm4428_vm12 = vcmp.lt.s32.totalorder %v11617_v61, %v11631_v9  ;;  %v4186_v48 = vsel %vm4154_vm10, %v14630_v55, 0.0 }
 0xa8d   : > { %15543 = vst [vmem:[#allocation103_spill] sm:$0xff] %v11665_v35  ;;  %v15546_v36 = vld [vmem:[#allocation190_spill] sm:$0xff]  ;;  %v11686_v16 = vpop.xlane.xlu1 %1651  ;;  %v4195_v6 = vsel %vm4163_vm1, %v14877_v8, 0.0  ;;  %v4196_v32 = vsel %vm4164_vm8, %v14879_v3, 0.0  ;;  %v4199_v27 = vsel %vm4167_vm6, %v14518_v42, 0.0  ;;  %v4200_v26 = vsel %vm4168_vm0, %v14633_v43, 0.0 }
 0xa8e   : > { %vm14293_vm11 = vcmp.eq.s32.totalorder %v15544_v52, %v4138_v41  ;;  %vm4170_vm9 = vcmp.eq.s32.totalorder %v15545_v1, %v4138_v41  ;;  %v11672_v0 = vsel %vm14292_vm14, %v4138_v41, %v15546_v36  ;;  %15550 = vst [vmem:[#allocation105_spill] sm:$0xff] %v11686_v16  ;;  %vm4540_vm14 = vcmp.lt.s32.totalorder %v11652_v30, %v11658_v24  ;;  %v15564_v25 = vld [vmem:[#allocation138_spill] sm:$0xff]  ;;  %v15567_v15 = vld [vmem:[#allocation137_spill] sm:$0xff] }
 0xa8f   : > { %15547 = vst [vmem:[#allocation53_spill] sm:$0xff] %v11672_v0  ;;  %v11677_v12 = vsel %vm14293_vm11, 2147483647, %v15544_v52  ;;  %v11682_v51 = vsel %vm4170_vm9, 2147483647, %v15545_v1  ;;  %v11694_v36 = vcvt.s32.f32 %v4415_v20  ;;  %v11698_v0 = vsel %vm4428_vm12, %v11617_v61, %v11631_v9  ;;  %v11716_v61 = vpop.xlane.xlu0 %1648 }
 0xa90   : > { %15548 = vst [vmem:[#allocation83_spill] sm:$0xff] %v11677_v12  ;;  %15549 = vst [vmem:[#allocation180_spill] sm:$0xff] %v11682_v51  ;;  %vm4556_vm11 = vcmp.lt.s32.totalorder %v11677_v12, %v11682_v51  ;;  %v11702_v58 = vsel %vm4540_vm14, %v11652_v30, %v11658_v24  ;;  %v4431_v50 = vshra.s32 %v11698_v0, 16  ;;  %vm15555_vm14 = vcmp.eq.s32.totalorder %v15513_v5, %v11505_v53  ;;  %v15562_v5 = vld [vmem:[#allocation133_spill] sm:$0xff] }
 0xa91   : > { %v11706_v16 = vsel %vm4556_vm11, %v11677_v12, %v11682_v51  ;;  %v4543_v35 = vshra.s32 %v11702_v58, 16  ;;  %4418 = vmin.xlane.f32.xlu1 %v11694_v36  ;;  %15551 = vst [vmem:[#allocation182_spill] sm:$0xff] %v11716_v61  ;;  %v11718_v24 = vpop.xlane.xlu1 %2042  ;;  %v4179_v12 = vsel %vm4147_vm4, %v15156_v38, 0.0  ;;  %v4197_v11 = vsel %vm15555_vm14, %v14624_v59, 0.0 }
 0xa92   : > { %v4559_v20 = vshra.s32 %v11706_v16, 16  ;;  %v11712_v4 = vcvt.s32.f32 %v4431_v50  ;;  %15552 = vst [vmem:[#allocation107_spill] sm:$0xff] %v11718_v24  ;;  %v4180_v50 = vsel %vm4148_vm15, %v15011_v40, 0.0  ;;  %vm15556_vm4 = vcmp.eq.s32.totalorder %v15516_v62, %v11505_v53 }
 0xa93   : > { %v11714_v9 = vcvt.s32.f32 %v4543_v35  ;;  %v4183_v35 = vsel %vm4151_vm3, %v14874_v47, 0.0  ;;  %v11736_v24 = vadd.f32 %v4180_v50, %v4179_v12  ;;  %v4185_v12 = vsel %vm4153_vm13, %v14628_v44, 0.0  ;;  %v11769_v39 = vpop.xlane.xlu0 %2039 }
 0xa94   : > { %4434 = vmin.xlane.f32.xlu0 %v11712_v4  ;;  %v11721_v51 = vcvt.s32.f32 %v4559_v20  ;;  %v4184_v20 = vsel %vm4152_vm5, %v14627_v60, 0.0  ;;  %v11763_v63 = vadd.f32 %v4186_v48, %v4185_v12  ;;  %15553 = vst [vmem:[#allocation191_spill] sm:$0xff] %v11769_v39  ;;  %v4198_v14 = vsel %vm15556_vm4, %v14752_v10, 0.0  ;;  %v15569_v12 = vld [vmem:[#allocation28_spill] sm:$0xff] }
 0xa95   : > { %4546 = vmin.xlane.f32.xlu1 %v11714_v9  ;;  %v11750_v28 = vadd.f32 %v4184_v20, %v4183_v35  ;;  %v11788_v50 = vpop.xlane.xlu1 %2048  ;;  %v11790_v35 = vadd.f32 %v4196_v32, %v4195_v6  ;;  %v11792_v22 = vadd.f32 %v4198_v14, %v4197_v11  ;;  %vm15560_vm15 = vcmp.eq.s32.totalorder %v15544_v52, %v4138_v41  ;;  %v15568_v52 = vld [vmem:[#allocation26_spill] sm:$0xff]  ;;  %v15571_v41 = vld [vmem:[#allocation149_spill] sm:$0xff] }
 0xa96   : > { %15557 = vst [vmem:[#allocation192_spill] sm:$0xff] %v11788_v50  ;;  %v4201_v53 = vsel %vm15560_vm15, %v14634_v46, 0.0  ;;  %v11801_v62 = vadd.f32 %v4200_v26, %v4199_v27  ;;  %v4202_v57 = vsel %vm4170_vm9, %v14636_v19, 0.0  ;;  %v15573_v6 = vld [vmem:[#allocation150_spill] sm:$0xff]  ;;  %v15578_v27 = vld [vmem:[#allocation41_spill] sm:$0xff]  ;;  %v15579_v26 = vld [vmem:[#allocation40_spill] sm:$0xff] }
 0xa97   : > { %15558 = vst [vmem:[#allocation190_spill] sm:$0xff] %v11790_v35  ;;  %15559 = vst [vmem:[#allocation134_spill] sm:$0xff] %v11792_v22  ;;  %v11807_v20 = vadd.f32 %v4202_v57, %v4201_v53  ;;  %v11810_v17 = vpop.xlane.xlu0 %2045  ;;  %v15577_v14 = vld [vmem:[#allocation126_spill] sm:$0xff]  ;;  %v15581_v57 = vld [vmem:[#allocation39_spill] sm:$0xff] }
 0xa98   : > { %4562 = vmin.xlane.f32.xlu0 %v11721_v51  ;;  %15561 = vst [vmem:[#allocation199_spill] sm:$0xff] %v11801_v62  ;;  %15565 = vst [vmem:[#allocation138_spill] sm:$0xff] %v11810_v17  ;;  %v15756_v62 = vld [vmem:[#allocation158_spill] sm:$0xff] }
 0xa99   : > { %2499 = vadd.xlane.f32.xlu1 %v15554_v13  ;;  %15563 = vst [vmem:[#allocation133_spill] sm:$0xff] %v11807_v20  ;;  %v11812_v23 = vpop.xlane.xlu1 %2054  ;;  %v15574_v13 = vld [vmem:[#allocation90_spill] sm:$0xff] }
 0xa9a   : > { %15566 = vst [vmem:[#allocation200_spill] sm:$0xff] %v11812_v23 }
 0xa9b   : > { %v11817_v48 = vpop.xlane.xlu0 %2051 }
 0xa9c   : > { %2496 = vadd.xlane.f32.xlu0 %v15562_v5  ;;  %15570 = vst [vmem:[#allocation137_spill] sm:$0xff] %v11817_v48  ;;  %v15615_v48 = vld [vmem:[#allocation51_spill] sm:$0xff] }
 0xa9d   : > { %2505 = vadd.xlane.f32.xlu1 %v15564_v25  ;;  %v11820_v1 = vpop.xlane.xlu1 %2060  ;;  %v15583_v25 = vld [vmem:[#allocation42_spill] sm:$0xff] }
 0xa9e   : > { %15572 = vst [vmem:[#allocation26_spill] sm:$0xff] %v11820_v1 }
 0xa9f   : > { %v11824_v32 = vpop.xlane.xlu0 %2057 }
 0xaa0   : > { %2502 = vadd.xlane.f32.xlu0 %v15567_v15  ;;  %15575 = vst [vmem:[#allocation28_spill] sm:$0xff] %v11824_v32  ;;  %v15584_v15 = vld [vmem:[#allocation37_spill] sm:$0xff] }
 0xaa1   : > { %2511 = vadd.xlane.f32.xlu1 %v15568_v52  ;;  %v11826_v11 = vpop.xlane.xlu1 %2066 }
 0xaa2   : > { %15576 = vst [vmem:[#allocation149_spill] sm:$0xff] %v11826_v11 }
 0xaa3   : > { %v11831_v53 = vpop.xlane.xlu0 %2063 }
 0xaa4   : > { %2508 = vadd.xlane.f32.xlu0 %v15569_v12  ;;  %15580 = vst [vmem:[#allocation150_spill] sm:$0xff] %v11831_v53 }
 0xaa5   : > { %2517 = vadd.xlane.f32.xlu1 %v15571_v41  ;;  %v11834_v5 = vpop.xlane.xlu1 %2072  ;;  %v15587_v41 = vld [vmem:[#allocation167_spill] sm:$0xff] }
 0xaa6   : > { %15582 = vst [vmem:[#allocation90_spill] sm:$0xff] %v11834_v5 }
 0xaa7   : > { %v11838_v52 = vpop.xlane.xlu0 %2069 }
 0xaa8   : > { %2514 = vadd.xlane.f32.xlu0 %v15573_v6  ;;  %15585 = vst [vmem:[#allocation126_spill] sm:$0xff] %v11838_v52  ;;  %v15588_v6 = vld [vmem:[#allocation60_spill] sm:$0xff]  ;;  %v4334_v52 = vand.u32 65535, %v11275_v29  ;;  %v4462_v29 = vand.u32 65535, %v11328_v37 }
 0xaa9   : > { %2908 = vadd.xlane.f32.xlu1 %v15574_v13  ;;  %v11840_v12 = vpop.xlane.xlu1 %2078  ;;  %v15589_v13 = vld [vmem:[#allocation114_spill] sm:$0xff] }
 0xaaa   : > { %15586 = vst [vmem:[#allocation41_spill] sm:$0xff] %v11840_v12  ;;  %v4336_v32 = vcvt.s32.f32 %v4334_v52  ;;  %v4350_v52 = vand.u32 65535, %v11363_v34  ;;  %v15604_v34 = vld [vmem:[#allocation144_spill] sm:$0xff] }
 0xaac   : > { %2905 = vadd.xlane.f32.xlu0 %v15577_v14  ;;  %v11845_v14 = vpop.xlane.xlu0 %2075 }
 0xaad   : > { %2914 = vadd.xlane.f32.xlu1 %v15578_v27  ;;  %15590 = vst [vmem:[#allocation40_spill] sm:$0xff] %v11845_v14  ;;  %v15591_v27 = vld [vmem:[#allocation156_spill] sm:$0xff] }
 0xab0   : > { %2911 = vadd.xlane.f32.xlu0 %v15579_v26  ;;  %v11848_v26 = vpop.xlane.xlu1 %2084 }
 0xab1   : > { %2920 = vadd.xlane.f32.xlu1 %v15581_v57  ;;  %15592 = vst [vmem:[#allocation39_spill] sm:$0xff] %v11848_v26  ;;  %v15593_v57 = vld [vmem:[#allocation152_spill] sm:$0xff] }
 0xab4   : > { %2917 = vadd.xlane.f32.xlu0 %v15583_v25  ;;  %v11851_v25 = vpop.xlane.xlu0 %2081 }
 0xab5   : > { %2926 = vadd.xlane.f32.xlu1 %v15584_v15  ;;  %15594 = vst [vmem:[#allocation42_spill] sm:$0xff] %v11851_v25  ;;  %v11853_v15 = vpop.xlane.xlu1 %2475 }
 0xab6   : > { %15595 = vst [vmem:[#allocation37_spill] sm:$0xff] %v11853_v15 }
 0xab8   : > { %2923 = vadd.xlane.f32.xlu0 %v15587_v41  ;;  %v11855_v11 = vpop.xlane.xlu0 %2472 }
 0xab9   : > { %2932 = vadd.xlane.f32.xlu1 %v15588_v6  ;;  %15596 = vst [vmem:[#allocation167_spill] sm:$0xff] %v11855_v11  ;;  %v11857_v53 = vpop.xlane.xlu1 %2481 }
 0xaba   : > { %15597 = vst [vmem:[#allocation60_spill] sm:$0xff] %v11857_v53 }
 0xabc   : > { %2929 = vadd.xlane.f32.xlu0 %v15589_v13  ;;  %v11859_v41 = vpop.xlane.xlu0 %2478 }
 0xabd   : > { %2938 = vadd.xlane.f32.xlu1 %v15591_v27  ;;  %15598 = vst [vmem:[#allocation114_spill] sm:$0xff] %v11859_v41  ;;  %v11861_v6 = vpop.xlane.xlu1 %2487  ;;  %v4318_v27 = vand.u32 65535, %v11228_v7 }
 0xabe   : > { %15599 = vst [vmem:[#allocation156_spill] sm:$0xff] %v11861_v6  ;;  %v4446_v6 = vand.u32 65535, %v11289_v31  ;;  %v4464_v31 = vcvt.s32.f32 %v4462_v29 }
 0xac0   : > { %2935 = vadd.xlane.f32.xlu0 %v15593_v57  ;;  %v11863_v13 = vpop.xlane.xlu0 %2484  ;;  %v4320_v57 = vcvt.s32.f32 %v4318_v27  ;;  %v4448_v27 = vcvt.s32.f32 %v4446_v6 }
 0xac1   : > { %15600 = vst [vmem:[#allocation152_spill] sm:$0xff] %v11863_v13  ;;  %v11865_v12 = vpop.xlane.xlu1 %2493 }
 0xac2   : > { %15601 = vst [vmem:[#allocation201_spill] sm:$0xff] %v11865_v12 }
 0xac4   : > { %v11870_v5 = vpop.xlane.xlu0 %2490 }
 0xac5   : > { %15602 = vst [vmem:[#allocation202_spill] sm:$0xff] %v11870_v5  ;;  %v15608_v5 = vld [vmem:[#allocation58_spill] sm:$0xff] }
 0xadb   : > { %v11868_v14 = vpop.xlane.xlu1 %4322 }
 0xadc   : > { %vm4324_vm0 = vcmp.eq.f32.partialorder %v11251_v2, %v11868_v14 }
 0xadd   : > { %v4325_v1 = vsel %vm4324_vm0, %v4320_v57, inf }
 0xade   : > { %4326 = vmin.xlane.f32.xlu1 %v4325_v1 }
 0xae1   : > { %v11876_v23 = vpop.xlane.xlu0 %4338 }
 0xae2   : > { %vm4340_vm2 = vcmp.eq.f32.partialorder %v11299_v49, %v11876_v23  ;;  %v11880_v7 = vpop.xlane.xlu1 %4450 }
 0xae3   : > { %v4341_v12 = vsel %vm4340_vm2, %v4336_v32, inf  ;;  %vm4452_vm7 = vcmp.eq.f32.partialorder %v11305_v54, %v11880_v7  ;;  %v4366_v32 = vand.u32 65535, %v11382_v21  ;;  %v4352_v54 = vcvt.s32.f32 %v4350_v52  ;;  %v15606_v52 = vld [vmem:[#allocation128_spill] sm:$0xff] }
 0xae4   : > { %4342 = vmin.xlane.f32.xlu0 %v4341_v12  ;;  %v4453_v2 = vsel %vm4452_vm7, %v4448_v27, inf  ;;  %v15603_v12 = vld [vmem:[#allocation135_spill] sm:$0xff] }
 0xae5   : > { %4454 = vmin.xlane.f32.xlu1 %v4453_v2  ;;  %v4368_v27 = vcvt.s32.f32 %v4366_v32 }
 0xaea   : > { %v11885_v1 = vpop.xlane.xlu0 %4466 }
 0xaeb   : > { %vm4468_vm1 = vcmp.eq.f32.partialorder %v11346_v33, %v11885_v1  ;;  %v15605_v33 = vld [vmem:[#allocation92_spill] sm:$0xff] }
 0xaec   : > { %v4469_v49 = vsel %vm4468_vm1, %v4464_v31, inf  ;;  %v4478_v29 = vand.u32 65535, %v15605_v33 }
 0xaed   : > { %4470 = vmin.xlane.f32.xlu0 %v4469_v49 }
 0xaee   : > { %v11891_v6 = vpop.xlane.xlu1 %4354  ;;  %v4480_v21 = vcvt.s32.f32 %v4478_v29 }
 0xaef   : > { %vm4356_vm8 = vcmp.eq.f32.partialorder %v15603_v12, %v11891_v6 }
 0xaf0   : > { %v4357_v57 = vsel %vm4356_vm8, %v4352_v54, inf  ;;  %v15607_v54 = vld [vmem:[#allocation175_spill] sm:$0xff] }
 0xaf1   : > { %4358 = vmin.xlane.f32.xlu1 %v4357_v57  ;;  %v4494_v12 = vand.u32 65535, %v15607_v54  ;;  %v15612_v54 = vld [vmem:[#allocation115_spill] sm:$0xff] }
 0xaf2   : > { %v11895_v37 = vpop.xlane.xlu0 %4370 }
 0xaf3   : > { %vm4372_vm9 = vcmp.eq.f32.partialorder %v15604_v34, %v11895_v37  ;;  %v4496_v32 = vcvt.s32.f32 %v4494_v12 }
 0xaf4   : > { %v4373_v2 = vsel %vm4372_vm9, %v4368_v27, inf  ;;  %v15609_v27 = vld [vmem:[#allocation59_spill] sm:$0xff] }
 0xaf5   : > { %4374 = vmin.xlane.f32.xlu0 %v4373_v2  ;;  %v4382_v34 = vand.u32 65535, %v15609_v27  ;;  %v15610_v2 = vld [vmem:[#allocation86_spill] sm:$0xff] }
 0xaf6   : > { %v4398_v53 = vand.u32 65535, %v15610_v2 }
 0xaf7   : > { %v4384_v13 = vcvt.s32.f32 %v4382_v34 }
 0xaf8   : > { %v11900_v31 = vpop.xlane.xlu1 %4482 }
 0xaf9   : > { %vm4484_vm11 = vcmp.eq.f32.partialorder %v15606_v52, %v11900_v31 }
 0xafa   : > { %v4485_v49 = vsel %vm4484_vm11, %v4480_v21, inf  ;;  %v4400_v21 = vcvt.s32.f32 %v4398_v53 }
 0xafb   : > { %4486 = vmin.xlane.f32.xlu1 %v4485_v49  ;;  %v15611_v49 = vld [vmem:[#allocation140_spill] sm:$0xff] }
 0xb05   : > { %v11905_v57 = vpop.xlane.xlu0 %4498 }
 0xb06   : > { %vm4500_vm3 = vcmp.eq.f32.partialorder %v15608_v5, %v11905_v57  ;;  %v15613_v5 = vld [vmem:[#allocation142_spill] sm:$0xff] }
 0xb07   : > { %v4501_v33 = vsel %vm4500_vm3, %v4496_v32, inf  ;;  %v4510_v50 = vand.u32 65535, %v15613_v5  ;;  %v15614_v32 = vld [vmem:[#allocation93_spill] sm:$0xff] }
 0xb08   : > { %4502 = vmin.xlane.f32.xlu0 %v4501_v33  ;;  %v4526_v33 = vand.u32 65535, %v15614_v32 }
 0xb09   : > { %v4512_v34 = vcvt.s32.f32 %v4510_v50 }
 0xb0e   : > { %v11911_v29 = vpop.xlane.xlu1 %4386  ;;  %v11913_v52 = vpop.xlane.xlu0 %4402 }
 0xb0f   : > { %vm4388_vm5 = vcmp.eq.f32.partialorder %v15611_v49, %v11911_v29  ;;  %vm4404_vm13 = vcmp.eq.f32.partialorder %v15612_v54, %v11913_v52  ;;  %v15616_v49 = vld [vmem:[#allocation103_spill] sm:$0xff]  ;;  %v4528_v54 = vcvt.s32.f32 %v4526_v33 }
 0xb10   : > { %v4389_v12 = vsel %vm4388_vm5, %v4384_v13, inf  ;;  %v4405_v27 = vsel %vm4404_vm13, %v4400_v21, inf  ;;  %v4414_v41 = vand.u32 65535, %v15616_v49  ;;  %v15617_v13 = vld [vmem:[#allocation143_spill] sm:$0xff] }
 0xb11   : > { %4390 = vmin.xlane.f32.xlu1 %v4389_v12  ;;  %4406 = vmin.xlane.f32.xlu0 %v4405_v27  ;;  %v4430_v12 = vand.u32 65535, %v11698_v0  ;;  %v4542_v27 = vand.u32 65535, %v11702_v58 }
 0xb12   : > { %v4416_v50 = vcvt.s32.f32 %v4414_v41 }
 0xb13   : > { %v4432_v33 = vcvt.s32.f32 %v4430_v12  ;;  %v4544_v49 = vcvt.s32.f32 %v4542_v27  ;;  %v15623_v12 = vld [vmem:[#allocation163_spill] sm:$0xff] }
 0xb14   : > { %v11921_v2 = vpop.xlane.xlu1 %4514  ;;  %v11925_v15 = vpop.xlane.xlu0 %4530 }
 0xb15   : > { %vm4516_vm10 = vcmp.eq.f32.partialorder %v15615_v48, %v11921_v2  ;;  %vm4532_vm6 = vcmp.eq.f32.partialorder %v15617_v13, %v11925_v15  ;;  %v15619_v13 = vld [vmem:[#allocation170_spill] sm:$0xff] }
 0xb16   : > { %v4517_v53 = vsel %vm4516_vm10, %v4512_v34, inf  ;;  %v4533_v21 = vsel %vm4532_vm6, %v4528_v54, inf  ;;  %v4558_v34 = vand.u32 65535, %v11706_v16  ;;  %v15618_v54 = vld [vmem:[#allocation168_spill] sm:$0xff] }
 0xb17   : > { %4518 = vmin.xlane.f32.xlu1 %v4517_v53  ;;  %4534 = vmin.xlane.f32.xlu0 %v4533_v21 }
 0xb18   : > { %v4560_v41 = vcvt.s32.f32 %v4558_v34  ;;  %v15629_v34 = vld [vmem:[#allocation183_spill] sm:$0xff] }
 0xb1a   : > { %v11931_v5 = vpop.xlane.xlu1 %4418 }
 0xb1b   : > { %vm4420_vm12 = vcmp.eq.f32.partialorder %v11694_v36, %v11931_v5 }
 0xb1c   : > { %v4421_v48 = vsel %vm4420_vm12, %v4416_v50, inf  ;;  %v15624_v50 = vld [vmem:[#allocation155_spill] sm:$0xff] }
 0xb1d   : > { %4422 = vmin.xlane.f32.xlu1 %v4421_v48  ;;  %v11936_v32 = vpop.xlane.xlu0 %4434  ;;  %v15626_v48 = vld [vmem:[#allocation62_spill] sm:$0xff] }
 0xb1e   : > { %v11939_v53 = vpop.xlane.xlu1 %4546  ;;  %vm4436_vm14 = vcmp.eq.f32.partialorder %v11712_v4, %v11936_v32  ;;  %v15620_v4 = vld [vmem:[#allocation169_spill] sm:$0xff] }
 0xb1f   : > { %vm4548_vm4 = vcmp.eq.f32.partialorder %v11714_v9, %v11939_v53  ;;  %v4437_v58 = vsel %vm4436_vm14, %v4432_v33, inf  ;;  %v15622_v9 = vld [vmem:[#allocation171_spill] sm:$0xff] }
 0xb20   : > { %v4549_v0 = vsel %vm4548_vm4, %v4544_v49, inf  ;;  %4438 = vmin.xlane.f32.xlu0 %v4437_v58  ;;  %v15628_v33 = vld [vmem:[#allocation91_spill] sm:$0xff] }
 0xb21   : > { %4550 = vmin.xlane.f32.xlu1 %v4549_v0  ;;  %v11945_v36 = vpop.xlane.xlu0 %4562  ;;  %v15632_v0 = vld [vmem:[#allocation34_spill] sm:$0xff] }
 0xb22   : > { %vm4564_vm15 = vcmp.eq.f32.partialorder %v11721_v51, %v11945_v36  ;;  %v11952_v21 = vpop.xlane.xlu1 %2499 }
 0xb23   : > { %v4565_v16 = vsel %vm4564_vm15, %v4560_v41, inf  ;;  %15621 = vst [vmem:[#allocation135_spill] sm:$0xff] %v11952_v21  ;;  %v15633_v41 = vld [vmem:[#allocation184_spill] sm:$0xff]  ;;  %v15648_v21 = vld [vmem:[#allocation189_spill] sm:$0xff] }
 0xb24   : > { %4566 = vmin.xlane.f32.xlu0 %v4565_v16  ;;  %v15634_v16 = vld [vmem:[#allocation185_spill] sm:$0xff] }
 0xb25   : > { %2944 = vadd.xlane.f32.xlu1 %v15618_v54  ;;  %v11957_v27 = vpop.xlane.xlu0 %2496 }
 0xb26   : > { %15625 = vst [vmem:[#allocation144_spill] sm:$0xff] %v11957_v27  ;;  %v11960_v51 = vpop.xlane.xlu1 %2505 }
 0xb27   : > { %15627 = vst [vmem:[#allocation92_spill] sm:$0xff] %v11960_v51  ;;  %v4329_v51 = vcvt.f32.s32 %v11868_v14 }
 0xb28   : > { %2941 = vadd.xlane.f32.xlu0 %v15619_v13  ;;  %v15636_v13 = vld [vmem:[#allocation141_spill] sm:$0xff] }
 0xb29   : > { %2950 = vadd.xlane.f32.xlu1 %v15620_v4  ;;  %v11964_v49 = vpop.xlane.xlu0 %2502 }
 0xb2a   : > { %15630 = vst [vmem:[#allocation128_spill] sm:$0xff] %v11964_v49  ;;  %v11966_v58 = vpop.xlane.xlu1 %2511 }
 0xb2b   : > { %15631 = vst [vmem:[#allocation175_spill] sm:$0xff] %v11966_v58  ;;  %v15652_v58 = vld [vmem:[#allocation63_spill] sm:$0xff] }
 0xb2c   : > { %2947 = vadd.xlane.f32.xlu0 %v15622_v9  ;;  %v15638_v9 = vld [vmem:[#allocation164_spill] sm:$0xff] }
 0xb2d   : > { %3341 = vadd.xlane.f32.xlu1 %v15623_v12  ;;  %v11971_v54 = vpop.xlane.xlu0 %2508  ;;  %v15639_v12 = vld [vmem:[#allocation172_spill] sm:$0xff] }
 0xb2e   : > { %15635 = vst [vmem:[#allocation58_spill] sm:$0xff] %v11971_v54  ;;  %v11974_v4 = vpop.xlane.xlu1 %2517 }
 0xb2f   : > { %15637 = vst [vmem:[#allocation59_spill] sm:$0xff] %v11974_v4 }
 0xb30   : > { %3338 = vadd.xlane.f32.xlu0 %v15624_v50 }
 0xb31   : > { %3347 = vadd.xlane.f32.xlu1 %v15626_v48  ;;  %v11978_v50 = vpop.xlane.xlu0 %2514 }
 0xb32   : > { %15640 = vst [vmem:[#allocation86_spill] sm:$0xff] %v11978_v50  ;;  %v11980_v48 = vpop.xlane.xlu1 %2908 }
 0xb33   : > { %15641 = vst [vmem:[#allocation140_spill] sm:$0xff] %v11980_v48 }
 0xb34   : > { %3344 = vadd.xlane.f32.xlu0 %v15628_v33  ;;  %v15642_v33 = vld [vmem:[#allocation65_spill] sm:$0xff] }
 0xb35   : > { %3353 = vadd.xlane.f32.xlu1 %v15629_v34  ;;  %v15643_v34 = vld [vmem:[#allocation186_spill] sm:$0xff] }
 0xb38   : > { %3350 = vadd.xlane.f32.xlu0 %v15632_v0  ;;  %v15644_v0 = vld [vmem:[#allocation188_spill] sm:$0xff] }
 0xb39   : > { %3359 = vadd.xlane.f32.xlu1 %v15633_v41  ;;  %v11985_v41 = vpop.xlane.xlu0 %2905 }
 0xb3a   : > { %15645 = vst [vmem:[#allocation115_spill] sm:$0xff] %v11985_v41 }
 0xb3c   : > { %3356 = vadd.xlane.f32.xlu0 %v15634_v16  ;;  %v15646_v16 = vld [vmem:[#allocation187_spill] sm:$0xff] }
 0xb3d   : > { %3365 = vadd.xlane.f32.xlu1 %v15636_v13  ;;  %v11988_v13 = vpop.xlane.xlu1 %2914 }
 0xb3e   : > { %15647 = vst [vmem:[#allocation142_spill] sm:$0xff] %v11988_v13 }
 0xb40   : > { %3362 = vadd.xlane.f32.xlu0 %v15638_v9  ;;  %v15649_v9 = vld [vmem:[#allocation178_spill] sm:$0xff] }
 0xb41   : > { %3371 = vadd.xlane.f32.xlu1 %v15639_v12  ;;  %v11992_v12 = vpop.xlane.xlu0 %2911  ;;  %v11994_v27 = vpop.xlane.xlu1 %2920 }
 0xb42   : > { %15650 = vst [vmem:[#allocation93_spill] sm:$0xff] %v11992_v12  ;;  %15651 = vst [vmem:[#allocation51_spill] sm:$0xff] %v11994_v27  ;;  %v15670_v12 = vld [vmem:[#allocation14_spill] sm:$0xff] }
 0xb44   : > { %3368 = vadd.xlane.f32.xlu0 %v15642_v33  ;;  %v15653_v33 = vld [vmem:[#allocation151_spill] sm:$0xff] }
 0xb45   : > { %3377 = vadd.xlane.f32.xlu1 %v15643_v34  ;;  %v15654_v34 = vld [vmem:[#allocation64_spill] sm:$0xff]  ;;  %v12001_v54 = vpop.xlane.xlu1 %2926 }
 0xb46   : > { %15656 = vst [vmem:[#allocation143_spill] sm:$0xff] %v12001_v54  ;;  %v4457_v54 = vcvt.f32.s32 %v11880_v7  ;;  %v15669_v7 = vld [vmem:[#allocation12_spill] sm:$0xff] }
 0xb48   : > { %3374 = vadd.xlane.f32.xlu0 %v15644_v0  ;;  %v11999_v0 = vpop.xlane.xlu0 %2917 }
 0xb49   : > { %3383 = vadd.xlane.f32.xlu1 %v15646_v16  ;;  %15655 = vst [vmem:[#allocation103_spill] sm:$0xff] %v11999_v0  ;;  %v12005_v49 = vpop.xlane.xlu1 %2932  ;;  %v15662_v0 = vld [vmem:[#allocation11_spill] sm:$0xff] }
 0xb4a   : > { %15658 = vst [vmem:[#allocation170_spill] sm:$0xff] %v12005_v49  ;;  %vm14351_vm0 = vcmp.eq.s32.totalorder %v15662_v0, 8  ;;  %v15663_v49 = vld [vmem:[#allocation106_spill] sm:$0xff] }
 0xb4c   : > { %3380 = vadd.xlane.f32.xlu0 %v15648_v21  ;;  %v12003_v16 = vpop.xlane.xlu0 %2923 }
 0xb4d   : > { %3774 = vadd.xlane.f32.xlu1 %v15649_v9  ;;  %15657 = vst [vmem:[#allocation168_spill] sm:$0xff] %v12003_v16  ;;  %v12009_v9 = vpop.xlane.xlu1 %2938 }
 0xb4e   : > { %15660 = vst [vmem:[#allocation171_spill] sm:$0xff] %v12009_v9  ;;  %v15665_v9 = vld [vmem:[#allocation79_spill] sm:$0xff] }
 0xb50   : > { %3771 = vadd.xlane.f32.xlu0 %v15652_v58  ;;  %v12007_v21 = vpop.xlane.xlu0 %2929  ;;  %v4330_v58 = vshll.u32 %v4329_v51, 16 }
 0xb51   : > { %3780 = vadd.xlane.f32.xlu1 %v15653_v33  ;;  %15659 = vst [vmem:[#allocation169_spill] sm:$0xff] %v12007_v21  ;;  %v4345_v33 = vcvt.f32.s32 %v11876_v23  ;;  %v15664_v21 = vld [vmem:[#allocation181_spill] sm:$0xff] }
 0xb53   : > { %v4346_v48 = vshll.u32 %v4345_v33, 16  ;;  %v4458_v33 = vshll.u32 %v4457_v54, 16  ;;  %v15673_v54 = vld [vmem:[#allocation118_spill] sm:$0xff] }
 0xb54   : > { %3777 = vadd.xlane.f32.xlu0 %v15654_v34  ;;  %v12013_v13 = vpop.xlane.xlu0 %2935 }
 0xb55   : > { %15661 = vst [vmem:[#allocation163_spill] sm:$0xff] %v12013_v13 }
 0xb67   : > { %v4327_v27 = vpop.xlane.xlu1 %4326 }
 0xb68   : > { %v4328_v34 = vcvt.f32.s32 %v4327_v27 }
 0xb6a   : > { %v4331_v16 = vadd.s32 %v4330_v58, %v4328_v34 }
 0xb6c   : > { %vm4572_vm2 = vcmp.eq.s32.totalorder %v15663_v49, %v4331_v16  ;;  %vm4573_vm7 = vcmp.eq.s32.totalorder %v15664_v21, %v4331_v16  ;;  %v12022_v14 = vsel %vm14351_vm0, %v4331_v16, %v15665_v9 }
 0xb6d   : > { %15666 = vst [vmem:[#allocation155_spill] sm:$0xff] %v12022_v14  ;;  %v4343_v51 = vpop.xlane.xlu0 %4342  ;;  %v12025_v13 = vsel %vm4572_vm2, 2147483647, %v15663_v49  ;;  %v12028_v27 = vsel %vm4573_vm7, 2147483647, %v15664_v21  ;;  %v4604_v58 = vsel %vm4572_vm2, %v15669_v7, 0.0 }
 0xb6e   : > { %v4344_v23 = vcvt.f32.s32 %v4343_v51  ;;  %15667 = vst [vmem:[#allocation62_spill] sm:$0xff] %v12025_v13  ;;  %15668 = vst [vmem:[#allocation91_spill] sm:$0xff] %v12028_v27  ;;  %v4455_v34 = vpop.xlane.xlu1 %4454  ;;  %vm4749_vm1 = vcmp.lt.s32.totalorder %v12025_v13, %v12028_v27  ;;  %v4605_v17 = vsel %vm4573_vm7, %v15670_v12, 0.0  ;;  %v15672_v14 = vld [vmem:[#allocation117_spill] sm:$0xff] }
 0xb6f   : > { %v4456_v4 = vcvt.f32.s32 %v4455_v34  ;;  %v12036_v9 = vsel %vm4749_vm1, %v12025_v13, %v12028_v27  ;;  %v12038_v49 = vadd.f32 %v4605_v17, %v4604_v58  ;;  %v15674_v7 = vld [vmem:[#allocation113_spill] sm:$0xff]  ;;  %v15679_v58 = vld [vmem:[#allocation124_spill] sm:$0xff]  ;;  %v15685_v27 = vld [vmem:[#allocation18_spill] sm:$0xff] }
 0xb70   : > { %v4347_v16 = vadd.s32 %v4346_v48, %v4344_v23  ;;  %v4752_v21 = vshra.s32 %v12036_v9, 16  ;;  %v4473_v48 = vcvt.f32.s32 %v11885_v1 }
 0xb71   : > { %15671 = vst [vmem:[#allocation183_spill] sm:$0xff] %v12038_v49  ;;  %v4459_v51 = vadd.s32 %v4458_v33, %v4456_v4  ;;  %v15678_v4 = vld [vmem:[#allocation122_spill] sm:$0xff]  ;;  %v15680_v33 = vld [vmem:[#allocation121_spill] sm:$0xff] }
 0xb72   : > { %vm4574_vm8 = vcmp.eq.s32.totalorder %v15672_v14, %v4347_v16  ;;  %vm4575_vm9 = vcmp.eq.s32.totalorder %v15673_v54, %v4347_v16  ;;  %v12046_v41 = vsel %vm14351_vm0, %v4347_v16, %v15674_v7  ;;  %v12049_v23 = vcvt.s32.f32 %v4752_v21 }
 0xb73   : > { %15675 = vst [vmem:[#allocation34_spill] sm:$0xff] %v12046_v41  ;;  %v12052_v34 = vsel %vm4574_vm8, 2147483647, %v15672_v14  ;;  %v12057_v17 = vsel %vm4575_vm9, 2147483647, %v15673_v54  ;;  %vm4588_vm11 = vcmp.eq.s32.totalorder %v15678_v4, %v4459_v51  ;;  %vm4589_vm3 = vcmp.eq.s32.totalorder %v15679_v58, %v4459_v51 }
 0xb74   : > { %15676 = vst [vmem:[#allocation184_spill] sm:$0xff] %v12052_v34  ;;  %15677 = vst [vmem:[#allocation185_spill] sm:$0xff] %v12057_v17  ;;  %v12064_v7 = vsel %vm14351_vm0, %v4459_v51, %v15680_v33  ;;  %vm4765_vm5 = vcmp.lt.s32.totalorder %v12052_v34, %v12057_v17  ;;  %4755 = vmin.xlane.f32.xlu0 %v12049_v23  ;;  %v12072_v1 = vsel %vm4588_vm11, 2147483647, %v15678_v4  ;;  %v12077_v14 = vsel %vm4589_vm3, 2147483647, %v15679_v58 }
 0xb75   : > { %15681 = vst [vmem:[#allocation141_spill] sm:$0xff] %v12064_v7  ;;  %15682 = vst [vmem:[#allocation164_spill] sm:$0xff] %v12072_v1  ;;  %v12081_v21 = vsel %vm4765_vm5, %v12052_v34, %v12057_v17  ;;  %v15684_v33 = vld [vmem:[#allocation16_spill] sm:$0xff]  ;;  %v4361_v41 = vcvt.f32.s32 %v11891_v6  ;;  %vm4877_vm13 = vcmp.lt.s32.totalorder %v12072_v1, %v12077_v14  ;;  %v4607_v13 = vsel %vm4575_vm9, %v15685_v27, 0.0  ;;  %v15687_v34 = vld [vmem:[#allocation13_spill] sm:$0xff] }
 0xb76   : > { %15683 = vst [vmem:[#allocation172_spill] sm:$0xff] %v12077_v14  ;;  %v4606_v7 = vsel %vm4574_vm8, %v15684_v33, 0.0  ;;  %v4768_v12 = vshra.s32 %v12081_v21, 16  ;;  %v4471_v26 = vpop.xlane.xlu0 %4470  ;;  %v12093_v11 = vsel %vm4877_vm13, %v12072_v1, %v12077_v14  ;;  %v4620_v6 = vsel %vm4588_vm11, %v15687_v34, 0.0  ;;  %v15688_v33 = vld [vmem:[#allocation15_spill] sm:$0xff]  ;;  %v15691_v51 = vld [vmem:[#allocation120_spill] sm:$0xff] }
 0xb77   : > { %v12095_v17 = vadd.f32 %v4607_v13, %v4606_v7  ;;  %v4621_v20 = vsel %vm4589_vm3, %v15688_v33, 0.0  ;;  %v4474_v39 = vshll.u32 %v4473_v48, 16  ;;  %v4472_v49 = vcvt.f32.s32 %v4471_v26  ;;  %v15690_v34 = vld [vmem:[#allocation119_spill] sm:$0xff]  ;;  %v15692_v26 = vld [vmem:[#allocation129_spill] sm:$0xff] }
 0xb78   : > { %v4880_v16 = vshra.s32 %v12093_v11, 16  ;;  %v12104_v54 = vcvt.s32.f32 %v4768_v12  ;;  %v12106_v27 = vadd.f32 %v4621_v20, %v4620_v6  ;;  %v4362_v13 = vshll.u32 %v4361_v41, 16  ;;  %v15697_v48 = vld [vmem:[#allocation19_spill] sm:$0xff]  ;;  %v15701_v33 = vld [vmem:[#allocation125_spill] sm:$0xff] }
 0xb79   : > { %15686 = vst [vmem:[#allocation65_spill] sm:$0xff] %v12095_v17  ;;  %v4475_v14 = vadd.s32 %v4474_v39, %v4472_v49  ;;  %v4377_v4 = vcvt.f32.s32 %v11895_v37  ;;  %v15696_v37 = vld [vmem:[#allocation17_spill] sm:$0xff] }
 0xb7a   : > { %15689 = vst [vmem:[#allocation186_spill] sm:$0xff] %v12106_v27  ;;  %v12108_v1 = vcvt.s32.f32 %v4880_v16  ;;  %4771 = vmin.xlane.f32.xlu1 %v12104_v54  ;;  %v4359_v7 = vpop.xlane.xlu1 %4358 }
 0xb7b   : > { %vm4590_vm10 = vcmp.eq.s32.totalorder %v15690_v34, %v4475_v14  ;;  %vm4591_vm6 = vcmp.eq.s32.totalorder %v15691_v51, %v4475_v14  ;;  %v12117_v12 = vsel %vm14351_vm0, %v4475_v14, %v15692_v26  ;;  %v4360_v39 = vcvt.f32.s32 %v4359_v7 }
 0xb7c   : > { %15693 = vst [vmem:[#allocation188_spill] sm:$0xff] %v12117_v12  ;;  %4883 = vmin.xlane.f32.xlu0 %v12108_v1  ;;  %v12121_v20 = vsel %vm4590_vm10, 2147483647, %v15690_v34  ;;  %v12124_v41 = vsel %vm4591_vm6, 2147483647, %v15691_v51  ;;  %v4622_v49 = vsel %vm4590_vm10, %v15696_v37, 0.0 }
 0xb7d   : > { %15694 = vst [vmem:[#allocation187_spill] sm:$0xff] %v12121_v20  ;;  %15695 = vst [vmem:[#allocation189_spill] sm:$0xff] %v12124_v41  ;;  %vm4893_vm12 = vcmp.lt.s32.totalorder %v12121_v20, %v12124_v41  ;;  %v4623_v58 = vsel %vm4591_vm6, %v15697_v48, 0.0  ;;  %v4363_v6 = vadd.s32 %v4362_v13, %v4360_v39  ;;  %v4378_v34 = vshll.u32 %v4377_v4, 16  ;;  %v15699_v12 = vld [vmem:[#allocation30_spill] sm:$0xff] }
 0xb7e   : > { %v4375_v16 = vpop.xlane.xlu0 %4374  ;;  %v12132_v14 = vsel %vm4893_vm12, %v12121_v20, %v12124_v41  ;;  %v12134_v7 = vadd.f32 %v4623_v58, %v4622_v49  ;;  %v15700_v37 = vld [vmem:[#allocation130_spill] sm:$0xff]  ;;  %v4489_v58 = vcvt.f32.s32 %v11900_v31  ;;  %v15706_v20 = vld [vmem:[#allocation24_spill] sm:$0xff] }
 0xb7f   : > { %v4376_v26 = vcvt.f32.s32 %v4375_v16  ;;  %v4896_v51 = vshra.s32 %v12132_v14, 16  ;;  %vm4576_vm14 = vcmp.eq.s32.totalorder %v15699_v12, %v4363_v6  ;;  %vm4577_vm4 = vcmp.eq.s32.totalorder %v15700_v37, %v4363_v6  ;;  %v15705_v16 = vld [vmem:[#allocation21_spill] sm:$0xff] }
 0xb80   : > { %15698 = vst [vmem:[#allocation178_spill] sm:$0xff] %v12134_v7  ;;  %v12142_v48 = vsel %vm14351_vm0, %v4363_v6, %v15701_v33  ;;  %v12145_v39 = vsel %vm4576_vm14, 2147483647, %v15699_v12  ;;  %v12148_v49 = vsel %vm4577_vm4, 2147483647, %v15700_v37  ;;  %v4608_v41 = vsel %vm4576_vm14, %v15705_v16, 0.0 }
 0xb81   : > { %15702 = vst [vmem:[#allocation63_spill] sm:$0xff] %v12142_v48  ;;  %v4379_v13 = vadd.s32 %v4378_v34, %v4376_v26  ;;  %15703 = vst [vmem:[#allocation151_spill] sm:$0xff] %v12145_v39  ;;  %v12150_v4 = vcvt.s32.f32 %v4896_v51  ;;  %vm4781_vm15 = vcmp.lt.s32.totalorder %v12145_v39, %v12148_v49  ;;  %v4609_v7 = vsel %vm4577_vm4, %v15706_v20, 0.0  ;;  %v15707_v33 = vld [vmem:[#allocation132_spill] sm:$0xff]  ;;  %v15709_v12 = vld [vmem:[#allocation131_spill] sm:$0xff] }
 0xb82   : > { %15704 = vst [vmem:[#allocation64_spill] sm:$0xff] %v12148_v49  ;;  %v15708_v6 = vld [vmem:[#allocation116_spill] sm:$0xff]  ;;  %v12166_v34 = vsel %vm4781_vm15, %v12145_v39, %v12148_v49  ;;  %v15715_v16 = vld [vmem:[#allocation31_spill] sm:$0xff]  ;;  %v4490_v39 = vshll.u32 %v4489_v58, 16 }
 0xb83   : > { %vm4578_vm2 = vcmp.eq.s32.totalorder %v15707_v33, %v4379_v13  ;;  %vm4579_vm7 = vcmp.eq.s32.totalorder %v15708_v6, %v4379_v13  ;;  %v12162_v37 = vsel %vm14351_vm0, %v4379_v13, %v15709_v12  ;;  %4899 = vmin.xlane.f32.xlu1 %v12150_v4  ;;  %v4784_v31 = vshra.s32 %v12166_v34, 16  ;;  %v15714_v12 = vld [vmem:[#allocation27_spill] sm:$0xff] }
 0xb84   : > { %15710 = vst [vmem:[#allocation106_spill] sm:$0xff] %v12162_v37  ;;  %v12171_v26 = vsel %vm4578_vm2, 2147483647, %v15707_v33  ;;  %v12174_v51 = vsel %vm4579_vm7, 2147483647, %v15708_v6  ;;  %v4487_v20 = vpop.xlane.xlu1 %4486  ;;  %v12178_v13 = vadd.f32 %v4609_v7, %v4608_v41  ;;  %v4610_v37 = vsel %vm4578_vm2, %v15714_v12, 0.0 }
 0xb85   : > { %15711 = vst [vmem:[#allocation181_spill] sm:$0xff] %v12171_v26  ;;  %15712 = vst [vmem:[#allocation79_spill] sm:$0xff] %v12174_v51  ;;  %vm4797_vm1 = vcmp.lt.s32.totalorder %v12171_v26, %v12174_v51  ;;  %v4611_v49 = vsel %vm4579_vm7, %v15715_v16, 0.0  ;;  %v4488_v48 = vcvt.f32.s32 %v4487_v20  ;;  %v12182_v27 = vcvt.s32.f32 %v4784_v31  ;;  %v15720_v7 = vld [vmem:[#allocation147_spill] sm:$0xff]  ;;  %v15721_v16 = vld [vmem:[#allocation148_spill] sm:$0xff] }
 0xb86   : > { %15713 = vst [vmem:[#allocation117_spill] sm:$0xff] %v12178_v13  ;;  %v12186_v33 = vsel %vm4797_vm1, %v12171_v26, %v12174_v51  ;;  %v12189_v17 = vadd.f32 %v4611_v49, %v4610_v37  ;;  %v15722_v20 = vld [vmem:[#allocation146_spill] sm:$0xff] }
 0xb87   : > { %15716 = vst [vmem:[#allocation118_spill] sm:$0xff] %v12182_v27  ;;  %15717 = vst [vmem:[#allocation113_spill] sm:$0xff] %v12186_v33  ;;  %v4800_v6 = vshra.s32 %v12186_v33, 16  ;;  %v4491_v50 = vadd.s32 %v4490_v39, %v4488_v48  ;;  %4787 = vmin.xlane.f32.xlu0 %v12182_v27  ;;  %v15726_v48 = vld [vmem:[#allocation20_spill] sm:$0xff]  ;;  %v15727_v37 = vld [vmem:[#allocation22_spill] sm:$0xff] }
 0xb88   : > { %15718 = vst [vmem:[#allocation122_spill] sm:$0xff] %v12189_v17  ;;  %v15733_v17 = vld [vmem:[#allocation70_spill] sm:$0xff] }
 0xb89   : > { %v12192_v41 = vcvt.s32.f32 %v4800_v6  ;;  %vm4592_vm8 = vcmp.eq.s32.totalorder %v15720_v7, %v4491_v50  ;;  %vm4593_vm9 = vcmp.eq.s32.totalorder %v15721_v16, %v4491_v50  ;;  %v12199_v58 = vsel %vm14351_vm0, %v4491_v50, %v15722_v20 }
 0xb8a   : > { %15723 = vst [vmem:[#allocation121_spill] sm:$0xff] %v12199_v58  ;;  %v12202_v31 = vsel %vm4592_vm8, 2147483647, %v15720_v7  ;;  %v12205_v49 = vsel %vm4593_vm9, 2147483647, %v15721_v16  ;;  %v4624_v39 = vsel %vm4592_vm8, %v15726_v48, 0.0  ;;  %v4505_v16 = vcvt.f32.s32 %v11905_v57 }
 0xb8b   : > { %15719 = vst [vmem:[#allocation124_spill] sm:$0xff] %v12192_v41  ;;  %15724 = vst [vmem:[#allocation119_spill] sm:$0xff] %v12202_v31  ;;  %4803 = vmin.xlane.f32.xlu1 %v12192_v41  ;;  %v4625_v6 = vsel %vm4593_vm9, %v15727_v37, 0.0  ;;  %vm4909_vm11 = vcmp.lt.s32.totalorder %v12202_v31, %v12205_v49  ;;  %v4393_v48 = vcvt.f32.s32 %v11911_v29  ;;  %v4409_v37 = vcvt.f32.s32 %v11913_v52 }
 0xb8c   : > { %15725 = vst [vmem:[#allocation120_spill] sm:$0xff] %v12205_v49  ;;  %v12212_v12 = vadd.f32 %v4625_v6, %v4624_v39  ;;  %v12216_v50 = vsel %vm4909_vm11, %v12202_v31, %v12205_v49  ;;  %v4506_v51 = vshll.u32 %v4505_v16, 16  ;;  %v4521_v49 = vcvt.f32.s32 %v11921_v2  ;;  %v15731_v31 = vld [vmem:[#allocation43_spill] sm:$0xff]  ;;  %v15738_v2 = vld [vmem:[#allocation25_spill] sm:$0xff] }
 0xb8d   : > { %15729 = vst [vmem:[#allocation30_spill] sm:$0xff] %v12216_v50  ;;  %v4912_v7 = vshra.s32 %v12216_v50, 16  ;;  %v4394_v26 = vshll.u32 %v4393_v48, 16 }
 0xb8e   : > { %15728 = vst [vmem:[#allocation129_spill] sm:$0xff] %v12212_v12  ;;  %v4410_v12 = vshll.u32 %v4409_v37, 16 }
 0xb8f   : > { %v12219_v20 = vcvt.s32.f32 %v4912_v7  ;;  %v15732_v7 = vld [vmem:[#allocation72_spill] sm:$0xff] }
 0xb91   : > { %15730 = vst [vmem:[#allocation130_spill] sm:$0xff] %v12219_v20  ;;  %4915 = vmin.xlane.f32.xlu0 %v12219_v20  ;;  %v4503_v58 = vpop.xlane.xlu0 %4502 }
 0xb92   : > { %v4504_v39 = vcvt.f32.s32 %v4503_v58  ;;  %v15737_v58 = vld [vmem:[#allocation23_spill] sm:$0xff] }
 0xb94   : > { %v4507_v6 = vadd.s32 %v4506_v51, %v4504_v39 }
 0xb96   : > { %vm4594_vm3 = vcmp.eq.s32.totalorder %v15731_v31, %v4507_v6  ;;  %vm4595_vm5 = vcmp.eq.s32.totalorder %v15732_v7, %v4507_v6  ;;  %v12231_v57 = vsel %vm14351_vm0, %v4507_v6, %v15733_v17 }
 0xb97   : > { %15734 = vst [vmem:[#allocation125_spill] sm:$0xff] %v12231_v57  ;;  %v12234_v52 = vsel %vm4594_vm3, 2147483647, %v15731_v31  ;;  %v12237_v51 = vsel %vm4595_vm5, 2147483647, %v15732_v7  ;;  %v4626_v48 = vsel %vm4594_vm3, %v15737_v58, 0.0 }
 0xb98   : > { %15735 = vst [vmem:[#allocation132_spill] sm:$0xff] %v12234_v52  ;;  %15736 = vst [vmem:[#allocation116_spill] sm:$0xff] %v12237_v51  ;;  %v4627_v37 = vsel %vm4595_vm5, %v15738_v2, 0.0  ;;  %vm4925_vm13 = vcmp.lt.s32.totalorder %v12234_v52, %v12237_v51  ;;  %v4522_v58 = vshll.u32 %v4521_v49, 16  ;;  %v4425_v2 = vcvt.f32.s32 %v11931_v5 }
 0xb99   : > { %v12243_v25 = vadd.f32 %v4627_v37, %v4626_v48  ;;  %v12247_v17 = vsel %vm4925_vm13, %v12234_v52, %v12237_v51  ;;  %v15741_v48 = vld [vmem:[#allocation179_spill] sm:$0xff]  ;;  %v15742_v37 = vld [vmem:[#allocation56_spill] sm:$0xff]  ;;  %v15743_v51 = vld [vmem:[#allocation173_spill] sm:$0xff] }
 0xb9a   : > { %v4391_v29 = vpop.xlane.xlu1 %4390  ;;  %v4407_v13 = vpop.xlane.xlu0 %4406  ;;  %15740 = vst [vmem:[#allocation147_spill] sm:$0xff] %v12247_v17  ;;  %v4928_v7 = vshra.s32 %v12247_v17, 16 }
 0xb9b   : > { %v4392_v16 = vcvt.f32.s32 %v4391_v29  ;;  %v4408_v39 = vcvt.f32.s32 %v4407_v13  ;;  %15739 = vst [vmem:[#allocation131_spill] sm:$0xff] %v12243_v25  ;;  %v4537_v13 = vcvt.f32.s32 %v11925_v15  ;;  %v4441_v29 = vcvt.f32.s32 %v11936_v32  ;;  %v15746_v15 = vld [vmem:[#allocation76_spill] sm:$0xff]  ;;  %v15747_v32 = vld [vmem:[#allocation69_spill] sm:$0xff] }
 0xb9d   : > { %v12249_v31 = vadd.s32 %v4394_v26, %v4392_v16  ;;  %v12251_v6 = vadd.s32 %v4410_v12, %v4408_v39  ;;  %v15745_v12 = vld [vmem:[#allocation177_spill] sm:$0xff] }
 0xb9f   : > { %vm4580_vm10 = vcmp.eq.s32.totalorder %v15741_v48, %v12249_v31  ;;  %vm4581_vm6 = vcmp.eq.s32.totalorder %v15742_v37, %v12249_v31  ;;  %v12265_v26 = vsel %vm14351_vm0, %v12249_v31, %v15743_v51  ;;  %vm4582_vm12 = vcmp.eq.s32.totalorder %v15745_v12, %v12251_v6 }
 0xba0   : > { %15744 = vst [vmem:[#allocation148_spill] sm:$0xff] %v12265_v26  ;;  %v4519_v5 = vpop.xlane.xlu1 %4518  ;;  %vm4583_vm14 = vcmp.eq.s32.totalorder %v15746_v15, %v12251_v6  ;;  %v12275_v49 = vsel %vm14351_vm0, %v12251_v6, %v15747_v32  ;;  %v12281_v16 = vsel %vm4580_vm10, 2147483647, %v15741_v48  ;;  %v12287_v51 = vsel %vm4581_vm6, 2147483647, %v15742_v37  ;;  %v4535_v52 = vpop.xlane.xlu0 %4534 }
 0xba1   : > { %15748 = vst [vmem:[#allocation146_spill] sm:$0xff] %v12275_v49  ;;  %15749 = vst [vmem:[#allocation43_spill] sm:$0xff] %v12281_v16  ;;  %v4520_v39 = vcvt.f32.s32 %v4519_v5  ;;  %vm4813_vm4 = vcmp.lt.s32.totalorder %v12281_v16, %v12287_v51  ;;  %v12291_v26 = vcvt.s32.f32 %v4928_v7  ;;  %v12297_v32 = vsel %vm4582_vm12, 2147483647, %v15745_v12 }
 0xba2   : > { %15750 = vst [vmem:[#allocation72_spill] sm:$0xff] %v12287_v51  ;;  %15752 = vst [vmem:[#allocation179_spill] sm:$0xff] %v12297_v32  ;;  %v4538_v49 = vshll.u32 %v4537_v13, 16  ;;  %v12301_v57 = vsel %vm4813_vm4, %v12281_v16, %v12287_v51  ;;  %v12307_v5 = vsel %vm4583_vm14, 2147483647, %v15746_v15  ;;  %v4536_v25 = vcvt.f32.s32 %v4535_v52  ;;  %v15757_v52 = vld [vmem:[#allocation161_spill] sm:$0xff] }
 0xba3   : > { %15751 = vst [vmem:[#allocation70_spill] sm:$0xff] %v12291_v26  ;;  %15753 = vst [vmem:[#allocation56_spill] sm:$0xff] %v12301_v57  ;;  %v12309_v7 = vadd.s32 %v4522_v58, %v4520_v39  ;;  %v4816_v22 = vshra.s32 %v12301_v57, 16  ;;  %4931 = vmin.xlane.f32.xlu1 %v12291_v26  ;;  %vm4829_vm15 = vcmp.lt.s32.totalorder %v12297_v32, %v12307_v5  ;;  %v4426_v13 = vshll.u32 %v4425_v2, 16  ;;  %v15758_v58 = vld [vmem:[#allocation84_spill] sm:$0xff] }
 0xba4   : > { %15754 = vst [vmem:[#allocation173_spill] sm:$0xff] %v12307_v5  ;;  %v4553_v51 = vcvt.f32.s32 %v11939_v53  ;;  %v4442_v16 = vshll.u32 %v4441_v29, 16  ;;  %v12318_v61 = vsel %vm4829_vm15, %v12297_v32, %v12307_v5  ;;  %v12330_v2 = vadd.s32 %v4538_v49, %v4536_v25  ;;  %v15763_v25 = vld [vmem:[#allocation157_spill] sm:$0xff] }
 0xba5   : > { %15755 = vst [vmem:[#allocation177_spill] sm:$0xff] %v12318_v61  ;;  %vm4596_vm2 = vcmp.eq.s32.totalorder %v15756_v62, %v12309_v7  ;;  %vm4597_vm7 = vcmp.eq.s32.totalorder %v15757_v52, %v12309_v7  ;;  %v12328_v39 = vsel %vm14351_vm0, %v12309_v7, %v15758_v58  ;;  %v12332_v29 = vcvt.s32.f32 %v4816_v22  ;;  %v15764_v22 = vld [vmem:[#allocation165_spill] sm:$0xff] }
 0xba6   : > { %15759 = vst [vmem:[#allocation76_spill] sm:$0xff] %v12328_v39  ;;  %v4423_v53 = vpop.xlane.xlu1 %4422  ;;  %v12338_v5 = vsel %vm4596_vm2, 2147483647, %v15756_v62  ;;  %v12344_v32 = vsel %vm4597_vm7, 2147483647, %v15757_v52  ;;  %v4832_v58 = vshra.s32 %v12318_v61, 16  ;;  %vm4598_vm1 = vcmp.eq.s32.totalorder %v15763_v25, %v12330_v2 }
 0xba7   : > { %15760 = vst [vmem:[#allocation69_spill] sm:$0xff] %v12332_v29  ;;  %15761 = vst [vmem:[#allocation158_spill] sm:$0xff] %v12338_v5  ;;  %v4424_v39 = vcvt.f32.s32 %v4423_v53  ;;  %vm14345_vm8 = vcmp.eq.s32.totalorder %v15764_v22, %v12330_v2  ;;  %v15765_v49 = vld [vmem:[#allocation145_spill] sm:$0xff]  ;;  %4819 = vmin.xlane.f32.xlu0 %v12332_v29  ;;  %vm4941_vm9 = vcmp.lt.s32.totalorder %v12338_v5, %v12344_v32  ;;  %v12366_v53 = vsel %vm4598_vm1, 2147483647, %v15763_v25 }
 0xba8   : > { %15762 = vst [vmem:[#allocation161_spill] sm:$0xff] %v12344_v32  ;;  %v12355_v35 = vsel %vm14351_vm0, %v12330_v2, %v15765_v49  ;;  %v12360_v57 = vcvt.s32.f32 %v4832_v58  ;;  %15768 = vst [vmem:[#allocation165_spill] sm:$0xff] %v12366_v53  ;;  %v12372_v61 = vsel %vm14345_vm8, 2147483647, %v15764_v22  ;;  %v4554_v49 = vshll.u32 %v4553_v51, 16 }
 0xba9   : > { %15766 = vst [vmem:[#allocation84_spill] sm:$0xff] %v12355_v35  ;;  %15769 = vst [vmem:[#allocation145_spill] sm:$0xff] %v12372_v61  ;;  %v12374_v35 = vadd.s32 %v4426_v13, %v4424_v39  ;;  %v4439_v29 = vpop.xlane.xlu0 %4438  ;;  %v12378_v58 = vsel %vm4941_vm9, %v12338_v5, %v12344_v32  ;;  %vm4957_vm11 = vcmp.lt.s32.totalorder %v12366_v53, %v12372_v61  ;;  %v4569_v26 = vcvt.f32.s32 %v11945_v36  ;;  %v15772_v13 = vld [vmem:[#allocation38_spill] sm:$0xff]  ;;  %v15773_v39 = vld [vmem:[#allocation61_spill] sm:$0xff] }
 0xbaa   : > { %15767 = vst [vmem:[#allocation157_spill] sm:$0xff] %v12360_v57  ;;  %15770 = vst [vmem:[#allocation203_spill] sm:$0xff] %v12378_v58  ;;  %v4551_v17 = vpop.xlane.xlu1 %4550  ;;  %v4440_v20 = vcvt.f32.s32 %v4439_v29  ;;  %v4944_v50 = vshra.s32 %v12378_v58, 16  ;;  %4835 = vmin.xlane.f32.xlu1 %v12360_v57  ;;  %v12387_v51 = vsel %vm4957_vm11, %v12366_v53, %v12372_v61  ;;  %v15774_v32 = vld [vmem:[#allocation66_spill] sm:$0xff]  ;;  %v4615_v31 = vsel %vm4583_vm14, %v15008_v45, 0.0 }
 0xbab   : > { %15771 = vst [vmem:[#allocation204_spill] sm:$0xff] %v12387_v51  ;;  %vm4584_vm3 = vcmp.eq.s32.totalorder %v15772_v13, %v12374_v35  ;;  %vm4585_vm5 = vcmp.eq.s32.totalorder %v15773_v39, %v12374_v35  ;;  %v12397_v36 = vsel %vm14351_vm0, %v12374_v35, %v15774_v32  ;;  %v4552_v29 = vcvt.f32.s32 %v4551_v17  ;;  %v15779_v17 = vld [vmem:[#allocation74_spill] sm:$0xff] }
 0xbac   : > { %15775 = vst [vmem:[#allocation38_spill] sm:$0xff] %v12397_v36  ;;  %v4443_v5 = vadd.s32 %v4442_v16, %v4440_v20  ;;  %v12399_v58 = vcvt.s32.f32 %v4944_v50  ;;  %v12405_v61 = vsel %vm4584_vm3, 2147483647, %v15772_v13  ;;  %v12411_v53 = vsel %vm4585_vm5, 2147483647, %v15773_v39  ;;  %v15780_v16 = vld [vmem:[#allocation47_spill] sm:$0xff] }
 0xbad   : > { %15777 = vst [vmem:[#allocation66_spill] sm:$0xff] %v12405_v61  ;;  %15778 = vst [vmem:[#allocation205_spill] sm:$0xff] %v12411_v53  ;;  %v12413_v57 = vadd.s32 %v4554_v49, %v4552_v29  ;;  %v4567_v32 = vpop.xlane.xlu0 %4566  ;;  %vm4845_vm13 = vcmp.lt.s32.totalorder %v12405_v61, %v12411_v53  ;;  %v4960_v50 = vshra.s32 %v12387_v51, 16  ;;  %v4570_v20 = vshll.u32 %v4569_v26, 16  ;;  %v15782_v49 = vld [vmem:[#allocation50_spill] sm:$0xff]  ;;  %v15783_v29 = vld [vmem:[#allocation49_spill] sm:$0xff] }
 0xbae   : > { %15776 = vst [vmem:[#allocation61_spill] sm:$0xff] %v12399_v58  ;;  %vm4586_vm4 = vcmp.eq.s32.totalorder %v15779_v17, %v4443_v5  ;;  %v12422_v36 = vsel %vm14351_vm0, %v4443_v5, %v15780_v16  ;;  %v4568_v41 = vcvt.f32.s32 %v4567_v32  ;;  %4947 = vmin.xlane.f32.xlu0 %v12399_v58  ;;  %v15785_v51 = vld [vmem:[#allocation99_spill] sm:$0xff]  ;;  %v12438_v32 = vsel %vm4845_vm13, %v12405_v61, %v12411_v53 }
 0xbaf   : > { %15781 = vst [vmem:[#allocation74_spill] sm:$0xff] %v12422_v36  ;;  %vm4600_vm15 = vcmp.eq.s32.totalorder %v11652_v30, %v12413_v57  ;;  %vm14348_vm9 = vcmp.eq.s32.totalorder %v15782_v49, %v12413_v57  ;;  %v12433_v26 = vsel %vm14351_vm0, %v12413_v57, %v15783_v29  ;;  %vm4587_vm11 = vcmp.eq.s32.totalorder %v15785_v51, %v4443_v5 }
 0xbb0   : > { %15784 = vst [vmem:[#allocation47_spill] sm:$0xff] %v12433_v26  ;;  %v4571_v27 = vadd.s32 %v4570_v20, %v4568_v41  ;;  %15786 = vst [vmem:[#allocation50_spill] sm:$0xff] %v12438_v32  ;;  %v12440_v16 = vcvt.s32.f32 %v4960_v50  ;;  %v12446_v36 = vsel %vm4600_vm15, 2147483647, %v11652_v30  ;;  %v4848_v58 = vshra.s32 %v12438_v32, 16  ;;  %v15791_v50 = vld [vmem:[#allocation83_spill] sm:$0xff] }
 0xbb1   : > { %15788 = vst [vmem:[#allocation99_spill] sm:$0xff] %v12446_v36  ;;  %v12453_v29 = vsel %vm14348_vm9, 2147483647, %v15782_v49  ;;  %v12458_v41 = vsel %vm4586_vm4, 2147483647, %v15779_v17  ;;  %v15792_v20 = vld [vmem:[#allocation180_spill] sm:$0xff] }
 0xbb2   : > { %15787 = vst [vmem:[#allocation49_spill] sm:$0xff] %v12440_v16  ;;  %15789 = vst [vmem:[#allocation206_spill] sm:$0xff] %v12453_v29  ;;  %vm4602_vm13 = vcmp.eq.s32.totalorder %v15791_v50, %v4571_v27  ;;  %vm4603_vm8 = vcmp.eq.s32.totalorder %v15792_v20, %v4571_v27  ;;  %v15793_v26 = vld [vmem:[#allocation53_spill] sm:$0xff]  ;;  %4963 = vmin.xlane.f32.xlu1 %v12440_v16  ;;  %v12468_v61 = vcvt.s32.f32 %v4848_v58  ;;  %v12475_v32 = vsel %vm4587_vm11, 2147483647, %v15785_v51  ;;  %v15805_v30 = vld [vmem:[#allocation194_spill] sm:$0xff] }
 0xbb3   : > { %15790 = vst [vmem:[#allocation207_spill] sm:$0xff] %v12458_v41  ;;  %v12465_v53 = vsel %vm14351_vm0, %v4571_v27, %v15793_v26  ;;  %vm4973_vm9 = vcmp.lt.s32.totalorder %v12446_v36, %v12453_v29  ;;  %15796 = vst [vmem:[#allocation53_spill] sm:$0xff] %v12475_v32  ;;  %vm4861_vm0 = vcmp.lt.s32.totalorder %v12458_v41, %v12475_v32  ;;  %v12486_v58 = vsel %vm4602_vm13, 2147483647, %v15791_v50  ;;  %v15808_v50 = vld [vmem:[#allocation195_spill] sm:$0xff]  ;;  %v15809_v27 = vld [vmem:[#allocation162_spill] sm:$0xff] }
 0xbb4   : > { %15794 = vst [vmem:[#allocation83_spill] sm:$0xff] %v12465_v53  ;;  %15795 = vst [vmem:[#allocation180_spill] sm:$0xff] %v12468_v61  ;;  %v12479_v33 = vsel %vm4973_vm9, %v12446_v36, %v12453_v29  ;;  %v12491_v26 = vsel %vm4603_vm8, 2147483647, %v15792_v20  ;;  %4851 = vmin.xlane.f32.xlu0 %v12468_v61  ;;  %v12497_v29 = vsel %vm4861_vm0, %v12458_v41, %v12475_v32  ;;  %v12501_v36 = vpop.xlane.xlu0 %2941  ;;  %v4612_v61 = vsel %vm4580_vm10, %v15156_v38, 0.0  ;;  %v15810_v20 = vld [vmem:[#allocation67_spill] sm:$0xff] }
 0xbb5   : > { %15797 = vst [vmem:[#allocation208_spill] sm:$0xff] %v12479_v33  ;;  %15798 = vst [vmem:[#allocation209_spill] sm:$0xff] %v12486_v58  ;;  %v4976_v53 = vshra.s32 %v12479_v33, 16  ;;  %vm4989_vm9 = vcmp.lt.s32.totalorder %v12486_v58, %v12491_v26  ;;  %v4864_v0 = vshra.s32 %v12497_v29, 16  ;;  %v4613_v32 = vsel %vm4581_vm6, %v15011_v40, 0.0 }
 0xbb6   : > { %15799 = vst [vmem:[#allocation210_spill] sm:$0xff] %v12491_v26  ;;  %15800 = vst [vmem:[#allocation211_spill] sm:$0xff] %v12501_v36  ;;  %v12506_v16 = vsel %vm4989_vm9, %v12486_v58, %v12491_v26  ;;  %v4614_v26 = vsel %vm4582_vm12, %v15007_v56, 0.0  ;;  %v12526_v48 = vadd.f32 %v4613_v32, %v4612_v61  ;;  %v4616_v12 = vsel %vm4584_vm3, %v14874_v47, 0.0 }
 0xbb7   : > { %v12516_v41 = vcvt.s32.f32 %v4976_v53  ;;  %v4992_v36 = vshra.s32 %v12506_v16, 16  ;;  %v12519_v33 = vcvt.s32.f32 %v4864_v0  ;;  %v12535_v0 = vpop.xlane.xlu1 %2944  ;;  %v12537_v37 = vadd.f32 %v4615_v31, %v4614_v26 }
 0xbb8   : > { %15801 = vst [vmem:[#allocation212_spill] sm:$0xff] %v12535_v0  ;;  %v12543_v61 = vpop.xlane.xlu0 %2947  ;;  %v4617_v53 = vsel %vm4585_vm5, %v14627_v60, 0.0  ;;  %v4618_v6 = vsel %vm4586_vm4, %v14628_v44, 0.0  ;;  %v4619_v15 = vsel %vm4587_vm11, %v14630_v55, 0.0  ;;  %v4628_v13 = vsel %vm4596_vm2, %v14877_v8, 0.0  ;;  %v15839_v44 = vld [vmem:[#allocation61_spill] sm:$0xff] }
 0xbb9   : > { %4979 = vmin.xlane.f32.xlu0 %v12516_v41  ;;  %4867 = vmin.xlane.f32.xlu1 %v12519_v33  ;;  %v12529_v58 = vcvt.s32.f32 %v4992_v36  ;;  %v15802_v36 = vld [vmem:[#allocation193_spill] sm:$0xff]  ;;  %v12560_v32 = vadd.f32 %v4617_v53, %v4616_v12  ;;  %v12562_v26 = vadd.f32 %v4619_v15, %v4618_v6  ;;  %v4629_v35 = vsel %vm4597_vm7, %v14879_v3, 0.0 }
 0xbba   : > { %v4630_v5 = vsel %vm4598_vm1, %v14624_v59, 0.0  ;;  %v12573_v62 = vadd.f32 %v4629_v35, %v4628_v13  ;;  %vm15803_vm0 = vcmp.eq.s32.totalorder %v15764_v22, %v12330_v2  ;;  %v4632_v7 = vsel %vm4600_vm15, %v14518_v42, 0.0  ;;  %v15811_v13 = vld [vmem:[#allocation196_spill] sm:$0xff] }
 0xbbb   : > { %v4631_v51 = vsel %vm15803_vm0, %v14752_v10, 0.0  ;;  %vm15804_vm10 = vcmp.eq.s32.totalorder %v15782_v49, %v12413_v57  ;;  %v4634_v39 = vsel %vm4602_vm13, %v14634_v46, 0.0  ;;  %v4635_v2 = vsel %vm4603_vm8, %v14636_v19, 0.0  ;;  %v12597_v22 = vpop.xlane.xlu1 %2950  ;;  %v15806_v57 = vld [vmem:[#allocation73_spill] sm:$0xff]  ;;  %v15807_v49 = vld [vmem:[#allocation176_spill] sm:$0xff]  ;;  %v15866_v10 = vld [vmem:[#allocation86_spill] sm:$0xff] }
 0xbbc   : > { %v12583_v52 = vadd.f32 %v4631_v51, %v4630_v5  ;;  %v4633_v25 = vsel %vm15804_vm10, %v14633_v43, 0.0  ;;  %v12600_v31 = vadd.f32 %v4635_v2, %v4634_v39  ;;  %v12602_v12 = vpop.xlane.xlu0 %3338  ;;  %v15812_v35 = vld [vmem:[#allocation108_spill] sm:$0xff]  ;;  %v15813_v5 = vld [vmem:[#allocation197_spill] sm:$0xff]  ;;  %v15814_v51 = vld [vmem:[#allocation198_spill] sm:$0xff] }
 0xbbd   : > { %3783 = vadd.xlane.f32.xlu0 %v15802_v36  ;;  %4995 = vmin.xlane.f32.xlu1 %v12529_v58  ;;  %v12592_v17 = vadd.f32 %v4633_v25, %v4632_v7  ;;  %v15815_v39 = vld [vmem:[#allocation112_spill] sm:$0xff]  ;;  %v15816_v2 = vld [vmem:[#allocation77_spill] sm:$0xff]  ;;  %v15832_v43 = vld [vmem:[#allocation70_spill] sm:$0xff] }
 0xbbe   : > { %v15843_v47 = vld [vmem:[#allocation180_spill] sm:$0xff] }
 0xbbf   : > { %v12607_v53 = vpop.xlane.xlu1 %3341 }
 0xbc0   : > { %v12609_v6 = vpop.xlane.xlu0 %3344 }
 0xbc1   : > { %3789 = vadd.xlane.f32.xlu0 %v15805_v30  ;;  %3786 = vadd.xlane.f32.xlu1 %v15806_v57  ;;  %v15817_v57 = vld [vmem:[#allocation29_spill] sm:$0xff] }
 0xbc3   : > { %v12613_v15 = vpop.xlane.xlu1 %3347 }
 0xbc4   : > { %v12616_v36 = vpop.xlane.xlu0 %3350 }
 0xbc5   : > { %3795 = vadd.xlane.f32.xlu0 %v15807_v49  ;;  %3792 = vadd.xlane.f32.xlu1 %v15808_v50  ;;  %v15819_v50 = vld [vmem:[#allocation127_spill] sm:$0xff] }
 0xbc7   : > { %v12621_v7 = vpop.xlane.xlu1 %3353 }
 0xbc8   : > { %v12623_v25 = vpop.xlane.xlu0 %3356 }
 0xbc9   : > { %3801 = vadd.xlane.f32.xlu0 %v15809_v27  ;;  %3798 = vadd.xlane.f32.xlu1 %v15810_v20  ;;  %v15820_v27 = vld [vmem:[#allocation136_spill] sm:$0xff] }
 0xbcb   : > { %v12627_v30 = vpop.xlane.xlu1 %3359 }
 0xbcc   : > { %v12630_v49 = vpop.xlane.xlu0 %3362 }
 0xbcd   : > { %3807 = vadd.xlane.f32.xlu0 %v15811_v13  ;;  %3804 = vadd.xlane.f32.xlu1 %v15812_v35  ;;  %15818 = vst [vmem:[#allocation193_spill] sm:$0xff] %v12630_v49 }
 0xbcf   : > { %v12635_v20 = vpop.xlane.xlu1 %3365 }
 0xbd0   : > { %15821 = vst [vmem:[#allocation194_spill] sm:$0xff] %v12635_v20  ;;  %v12637_v13 = vpop.xlane.xlu0 %3368 }
 0xbd1   : > { %3813 = vadd.xlane.f32.xlu0 %v15813_v5  ;;  %3810 = vadd.xlane.f32.xlu1 %v15814_v51  ;;  %15822 = vst [vmem:[#allocation73_spill] sm:$0xff] %v12637_v13 }
 0xbd3   : > { %v12641_v35 = vpop.xlane.xlu1 %3371 }
 0xbd4   : > { %15823 = vst [vmem:[#allocation176_spill] sm:$0xff] %v12641_v35  ;;  %v12643_v5 = vpop.xlane.xlu0 %3374 }
 0xbd5   : > { %4204 = vadd.xlane.f32.xlu0 %v15815_v39  ;;  %3816 = vadd.xlane.f32.xlu1 %v15816_v2  ;;  %15824 = vst [vmem:[#allocation195_spill] sm:$0xff] %v12643_v5 }
 0xbd7   : > { %v12646_v51 = vpop.xlane.xlu1 %3377 }
 0xbd8   : > { %15825 = vst [vmem:[#allocation162_spill] sm:$0xff] %v12646_v51  ;;  %v12648_v39 = vpop.xlane.xlu0 %3380  ;;  %v4879_v51 = vand.u32 65535, %v12093_v11 }
 0xbd9   : > { %4210 = vadd.xlane.f32.xlu0 %v15817_v57  ;;  %4207 = vadd.xlane.f32.xlu1 %v15819_v50 }
 0xbda   : > { %v4881_v46 = vcvt.s32.f32 %v4879_v51 }
 0xbdc   : > { %v12652_v2 = vpop.xlane.xlu0 %3771 }
 0xbdd   : > { %4216 = vadd.xlane.f32.xlu0 %v11736_v24  ;;  %4213 = vadd.xlane.f32.xlu1 %v15820_v27  ;;  %v12650_v24 = vpop.xlane.xlu1 %3383 }
 0xbe0   : > { %v12656_v50 = vpop.xlane.xlu0 %3777 }
 0xbe1   : > { %4222 = vadd.xlane.f32.xlu0 %v11750_v28  ;;  %4219 = vadd.xlane.f32.xlu1 %v11752_v18  ;;  %v12654_v57 = vpop.xlane.xlu1 %3774  ;;  %v4751_v28 = vand.u32 65535, %v12036_v9 }
 0xbe3   : > { %v4753_v27 = vcvt.s32.f32 %v4751_v28 }
 0xbe5   : > { %4225 = vadd.xlane.f32.xlu1 %v11763_v63  ;;  %v12661_v20 = vpop.xlane.xlu1 %3780  ;;  %v4767_v63 = vand.u32 65535, %v12081_v21  ;;  %v4895_v21 = vand.u32 65535, %v12132_v14 }
 0xbe7   : > { %v4769_v19 = vcvt.s32.f32 %v4767_v63  ;;  %v4897_v11 = vcvt.s32.f32 %v4895_v21  ;;  %v15828_v21 = vld [vmem:[#allocation124_spill] sm:$0xff] }
 0xbfd   : > { %v12659_v18 = vpop.xlane.xlu0 %4755 }
 0xbfe   : > { %vm4757_vm6 = vcmp.eq.f32.partialorder %v12049_v23, %v12659_v18 }
 0xbff   : > { %v4758_v49 = vsel %vm4757_vm6, %v4753_v27, inf }
 0xc00   : > { %4759 = vmin.xlane.f32.xlu0 %v4758_v49 }
 0xc03   : > { %v12667_v0 = vpop.xlane.xlu1 %4771 }
 0xc04   : > { %vm4773_vm12 = vcmp.eq.f32.partialorder %v12104_v54, %v12667_v0  ;;  %v4783_v54 = vand.u32 65535, %v12166_v34  ;;  %v15829_v34 = vld [vmem:[#allocation30_spill] sm:$0xff] }
 0xc05   : > { %v12671_v9 = vpop.xlane.xlu0 %4883  ;;  %v4774_v28 = vsel %vm4773_vm12, %v4769_v19, inf  ;;  %v15826_v19 = vld [vmem:[#allocation113_spill] sm:$0xff] }
 0xc06   : > { %vm4885_vm14 = vcmp.eq.f32.partialorder %v12108_v1, %v12671_v9  ;;  %4775 = vmin.xlane.f32.xlu1 %v4774_v28  ;;  %v4799_v51 = vand.u32 65535, %v15826_v19  ;;  %v4785_v1 = vcvt.s32.f32 %v4783_v54  ;;  %v15830_v54 = vld [vmem:[#allocation130_spill] sm:$0xff] }
 0xc07   : > { %v4886_v23 = vsel %vm4885_vm14, %v4881_v46, inf  ;;  %v15827_v46 = vld [vmem:[#allocation118_spill] sm:$0xff] }
 0xc08   : > { %4887 = vmin.xlane.f32.xlu0 %v4886_v23  ;;  %v4801_v23 = vcvt.s32.f32 %v4799_v51 }
 0xc0c   : > { %v12676_v49 = vpop.xlane.xlu1 %4899 }
 0xc0d   : > { %vm4901_vm2 = vcmp.eq.f32.partialorder %v12150_v4, %v12676_v49 }
 0xc0e   : > { %v4902_v27 = vsel %vm4901_vm2, %v4897_v11, inf  ;;  %v4911_v11 = vand.u32 65535, %v15829_v34  ;;  %v15834_v34 = vld [vmem:[#allocation177_spill] sm:$0xff] }
 0xc0f   : > { %4903 = vmin.xlane.f32.xlu1 %v4902_v27  ;;  %v4831_v42 = vand.u32 65535, %v15834_v34  ;;  %v15838_v34 = vld [vmem:[#allocation204_spill] sm:$0xff] }
 0xc10   : > { %v12682_v63 = vpop.xlane.xlu0 %4787  ;;  %v4913_v19 = vcvt.s32.f32 %v4911_v11 }
 0xc11   : > { %vm4789_vm7 = vcmp.eq.f32.partialorder %v15827_v46, %v12682_v63 }
 0xc12   : > { %v4790_v28 = vsel %vm4789_vm7, %v4785_v1, inf  ;;  %v15831_v1 = vld [vmem:[#allocation147_spill] sm:$0xff] }
 0xc13   : > { %4791 = vmin.xlane.f32.xlu0 %v4790_v28  ;;  %v4927_v46 = vand.u32 65535, %v15831_v1  ;;  %v4833_v1 = vcvt.s32.f32 %v4831_v42 }
 0xc14   : > { %v12686_v14 = vpop.xlane.xlu1 %4803 }
 0xc15   : > { %vm4805_vm1 = vcmp.eq.f32.partialorder %v15828_v21, %v12686_v14  ;;  %v4929_v51 = vcvt.s32.f32 %v4927_v46  ;;  %v15836_v46 = vld [vmem:[#allocation203_spill] sm:$0xff] }
 0xc16   : > { %v4806_v4 = vsel %vm4805_vm1, %v4801_v23, inf  ;;  %v15833_v23 = vld [vmem:[#allocation56_spill] sm:$0xff]  ;;  %v4943_v55 = vand.u32 65535, %v15836_v46  ;;  %v15841_v46 = vld [vmem:[#allocation49_spill] sm:$0xff] }
 0xc17   : > { %4807 = vmin.xlane.f32.xlu1 %v4806_v4  ;;  %v4815_v21 = vand.u32 65535, %v15833_v23 }
 0xc19   : > { %v4817_v5 = vcvt.s32.f32 %v4815_v21  ;;  %v4959_v21 = vand.u32 65535, %v15838_v34 }
 0xc1a   : > { %v12691_v27 = vpop.xlane.xlu0 %4915 }
 0xc1b   : > { %vm4917_vm8 = vcmp.eq.f32.partialorder %v15830_v54, %v12691_v27 }
 0xc1c   : > { %v4918_v35 = vsel %vm4917_vm8, %v4913_v19, inf  ;;  %v15835_v19 = vld [vmem:[#allocation69_spill] sm:$0xff] }
 0xc1d   : > { %4919 = vmin.xlane.f32.xlu0 %v4918_v35 }
 0xc2c   : > { %v12696_v28 = vpop.xlane.xlu1 %4931 }
 0xc2d   : > { %vm4933_vm3 = vcmp.eq.f32.partialorder %v15832_v43, %v12696_v28  ;;  %v15837_v43 = vld [vmem:[#allocation157_spill] sm:$0xff] }
 0xc2e   : > { %v4934_v4 = vsel %vm4933_vm3, %v4929_v51, inf }
 0xc2f   : > { %4935 = vmin.xlane.f32.xlu1 %v4934_v4  ;;  %v4945_v4 = vcvt.s32.f32 %v4943_v55 }
 0xc30   : > { %v12702_v11 = vpop.xlane.xlu0 %4819 }
 0xc31   : > { %vm4821_vm5 = vcmp.eq.f32.partialorder %v15835_v19, %v12702_v11  ;;  %v15840_v19 = vld [vmem:[#allocation50_spill] sm:$0xff] }
 0xc32   : > { %v4822_v35 = vsel %vm4821_vm5, %v4817_v5, inf  ;;  %v4847_v42 = vand.u32 65535, %v15840_v19 }
 0xc33   : > { %v12706_v54 = vpop.xlane.xlu1 %4835  ;;  %4823 = vmin.xlane.f32.xlu0 %v4822_v35  ;;  %v4961_v35 = vcvt.s32.f32 %v4959_v21 }
 0xc34   : > { %vm4837_vm4 = vcmp.eq.f32.partialorder %v15837_v43, %v12706_v54  ;;  %v4849_v55 = vcvt.s32.f32 %v4847_v42  ;;  %v4991_v42 = vand.u32 65535, %v12506_v16 }
 0xc35   : > { %v4838_v51 = vsel %vm4837_vm4, %v4833_v1, inf }
 0xc36   : > { %4839 = vmin.xlane.f32.xlu1 %v4838_v51  ;;  %v15842_v51 = vld [vmem:[#allocation208_spill] sm:$0xff] }
 0xc37   : > { %v12711_v23 = vpop.xlane.xlu0 %4947  ;;  %v4975_v34 = vand.u32 65535, %v15842_v51 }
 0xc38   : > { %vm4949_vm15 = vcmp.eq.f32.partialorder %v15839_v44, %v12711_v23  ;;  %v4863_v44 = vand.u32 65535, %v12497_v29 }
 0xc39   : > { %v4950_v5 = vsel %vm4949_vm15, %v4945_v4, inf  ;;  %v4977_v21 = vcvt.s32.f32 %v4975_v34 }
 0xc3a   : > { %4951 = vmin.xlane.f32.xlu0 %v4950_v5 }
 0xc3b   : > { %v12717_v60 = vpop.xlane.xlu1 %4963 }
 0xc3c   : > { %vm4965_vm11 = vcmp.eq.f32.partialorder %v15841_v46, %v12717_v60 }
 0xc3d   : > { %v4966_v1 = vsel %vm4965_vm11, %v4961_v35, inf  ;;  %v12721_v43 = vpop.xlane.xlu0 %4851  ;;  %v4865_v35 = vcvt.s32.f32 %v4863_v44  ;;  %v15847_v44 = vld [vmem:[#allocation123_spill] sm:$0xff] }
 0xc3e   : > { %4967 = vmin.xlane.f32.xlu1 %v4966_v1  ;;  %vm4853_vm13 = vcmp.eq.f32.partialorder %v15843_v47, %v12721_v43 }
 0xc3f   : > { %v4854_v4 = vsel %vm4853_vm13, %v4849_v55, inf  ;;  %v4993_v55 = vcvt.s32.f32 %v4991_v42  ;;  %v15850_v42 = vld [vmem:[#allocation174_spill] sm:$0xff] }
 0xc40   : > { %4855 = vmin.xlane.f32.xlu0 %v4854_v4 }
 0xc42   : > { %v12727_v5 = vpop.xlane.xlu0 %4979  ;;  %v12729_v19 = vpop.xlane.xlu1 %4867 }
 0xc43   : > { %vm4981_vm9 = vcmp.eq.f32.partialorder %v12516_v41, %v12727_v5  ;;  %vm4869_vm0 = vcmp.eq.f32.partialorder %v12519_v33, %v12729_v19  ;;  %v15845_v41 = vld [vmem:[#allocation82_spill] sm:$0xff]  ;;  %v15846_v33 = vld [vmem:[#allocation57_spill] sm:$0xff] }
 0xc44   : > { %v4982_v46 = vsel %vm4981_vm9, %v4977_v21, inf  ;;  %v4870_v47 = vsel %vm4869_vm0, %v4865_v35, inf  ;;  %v15849_v35 = vld [vmem:[#allocation190_spill] sm:$0xff] }
 0xc45   : > { %4983 = vmin.xlane.f32.xlu0 %v4982_v46  ;;  %4871 = vmin.xlane.f32.xlu1 %v4870_v47  ;;  %v15853_v47 = vld [vmem:[#allocation71_spill] sm:$0xff] }
 0xc46   : > { %v12736_v29 = vpop.xlane.xlu0 %3783  ;;  %v12738_v1 = vpop.xlane.xlu1 %4995 }
 0xc47   : > { %15844 = vst [vmem:[#allocation67_spill] sm:$0xff] %v12738_v1  ;;  %vm4997_vm10 = vcmp.eq.f32.partialorder %v12529_v58, %v12738_v1  ;;  %v15868_v1 = vld [vmem:[#allocation104_spill] sm:$0xff] }
 0xc48   : > { %v4998_v51 = vsel %vm4997_vm10, %v4993_v55, inf  ;;  %v15854_v55 = vld [vmem:[#allocation11_spill] sm:$0xff] }
 0xc49   : > { %4228 = vadd.xlane.f32.xlu0 %v15845_v41  ;;  %4999 = vmin.xlane.f32.xlu1 %v4998_v51  ;;  %vm15855_vm6 = vcmp.eq.s32.totalorder %v15854_v55, 0  ;;  %v15856_v41 = vld [vmem:[#allocation199_spill] sm:$0xff]  ;;  %vm15858_vm12 = vcmp.eq.s32.totalorder %v15854_v55, 1  ;;  %vm15862_vm14 = vcmp.eq.s32.totalorder %v15854_v55, 2  ;;  %vm15867_vm7 = vcmp.eq.s32.totalorder %v15854_v55, 3 }
 0xc4a   : > { %v12743_v16 = vpop.xlane.xlu0 %3789  ;;  %v12745_v34 = vpop.xlane.xlu1 %3786  ;;  %v1283_v51 = vsel %vm15855_vm6, %v15853_v47, 0.0  ;;  %vm15865_vm2 = vmmov %vm15855_vm6  ;;  %vm15870_vm8 = vcmp.eq.s32.totalorder %v15854_v55, 4  ;;  %vm15876_vm4 = vcmp.eq.s32.totalorder %v15854_v55, 5  ;;  %vm15882_vm13 = vcmp.eq.s32.totalorder %v15854_v55, 6 }
 0xc4b   : > { %vm15869_vm1 = vmmov %vm15858_vm12 }
 0xc4c   : > { %vm15873_vm3 = vmmov %vm15865_vm2 }
 0xc4d   : > { %4234 = vadd.xlane.f32.xlu0 %v15846_v33  ;;  %4231 = vadd.xlane.f32.xlu1 %v15847_v44  ;;  %v15857_v33 = vld [vmem:[#allocation182_spill] sm:$0xff]  ;;  %vm15875_vm5 = vmmov %vm15862_vm14 }
 0xc4e   : > { %v12749_v4 = vpop.xlane.xlu0 %3795  ;;  %v12751_v21 = vpop.xlane.xlu1 %3792  ;;  %v1716_v44 = vsel %vm15858_vm12, %v15857_v33, %v1283_v51  ;;  %v15871_v33 = vld [vmem:[#allocation183_spill] sm:$0xff]  ;;  %vm15879_vm15 = vmmov %vm15869_vm1 }
 0xc4f   : > { %15848 = vst [vmem:[#allocation196_spill] sm:$0xff] %v12749_v4  ;;  %v15859_v4 = vld [vmem:[#allocation134_spill] sm:$0xff]  ;;  %vm15881_vm11 = vmmov %vm15867_vm7 }
 0xc50   : > { %vm15885_vm9 = vmmov %vm15865_vm2 }
 0xc51   : > { %4240 = vadd.xlane.f32.xlu0 %v15849_v35  ;;  %4237 = vadd.xlane.f32.xlu1 %v15850_v42  ;;  %v15861_v35 = vld [vmem:[#allocation42_spill] sm:$0xff]  ;;  %vm15887_vm0 = vmmov %vm15875_vm5 }
 0xc52   : > { %v12755_v58 = vpop.xlane.xlu0 %3801  ;;  %v12757_v46 = vpop.xlane.xlu1 %3798  ;;  %v2149_v42 = vsel %vm15862_vm14, %v15861_v35, %v1716_v44  ;;  %v15872_v44 = vld [vmem:[#allocation80_spill] sm:$0xff]  ;;  %vm15889_vm10 = vmmov %vm15870_vm8 }
 0xc53   : > { %15851 = vst [vmem:[#allocation108_spill] sm:$0xff] %v12755_v58  ;;  %15852 = vst [vmem:[#allocation197_spill] sm:$0xff] %v12757_v46  ;;  %v15864_v46 = vld [vmem:[#allocation81_spill] sm:$0xff]  ;;  %v1284_v35 = vsel %vm15873_vm3, %v15872_v44, 0.0 }
 0xc54   : > { %v1269_v47 = vsel %vm15865_vm2, %v15864_v46, 0.0  ;;  %vm15891_vm6 = vmmov %vm15865_vm2 }
 0xc55   : > { %4246 = vadd.xlane.f32.xlu0 %v15856_v41  ;;  %4243 = vadd.xlane.f32.xlu1 %v15859_v4  ;;  %v2582_v41 = vsel %vm15867_vm7, %v15866_v10, %v2149_v42  ;;  %v1702_v4 = vsel %vm15869_vm1, %v15868_v1, %v1269_v47  ;;  %v15877_v42 = vld [vmem:[#allocation133_spill] sm:$0xff]  ;;  %vm15893_vm12 = vmmov %vm15869_vm1 }
 0xc56   : > { %v12767_v13 = vpop.xlane.xlu0 %3807  ;;  %v12772_v58 = vpop.xlane.xlu1 %3804  ;;  %v3015_v51 = vsel %vm15870_vm8, %v12543_v61, %v2582_v41  ;;  %v15878_v47 = vld [vmem:[#allocation105_spill] sm:$0xff]  ;;  %v15880_v41 = vld [vmem:[#allocation167_spill] sm:$0xff]  ;;  %vm15895_vm14 = vmmov %vm15867_vm7 }
 0xc57   : > { %15860 = vst [vmem:[#allocation198_spill] sm:$0xff] %v12767_v13  ;;  %15863 = vst [vmem:[#allocation112_spill] sm:$0xff] %v12772_v58  ;;  %v15874_v58 = vld [vmem:[#allocation191_spill] sm:$0xff]  ;;  %v3448_v10 = vsel %vm15876_vm4, %v12648_v39, %v3015_v51  ;;  %v1717_v61 = vsel %vm15879_vm15, %v15878_v47, %v1284_v35  ;;  %v15890_v47 = vld [vmem:[#allocation85_spill] sm:$0xff] }
 0xc58   : > { %v2135_v46 = vsel %vm15875_vm5, %v15874_v58, %v1702_v4  ;;  %v15884_v4 = vld [vmem:[#allocation87_spill] sm:$0xff]  ;;  %vm15896_vm2 = vmmov %vm15876_vm4 }
 0xc59   : > { %4637 = vadd.xlane.f32.xlu0 %v15871_v33  ;;  %4249 = vadd.xlane.f32.xlu1 %v15877_v42  ;;  %v2568_v33 = vsel %vm15881_vm11, %v15880_v41, %v2135_v46  ;;  %v1271_v39 = vsel %vm15885_vm9, %v15884_v4, 0.0  ;;  %v15886_v51 = vld [vmem:[#allocation39_spill] sm:$0xff]  ;;  %v1270_v46 = vsel %vm15891_vm6, %v15890_v47, 0.0  ;;  %v15892_v41 = vld [vmem:[#allocation78_spill] sm:$0xff]  ;;  %vm15899_vm7 = vmmov %vm15869_vm1 }
 0xc5a   : > { %v3814_v1 = vpop.xlane.xlu0 %3813  ;;  %v12803_v44 = vpop.xlane.xlu1 %3810  ;;  %v2150_v42 = vsel %vm15887_vm0, %v15886_v51, %v1717_v61  ;;  %v15888_v13 = vld [vmem:[#allocation115_spill] sm:$0xff]  ;;  %v15897_v51 = vld [vmem:[#allocation117_spill] sm:$0xff]  ;;  %vm15901_vm1 = vmmov %vm15887_vm0 }
 0xc5b   : > { %v12807_v58 = vsel %vm15882_vm13, %v3814_v1, %v3448_v10  ;;  %v3001_v35 = vsel %vm15889_vm10, %v15888_v13, %v2568_v33  ;;  %v1704_v10 = vsel %vm15893_vm12, %v15892_v41, %v1271_v39  ;;  %v15894_v1 = vld [vmem:[#allocation59_spill] sm:$0xff]  ;;  %v15900_v33 = vld [vmem:[#allocation138_spill] sm:$0xff]  ;;  %vm15902_vm3 = vmmov %vm15882_vm13 }
 0xc5c   : > { %15883 = vst [vmem:[#allocation77_spill] sm:$0xff] %v12807_v58  ;;  %v2583_v4 = vsel %vm15895_vm14, %v15894_v1, %v2150_v42  ;;  %v3434_v61 = vsel %vm15896_vm2, %v12602_v12, %v3001_v35  ;;  %v15898_v58 = vld [vmem:[#allocation111_spill] sm:$0xff]  ;;  %v2137_v47 = vsel %vm15901_vm1, %v15900_v33, %v1704_v10  ;;  %v15903_v41 = vld [vmem:[#allocation65_spill] sm:$0xff]  ;;  %vm15905_vm5 = vmmov %vm15887_vm0 }
 0xc5d   : > { %4643 = vadd.xlane.f32.xlu0 %v15897_v51  ;;  %v1703_v13 = vsel %vm15899_vm7, %v15898_v58, %v1270_v46  ;;  %v3016_v39 = vsel %vm15870_vm8, %v12597_v22, %v2583_v4  ;;  %v3867_v42 = vsel %vm15902_vm3, %v12652_v2, %v3434_v61  ;;  %4640 = vadd.xlane.f32.xlu1 %v15903_v41  ;;  %v15904_v35 = vld [vmem:[#allocation107_spill] sm:$0xff]  ;;  %v15906_v58 = vld [vmem:[#allocation114_spill] sm:$0xff]  ;;  %vm15907_vm4 = vmmov %vm15881_vm11  ;;  %vm15909_vm11 = vcmp.eq.s32.totalorder %v15854_v55, 7 }
 0xc5e   : > { %v4205_v12 = vpop.xlane.xlu0 %4204  ;;  %v2136_v1 = vsel %vm15905_vm5, %v15904_v35, %v1703_v13  ;;  %v2570_v46 = vsel %vm15907_vm4, %v15906_v58, %v2137_v47  ;;  %vm15908_vm15 = vmmov %vm15896_vm2  ;;  %v3817_v22 = vpop.xlane.xlu1 %3816  ;;  %v15910_v2 = vld [vmem:[#allocation89_spill] sm:$0xff]  ;;  %v15920_v35 = vld [vmem:[#allocation140_spill] sm:$0xff] }
 0xc5f   : > { %v3449_v10 = vsel %vm15908_vm15, %v12650_v24, %v3016_v39  ;;  %v12855_v4 = vsel %vm15909_vm11, %v4205_v12, %v3867_v42  ;;  %vm15911_vm13 = vmmov %vm15891_vm6  ;;  %v15912_v51 = vld [vmem:[#allocation37_spill] sm:$0xff]  ;;  %v15917_v39 = vld [vmem:[#allocation88_spill] sm:$0xff] }
 0xc60   : > { %v1273_v61 = vsel %vm15911_vm13, %v15910_v2, 0.0  ;;  %vm15913_vm9 = vmmov %vm15907_vm4  ;;  %v15914_v33 = vld [vmem:[#allocation93_spill] sm:$0xff]  ;;  %v1272_v42 = vsel %vm15891_vm6, %v15917_v39, 0.0 }
 0xc61   : > { %v2569_v13 = vsel %vm15913_vm9, %v15912_v51, %v2136_v1  ;;  %vm15915_vm0 = vmmov %vm15870_vm8  ;;  %v15918_v41 = vld [vmem:[#allocation153_spill] sm:$0xff]  ;;  %4649 = vadd.xlane.f32.xlu0 %v12526_v48  ;;  %v15926_v48 = vld [vmem:[#allocation192_spill] sm:$0xff] }
 0xc62   : > { %v3003_v47 = vsel %vm15915_vm0, %v15914_v33, %v2570_v46  ;;  %vm15916_vm10 = vmmov %vm15902_vm3  ;;  %v15922_v46 = vld [vmem:[#allocation154_spill] sm:$0xff] }
 0xc63   : > { %v12868_v24 = vsel %vm15916_vm10, %v3817_v22, %v3449_v10  ;;  %vm15919_vm12 = vmmov %vm15899_vm7  ;;  %v3436_v58 = vsel %vm15896_vm2, %v12609_v6, %v3003_v47  ;;  %v1705_v10 = vsel %vm15899_vm7, %v15922_v46, %v1272_v42  ;;  %v15923_v22 = vld [vmem:[#allocation137_spill] sm:$0xff]  ;;  %v4211_v6 = vpop.xlane.xlu0 %4210  ;;  %v15928_v47 = vld [vmem:[#allocation152_spill] sm:$0xff] }
 0xc64   : > { %v1706_v12 = vsel %vm15919_vm12, %v15918_v41, %v1273_v61  ;;  %vm15921_vm14 = vmmov %vm15915_vm0  ;;  %v3869_v51 = vsel %vm15902_vm3, %v12656_v50, %v3436_v58  ;;  %v15930_v50 = vld [vmem:[#allocation97_spill] sm:$0xff]  ;;  %v15934_v58 = vld [vmem:[#allocation103_spill] sm:$0xff] }
 0xc65   : > { %v3002_v1 = vsel %vm15921_vm14, %v15920_v35, %v2569_v13  ;;  %v2139_v2 = vsel %vm15901_vm1, %v15923_v22, %v1706_v12  ;;  %vm15924_vm8 = vmmov %vm15896_vm2  ;;  %v15925_v13 = vld [vmem:[#allocation122_spill] sm:$0xff]  ;;  %v12907_v41 = vsel %vm15909_vm11, %v4211_v6, %v3869_v51  ;;  %v15932_v35 = vld [vmem:[#allocation60_spill] sm:$0xff]  ;;  %4655 = vadd.xlane.f32.xlu0 %v12560_v32 }
 0xc66   : > { %v3435_v61 = vsel %vm15924_vm8, %v12607_v53, %v3002_v1  ;;  %4646 = vadd.xlane.f32.xlu1 %v15925_v13  ;;  %vm15927_vm5 = vmmov %vm15901_vm1  ;;  %v2572_v39 = vsel %vm15907_vm4, %v15928_v47, %v2139_v2  ;;  %v4208_v53 = vpop.xlane.xlu1 %4207  ;;  %v15937_v2 = vld [vmem:[#allocation160_spill] sm:$0xff]  ;;  %v15939_v51 = vld [vmem:[#allocation142_spill] sm:$0xff] }
 0xc67   : > { %v2138_v33 = vsel %vm15927_vm5, %v15926_v48, %v1705_v10  ;;  %vm15929_vm15 = vmmov %vm15902_vm3  ;;  %v3005_v46 = vsel %vm15915_vm0, %v15934_v58, %v2572_v39  ;;  %v15936_v10 = vld [vmem:[#allocation94_spill] sm:$0xff]  ;;  %v15941_v48 = vld [vmem:[#allocation159_spill] sm:$0xff] }
 0xc68   : > { %v3868_v42 = vsel %vm15929_vm15, %v12654_v57, %v3435_v61  ;;  %vm15931_vm13 = vmmov %vm15891_vm6  ;;  %v1274_v22 = vsel %vm15891_vm6, %v15936_v10, 0.0  ;;  %v3438_v6 = vsel %vm15896_vm2, %v12616_v36, %v3005_v46  ;;  %v15942_v47 = vld [vmem:[#allocation28_spill] sm:$0xff]  ;;  %v4217_v36 = vpop.xlane.xlu0 %4216 }
 0xc69   : > { %v1275_v12 = vsel %vm15931_vm13, %v15930_v50, 0.0  ;;  %vm15933_vm9 = vmmov %vm15907_vm4  ;;  %v15944_v32 = vld [vmem:[#allocation200_spill] sm:$0xff] }
 0xc6a   : > { %v2571_v1 = vsel %vm15933_vm9, %v15932_v35, %v2138_v33  ;;  %vm15935_vm10 = vmmov %vm15909_vm11  ;;  %v1707_v33 = vsel %vm15899_vm7, %v15941_v48, %v1274_v22  ;;  %4652 = vadd.xlane.f32.xlu1 %v12537_v37  ;;  %v15951_v46 = vld [vmem:[#allocation168_spill] sm:$0xff]  ;;  %v15960_v48 = vld [vmem:[#allocation166_spill] sm:$0xff] }
 0xc6b   : > { %v12920_v57 = vsel %vm15935_vm10, %v4208_v53, %v3868_v42  ;;  %vm15938_vm12 = vmmov %vm15899_vm7  ;;  %v3871_v53 = vsel %vm15902_vm3, %v12736_v29, %v3438_v6  ;;  %v15949_v29 = vld [vmem:[#allocation156_spill] sm:$0xff]  ;;  %v15959_v6 = vld [vmem:[#allocation186_spill] sm:$0xff] }
 0xc6c   : > { %v1708_v61 = vsel %vm15938_vm12, %v15937_v2, %v1275_v12  ;;  %vm15940_vm14 = vmmov %vm15915_vm0  ;;  %v15946_v12 = vld [vmem:[#allocation202_spill] sm:$0xff]  ;;  %4661 = vadd.xlane.f32.xlu0 %v15959_v6  ;;  %v15979_v6 = vld [vmem:[#allocation91_spill] sm:$0xff] }
 0xc6d   : > { %v3004_v13 = vsel %vm15940_vm14, %v15939_v51, %v2571_v1  ;;  %v2141_v39 = vsel %vm15901_vm1, %v15942_v47, %v1708_v61  ;;  %vm15943_vm8 = vmmov %vm15896_vm2  ;;  %v15954_v2 = vld [vmem:[#allocation98_spill] sm:$0xff]  ;;  %v15956_v61 = vld [vmem:[#allocation51_spill] sm:$0xff] }
 0xc6e   : > { %v3437_v42 = vsel %vm15943_vm8, %v12613_v15, %v3004_v13  ;;  %vm15945_vm5 = vmmov %vm15901_vm1  ;;  %v2574_v35 = vsel %vm15907_vm4, %v15946_v12, %v2141_v39  ;;  %v4214_v15 = vpop.xlane.xlu1 %4213  ;;  %4658 = vadd.xlane.f32.xlu1 %v12562_v26  ;;  %v15969_v12 = vld [vmem:[#allocation143_spill] sm:$0xff] }
 0xc6f   : > { %v2140_v50 = vsel %vm15945_vm5, %v15944_v32, %v1707_v33  ;;  %vm15947_vm15 = vmmov %vm15902_vm3 }
 0xc70   : > { %v3870_v1 = vsel %vm15947_vm15, %v12661_v20, %v3437_v42  ;;  %vm15948_vm11 = vmmov %vm15935_vm10  ;;  %v4223_v42 = vpop.xlane.xlu0 %4222 }
 0xc71   : > { %v12959_v58 = vsel %vm15948_vm11, %v4217_v36, %v3871_v53  ;;  %vm15950_vm13 = vmmov %vm15907_vm4  ;;  %v15963_v53 = vld [vmem:[#allocation26_spill] sm:$0xff] }
 0xc72   : > { %v2573_v37 = vsel %vm15950_vm13, %v15949_v29, %v2140_v50  ;;  %vm15952_vm9 = vmmov %vm15915_vm0  ;;  %v4220_v32 = vpop.xlane.xlu1 %4219  ;;  %v15966_v50 = vld [vmem:[#allocation201_spill] sm:$0xff] }
 0xc73   : > { %v3007_v10 = vsel %vm15952_vm9, %v15951_v46, %v2574_v35  ;;  %vm15953_vm0 = vmmov %vm15935_vm10 }
 0xc74   : > { %v12969_v22 = vsel %vm15953_vm0, %v4214_v15, %v3870_v1  ;;  %vm15955_vm10 = vmmov %vm15891_vm6  ;;  %v15971_v1 = vld [vmem:[#allocation129_spill] sm:$0xff]  ;;  %v15973_v15 = vld [vmem:[#allocation178_spill] sm:$0xff] }
 0xc75   : > { %v1276_v20 = vsel %vm15955_vm10, %v15954_v2, 0.0  ;;  %vm15957_vm6 = vmmov %vm15952_vm9  ;;  %4667 = vadd.xlane.f32.xlu0 %v15971_v1  ;;  %4664 = vadd.xlane.f32.xlu1 %v15973_v15  ;;  %vm5344_vm10 = vcmask 80896   ;;  %v15984_v15 = vld [vmem:[#allocation185_spill] sm:$0xff] }
 0xc76   : > { %v3006_v51 = vsel %vm15957_vm6, %v15956_v61, %v2573_v37  ;;  %vm15958_vm12 = vmmov %vm15896_vm2  ;;  %v4226_v37 = vpop.xlane.xlu1 %4225  ;;  %v15977_v61 = vld [vmem:[#allocation155_spill] sm:$0xff] }
 0xc77   : > { %v3440_v13 = vsel %vm15958_vm12, %v12623_v25, %v3007_v10  ;;  %vm15961_vm14 = vmmov %vm15899_vm7  ;;  %v3439_v47 = vsel %vm15896_vm2, %v12621_v7, %v3006_v51  ;;  %v15976_v10 = vld [vmem:[#allocation131_spill] sm:$0xff] }
 0xc78   : > { %v1709_v33 = vsel %vm15961_vm14, %v15960_v48, %v1276_v20  ;;  %vm15962_vm7 = vmmov %vm15902_vm3  ;;  %v15980_v48 = vld [vmem:[#allocation12_spill] sm:$0xff] }
 0xc79   : > { %v3873_v39 = vsel %vm15962_vm7, %v12743_v16, %v3440_v13  ;;  %v2142_v25 = vsel %vm15901_vm1, %v15963_v53, %v1709_v33  ;;  %vm15964_vm8 = vmmov %vm15902_vm3  ;;  %4673 = vadd.xlane.f32.xlu0 %v12573_v62  ;;  %4670 = vadd.xlane.f32.xlu1 %v15976_v10  ;;  %v4778_v62 = vcvt.f32.s32 %v12667_v0  ;;  %v15978_v13 = vld [vmem:[#allocation62_spill] sm:$0xff] }
 0xc7a   : > { %v3872_v36 = vsel %vm15964_vm8, %v12745_v34, %v3439_v47  ;;  %vm15965_vm3 = vmmov %vm15953_vm0  ;;  %v15986_v10 = vld [vmem:[#allocation18_spill] sm:$0xff] }
 0xc7b   : > { %v12999_v7 = vsel %vm15965_vm3, %v4223_v42, %v3873_v39  ;;  %vm15967_vm5 = vmmov %vm15907_vm4  ;;  %v15981_v42 = vld [vmem:[#allocation14_spill] sm:$0xff] }
 0xc7c   : > { %v2575_v16 = vsel %vm15967_vm5, %v15966_v50, %v2142_v25  ;;  %vm15968_vm4 = vmmov %vm15953_vm0 }
 0xc7d   : > { %v13006_v26 = vsel %vm15968_vm4, %v4220_v32, %v3872_v36  ;;  %vm15970_vm15 = vmmov %vm15957_vm6  ;;  %4679 = vadd.xlane.f32.xlu0 %v12592_v17  ;;  %4676 = vadd.xlane.f32.xlu1 %v12583_v52  ;;  %v4890_v52 = vcvt.f32.s32 %v12671_v9 }
 0xc7e   : > { %v3008_v35 = vsel %vm15970_vm15, %v15969_v12, %v2575_v16  ;;  %vm15972_vm11 = vmmov %vm15896_vm2  ;;  %v4906_v16 = vcvt.f32.s32 %v12676_v49  ;;  %v15982_v12 = vld [vmem:[#allocation34_spill] sm:$0xff] }
 0xc7f   : > { %v3441_v34 = vsel %vm15972_vm11, %v12627_v30, %v3008_v35  ;;  %vm15974_vm13 = vmmov %vm15962_vm7  ;;  %v4762_v30 = vcvt.f32.s32 %v12659_v18  ;;  %v4891_v47 = vshll.u32 %v4890_v52, 16  ;;  %v15989_v52 = vld [vmem:[#allocation172_spill] sm:$0xff] }
 0xc80   : > { %v3874_v29 = vsel %vm15974_vm13, %v12751_v21, %v3441_v34  ;;  %vm15975_vm9 = vmmov %vm15953_vm0  ;;  %vm5117_vm0 = vcmp.eq.s32.totalorder %v15854_v55, 9  ;;  %v15983_v34 = vld [vmem:[#allocation184_spill] sm:$0xff] }
 0xc81   : > { %v13021_v46 = vsel %vm15975_vm9, %v4226_v37, %v3874_v29  ;;  %4682 = vadd.xlane.f32.xlu1 %v12600_v31  ;;  %v4763_v2 = vshll.u32 %v4762_v30, 16  ;;  %v4779_v31 = vshll.u32 %v4778_v62, 16  ;;  %v15985_v37 = vld [vmem:[#allocation16_spill] sm:$0xff] }
 0xc89   : > { %v4760_v21 = vpop.xlane.xlu0 %4759 }
 0xc8a   : > { %v4761_v20 = vcvt.f32.s32 %v4760_v21  ;;  %v15987_v21 = vld [vmem:[#allocation141_spill] sm:$0xff] }
 0xc8c   : > { %v4764_v17 = vadd.s32 %v4763_v2, %v4761_v20  ;;  %v15988_v20 = vld [vmem:[#allocation164_spill] sm:$0xff] }
 0xc8e   : > { %v13040_v18 = vsel %vm5117_vm0, %v4764_v17, %v15977_v61  ;;  %vm5005_vm6 = vcmp.eq.s32.totalorder %v15978_v13, %v4764_v17  ;;  %vm5006_vm12 = vcmp.eq.s32.totalorder %v15979_v6, %v4764_v17  ;;  %v15990_v61 = vld [vmem:[#allocation13_spill] sm:$0xff]  ;;  %v15991_v13 = vld [vmem:[#allocation15_spill] sm:$0xff] }
 0xc8f   : > { %v4776_v51 = vpop.xlane.xlu1 %4775  ;;  %vm5150_vm14 = vcmp.lt.s32.totalorder %v13040_v18, 2147483647  ;;  %v5166_v0 = vand.u32 255, %v13040_v18  ;;  %v5037_v33 = vsel %vm5005_vm6, %v15980_v48, 0.0  ;;  %v5038_v53 = vsel %vm5006_vm12, %v15981_v42, 0.0 }
 0xc90   : > { %v4777_v9 = vcvt.f32.s32 %v4776_v51  ;;  %v5069_v50 = vadd.f32 %v5038_v53, %v5037_v33 }
 0xc91   : > { %v4888_v39 = vpop.xlane.xlu0 %4887  ;;  %v5182_v25 = vsel %vm5150_vm14, %v5166_v0, 4294967295  ;;  %v4794_v0 = vcvt.f32.s32 %v12682_v63 }
 0xc92   : > { %v4780_v36 = vadd.s32 %v4779_v31, %v4777_v9  ;;  %v4889_v32 = vcvt.f32.s32 %v4888_v39  ;;  %5345 = vst.msk [vmem:[%s13049_s11] sm:$0xff] %vm5344_vm10, %v5182_v25  ;;  %5070 = vadd.xlane.f32.xlu0 %v5069_v50  ;;  %v4810_v25 = vcvt.f32.s32 %v12686_v14  ;;  %v15993_v50 = vld [vmem:[#allocation187_spill] sm:$0xff] }
 0xc93   : > { %v4795_v53 = vshll.u32 %v4794_v0, 16  ;;  %v4922_v0 = vcvt.f32.s32 %v12691_v27 }
 0xc94   : > { %v13063_v35 = vsel %vm5117_vm0, %v4780_v36, %v15982_v12  ;;  %v4892_v1 = vadd.s32 %v4891_v47, %v4889_v32  ;;  %vm5007_vm2 = vcmp.eq.s32.totalorder %v15983_v34, %v4780_v36  ;;  %vm5008_vm7 = vcmp.eq.s32.totalorder %v15984_v15, %v4780_v36  ;;  %v15992_v36 = vld [vmem:[#allocation188_spill] sm:$0xff]  ;;  %v15994_v12 = vld [vmem:[#allocation189_spill] sm:$0xff] }
 0xc95   : > { %vm5151_vm1 = vcmp.lt.s32.totalorder %v13063_v35, 2147483647  ;;  %v5167_v29 = vand.u32 255, %v13063_v35  ;;  %v5039_v49 = vsel %vm5007_vm2, %v15985_v37, 0.0  ;;  %v5040_v30 = vsel %vm5008_vm7, %v15986_v10, 0.0  ;;  %v15995_v34 = vld [vmem:[#allocation17_spill] sm:$0xff] }
 0xc96   : > { %v13074_v2 = vsel %vm5117_vm0, %v4892_v1, %v15987_v21  ;;  %v5072_v62 = vadd.f32 %v5040_v30, %v5039_v49  ;;  %vm5021_vm8 = vcmp.eq.s32.totalorder %v15988_v20, %v4892_v1  ;;  %vm5022_vm3 = vcmp.eq.s32.totalorder %v15989_v52, %v4892_v1  ;;  %v15997_v20 = vld [vmem:[#allocation63_spill] sm:$0xff] }
 0xc97   : > { %v5183_v17 = vsel %vm5151_vm1, %v5167_v29, 4294967295  ;;  %vm5158_vm5 = vcmp.lt.s32.totalorder %v13074_v2, 2147483647  ;;  %v5174_v31 = vand.u32 255, %v13074_v2  ;;  %v5053_v51 = vsel %vm5021_vm8, %v15990_v61, 0.0  ;;  %v15996_v29 = vld [vmem:[#allocation19_spill] sm:$0xff] }
 0xc98   : > { %5346 = vst.msk [vmem:[%s13049_s11 + $0x8] sm:$0xff] %vm5344_vm10, %v5183_v17  ;;  %5073 = vadd.xlane.f32.xlu1 %v5072_v62  ;;  %v5054_v6 = vsel %vm5022_vm3, %v15991_v13, 0.0  ;;  %v4904_v48 = vpop.xlane.xlu1 %4903  ;;  %v4907_v47 = vshll.u32 %v4906_v16, 16  ;;  %v4811_v21 = vshll.u32 %v4810_v25, 16  ;;  %v15998_v17 = vld [vmem:[#allocation151_spill] sm:$0xff]  ;;  %v16000_v13 = vld [vmem:[#allocation21_spill] sm:$0xff] }
 0xc99   : > { %v5190_v9 = vsel %vm5158_vm5, %v5174_v31, 4294967295  ;;  %v5093_v33 = vadd.f32 %v5054_v6, %v5053_v51  ;;  %v4905_v39 = vcvt.f32.s32 %v4904_v48  ;;  %v15999_v31 = vld [vmem:[#allocation64_spill] sm:$0xff]  ;;  %v16004_v25 = vld [vmem:[#allocation79_spill] sm:$0xff] }
 0xc9a   : > { %5353 = vst.msk [vmem:[%s13049_s11 + $0x40] sm:$0xff] %vm5344_vm10, %v5190_v9  ;;  %v16001_v9 = vld [vmem:[#allocation24_spill] sm:$0xff] }
 0xc9b   : > { %5094 = vadd.xlane.f32.xlu0 %v5093_v33  ;;  %v4908_v42 = vadd.s32 %v4907_v47, %v4905_v39  ;;  %v16002_v47 = vld [vmem:[#allocation106_spill] sm:$0xff] }
 0xc9c   : > { %v4792_v63 = vpop.xlane.xlu0 %4791 }
 0xc9d   : > { %v13095_v32 = vsel %vm5117_vm0, %v4908_v42, %v15992_v36  ;;  %vm5023_vm4 = vcmp.eq.s32.totalorder %v15993_v50, %v4908_v42  ;;  %vm5024_vm15 = vcmp.eq.s32.totalorder %v15994_v12, %v4908_v42  ;;  %v4793_v1 = vcvt.f32.s32 %v4792_v63  ;;  %v16005_v36 = vld [vmem:[#allocation27_spill] sm:$0xff] }
 0xc9e   : > { %vm5159_vm11 = vcmp.lt.s32.totalorder %v13095_v32, 2147483647  ;;  %v5175_v16 = vand.u32 255, %v13095_v32  ;;  %v5055_v15 = vsel %vm5023_vm4, %v15995_v34, 0.0  ;;  %v5056_v37 = vsel %vm5024_vm15, %v15996_v29, 0.0  ;;  %v16006_v12 = vld [vmem:[#allocation31_spill] sm:$0xff] }
 0xc9f   : > { %v4796_v49 = vadd.s32 %v4795_v53, %v4793_v1  ;;  %v5096_v30 = vadd.f32 %v5056_v37, %v5055_v15  ;;  %v16003_v53 = vld [vmem:[#allocation181_spill] sm:$0xff]  ;;  %v4923_v1 = vshll.u32 %v4922_v0, 16  ;;  %vm16013_vm15 = vcmp.eq.s32.totalorder %v15854_v55, 0 }
 0xca0   : > { %v5191_v14 = vsel %vm5159_vm11, %v5175_v16, 4294967295  ;;  %v4808_v10 = vpop.xlane.xlu1 %4807 }
 0xca1   : > { %5354 = vst.msk [vmem:[%s13049_s11 + $0x48] sm:$0xff] %vm5344_vm10, %v5191_v14  ;;  %v4809_v62 = vcvt.f32.s32 %v4808_v10  ;;  %v13110_v52 = vsel %vm5117_vm0, %v4796_v49, %v15997_v20  ;;  %5097 = vadd.xlane.f32.xlu1 %v5096_v30  ;;  %vm5009_vm13 = vcmp.eq.s32.totalorder %v15998_v17, %v4796_v49  ;;  %vm5010_vm9 = vcmp.eq.s32.totalorder %v15999_v31, %v4796_v49  ;;  %v16007_v14 = vld [vmem:[#allocation121_spill] sm:$0xff]  ;;  %v16008_v10 = vld [vmem:[#allocation119_spill] sm:$0xff]  ;;  %v16009_v30 = vld [vmem:[#allocation120_spill] sm:$0xff] }
 0xca2   : > { %vm5152_vm6 = vcmp.lt.s32.totalorder %v13110_v52, 2147483647  ;;  %v5168_v61 = vand.u32 255, %v13110_v52  ;;  %v5041_v6 = vsel %vm5009_vm13, %v16000_v13, 0.0  ;;  %v5042_v48 = vsel %vm5010_vm9, %v16001_v9, 0.0  ;;  %v16011_v17 = vld [vmem:[#allocation22_spill] sm:$0xff]  ;;  %vm16015_vm13 = vmmov %vm16013_vm15 }
 0xca3   : > { %v4812_v51 = vadd.s32 %v4811_v21, %v4809_v62  ;;  %v5075_v42 = vadd.f32 %v5042_v48, %v5041_v6  ;;  %v16010_v62 = vld [vmem:[#allocation20_spill] sm:$0xff]  ;;  %v4938_v13 = vcvt.f32.s32 %v12696_v28  ;;  %v4826_v6 = vcvt.f32.s32 %v12702_v11  ;;  %v16012_v9 = vld [vmem:[#allocation109_spill] sm:$0xff]  ;;  %vm16017_vm9 = vmmov %vm16015_vm13 }
 0xca4   : > { %v5184_v33 = vsel %vm5152_vm6, %v5168_v61, 4294967295  ;;  %v1279_v48 = vsel %vm16013_vm15, %v16012_v9, 0.0  ;;  %v16020_v11 = vld [vmem:[#allocation46_spill] sm:$0xff] }
 0xca5   : > { %v13124_v39 = vsel %vm5117_vm0, %v4812_v51, %v16002_v47  ;;  %vm5011_vm12 = vcmp.eq.s32.totalorder %v16003_v53, %v4812_v51  ;;  %5347 = vst.msk [vmem:[%s13049_s11 + $0x10] sm:$0xff] %vm5344_vm10, %v5184_v33  ;;  %vm5012_vm7 = vcmp.eq.s32.totalorder %v16004_v25, %v4812_v51  ;;  %5076 = vadd.xlane.f32.xlu0 %v5075_v42  ;;  %v16014_v33 = vld [vmem:[#allocation110_spill] sm:$0xff]  ;;  %v4939_v42 = vshll.u32 %v4938_v13, 16  ;;  %v16035_v13 = vld [vmem:[#allocation132_spill] sm:$0xff] }
 0xca6   : > { %vm5153_vm2 = vcmp.lt.s32.totalorder %v13124_v39, 2147483647  ;;  %v5169_v27 = vand.u32 255, %v13124_v39  ;;  %v5043_v63 = vsel %vm5011_vm12, %v16005_v36, 0.0  ;;  %v4920_v50 = vpop.xlane.xlu0 %4919  ;;  %v5044_v16 = vsel %vm5012_vm7, %v16006_v12, 0.0  ;;  %v16018_v36 = vld [vmem:[#allocation96_spill] sm:$0xff]  ;;  %vm16019_vm12 = vmmov %vm16017_vm9 }
 0xca7   : > { %v4921_v15 = vcvt.f32.s32 %v4920_v50  ;;  %v5078_v29 = vadd.f32 %v5044_v16, %v5043_v63  ;;  %v1280_v47 = vsel %vm16015_vm13, %v16014_v33, 0.0  ;;  %v1282_v28 = vsel %vm16019_vm12, %v16018_v36, 0.0  ;;  %v16022_v50 = vld [vmem:[#allocation68_spill] sm:$0xff]  ;;  %v16024_v16 = vld [vmem:[#allocation54_spill] sm:$0xff]  ;;  %v16037_v33 = vld [vmem:[#allocation23_spill] sm:$0xff] }
 0xca8   : > { %v5185_v34 = vsel %vm5153_vm2, %v5169_v27, 4294967295  ;;  %v16016_v27 = vld [vmem:[#allocation95_spill] sm:$0xff]  ;;  %vm16021_vm7 = vcmp.eq.s32.totalorder %v15854_v55, 1  ;;  %vm16029_vm13 = vcmp.eq.s32.totalorder %v15854_v55, 2  ;;  %v16042_v36 = vld [vmem:[#allocation25_spill] sm:$0xff] }
 0xca9   : > { %5348 = vst.msk [vmem:[%s13049_s11 + $0x18] sm:$0xff] %vm5344_vm10, %v5185_v34  ;;  %v4924_v37 = vadd.s32 %v4923_v1, %v4921_v15  ;;  %5079 = vadd.xlane.f32.xlu1 %v5078_v29  ;;  %v1281_v25 = vsel %vm16017_vm9, %v16016_v27, 0.0  ;;  %v1712_v63 = vsel %vm16021_vm7, %v16020_v11, %v1279_v48  ;;  %v16026_v34 = vld [vmem:[#allocation100_spill] sm:$0xff]  ;;  %v4842_v29 = vcvt.f32.s32 %v12706_v54  ;;  %vm16031_vm9 = vmmov %vm16029_vm13 }
 0xcaa   : > { %vm16033_vm12 = vmmov %vm16031_vm9 }
 0xcab   : > { %v13141_v49 = vsel %vm5117_vm0, %v4924_v37, %v16007_v14  ;;  %vm5025_vm8 = vcmp.eq.s32.totalorder %v16008_v10, %v4924_v37  ;;  %vm5026_vm3 = vcmp.eq.s32.totalorder %v16009_v30, %v4924_v37  ;;  %v16028_v14 = vld [vmem:[#allocation126_spill] sm:$0xff]  ;;  %v4843_v27 = vshll.u32 %v4842_v29, 16 }
 0xcac   : > { %vm5160_vm4 = vcmp.lt.s32.totalorder %v13141_v49, 2147483647  ;;  %v5176_v21 = vand.u32 255, %v13141_v49  ;;  %v5057_v20 = vsel %vm5025_vm8, %v16010_v62, 0.0  ;;  %v5058_v31 = vsel %vm5026_vm3, %v16011_v17, 0.0  ;;  %vm16023_vm8 = vmmov %vm16021_vm7  ;;  %v16030_v30 = vld [vmem:[#allocation90_spill] sm:$0xff] }
 0xcad   : > { %v5099_v61 = vadd.f32 %v5058_v31, %v5057_v20  ;;  %v1713_v12 = vsel %vm16023_vm8, %v16022_v50, %v1280_v47  ;;  %vm16025_vm3 = vmmov %vm16021_vm7  ;;  %v2145_v10 = vsel %vm16029_vm13, %v16028_v14, %v1712_v63  ;;  %v16032_v62 = vld [vmem:[#allocation40_spill] sm:$0xff]  ;;  %v4827_v17 = vshll.u32 %v4826_v6, 16  ;;  %v16038_v47 = vld [vmem:[#allocation41_spill] sm:$0xff] }
 0xcae   : > { %v5192_v51 = vsel %vm5160_vm4, %v5176_v21, 4294967295  ;;  %v1714_v1 = vsel %vm16025_vm3, %v16024_v16, %v1281_v25  ;;  %vm16027_vm15 = vmmov %vm16025_vm3  ;;  %v2146_v21 = vsel %vm16031_vm9, %v16030_v30, %v1713_v12  ;;  %v4954_v31 = vcvt.f32.s32 %v12711_v23  ;;  %v16043_v16 = vld [vmem:[#allocation128_spill] sm:$0xff] }
 0xcaf   : > { %5355 = vst.msk [vmem:[%s13049_s11 + $0x50] sm:$0xff] %vm5344_vm10, %v5192_v51  ;;  %5100 = vadd.xlane.f32.xlu0 %v5099_v61  ;;  %v1715_v15 = vsel %vm16027_vm15, %v16026_v34, %v1282_v28  ;;  %v2147_v20 = vsel %vm16033_vm12, %v16032_v62, %v1714_v1  ;;  %v16034_v61 = vld [vmem:[#allocation125_spill] sm:$0xff]  ;;  %vm16039_vm15 = vmmov %vm16031_vm9  ;;  %vm16041_vm13 = vcmp.eq.s32.totalorder %v15854_v55, 3  ;;  %v16045_v34 = vld [vmem:[#allocation58_spill] sm:$0xff]  ;;  %v4970_v29 = vcvt.f32.s32 %v12717_v60 }
 0xcb0   : > { %v13203_v23 = vsel %vm16039_vm15, %v16038_v47, %v1715_v15  ;;  %vm16044_vm9 = vmmov %vm16041_vm13  ;;  %v16047_v14 = vld [vmem:[#allocation148_spill] sm:$0xff]  ;;  %v16048_v62 = vld [vmem:[#allocation43_spill] sm:$0xff] }
 0xcb1   : > { %v2578_v1 = vsel %vm16044_vm9, %v16043_v16, %v2145_v10  ;;  %vm16046_vm12 = vmmov %vm16044_vm9  ;;  %v16056_v16 = vld [vmem:[#allocation158_spill] sm:$0xff] }
 0xcb2   : > { %v2580_v15 = vsel %vm16046_vm12, %v16045_v34, %v2147_v20 }
 0xcb8   : > { %v4936_v0 = vpop.xlane.xlu1 %4935 }
 0xcb9   : > { %v4937_v53 = vcvt.f32.s32 %v4936_v0  ;;  %v16036_v0 = vld [vmem:[#allocation116_spill] sm:$0xff] }
 0xcbb   : > { %v4940_v37 = vadd.s32 %v4939_v42, %v4937_v53  ;;  %v16040_v42 = vld [vmem:[#allocation92_spill] sm:$0xff] }
 0xcbc   : > { %v4824_v51 = vpop.xlane.xlu0 %4823  ;;  %v2579_v53 = vsel %vm16041_vm13, %v16040_v42, %v2146_v21 }
 0xcbd   : > { %v13193_v54 = vsel %vm5117_vm0, %v4940_v37, %v16034_v61  ;;  %vm5027_vm7 = vcmp.eq.s32.totalorder %v16035_v13, %v4940_v37  ;;  %vm5028_vm8 = vcmp.eq.s32.totalorder %v16036_v0, %v4940_v37  ;;  %v4825_v48 = vcvt.f32.s32 %v4824_v51  ;;  %v16050_v61 = vld [vmem:[#allocation146_spill] sm:$0xff] }
 0xcbe   : > { %vm14379_vm3 = vcmp.lt.s32.totalorder %v13193_v54, 2147483647  ;;  %v5177_v9 = vand.u32 255, %v13193_v54  ;;  %v5059_v6 = vsel %vm5027_vm7, %v16037_v33, 0.0  ;;  %v5060_v28 = vsel %vm5028_vm8, %v16042_v36, 0.0 }
 0xcbf   : > { %v4840_v25 = vpop.xlane.xlu1 %4839  ;;  %v4828_v63 = vadd.s32 %v4827_v17, %v4825_v48  ;;  %v5102_v12 = vadd.f32 %v5060_v28, %v5059_v6  ;;  %v4955_v37 = vshll.u32 %v4954_v31, 16  ;;  %v16049_v17 = vld [vmem:[#allocation72_spill] sm:$0xff]  ;;  %v4858_v36 = vcvt.f32.s32 %v12721_v43 }
 0xcc0   : > { %v5193_v11 = vsel %vm14379_vm3, %v5177_v9, 4294967295  ;;  %v4841_v50 = vcvt.f32.s32 %v4840_v25  ;;  %v16051_v9 = vld [vmem:[#allocation179_spill] sm:$0xff]  ;;  %v4971_v25 = vshll.u32 %v4970_v29, 16  ;;  %v4986_v29 = vcvt.f32.s32 %v12727_v5 }
 0xcc1   : > { %5356 = vst.msk [vmem:[%s13049_s11 + $0x58] sm:$0xff] %vm5344_vm10, %v5193_v11  ;;  %v13223_v30 = vsel %vm5117_vm0, %v4828_v63, %v16047_v14  ;;  %5103 = vadd.xlane.f32.xlu1 %v5102_v12  ;;  %vm5013_vm7 = vcmp.eq.s32.totalorder %v16048_v62, %v4828_v63  ;;  %vm5014_vm8 = vcmp.eq.s32.totalorder %v16049_v17, %v4828_v63  ;;  %v16058_v17 = vld [vmem:[#allocation163_spill] sm:$0xff]  ;;  %vm16085_vm3 = vcmp.eq.s32.totalorder %v15854_v55, 5 }
 0xcc2   : > { %v4844_v21 = vadd.s32 %v4843_v27, %v4841_v50  ;;  %vm14377_vm15 = vcmp.lt.s32.totalorder %v13223_v30, 2147483647  ;;  %v5170_v10 = vand.u32 255, %v13223_v30  ;;  %v5045_v60 = vsel %vm5013_vm7, %v15156_v38, 0.0  ;;  %v16052_v38 = vld [vmem:[#allocation173_spill] sm:$0xff] }
 0xcc3   : > { %v4952_v20 = vpop.xlane.xlu0 %4951  ;;  %v5046_v31 = vsel %vm5014_vm8, %v15011_v40, 0.0  ;;  %v16053_v40 = vld [vmem:[#allocation171_spill] sm:$0xff]  ;;  %vm16054_vm7 = vcmp.eq.s32.totalorder %v15854_v55, 4 }
 0xcc4   : > { %v13234_v51 = vsel %vm5117_vm0, %v4844_v21, %v16050_v61  ;;  %v4953_v13 = vcvt.f32.s32 %v4952_v20  ;;  %v5081_v0 = vadd.f32 %v5046_v31, %v5045_v60  ;;  %vm5015_vm13 = vcmp.eq.s32.totalorder %v16051_v9, %v4844_v21  ;;  %v16059_v61 = vld [vmem:[#allocation211_spill] sm:$0xff] }
 0xcc5   : > { %v5186_v48 = vsel %vm14377_vm15, %v5170_v10, 4294967295  ;;  %vm14375_vm9 = vcmp.lt.s32.totalorder %v13234_v51, 2147483647  ;;  %v5171_v33 = vand.u32 255, %v13234_v51  ;;  %vm5016_vm12 = vcmp.eq.s32.totalorder %v16052_v38, %v4844_v21 }
 0xcc6   : > { %v13245_v6 = vsel %vm16054_vm7, %v16053_v40, %v2579_v53  ;;  %5349 = vst.msk [vmem:[%s13049_s11 + $0x20] sm:$0xff] %vm5344_vm10, %v5186_v48  ;;  %v4956_v47 = vadd.s32 %v4955_v37, %v4953_v13  ;;  %5082 = vadd.xlane.f32.xlu0 %v5081_v0  ;;  %v5047_v42 = vsel %vm5015_vm13, %v15007_v56, 0.0  ;;  %v5048_v27 = vsel %vm5016_vm12, %v15008_v45, 0.0  ;;  %v16055_v53 = vld [vmem:[#allocation76_spill] sm:$0xff]  ;;  %v16057_v56 = vld [vmem:[#allocation161_spill] sm:$0xff] }
 0xcc7   : > { %v5187_v28 = vsel %vm14375_vm9, %v5171_v33, 4294967295  ;;  %v4968_v11 = vpop.xlane.xlu1 %4967  ;;  %v5084_v63 = vadd.f32 %v5048_v27, %v5047_v42  ;;  %v4874_v37 = vcvt.f32.s32 %v12729_v19  ;;  %v3011_v10 = vsel %vm16054_vm7, %v16058_v17, %v2578_v1  ;;  %v16062_v19 = vld [vmem:[#allocation165_spill] sm:$0xff]  ;;  %v16064_v33 = vld [vmem:[#allocation67_spill] sm:$0xff] }
 0xcc8   : > { %5350 = vst.msk [vmem:[%s13049_s11 + $0x28] sm:$0xff] %vm5344_vm10, %v5187_v28  ;;  %v13259_v50 = vsel %vm5117_vm0, %v4956_v47, %v16055_v53  ;;  %v4969_v12 = vcvt.f32.s32 %v4968_v11  ;;  %vm5029_vm8 = vcmp.eq.s32.totalorder %v16056_v16, %v4956_v47  ;;  %vm5030_vm13 = vcmp.eq.s32.totalorder %v16057_v56, %v4956_v47  ;;  %v16063_v1 = vld [vmem:[#allocation145_spill] sm:$0xff]  ;;  %v16065_v47 = vld [vmem:[#allocation32_spill] sm:$0xff] }
 0xcc9   : > { %vm14373_vm12 = vcmp.lt.s32.totalorder %v13259_v50, 2147483647  ;;  %v5178_v45 = vand.u32 255, %v13259_v50  ;;  %5085 = vadd.xlane.f32.xlu1 %v5084_v63  ;;  %v5061_v43 = vsel %vm5029_vm8, %v14877_v8, 0.0  ;;  %v5062_v34 = vsel %vm5030_vm13, %v14879_v3, 0.0  ;;  %v4856_v21 = vpop.xlane.xlu0 %4855  ;;  %vm16060_vm8 = vmmov %vm16054_vm7  ;;  %v16061_v3 = vld [vmem:[#allocation84_spill] sm:$0xff] }
 0xcca   : > { %v4972_v14 = vadd.s32 %v4971_v25, %v4969_v12  ;;  %v5105_v62 = vadd.f32 %v5062_v34, %v5061_v43  ;;  %v4859_v20 = vshll.u32 %v4858_v36, 16  ;;  %v4857_v31 = vcvt.f32.s32 %v4856_v21  ;;  %v16066_v25 = vld [vmem:[#allocation38_spill] sm:$0xff]  ;;  %v16068_v16 = vld [vmem:[#allocation73_spill] sm:$0xff]  ;;  %v16071_v34 = vld [vmem:[#allocation44_spill] sm:$0xff] }
 0xccb   : > { %v5194_v60 = vsel %vm14373_vm12, %v5178_v45, 4294967295  ;;  %v3013_v8 = vsel %vm16060_vm8, %v16059_v61, %v2580_v15  ;;  %v4875_v9 = vshll.u32 %v4874_v37, 16  ;;  %v4987_v48 = vshll.u32 %v4986_v29, 16  ;;  %v16067_v12 = vld [vmem:[#allocation66_spill] sm:$0xff]  ;;  %v16070_v43 = vld [vmem:[#allocation205_spill] sm:$0xff] }
 0xccc   : > { %5357 = vst.msk [vmem:[%s13049_s11 + $0x60] sm:$0xff] %vm5344_vm10, %v5194_v60  ;;  %v13282_v5 = vsel %vm5117_vm0, %v4972_v14, %v16061_v3  ;;  %5106 = vadd.xlane.f32.xlu0 %v5105_v62  ;;  %vm5031_vm13 = vcmp.eq.s32.totalorder %v16062_v19, %v4972_v14  ;;  %vm5032_vm7 = vcmp.eq.s32.totalorder %v16063_v1, %v4972_v14  ;;  %v5002_v38 = vcvt.f32.s32 %v16064_v33  ;;  %v16072_v17 = vld [vmem:[#allocation45_spill] sm:$0xff]  ;;  %v16073_v60 = vld [vmem:[#allocation108_spill] sm:$0xff]  ;;  %v16076_v1 = vld [vmem:[#allocation99_spill] sm:$0xff] }
 0xccd   : > { %vm14374_vm12 = vcmp.lt.s32.totalorder %v13282_v5, 2147483647  ;;  %v5179_v13 = vand.u32 255, %v13282_v5  ;;  %v4860_v0 = vadd.s32 %v4859_v20, %v4857_v31  ;;  %v5063_v15 = vsel %vm5031_vm13, %v14624_v59, 0.0  ;;  %v16078_v33 = vld [vmem:[#allocation207_spill] sm:$0xff] }
 0xcce   : > { %v4984_v40 = vpop.xlane.xlu0 %4983  ;;  %v5064_v42 = vsel %vm5032_vm7, %v16065_v47, 0.0  ;;  %v4872_v28 = vpop.xlane.xlu1 %4871  ;;  %vm16069_vm7 = vcmp.eq.s32.totalorder %v15854_v55, 5  ;;  %v5003_v29 = vshll.u32 %v5002_v38, 16  ;;  %vm16074_vm9 = vcmp.eq.s32.totalorder %v15854_v55, 6  ;;  %v16079_v38 = vld [vmem:[#allocation53_spill] sm:$0xff] }
 0xccf   : > { %v5195_v27 = vsel %vm14374_vm12, %v5179_v13, 4294967295  ;;  %v13296_v36 = vsel %vm5117_vm0, %v4860_v0, %v16066_v25  ;;  %v4985_v11 = vcvt.f32.s32 %v4984_v40  ;;  %v5108_v63 = vadd.f32 %v5064_v42, %v5063_v15  ;;  %v16077_v13 = vld [vmem:[#allocation74_spill] sm:$0xff] }
 0xcd0   : > { %5358 = vst.msk [vmem:[%s13049_s11 + $0x68] sm:$0xff] %vm5344_vm10, %v5195_v27  ;;  %vm14376_vm8 = vcmp.lt.s32.totalorder %v13296_v36, 2147483647  ;;  %v5172_v59 = vand.u32 255, %v13296_v36  ;;  %v4873_v53 = vcvt.f32.s32 %v4872_v28  ;;  %vm5017_vm13 = vcmp.eq.s32.totalorder %v16067_v12, %v4860_v0  ;;  %v16080_v27 = vld [vmem:[#allocation48_spill] sm:$0xff] }
 0xcd1   : > { %v3444_v56 = vsel %vm16069_vm7, %v16068_v16, %v3011_v10  ;;  %v4988_v45 = vadd.s32 %v4987_v48, %v4985_v11  ;;  %5109 = vadd.xlane.f32.xlu1 %v5108_v63  ;;  %vm5018_vm12 = vcmp.eq.s32.totalorder %v16070_v43, %v4860_v0  ;;  %v5049_v37 = vsel %vm5017_vm13, %v16071_v34, 0.0  ;;  %v16075_v10 = vld [vmem:[#allocation47_spill] sm:$0xff]  ;;  %v16081_v28 = vld [vmem:[#allocation52_spill] sm:$0xff]  ;;  %v16083_v16 = vld [vmem:[#allocation206_spill] sm:$0xff] }
 0xcd2   : > { %v5188_v14 = vsel %vm14376_vm8, %v5172_v59, 4294967295  ;;  %v4876_v21 = vadd.s32 %v4875_v9, %v4873_v53  ;;  %v13310_v62 = vpop.xlane.xlu0 %4228  ;;  %v5050_v20 = vsel %vm5018_vm12, %v16072_v17, 0.0  ;;  %v3877_v31 = vsel %vm16074_vm9, %v16073_v60, %v3444_v56  ;;  %v5000_v3 = vpop.xlane.xlu1 %4999  ;;  %v16084_v56 = vld [vmem:[#allocation195_spill] sm:$0xff]  ;;  %v16089_v60 = vld [vmem:[#allocation209_spill] sm:$0xff] }
 0xcd3   : > { %5351 = vst.msk [vmem:[%s13049_s11 + $0x30] sm:$0xff] %vm5344_vm10, %v5188_v14  ;;  %v13321_v61 = vsel %vm5117_vm0, %v4988_v45, %v16075_v10  ;;  %v5087_v19 = vadd.f32 %v5050_v20, %v5049_v37  ;;  %vm5033_vm13 = vcmp.eq.s32.totalorder %v16076_v1, %v4988_v45  ;;  %v5001_v9 = vcvt.f32.s32 %v5000_v3  ;;  %v16086_v34 = vld [vmem:[#allocation83_spill] sm:$0xff]  ;;  %v16092_v3 = vld [vmem:[#allocation198_spill] sm:$0xff] }
 0xcd4   : > { %v13327_v0 = vsel %vm5117_vm0, %v4876_v21, %v16077_v13  ;;  %vm14378_vm12 = vcmp.lt.s32.totalorder %v13321_v61, 2147483647  ;;  %v5180_v15 = vand.u32 255, %v13321_v61  ;;  %vm5019_vm7 = vcmp.eq.s32.totalorder %v16078_v33, %v4876_v21  ;;  %v16094_v1 = vld [vmem:[#allocation210_spill] sm:$0xff]  ;;  %v16095_v13 = vld [vmem:[#allocation36_spill] sm:$0xff] }
 0xcd5   : > { %vm5157_vm9 = vcmp.lt.s32.totalorder %v13327_v0, 2147483647  ;;  %v5173_v48 = vand.u32 255, %v13327_v0  ;;  %5088 = vadd.xlane.f32.xlu0 %v5087_v19  ;;  %vm5020_vm8 = vcmp.eq.s32.totalorder %v16079_v38, %v4876_v21  ;;  %v5004_v47 = vadd.s32 %v5003_v29, %v5001_v9  ;;  %v16087_v29 = vld [vmem:[#allocation33_spill] sm:$0xff]  ;;  %v16088_v21 = vld [vmem:[#allocation35_spill] sm:$0xff]  ;;  %v16096_v9 = vld [vmem:[#allocation112_spill] sm:$0xff] }
 0xcd6   : > { %v5196_v40 = vsel %vm14378_vm12, %v5180_v15, 4294967295  ;;  %v4235_v42 = vpop.xlane.xlu0 %4234  ;;  %v5051_v25 = vsel %vm5019_vm7, %v16080_v27, 0.0  ;;  %v5052_v11 = vsel %vm5020_vm8, %v16081_v28, 0.0  ;;  %v13343_v59 = vpop.xlane.xlu1 %4231  ;;  %vm16082_vm15 = vcmp.eq.s32.totalorder %v15854_v55, 7  ;;  %v16100_v27 = vld [vmem:[#allocation175_spill] sm:$0xff] }
 0xcd7   : > { %v5189_v63 = vsel %vm5157_vm9, %v5173_v48, 4294967295  ;;  %5359 = vst.msk [vmem:[%s13049_s11 + $0x70] sm:$0xff] %vm5344_vm10, %v5196_v40  ;;  %v13347_v53 = vsel %vm16082_vm15, %v4235_v42, %v3877_v31  ;;  %v5090_v12 = vadd.f32 %v5052_v11, %v5051_v25  ;;  %vm5034_vm12 = vcmp.eq.s32.totalorder %v16083_v16, %v4988_v45  ;;  %v16090_v31 = vld [vmem:[#allocation176_spill] sm:$0xff]  ;;  %v16099_v40 = vld [vmem:[#allocation55_spill] sm:$0xff] }
 0xcd8   : > { %v3446_v43 = vsel %vm16085_vm3, %v16084_v56, %v3013_v8  ;;  %5352 = vst.msk [vmem:[%s13049_s11 + $0x38] sm:$0xff] %vm5344_vm10, %v5189_v63  ;;  %v13358_v37 = vsel %vm5117_vm0, %v5004_v47, %v16086_v34  ;;  %v5065_v14 = vsel %vm5033_vm13, %v16087_v29, 0.0  ;;  %v5066_v17 = vsel %vm5034_vm12, %v16088_v21, 0.0  ;;  %v16103_v11 = vld [vmem:[#allocation212_spill] sm:$0xff]  ;;  %v16108_v34 = vld [vmem:[#allocation77_spill] sm:$0xff] }
 0xcd9   : > { %vm5165_vm15 = vcmp.lt.s32.totalorder %v13358_v37, 2147483647  ;;  %v5181_v20 = vand.u32 255, %v13358_v37  ;;  %5091 = vadd.xlane.f32.xlu1 %v5090_v12  ;;  %v5111_v8 = vadd.f32 %v5066_v17, %v5065_v14  ;;  %vm5035_vm3 = vcmp.eq.s32.totalorder %v16089_v60, %v5004_v47  ;;  %v16105_v12 = vld [vmem:[#allocation162_spill] sm:$0xff] }
 0xcda   : > { %vm16091_vm8 = vcmp.eq.s32.totalorder %v15854_v55, 5  ;;  %vm16093_vm7 = vcmp.eq.s32.totalorder %v15854_v55, 6  ;;  %v4241_v19 = vpop.xlane.xlu0 %4240  ;;  %vm5036_vm13 = vcmp.eq.s32.totalorder %v16094_v1, %v5004_v47  ;;  %v5067_v15 = vsel %vm5035_vm3, %v16095_v13, 0.0  ;;  %v4238_v38 = vpop.xlane.xlu1 %4237 }
 0xcdb   : > { %v3445_v10 = vsel %vm16091_vm8, %v16090_v31, %v13245_v6  ;;  %v3879_v45 = vsel %vm16093_vm7, %v16092_v3, %v3446_v43  ;;  %vm16097_vm12 = vmmov %vm16093_vm7  ;;  %v5197_v33 = vsel %vm5165_vm15, %v5181_v20, 4294967295  ;;  %5112 = vadd.xlane.f32.xlu0 %v5111_v8  ;;  %vm16098_vm8 = vcmp.eq.s32.totalorder %v15854_v55, 7 }
 0xcdc   : > { %v3878_v48 = vsel %vm16097_vm12, %v16096_v9, %v3445_v10  ;;  %v4312_v6 = vsel %vm16098_vm8, %v4241_v19, %v3879_v45  ;;  %v5068_v42 = vsel %vm5036_vm13, %v16099_v40, 0.0  ;;  %vm16101_vm7 = vcmp.eq.s32.totalorder %v15854_v55, 3  ;;  %5360 = vst.msk [vmem:[%s13049_s11 + $0x78] sm:$0xff] %vm5344_vm10, %v5197_v33  ;;  %vm16102_vm3 = vmmov %vm16098_vm8 }
 0xcdd   : > { %v2581_v47 = vsel %vm16101_vm7, %v16100_v27, %v13203_v23  ;;  %v13392_v25 = vsel %vm16102_vm3, %v4238_v38, %v3878_v48  ;;  %v5114_v28 = vadd.f32 %v5068_v42, %v5067_v15  ;;  %vm16104_vm12 = vcmp.eq.s32.totalorder %v15854_v55, 4  ;;  %vm16109_vm7 = vmmov %vm16102_vm3 }
 0xcde   : > { %v3014_v63 = vsel %vm16104_vm12, %v16103_v11, %v2581_v47  ;;  %vm16106_vm8 = vcmp.eq.s32.totalorder %v15854_v55, 5  ;;  %v4247_v56 = vpop.xlane.xlu0 %4246  ;;  %vm16107_vm13 = vcmp.eq.s32.totalorder %v15854_v55, 6  ;;  %v4244_v43 = vpop.xlane.xlu1 %4243  ;;  %vm16110_vm12 = vmmov %vm16102_vm3  ;;  %v16119_v47 = vld [vmem:[#allocation101_spill] sm:$0xff]  ;;  %v16121_v11 = vld [vmem:[#allocation139_spill] sm:$0xff] }
 0xcdf   : > { %v3447_v16 = vsel %vm16106_vm8, %v16105_v12, %v3014_v63  ;;  %5115 = vadd.xlane.f32.xlu1 %v5114_v28  ;;  %v4314_v29 = vsel %vm16109_vm7, %v4247_v56, %v16108_v34  ;;  %vm16111_vm8 = vcmp.eq.s32.totalorder %v15854_v55, 8  ;;  %v13458_v28 = vstv %s288_s8  ;;  %v16124_v56 = vld [vmem:[#allocation150_spill] sm:$0xff] }
 0xce0   : > { %v3880_v23 = vsel %vm16107_vm13, %v12803_v44, %v3447_v16  ;;  %vm16112_vm13 = vmmov %vm16111_vm8  ;;  %v13471_v34 = vstv %s5517_s15 }
 0xce1   : > { %v4313_v14 = vsel %vm16102_vm3, %v4244_v43, %v3880_v23  ;;  %vm16113_vm7 = vmmov %vm16111_vm8 }
 0xce2   : > { %v4638_v21 = vpop.xlane.xlu0 %4637  ;;  %v4250_v17 = vpop.xlane.xlu1 %4249  ;;  %vm16114_vm3 = vmmov %vm16113_vm7 }
 0xce3   : > { %v4315_v20 = vsel %vm16110_vm12, %v4250_v17, %v12868_v24  ;;  %vm16115_vm12 = vmmov %vm16114_vm3 }
 0xce6   : > { %v13411_v8 = vpop.xlane.xlu0 %4643  ;;  %v4641_v60 = vpop.xlane.xlu1 %4640 }
 0xcea   : > { %v4650_v31 = vpop.xlane.xlu0 %4649 }
 0xceb   : > { %v13418_v44 = vsel %vm16111_vm8, %v4650_v31, %v12959_v58  ;;  %vm16116_vm8 = vmmov %vm16114_vm3 }
 0xcee   : > { %v4656_v3 = vpop.xlane.xlu0 %4655 }
 0xcef   : > { %v13413_v10 = vpop.xlane.xlu1 %4646  ;;  %v13423_v19 = vsel %vm16112_vm13, %v4656_v3, %v12999_v7  ;;  %vm16117_vm13 = vmmov %vm16114_vm3 }
 0xcf3   : > { %v4653_v45 = vpop.xlane.xlu1 %4652 }
 0xcf4   : > { %v13428_v24 = vsel %vm16113_vm7, %v4653_v45, %v13006_v26  ;;  %vm16118_vm7 = vmmov %vm16114_vm3 }
 0xcf5   : > { %v4662_v1 = vpop.xlane.xlu0 %4661 }
 0xcf7   : > { %v4659_v13 = vpop.xlane.xlu1 %4658 }
 0xcf8   : > { %v13433_v15 = vsel %vm16114_vm3, %v4659_v13, %v13021_v46  ;;  %vm16120_vm3 = vcmp.eq.s32.totalorder %v15854_v55, 0 }
 0xcfe   : > { %v13435_v58 = vpop.xlane.xlu0 %4667  ;;  %v4665_v9 = vpop.xlane.xlu1 %4664 }
 0xd02   : > { %v4674_v48 = vpop.xlane.xlu0 %4673  ;;  %v13437_v33 = vpop.xlane.xlu1 %4670 }
 0xd03   : > { %v13441_v7 = vsel %vm16115_vm12, %v4674_v48, %v4312_v6  ;;  %v1277_v6 = vsel %vm16120_vm3, %v16119_v47, 0.0  ;;  %vm16122_vm12 = vcmp.eq.s32.totalorder %v15854_v55, 1  ;;  %vm16129_vm3 = vcmp.eq.s32.totalorder %v15854_v55, 4  ;;  %v16132_v48 = vld [vmem:[#allocation196_spill] sm:$0xff] }
 0xd04   : > { %v1710_v63 = vsel %vm16122_vm12, %v16121_v11, %v1277_v6  ;;  %vm16131_vm12 = vcmp.eq.s32.totalorder %v15854_v55, 5  ;;  %v16135_v11 = vld [vmem:[#allocation102_spill] sm:$0xff] }
 0xd06   : > { %v4680_v38 = vpop.xlane.xlu0 %4679  ;;  %v4677_v26 = vpop.xlane.xlu1 %4676 }
 0xd07   : > { %v13445_v40 = vsel %vm16116_vm8, %v4680_v38, %v4314_v29  ;;  %v13449_v46 = vsel %vm16117_vm13, %v4677_v26, %v4313_v14  ;;  %vm16123_vm8 = vmmov %vm16118_vm7  ;;  %vm16125_vm13 = vcmp.eq.s32.totalorder %v15854_v55, 2  ;;  %v16126_v29 = vld [vmem:[#allocation144_spill] sm:$0xff] }
 0xd08   : > { %v4733_v12 = vsel %vm16123_vm8, %v4638_v21, %v12855_v4  ;;  %v2143_v23 = vsel %vm16125_vm13, %v16124_v56, %v1710_v63  ;;  %v16130_v21 = vld [vmem:[#allocation193_spill] sm:$0xff]  ;;  %v4734_v3 = vsel %vm16123_vm8, %v4641_v60, %v12920_v57  ;;  %vm16133_vm13 = vcmp.eq.s32.totalorder %v15854_v55, 6 }
 0xd0a   : > { %v4683_v42 = vpop.xlane.xlu1 %4682 }
 0xd0b   : > { %v13453_v27 = vsel %vm16118_vm7, %v4683_v42, %v4315_v20  ;;  %vm16127_vm7 = vcmp.eq.s32.totalorder %v15854_v55, 3  ;;  %v16128_v20 = vld [vmem:[#allocation169_spill] sm:$0xff] }
 0xd0c   : > { %v2576_v14 = vsel %vm16127_vm7, %v16126_v29, %v2143_v23  ;;  %vm16134_vm7 = vcmp.eq.s32.totalorder %v15854_v55, 7 }
 0xd0d   : > { %v3009_v4 = vsel %vm16129_vm3, %v16128_v20, %v2576_v14  ;;  %vm16136_vm3 = vcmp.eq.s32.totalorder %v15854_v55, 0 }
 0xd0e   : > { %v3442_v31 = vsel %vm16131_vm12, %v16130_v21, %v3009_v4  ;;  %v1278_v57 = vsel %vm16136_vm3, %v16135_v11, 0.0  ;;  %vm16137_vm12 = vmmov %vm16123_vm8  ;;  %vm16139_vm8 = vcmp.eq.s32.totalorder %v15854_v55, 1  ;;  %v16144_v4 = vld [vmem:[#allocation170_spill] sm:$0xff]  ;;  %vm16145_vm3 = vcmp.eq.s32.totalorder %v15854_v55, 4 }
 0xd0f   : > { %v3875_v38 = vsel %vm16133_vm13, %v16132_v48, %v3442_v31  ;;  %vm16141_vm13 = vcmp.eq.s32.totalorder %v15854_v55, 2  ;;  %v16148_v48 = vld [vmem:[#allocation197_spill] sm:$0xff] }
 0xd10   : > { %v4308_v42 = vsel %vm16134_vm7, %v13310_v62, %v3875_v38  ;;  %vm16143_vm7 = vcmp.eq.s32.totalorder %v15854_v55, 3 }
 0xd11   : > { %v4741_v60 = vsel %vm16137_vm12, %v4662_v1, %v4308_v42  ;;  %vm16147_vm12 = vcmp.eq.s32.totalorder %v15854_v55, 5 }
 0xd1b   : > { %v5071_v16 = vpop.xlane.xlu0 %5070 }
 0xd1c   : > { %v5134_v43 = vsel %vm5117_vm0, %v5071_v16, %v4733_v12  ;;  %v16138_v12 = vld [vmem:[#allocation75_spill] sm:$0xff] }
 0xd1d   : > { %v5199_v17 = vmul.f32 %v13458_v28, %v5134_v43  ;;  %v1711_v16 = vsel %vm16139_vm8, %v16138_v12, %v1278_v57  ;;  %v16140_v43 = vld [vmem:[#allocation149_spill] sm:$0xff]  ;;  %vm16149_vm8 = vcmp.eq.s32.totalorder %v15854_v55, 6 }
 0xd1e   : > { %v2144_v29 = vsel %vm16141_vm13, %v16140_v43, %v1711_v16  ;;  %vm16150_vm13 = vcmp.eq.s32.totalorder %v15854_v55, 7 }
 0xd1f   : > { %v5216_v45 = vadd.f32 %v13471_v34, %v5199_v17  ;;  %v16142_v17 = vld [vmem:[#allocation135_spill] sm:$0xff] }
 0xd20   : > { %v2577_v1 = vsel %vm16143_vm7, %v16142_v17, %v2144_v29  ;;  %vm16151_vm7 = vcmp.eq.s32.totalorder %v15854_v55, 8 }
 0xd21   : > { %v5074_v13 = vpop.xlane.xlu1 %5073  ;;  %v5232_v47 = vsub.f32 0.0, %v5216_v45  ;;  %v3010_v21 = vsel %vm16145_vm3, %v16144_v4, %v2577_v1  ;;  %vm16152_vm3 = vmmov %vm16151_vm7 }
 0xd22   : > { %v5135_v26 = vsel %vm5117_vm0, %v5074_v13, %v4734_v3  ;;  %v16146_v3 = vld [vmem:[#allocation194_spill] sm:$0xff]  ;;  %v4735_v12 = vsel %vm16152_vm3, %v13411_v8, %v12907_v41 }
 0xd23   : > { %v5200_v6 = vmul.f32 %v13458_v28, %v5135_v26  ;;  %v5248_v56 = vmul.f32 1.442695, %v5232_v47  ;;  %v3443_v45 = vsel %vm16147_vm12, %v16146_v3, %v3010_v21  ;;  %vm16153_vm12 = vmmov %vm16152_vm3 }
 0xd24   : > { %v5095_v63 = vpop.xlane.xlu0 %5094  ;;  %v3876_v38 = vsel %vm16149_vm8, %v16148_v48, %v3443_v45  ;;  %vm16154_vm8 = vmmov %vm16152_vm3 }
 0xd25   : > { %v5217_v23 = vadd.f32 %v13471_v34, %v5200_v6  ;;  %v5142_v62 = vsel %vm5117_vm0, %v5095_v63, %v4741_v60  ;;  %5619 = vpow2.f32 %v5248_v56  ;;  %v4309_v42 = vsel %vm16150_vm13, %v13343_v59, %v3876_v38 }
 0xd26   : > { %v5207_v14 = vmul.f32 %v13458_v28, %v5142_v62  ;;  %v4742_v47 = vsel %vm16151_vm7, %v4665_v9, %v4309_v42  ;;  %v4736_v62 = vsel %vm16153_vm12, %v13413_v10, %v12969_v22  ;;  %v4743_v22 = vsel %vm16154_vm8, %v13435_v58, %v13347_v53 }
 0xd27   : > { %v5233_v20 = vsub.f32 0.0, %v5217_v23 }
 0xd28   : > { %v5224_v31 = vadd.f32 %v13471_v34, %v5207_v14 }
 0xd29   : > { %v5250_v13 = vmul.f32 1.442695, %v5233_v20 }
 0xd2a   : > { %v5240_v26 = vsub.f32 0.0, %v5224_v31  ;;  %v5098_v11 = vpop.xlane.xlu1 %5097 }
 0xd2b   : > { %5621 = vpow2.f32 %v5250_v13  ;;  %v5143_v57 = vsel %vm5117_vm0, %v5098_v11, %v4742_v47 }
 0xd2c   : > { %v5264_v6 = vmul.f32 1.442695, %v5240_v26  ;;  %v5208_v60 = vmul.f32 %v13458_v28, %v5143_v57 }
 0xd2e   : > { %5623 = vpow2.f32 %v5264_v6  ;;  %v5225_v63 = vadd.f32 %v13471_v34, %v5208_v60  ;;  %v5077_v59 = vpop.xlane.xlu0 %5076 }
 0xd2f   : > { %v5136_v9 = vsel %vm5117_vm0, %v5077_v59, %v4735_v12 }
 0xd30   : > { %v5241_v16 = vsub.f32 0.0, %v5225_v63  ;;  %v5201_v56 = vmul.f32 %v13458_v28, %v5136_v9 }
 0xd32   : > { %v5620_v23 = vpop.eup %5619  ;;  %v5266_v43 = vmul.f32 1.442695, %v5241_v16  ;;  %v5080_v29 = vpop.xlane.xlu1 %5079  ;;  %v5218_v17 = vadd.f32 %v13471_v34, %v5201_v56 }
 0xd33   : > { %v5280_v14 = vadd.f32 1.0, %v5620_v23  ;;  %v5137_v41 = vsel %vm5117_vm0, %v5080_v29, %v4736_v62 }
 0xd34   : > { %5625 = vpow2.f32 %v5266_v43  ;;  %v5202_v8 = vmul.f32 %v13458_v28, %v5137_v41  ;;  %v5234_v1 = vsub.f32 0.0, %v5218_v17 }
 0xd35   : > { %5627 = vrcp.f32 %v5280_v14 }
 0xd36   : > { %v5219_v4 = vadd.f32 %v13471_v34, %v5202_v8  ;;  %v5252_v31 = vmul.f32 1.442695, %v5234_v1 }
 0xd38   : > { %v5622_v20 = vpop.eup %5621  ;;  %v5235_v10 = vsub.f32 0.0, %v5219_v4  ;;  %v5101_v3 = vpop.xlane.xlu0 %5100 }
 0xd39   : > { %v5281_v21 = vadd.f32 1.0, %v5622_v20  ;;  %v5144_v13 = vsel %vm5117_vm0, %v5101_v3, %v4743_v22 }
 0xd3a   : > { %v5254_v38 = vmul.f32 1.442695, %v5235_v10  ;;  %v5209_v26 = vmul.f32 %v13458_v28, %v5144_v13 }
 0xd3b   : > { %v5624_v45 = vpop.eup %5623  ;;  %5629 = vrcp.f32 %v5281_v21 }
 0xd3c   : > { %v5288_v48 = vadd.f32 1.0, %v5624_v45  ;;  %5631 = vpow2.f32 %v5252_v31  ;;  %v5226_v42 = vadd.f32 %v13471_v34, %v5209_v26 }
 0xd3e   : > { %5633 = vrcp.f32 %v5288_v48  ;;  %v5242_v47 = vsub.f32 0.0, %v5226_v42 }
 0xd3f   : > { %5635 = vpow2.f32 %v5254_v38 }
 0xd40   : > { %v5268_v6 = vmul.f32 1.442695, %v5242_v47 }
 0xd41   : > { %v5626_v53 = vpop.eup %5625 }
 0xd42   : > { %v5628_v58 = vpop.eup %5627  ;;  %v5289_v11 = vadd.f32 1.0, %v5626_v53  ;;  %5637 = vpow2.f32 %v5268_v6 }
 0xd43   : > { %v5328_v57 = vsel %vm5150_vm14, %v5628_v58, 0.0  ;;  %vm16155_vm14 = vmmov %vm16152_vm3 }
 0xd44   : > { %5361 = vst.msk [vmem:[%s13562_s18] sm:$0xff] %vm5344_vm10, %v5328_v57  ;;  %5639 = vrcp.f32 %v5289_v11  ;;  %v4744_v18 = vsel %vm16155_vm14, %v13437_v33, %v13392_v25 }
 0xd48   : > { %v5630_v60 = vpop.eup %5629 }
 0xd49   : > { %v5632_v63 = vpop.eup %5631  ;;  %v5329_v12 = vsel %vm5151_vm1, %v5630_v60, 0.0  ;;  %vm16157_vm1 = vcmp.lt.s32.totalorder %v13223_v30, 2147483647 }
 0xd4a   : > { %5362 = vst.msk [vmem:[%s13562_s18 + $0x8] sm:$0xff] %vm5344_vm10, %v5329_v12  ;;  %v5282_v59 = vadd.f32 1.0, %v5632_v63  ;;  %v5104_v35 = vpop.xlane.xlu1 %5103 }
 0xd4b   : > { %v5634_v16 = vpop.eup %5633  ;;  %v5145_v62 = vsel %vm5117_vm0, %v5104_v35, %v4744_v18 }
 0xd4c   : > { %v5636_v9 = vpop.eup %5635  ;;  %v5336_v56 = vsel %vm5158_vm5, %v5634_v16, 0.0  ;;  %5641 = vrcp.f32 %v5282_v59  ;;  %v5210_v43 = vmul.f32 %v13458_v28, %v5145_v62  ;;  %vm16158_vm5 = vcmp.lt.s32.totalorder %v13234_v51, 2147483647 }
 0xd4d   : > { %5369 = vst.msk [vmem:[%s13562_s18 + $0x40] sm:$0xff] %vm5344_vm10, %v5336_v56  ;;  %v5283_v23 = vadd.f32 1.0, %v5636_v9 }
 0xd4e   : > { %v5227_v2 = vadd.f32 %v13471_v34, %v5210_v43 }
 0xd4f   : > { %5643 = vrcp.f32 %v5283_v23  ;;  %v5638_v29 = vpop.eup %5637  ;;  %v5083_v14 = vpop.xlane.xlu0 %5082 }
 0xd50   : > { %v5290_v17 = vadd.f32 1.0, %v5638_v29  ;;  %v5138_v25 = vsel %vm5117_vm0, %v5083_v14, %v13418_v44  ;;  %v5243_v41 = vsub.f32 0.0, %v5227_v2 }
 0xd51   : > { %v5640_v33 = vpop.eup %5639  ;;  %v5203_v8 = vmul.f32 %v13458_v28, %v5138_v25 }
 0xd52   : > { %v5337_v1 = vsel %vm5159_vm11, %v5640_v33, 0.0  ;;  %5645 = vrcp.f32 %v5290_v17  ;;  %v5086_v20 = vpop.xlane.xlu1 %5085  ;;  %v5270_v4 = vmul.f32 1.442695, %v5243_v41  ;;  %vm16159_vm11 = vcmp.lt.s32.totalorder %v13259_v50, 2147483647 }
 0xd53   : > { %5370 = vst.msk [vmem:[%s13562_s18 + $0x48] sm:$0xff] %vm5344_vm10, %v5337_v1  ;;  %v5220_v21 = vadd.f32 %v13471_v34, %v5203_v8  ;;  %v5139_v31 = vsel %vm5117_vm0, %v5086_v20, %v13428_v24 }
 0xd54   : > { %v5204_v44 = vmul.f32 %v13458_v28, %v5139_v31  ;;  %5647 = vpow2.f32 %v5270_v4 }
 0xd55   : > { %v5236_v22 = vsub.f32 0.0, %v5220_v21  ;;  %v5107_v10 = vpop.xlane.xlu0 %5106 }
 0xd56   : > { %v5221_v32 = vadd.f32 %v13471_v34, %v5204_v44  ;;  %v5146_v3 = vsel %vm5117_vm0, %v5107_v10, %v13441_v7 }
 0xd57   : > { %v5256_v13 = vmul.f32 1.442695, %v5236_v22  ;;  %v5211_v48 = vmul.f32 %v13458_v28, %v5146_v3 }
 0xd58   : > { %v5237_v24 = vsub.f32 0.0, %v5221_v32 }
 0xd59   : > { %v5642_v45 = vpop.eup %5641  ;;  %5649 = vpow2.f32 %v5256_v13  ;;  %v5228_v26 = vadd.f32 %v13471_v34, %v5211_v48 }
 0xd5a   : > { %v5330_v38 = vsel %vm5152_vm6, %v5642_v45, 0.0  ;;  %v5258_v47 = vmul.f32 1.442695, %v5237_v24  ;;  %v5110_v6 = vpop.xlane.xlu1 %5109  ;;  %vm16160_vm6 = vcmp.lt.s32.totalorder %v13282_v5, 2147483647 }
 0xd5b   : > { %5363 = vst.msk [vmem:[%s13562_s18 + $0x10] sm:$0xff] %vm5344_vm10, %v5330_v38  ;;  %v5244_v53 = vsub.f32 0.0, %v5228_v26  ;;  %v5147_v58 = vsel %vm5117_vm0, %v5110_v6, %v13449_v46 }
 0xd5c   : > { %v5644_v42 = vpop.eup %5643  ;;  %5651 = vpow2.f32 %v5258_v47  ;;  %v5212_v52 = vmul.f32 %v13458_v28, %v5147_v58 }
 0xd5d   : > { %v5331_v7 = vsel %vm5153_vm2, %v5644_v42, 0.0  ;;  %v5272_v11 = vmul.f32 1.442695, %v5244_v53  ;;  %vm16161_vm2 = vcmp.lt.s32.totalorder %v13296_v36, 2147483647 }
 0xd5e   : > { %5364 = vst.msk [vmem:[%s13562_s18 + $0x18] sm:$0xff] %vm5344_vm10, %v5331_v7  ;;  %v5229_v57 = vadd.f32 %v13471_v34, %v5212_v52  ;;  %v5089_v60 = vpop.xlane.xlu0 %5088 }
 0xd5f   : > { %v5646_v63 = vpop.eup %5645  ;;  %5653 = vpow2.f32 %v5272_v11  ;;  %v5140_v39 = vsel %vm5117_vm0, %v5089_v60, %v13423_v19 }
 0xd60   : > { %v5338_v12 = vsel %vm5160_vm4, %v5646_v63, 0.0  ;;  %v5245_v59 = vsub.f32 0.0, %v5229_v57  ;;  %v5205_v46 = vmul.f32 %v13458_v28, %v5140_v39  ;;  %vm16162_vm4 = vcmp.lt.s32.totalorder %v13321_v61, 2147483647 }
 0xd61   : > { %5371 = vst.msk [vmem:[%s13562_s18 + $0x50] sm:$0xff] %vm5344_vm10, %v5338_v12  ;;  %v5648_v16 = vpop.eup %5647 }
 0xd62   : > { %v5274_v9 = vmul.f32 1.442695, %v5245_v59  ;;  %v5222_v56 = vadd.f32 %v13471_v34, %v5205_v46  ;;  %v5092_v18 = vpop.xlane.xlu1 %5091  ;;  %v5291_v23 = vadd.f32 1.0, %v5648_v16 }
 0xd63   : > { %v5141_v35 = vsel %vm5117_vm0, %v5092_v18, %v13433_v15 }
 0xd64   : > { %5655 = vpow2.f32 %v5274_v9  ;;  %v5238_v19 = vsub.f32 0.0, %v5222_v56  ;;  %v5206_v49 = vmul.f32 %v13458_v28, %v5141_v35  ;;  %v5113_v62 = vpop.xlane.xlu0 %5112 }
 0xd65   : > { %5657 = vrcp.f32 %v5291_v23  ;;  %v5148_v43 = vsel %vm5117_vm0, %v5113_v62, %v13445_v40 }
 0xd66   : > { %v5650_v29 = vpop.eup %5649  ;;  %v5260_v2 = vmul.f32 1.442695, %v5238_v19  ;;  %v5223_v14 = vadd.f32 %v13471_v34, %v5206_v49  ;;  %v5213_v17 = vmul.f32 %v13458_v28, %v5148_v43 }
 0xd67   : > { %v5284_v25 = vadd.f32 1.0, %v5650_v29 }
 0xd68   : > { %v5116_v33 = vpop.xlane.xlu1 %5115  ;;  %5659 = vpow2.f32 %v5260_v2  ;;  %v5239_v15 = vsub.f32 0.0, %v5223_v14  ;;  %v5230_v41 = vadd.f32 %v13471_v34, %v5213_v17 }
 0xd69   : > { %v5149_v8 = vsel %vm5117_vm0, %v5116_v33, %v13453_v27  ;;  %v5652_v1 = vpop.eup %5651  ;;  %5661 = vrcp.f32 %v5284_v25  ;;  %vm16156_vm0 = vcmp.lt.s32.totalorder %v13193_v54, 2147483647 }
 0xd6a   : > { %v5214_v40 = vmul.f32 %v13458_v28, %v5149_v8  ;;  %v5285_v20 = vadd.f32 1.0, %v5652_v1  ;;  %v5262_v4 = vmul.f32 1.442695, %v5239_v15  ;;  %v5246_v21 = vsub.f32 0.0, %v5230_v41 }
 0xd6c   : > { %v5231_v31 = vadd.f32 %v13471_v34, %v5214_v40  ;;  %v5654_v44 = vpop.eup %5653  ;;  %5663 = vrcp.f32 %v5285_v20  ;;  %v5276_v22 = vmul.f32 1.442695, %v5246_v21 }
 0xd6d   : > { %v5292_v10 = vadd.f32 1.0, %v5654_v44  ;;  %5665 = vpow2.f32 %v5262_v4 }
 0xd6e   : > { %v5247_v32 = vsub.f32 0.0, %v5231_v31  ;;  %5667 = vpow2.f32 %v5276_v22 }
 0xd6f   : > { %5669 = vrcp.f32 %v5292_v10 }
 0xd70   : > { %v5278_v55 = vmul.f32 1.442695, %v5247_v32 }
 0xd71   : > { %v5656_v27 = vpop.eup %5655 }
 0xd72   : > { %5671 = vpow2.f32 %v5278_v55  ;;  %v5658_v28 = vpop.eup %5657  ;;  %v5293_v3 = vadd.f32 1.0, %v5656_v27 }
 0xd73   : > { %v5339_v45 = vsel %vm16156_vm0, %v5658_v28, 0.0 }
 0xd74   : > { %5372 = vst.msk [vmem:[%s13562_s18 + $0x58] sm:$0xff] %vm5344_vm10, %v5339_v45  ;;  %5673 = vrcp.f32 %v5293_v3 }
 0xd75   : > { %v5660_v34 = vpop.eup %5659 }
 0xd76   : > { %v5662_v13 = vpop.eup %5661  ;;  %v5286_v48 = vadd.f32 1.0, %v5660_v34 }
 0xd77   : > { %v5332_v38 = vsel %vm16157_vm1, %v5662_v13, 0.0 }
 0xd78   : > { %5365 = vst.msk [vmem:[%s13562_s18 + $0x20] sm:$0xff] %vm5344_vm10, %v5332_v38  ;;  %5675 = vrcp.f32 %v5286_v48 }
 0xd79   : > { %v5664_v24 = vpop.eup %5663 }
 0xd7a   : > { %v5666_v26 = vpop.eup %5665  ;;  %v5333_v54 = vsel %vm16158_vm5, %v5664_v24, 0.0 }
 0xd7b   : > { %v5668_v42 = vpop.eup %5667  ;;  %5366 = vst.msk [vmem:[%s13562_s18 + $0x28] sm:$0xff] %vm5344_vm10, %v5333_v54  ;;  %v5287_v47 = vadd.f32 1.0, %v5666_v26 }
 0xd7c   : > { %v5670_v6 = vpop.eup %5669  ;;  %v5294_v7 = vadd.f32 1.0, %v5668_v42 }
 0xd7d   : > { %v5340_v30 = vsel %vm16159_vm11, %v5670_v6, 0.0  ;;  %5677 = vrcp.f32 %v5287_v47 }
 0xd7e   : > { %5373 = vst.msk [vmem:[%s13562_s18 + $0x60] sm:$0xff] %vm5344_vm10, %v5340_v30  ;;  %5679 = vrcp.f32 %v5294_v7 }
 0xd7f   : > { %v5672_v53 = vpop.eup %5671 }
 0xd80   : > { %v5295_v51 = vadd.f32 1.0, %v5672_v53 }
 0xd81   : > { %v5674_v58 = vpop.eup %5673 }
 0xd82   : > { %5681 = vrcp.f32 %v5295_v51  ;;  %v5341_v52 = vsel %vm16160_vm6, %v5674_v58, 0.0 }
 0xd83   : > { %5374 = vst.msk [vmem:[%s13562_s18 + $0x68] sm:$0xff] %vm5344_vm10, %v5341_v52 }
 0xd85   : > { %v5676_v11 = vpop.eup %5675 }
 0xd86   : > { %v5334_v50 = vsel %vm16161_vm2, %v5676_v11, 0.0 }
 0xd87   : > { %5367 = vst.msk [vmem:[%s13562_s18 + $0x30] sm:$0xff] %vm5344_vm10, %v5334_v50 }
 0xd8a   : > { %v5678_v57 = vpop.eup %5677 }
 0xd8b   : > { %v5680_v60 = vpop.eup %5679  ;;  %v5335_v63 = vsel %vm5157_vm9, %v5678_v57, 0.0 }
 0xd8c   : > { %5368 = vst.msk [vmem:[%s13562_s18 + $0x38] sm:$0xff] %vm5344_vm10, %v5335_v63  ;;  %v5342_v39 = vsel %vm16162_vm4, %v5680_v60, 0.0 }
 0xd8d   : > { %5375 = vst.msk [vmem:[%s13562_s18 + $0x70] sm:$0xff] %vm5344_vm10, %v5342_v39 }
 0xd8f   : > { %v5682_v5 = vpop.eup %5681 }
 0xd90   : > { %v5343_v12 = vsel %vm5165_vm15, %v5682_v5, 0.0 }
 0xd91   : > { %5376 = vst.msk [vmem:[%s13562_s18 + $0x78] sm:$0xff] %vm5344_vm10, %v5343_v12 }
 0xd92 PF: > { %p18_p9 = scmp.ge.s32.totalorder %s5850_s23, 4   ;;  %s16163_s18 = smov %s5782_s19 }
 0xd93   : > { %s16164_s19 = smov %s5786_s20  ;;  %s16165_s20 = smov %s5860_s26 }
 0xd94   : > { %s16166_s21 = smov %s5850_s23  ;;  %20 = sbr.rel (!%p18_p9) target bundleno = 5 (0x5), region = 97 }
 0xd99   :  { %5416 = vsyncpa [#allocation3], 1 }
 0xd9a   :  { %5418 = vsyncpa [#allocation3 + $0x1], 1 }
 0xd9b   :  { %5419 = vsyncpa [#allocation7], 1 }
 0xd9c   :  { %5420 = vsyncpa [#allocation4], 1 }
 0xd9d   :  { %5422 = vsyncpa [#allocation4 + $0x1], 1 }

</bundles_post_ra>
